<compile_context>
chip_gen: v7x
topology: tpu7x:2x2x1
jax: 0.10.0
libtpu: 0.0.40
codegen_flags: <defaults>
</compile_context>

<pallas_src>
import functools

import numpy as np

import jax
import jax.numpy as jnp
from jax.experimental import pallas as pl
from jax.experimental.pallas import tpu as pltpu

STORAGE_DTYPE = jnp.float32   # flip to jnp.bfloat16 on v6e/v7x at production widths

_VMEM_LIMIT = 48 * 1024 * 1024   # explicit VMEM budget (safe on v5e/v6e/v7x)


# ----------------------------- in-kernel math helpers ------------------------

def _mish(x):
    # mish(x) = x * tanh(softplus(x)) with a single exp + two approx recips:
    #   u = e^{-|x|};  e^{-softplus(x)} = (x>=0 ? u : 1) / (1+u)
    #   tanh(s)      = (1 - e^{-2s}) / (1 + e^{-2s})
    u = jnp.exp(-jnp.abs(x))
    es = jnp.where(x >= 0.0, u, 1.0) * pl.reciprocal(1.0 + u, approx=True)
    e2 = es * es
    return x * (1.0 - e2) * pl.reciprocal(1.0 + e2, approx=True)


def _conv_block(x, w_ref, b_ref, gamma_ref, beta_ref, gmat, gt, n_groups, eps=1e-5):
    """Conv1d('same' zero pad) -> GroupNorm -> Mish on one sample's (T, Cin).

    w_ref: (K*Cin, Cout) im2col weight, rows ordered (tap k, input channel ci),
           i.e. w_ref[k*Cin + ci, co] == torch_conv_weight[co, ci, k].
    gmat: (Cout, G) channel->group indicator; gt: (G, Cout) group->channel.
    """
    T, Cin = x.shape
    Cout = w_ref.shape[-1]
    K = w_ref.shape[0] // Cin
    pad = K // 2

    # im2col slab from shifted, zero-padded slices (no mixing-matrix matmuls).
    zpad = jnp.zeros((pad, Cin), jnp.float32)
    xpad = jnp.concatenate([zpad, x, zpad], axis=0)                      # (T+2p, Cin)
    slab = jnp.concatenate([xpad[k:k + T, :] for k in range(K)], axis=-1)  # (T, K*Cin)
    y = jnp.dot(slab, w_ref[...].astype(jnp.float32),
                preferred_element_type=jnp.float32) + b_ref[...].astype(jnp.float32)

    # GroupNorm over (T, C/G) per group: centered two-pass, f32 stats.
    inv_n = 1.0 / float(T * (Cout // n_groups))
    mean_g = jnp.dot(jnp.sum(y, axis=0, keepdims=True), gmat,
                     preferred_element_type=jnp.float32) * inv_n          # (1, G)
    yc = y - jnp.dot(mean_g, gt, preferred_element_type=jnp.float32)      # centered
    var_g = jnp.dot(jnp.sum(yc * yc, axis=0, keepdims=True), gmat,
                    preferred_element_type=jnp.float32) * inv_n           # (1, G)
    rstd_c = jnp.dot(jax.lax.rsqrt(var_g + eps), gt,
                     preferred_element_type=jnp.float32)                  # (1, Cout)
    y = yc * rstd_c * gamma_ref[...].astype(jnp.float32) + beta_ref[...].astype(jnp.float32)
    return _mish(y)


# --------------------------------- kernels -----------------------------------

def _res_block_kernel(*refs, n_groups, has_res, has_skip):
    # ConditionalResidualBlock1D (cond_predict_scale=False), fully fused, one
    # batch element per grid step.  Optional fused skip concat (up path).
    it = iter(refs)
    x_ref = next(it)
    skip_ref = next(it) if has_skip else None
    cond_ref = next(it)
    gmat_ref, gt_ref = next(it), next(it)
    w0, b0, g0, be0 = next(it), next(it), next(it), next(it)
    cw, cb = next(it), next(it)
    w1, b1, g1, be1 = next(it), next(it), next(it), next(it)
    rw, rb = (next(it), next(it)) if has_res else (None, None)
    o_ref = next(it)

    x = x_ref[...].astype(jnp.float32)                        # (T, Cin)
    if has_skip:                                              # fused up-path concat
        x = jnp.concatenate([x, skip_ref[...].astype(jnp.float32)], axis=-1)
    gmat = gmat_ref[...]
    gt = gt_ref[...]

    # FiLM-style bias: Mish -> Linear on the conditioning vector.
    embed = jnp.dot(_mish(cond_ref[...].astype(jnp.float32)),
                    cw[...].astype(jnp.float32),
                    preferred_element_type=jnp.float32) + cb[...].astype(jnp.float32)

    h = _conv_block(x, w0, b0, g0, be0, gmat, gt, n_groups)
    h = h + embed                                             # broadcast over time
    h = _conv_block(h, w1, b1, g1, be1, gmat, gt, n_groups)

    if has_res:
        res = jnp.dot(x, rw[...].astype(jnp.float32),
                      preferred_element_type=jnp.float32) + rb[...].astype(jnp.float32)
    else:
        res = x
    o_ref[...] = (h + res).astype(o_ref.dtype)


def _downsample_kernel(x_ref, w_ref, b_ref, o_ref):
    # Downsample1d = Conv1d(C, C, k=3, stride=2, padding=1), one sample:
    #   out[t] = x[2t-1] @ W0 + x[2t] @ W1 + x[2t+1] @ W2   (x[-1] = 0)
    # via strided sublane reads + one (To, 3C) x (3C, C) im2col matmul.
    T, C = x_ref.shape
    To = o_ref.shape[0]
    xe = x_ref[pl.ds(0, To, stride=2), :].astype(jnp.float32)     # x[0], x[2], ...
    xo = x_ref[pl.ds(1, To, stride=2), :].astype(jnp.float32)     # x[1], x[3], ...
    tap0 = jnp.concatenate([jnp.zeros((1, C), jnp.float32), xo[:To - 1, :]], axis=0)
    slab = jnp.concatenate([tap0, xe, xo], axis=-1)               # (To, 3C)
    y = jnp.dot(slab, w_ref[...].astype(jnp.float32),
                preferred_element_type=jnp.float32) + b_ref[...].astype(jnp.float32)
    o_ref[...] = y.astype(o_ref.dtype)


def _upsample_kernel(x_ref, we_ref, wo_ref, b_ref, o_ref):
    # Upsample1d = ConvTranspose1d(C, C, k=4, stride=2, padding=1), one sample:
    #   out[2m]   = x[m] @ W1 + x[m-1] @ W3
    #   out[2m+1] = x[m] @ W2 + x[m+1] @ W0        (x[-1] = x[T] = 0)
    # packed as two (T, 2C) x (2C, C) matmuls, then a sublane interleave.
    T, C = x_ref.shape
    x = x_ref[...].astype(jnp.float32)
    z = jnp.zeros((1, C), jnp.float32)
    xm1 = jnp.concatenate([z, x[:T - 1, :]], axis=0)              # x[m-1]
    xp1 = jnp.concatenate([x[1:, :], z], axis=0)                  # x[m+1]
    b = b_ref[...].astype(jnp.float32)
    even = jnp.dot(jnp.concatenate([x, xm1], axis=-1), we_ref[...].astype(jnp.float32),
                   preferred_element_type=jnp.float32) + b
    odd = jnp.dot(jnp.concatenate([x, xp1], axis=-1), wo_ref[...].astype(jnp.float32),
                  preferred_element_type=jnp.float32) + b
    y = jnp.stack([even, odd], axis=1).reshape(2 * T, C)          # interleave in time
    o_ref[...] = y.astype(o_ref.dtype)


def _final_kernel(x_ref, gmat_ref, gt_ref, w_ref, b_ref, g_ref, be_ref,
                  fw_ref, fb_ref, o_ref, *, n_groups):
    # final_conv = Conv1dBlock(start, start, k) -> Conv1d(start, input_dim, 1), fused.
    x = x_ref[...].astype(jnp.float32)
    h = _conv_block(x, w_ref, b_ref, g_ref, be_ref, gmat_ref[...], gt_ref[...], n_groups)
    y = jnp.dot(h, fw_ref[...].astype(jnp.float32),
                preferred_element_type=jnp.float32) + fb_ref[...].astype(jnp.float32)
    o_ref[...] = y.astype(o_ref.dtype)


# --------------------------- pallas_call wrappers -----------------------------

def _pallas_per_batch(kernel, batched, shared, out_shape, out_dtype):
    """Grid over the batch ('parallel' -> both TCs on v7x).  The batch dim of
    batched operands / the output is squeezed out of the kernel refs; shared
    operands (weights, group maps) are mapped whole into VMEM (constant block
    index => fetched once, not per step)."""
    B = out_shape[0]
    in_specs = []
    for a in batched:
        in_specs.append(pl.BlockSpec((None,) + tuple(a.shape[1:]),
                                     lambda b, nd=a.ndim: (b,) + (0,) * (nd - 1)))
    for a in shared:
        in_specs.append(pl.BlockSpec(tuple(a.shape),
                                     lambda b, nd=a.ndim: (0,) * nd))
    out_spec = pl.BlockSpec((None,) + tuple(out_shape[1:]),
                            lambda b, nd=len(out_shape): (b,) + (0,) * (nd - 1))
    return pl.pallas_call(
        kernel,
        out_shape=jax.ShapeDtypeStruct(out_shape, out_dtype),
        grid=(B,),
        in_specs=in_specs,
        out_specs=out_spec,
        compiler_params=pltpu.CompilerParams(
            dimension_semantics=("parallel",),
            vmem_limit_bytes=_VMEM_LIMIT),
    )(*batched, *shared)


@functools.lru_cache(maxsize=None)
def _group_maps(C, n_groups):
    # Tiny channel<->group indicator maps, precomputed once (review: no per-call
    # in-kernel iota construction) and passed as kernel operands.
    cg = C // n_groups
    ch_group = np.arange(C) // cg
    gmat = (ch_group[:, None] == np.arange(n_groups)[None, :]).astype(np.float32)  # (C, G)
    return jnp.asarray(gmat), jnp.asarray(gmat.T)


def pallas_res_block(x, cond3, p, n_groups, skip=None):
    B, T, _ = x.shape
    Cout = p["block0"]["w"].shape[-1]
    has_res = p["res_w"] is not None
    has_skip = skip is not None
    gmat, gt = _group_maps(Cout, n_groups)
    batched = [x] + ([skip] if has_skip else []) + [cond3]
    shared = [gmat, gt,
              p["block0"]["w"], p["block0"]["b"], p["block0"]["gn_g"], p["block0"]["gn_b"],
              p["cond_w"], p["cond_b"],
              p["block1"]["w"], p["block1"]["b"], p["block1"]["gn_g"], p["block1"]["gn_b"]]
    if has_res:
        shared += [p["res_w"], p["res_b"]]
    kern = functools.partial(_res_block_kernel, n_groups=n_groups,
                             has_res=has_res, has_skip=has_skip)
    return _pallas_per_batch(kern, batched, shared, (B, T, Cout), x.dtype)


def pallas_downsample(x, w, b):
    B, T, C = x.shape
    assert T % 2 == 0, "Downsample1d expects an even horizon"
    To = (T + 2 - 3) // 2 + 1
    return _pallas_per_batch(_downsample_kernel, [x], [w, b], (B, To, C), x.dtype)


def pallas_upsample(x, we, wo, b):
    B, T, C = x.shape
    return _pallas_per_batch(_upsample_kernel, [x], [we, wo, b], (B, 2 * T, C), x.dtype)


def pallas_final(x, pb, pc, n_groups):
    B, T, _ = x.shape
    Cmid = pb["w"].shape[-1]
    out_dim = pc["w"].shape[-1]
    gmat, gt = _group_maps(Cmid, n_groups)
    kern = functools.partial(_final_kernel, n_groups=n_groups)
    return _pallas_per_batch(kern, [x],
                             [gmat, gt, pb["w"], pb["b"], pb["gn_g"], pb["gn_b"],
                              pc["w"], pc["b"]],
                             (B, T, out_dim), x.dtype)


# --------------------------- module glue (plain JAX) --------------------------

def timestep_embedding(timesteps, dim):
    # Timesteps(dim, flip_sin_to_cos=False, downscale_freq_shift=1)
    half = dim // 2
    exponent = -jnp.log(10000.0) * jnp.arange(half, dtype=jnp.float32) / (half - 1.0)
    emb = timesteps.astype(jnp.float32)[:, None] * jnp.exp(exponent)[None, :]
    return jnp.concatenate([jnp.sin(emb), jnp.cos(emb)], axis=-1)


def forward(params, sample, timestep, cond, *, dsed, n_groups):
    B = sample.shape[0]
    timesteps = jnp.broadcast_to(jnp.asarray(timestep, jnp.int32).reshape(-1), (B,))
    t_emb = timestep_embedding(timesteps, dsed)

    # TODO(synk): diffusion_step_proj (Linear -> Mish -> Linear) stays plain XLA;
    # a (B, dsed) MLP is launch-latency bound as a dedicated pallas_call.
    h1 = t_emb @ params["proj1_w"].astype(jnp.float32) + params["proj1_b"].astype(jnp.float32)
    h1 = h1 * jnp.tanh(jnp.logaddexp(h1, 0.0))                     # Mish
    g = h1 @ params["proj2_w"].astype(jnp.float32) + params["proj2_b"].astype(jnp.float32)
    if cond is not None:
        g = jnp.concatenate([g, cond.reshape(B, -1).astype(jnp.float32)], axis=-1)
    cond3 = g[:, None, :].astype(sample.dtype)                     # (B, 1, cond_dim)

    x = sample
    skips = []
    for lvl in params["down"]:
        x = pallas_res_block(x, cond3, lvl["res1"], n_groups)
        x = pallas_res_block(x, cond3, lvl["res2"], n_groups)
        skips.append(x)
        if lvl["down"] is not None:
            x = pallas_downsample(x, lvl["down"]["w"], lvl["down"]["b"])
    for m in params["mid"]:
        x = pallas_res_block(x, cond3, m, n_groups)
    for lvl in params["up"]:
        # Skip concat fused into the res-block kernel (no HBM concat).
        x = pallas_res_block(x, cond3, lvl["res1"], n_groups, skip=skips.pop())
        x = pallas_res_block(x, cond3, lvl["res2"], n_groups)
        if lvl["up"] is not None:
            x = pallas_upsample(x, lvl["up"]["we"], lvl["up"]["wo"], lvl["up"]["b"])
    return pallas_final(x, params["final_block"], params["final_conv"], n_groups)


# --------------------------- deterministic parameter init ---------------------

def build_params(key, input_dim, global_cond_dim, dsed, down_dims, ksize):
    ctr = [0]

    def nk():
        ctr[0] += 1
        return jax.random.fold_in(key, ctr[0])

    def w(shape, scale=0.1):
        return (scale * jax.random.normal(nk(), shape, jnp.float32)).astype(STORAGE_DTYPE)

    # Conv1d weights stored im2col-ready as (K*Cin, Cout):
    #   w[k*Cin + ci, co] == torch_conv_weight[co, ci, k]
    def conv_block_p(cin, cout, kk):
        return {"w": w((kk * cin, cout)), "b": w((1, cout)),
                "gn_g": (1.0 + w((1, cout))).astype(STORAGE_DTYPE), "gn_b": w((1, cout))}

    def res_block_p(cin, cout, cond_dim, kk):
        p = {"block0": conv_block_p(cin, cout, kk),
             "block1": conv_block_p(cout, cout, kk),
             "cond_w": w((cond_dim, cout)), "cond_b": w((1, cout))}
        if cin != cout:
            p["res_w"] = w((cin, cout))
            p["res_b"] = w((1, cout))
        else:
            p["res_w"] = None
            p["res_b"] = None
        return p

    all_dims = [input_dim] + list(down_dims)
    start_dim = down_dims[0]
    mid_dim = all_dims[-1]
    cond_dim = dsed + (global_cond_dim if global_cond_dim is not None else 0)
    in_out = list(zip(all_dims[:-1], all_dims[1:]))

    params = {
        "proj1_w": w((dsed, dsed * 4)), "proj1_b": w((1, dsed * 4)),
        "proj2_w": w((dsed * 4, dsed)), "proj2_b": w((1, dsed)),
        "down": [], "mid": [], "up": [],
    }
    for ind, (din, dout) in enumerate(in_out):
        is_last = ind >= len(in_out) - 1
        params["down"].append({
            "res1": res_block_p(din, dout, cond_dim, ksize),
            "res2": res_block_p(dout, dout, cond_dim, ksize),
            # Downsample1d k=3 s=2 p=1, im2col weight (3*C, C)
            "down": None if is_last else {"w": w((3 * dout, dout)), "b": w((1, dout))},
        })
    params["mid"] = [res_block_p(mid_dim, mid_dim, cond_dim, ksize) for _ in range(2)]
    for ind, (din, dout) in enumerate(reversed(in_out[1:])):
        is_last = ind >= len(in_out) - 1
        params["up"].append({
            "res1": res_block_p(dout * 2, din, cond_dim, ksize),
            "res2": res_block_p(din, din, cond_dim, ksize),
            # ConvTranspose1d k=4 s=2 p=1, packed per output parity:
            #   we = [[W1],[W3]],  wo = [[W2],[W0]]  with W_k[ci,co] = torch_w[ci,co,k]
            "up": None if is_last else {"we": w((2 * din, din)),
                                        "wo": w((2 * din, din)),
                                        "b": w((1, din))},
        })
    params["final_block"] = conv_block_p(start_dim, start_dim, ksize)
    params["final_conv"] = {"w": w((start_dim, input_dim)), "b": w((1, input_dim))}
    return params


# --------------------------------- main ---------------------------------------

if __name__ == "__main__":
    B, T = 2, 16            # (batch, horizon)
    input_dim = 4           # Da
    global_cond_dim = 16
    dsed = 64               # diffusion step embed dim (small for the demo)
    down_dims = [64, 128]
    n_groups = 8
    ksize = 3

    params = build_params(jax.random.PRNGKey(0), input_dim, global_cond_dim,
                          dsed, down_dims, ksize)

    k1, k2 = jax.random.split(jax.random.PRNGKey(0), 2)
    sample = jax.random.normal(k1, (B, T, input_dim), jnp.float32).astype(STORAGE_DTYPE)
    timestep = jnp.array([3, 7], dtype=jnp.int32)                    # (B,)
    cond = jax.random.normal(k2, (B, global_cond_dim), jnp.float32)  # (B, global_cond_dim)

    fwd = jax.jit(functools.partial(forward, params, dsed=dsed, n_groups=n_groups))
    out = jax.block_until_ready(fwd(sample, timestep, cond))
    assert out.shape == (B, T, input_dim), out.shape
    assert bool(jnp.all(jnp.isfinite(out)))
    print("KERNEL_OK")
</pallas_src>

<mosaic_0001>
module attributes {stable_mosaic.version = 11 : i64} {
  func.func @_res_block_kernel(%arg0: i32, %arg1: memref<1x16x4xf32, #tpu.memory_space<vmem>>, %arg2: memref<1x1x80xf32, #tpu.memory_space<vmem>>, %arg3: memref<64x8xf32, #tpu.memory_space<vmem>>, %arg4: memref<8x64xf32, #tpu.memory_space<vmem>>, %arg5: memref<12x64xf32, #tpu.memory_space<vmem>>, %arg6: memref<1x64xf32, #tpu.memory_space<vmem>>, %arg7: memref<1x64xf32, #tpu.memory_space<vmem>>, %arg8: memref<1x64xf32, #tpu.memory_space<vmem>>, %arg9: memref<80x64xf32, #tpu.memory_space<vmem>>, %arg10: memref<1x64xf32, #tpu.memory_space<vmem>>, %arg11: memref<192x64xf32, #tpu.memory_space<vmem>>, %arg12: memref<1x64xf32, #tpu.memory_space<vmem>>, %arg13: memref<1x64xf32, #tpu.memory_space<vmem>>, %arg14: memref<1x64xf32, #tpu.memory_space<vmem>>, %arg15: memref<4x64xf32, #tpu.memory_space<vmem>>, %arg16: memref<1x64xf32, #tpu.memory_space<vmem>>, %arg17: memref<1x16x64xf32, #tpu.memory_space<vmem>>) attributes {dimension_semantics = [#tpu.dimension_semantics<parallel>], iteration_bounds = array<i64: 2>, scalar_prefetch = 0 : i64, scratch_operands = 0 : i64, tpu.core_type = #tpu.core_type<tc>, window_params = [{transform_indices = @transform_0, window_bounds = array<i64: 1, 16, 4>}, {transform_indices = @transform_1, window_bounds = array<i64: 1, 1, 80>}, {pipeline_mode = #tpu.pipeline_mode<synchronous>, transform_indices = @transform_2, window_bounds = array<i64: 64, 8>}, {pipeline_mode = #tpu.pipeline_mode<synchronous>, transform_indices = @transform_3, window_bounds = array<i64: 8, 64>}, {pipeline_mode = #tpu.pipeline_mode<synchronous>, transform_indices = @transform_4, window_bounds = array<i64: 12, 64>}, {pipeline_mode = #tpu.pipeline_mode<synchronous>, transform_indices = @transform_5, window_bounds = array<i64: 1, 64>}, {pipeline_mode = #tpu.pipeline_mode<synchronous>, transform_indices = @transform_6, window_bounds = array<i64: 1, 64>}, {pipeline_mode = #tpu.pipeline_mode<synchronous>, transform_indices = @transform_7, window_bounds = array<i64: 1, 64>}, {pipeline_mode = #tpu.pipeline_mode<synchronous>, transform_indices = @transform_8, window_bounds = array<i64: 80, 64>}, {pipeline_mode = #tpu.pipeline_mode<synchronous>, transform_indices = @transform_9, window_bounds = array<i64: 1, 64>}, {pipeline_mode = #tpu.pipeline_mode<synchronous>, transform_indices = @transform_10, window_bounds = array<i64: 192, 64>}, {pipeline_mode = #tpu.pipeline_mode<synchronous>, transform_indices = @transform_11, window_bounds = array<i64: 1, 64>}, {pipeline_mode = #tpu.pipeline_mode<synchronous>, transform_indices = @transform_12, window_bounds = array<i64: 1, 64>}, {pipeline_mode = #tpu.pipeline_mode<synchronous>, transform_indices = @transform_13, window_bounds = array<i64: 1, 64>}, {pipeline_mode = #tpu.pipeline_mode<synchronous>, transform_indices = @transform_14, window_bounds = array<i64: 4, 64>}, {pipeline_mode = #tpu.pipeline_mode<synchronous>, transform_indices = @transform_15, window_bounds = array<i64: 1, 64>}, {transform_indices = @transform_16, window_bounds = array<i64: 1, 16, 64>}]} {
    %c0 = arith.constant 0 : index
    %c0_0 = arith.constant 0 : index
    %c0_1 = arith.constant 0 : index
    %0 = vector.load %arg1[%c0, %c0_0, %c0_1] : memref<1x16x4xf32, #tpu.memory_space<vmem>>, vector<1x16x4xf32>
    %1 = vector.shape_cast %0 : vector<1x16x4xf32> to vector<16x4xf32>
    %c0_2 = arith.constant 0 : index
    %c0_3 = arith.constant 0 : index
    %2 = vector.load %arg3[%c0_2, %c0_3] : memref<64x8xf32, #tpu.memory_space<vmem>>, vector<64x8xf32>
    %c0_4 = arith.constant 0 : index
    %c0_5 = arith.constant 0 : index
    %3 = vector.load %arg4[%c0_4, %c0_5] : memref<8x64xf32, #tpu.memory_space<vmem>>, vector<8x64xf32>
    %c0_6 = arith.constant 0 : index
    %c0_7 = arith.constant 0 : index
    %c0_8 = arith.constant 0 : index
    %4 = vector.load %arg2[%c0_6, %c0_7, %c0_8] : memref<1x1x80xf32, #tpu.memory_space<vmem>>, vector<1x1x80xf32>
    %5 = vector.shape_cast %4 : vector<1x1x80xf32> to vector<1x80xf32>
    %6 = math.absf %5 : vector<1x80xf32>
    %cst = arith.constant 0.000000e+00 : f32
    %7 = vector.broadcast %cst : f32 to vector<1x80xf32>
    %8 = arith.subf %7, %6 : vector<1x80xf32>
    %9 = math.exp %8 : vector<1x80xf32>
    %cst_9 = arith.constant 0.000000e+00 : f32
    %10 = vector.broadcast %cst_9 : f32 to vector<1x80xf32>
    %11 = arith.cmpf oge, %5, %10 : vector<1x80xf32>
    %cst_10 = arith.constant 1.000000e+00 : f32
    %12 = vector.broadcast %cst_10 : f32 to vector<1x80xf32>
    %13 = arith.select %11, %9, %12 : vector<1x80xi1>, vector<1x80xf32>
    %cst_11 = arith.constant 1.000000e+00 : f32
    %14 = vector.broadcast %cst_11 : f32 to vector<1x80xf32>
    %15 = arith.addf %14, %9 : vector<1x80xf32>
    %16 = tpu.reciprocal %15 {approx = true} : vector<1x80xf32> -> vector<1x80xf32>
    %17 = arith.mulf %13, %16 : vector<1x80xf32>
    %18 = arith.mulf %17, %17 : vector<1x80xf32>
    %cst_12 = arith.constant 1.000000e+00 : f32
    %19 = vector.broadcast %cst_12 : f32 to vector<1x80xf32>
    %20 = arith.subf %19, %18 : vector<1x80xf32>
    %21 = arith.mulf %5, %20 : vector<1x80xf32>
    %cst_13 = arith.constant 1.000000e+00 : f32
    %22 = vector.broadcast %cst_13 : f32 to vector<1x80xf32>
    %23 = arith.addf %22, %18 : vector<1x80xf32>
    %24 = tpu.reciprocal %23 {approx = true} : vector<1x80xf32> -> vector<1x80xf32>
    %25 = arith.mulf %21, %24 : vector<1x80xf32>
    %c0_14 = arith.constant 0 : index
    %c0_15 = arith.constant 0 : index
    %26 = vector.load %arg9[%c0_14, %c0_15] : memref<80x64xf32, #tpu.memory_space<vmem>>, vector<80x64xf32>
    %cst_16 = arith.constant dense<0.000000e+00> : vector<1x64xf32>
    %27 = tpu.matmul %25, %26, %cst_16 {dimension_numbers = #tpu.dot_dimension_numbers<[1], [0], [0], [1], [0, 0, 1, 1], [], []>} : vector<1x80xf32>, vector<80x64xf32>, vector<1x64xf32> -> vector<1x64xf32>
    %c0_17 = arith.constant 0 : index
    %c0_18 = arith.constant 0 : index
    %28 = vector.load %arg10[%c0_17, %c0_18] : memref<1x64xf32, #tpu.memory_space<vmem>>, vector<1x64xf32>
    %29 = arith.addf %27, %28 : vector<1x64xf32>
    %cst_19 = arith.constant 0.000000e+00 : f32
    %30 = vector.broadcast %cst_19 : f32 to vector<1x4xf32>
    %31 = tpu.concatenate %30, %1, %30 in 0 : vector<1x4xf32>, vector<16x4xf32>, vector<1x4xf32> -> vector<18x4xf32>
    %32 = vector.extract_strided_slice %31 {offsets = [0, 0], sizes = [16, 4], strides = [1, 1]} : vector<18x4xf32> to vector<16x4xf32>
    %33 = vector.extract_strided_slice %31 {offsets = [1, 0], sizes = [16, 4], strides = [1, 1]} : vector<18x4xf32> to vector<16x4xf32>
    %34 = vector.extract_strided_slice %31 {offsets = [2, 0], sizes = [16, 4], strides = [1, 1]} : vector<18x4xf32> to vector<16x4xf32>
    %35 = tpu.concatenate %32, %33, %34 in 1 : vector<16x4xf32>, vector<16x4xf32>, vector<16x4xf32> -> vector<16x12xf32>
    %c0_20 = arith.constant 0 : index
    %c0_21 = arith.constant 0 : index
    %36 = vector.load %arg5[%c0_20, %c0_21] : memref<12x64xf32, #tpu.memory_space<vmem>>, vector<12x64xf32>
    %cst_22 = arith.constant dense<0.000000e+00> : vector<16x64xf32>
    %37 = tpu.matmul %35, %36, %cst_22 {dimension_numbers = #tpu.dot_dimension_numbers<[1], [0], [0], [1], [0, 0, 1, 1], [], []>} : vector<16x12xf32>, vector<12x64xf32>, vector<16x64xf32> -> vector<16x64xf32>
    %c0_23 = arith.constant 0 : index
    %c0_24 = arith.constant 0 : index
    %38 = vector.load %arg6[%c0_23, %c0_24] : memref<1x64xf32, #tpu.memory_space<vmem>>, vector<1x64xf32>
    %39 = vector.broadcast %38 : vector<1x64xf32> to vector<16x64xf32>
    %40 = arith.addf %37, %39 : vector<16x64xf32>
    %cst_25 = arith.constant dense<0.000000e+00> : vector<64xf32>
    %41 = vector.multi_reduction <add>, %40, %cst_25 [0] : vector<16x64xf32> to vector<64xf32>
    %42 = vector.shape_cast %41 : vector<64xf32> to vector<1x64xf32>
    %cst_26 = arith.constant dense<0.000000e+00> : vector<1x8xf32>
    %43 = tpu.matmul %42, %2, %cst_26 {dimension_numbers = #tpu.dot_dimension_numbers<[1], [0], [0], [1], [0, 0, 1, 1], [], []>} : vector<1x64xf32>, vector<64x8xf32>, vector<1x8xf32> -> vector<1x8xf32>
    %cst_27 = arith.constant 7.812500e-03 : f32
    %44 = vector.broadcast %cst_27 : f32 to vector<1x8xf32>
    %45 = arith.mulf %43, %44 : vector<1x8xf32>
    %cst_28 = arith.constant dense<0.000000e+00> : vector<1x64xf32>
    %46 = tpu.matmul %45, %3, %cst_28 {dimension_numbers = #tpu.dot_dimension_numbers<[1], [0], [0], [1], [0, 0, 1, 1], [], []>} : vector<1x8xf32>, vector<8x64xf32>, vector<1x64xf32> -> vector<1x64xf32>
    %47 = vector.broadcast %46 : vector<1x64xf32> to vector<16x64xf32>
    %48 = arith.subf %40, %47 : vector<16x64xf32>
    %49 = arith.mulf %48, %48 : vector<16x64xf32>
    %cst_29 = arith.constant dense<0.000000e+00> : vector<64xf32>
    %50 = vector.multi_reduction <add>, %49, %cst_29 [0] : vector<16x64xf32> to vector<64xf32>
    %51 = vector.shape_cast %50 : vector<64xf32> to vector<1x64xf32>
    %cst_30 = arith.constant dense<0.000000e+00> : vector<1x8xf32>
    %52 = tpu.matmul %51, %2, %cst_30 {dimension_numbers = #tpu.dot_dimension_numbers<[1], [0], [0], [1], [0, 0, 1, 1], [], []>} : vector<1x64xf32>, vector<64x8xf32>, vector<1x8xf32> -> vector<1x8xf32>
    %cst_31 = arith.constant 7.812500e-03 : f32
    %53 = vector.broadcast %cst_31 : f32 to vector<1x8xf32>
    %54 = arith.mulf %52, %53 : vector<1x8xf32>
    %cst_32 = arith.constant 9.99999974E-6 : f32
    %55 = vector.broadcast %cst_32 : f32 to vector<1x8xf32>
    %56 = arith.addf %54, %55 : vector<1x8xf32>
    %57 = math.rsqrt %56 : vector<1x8xf32>
    %cst_33 = arith.constant dense<0.000000e+00> : vector<1x64xf32>
    %58 = tpu.matmul %57, %3, %cst_33 {dimension_numbers = #tpu.dot_dimension_numbers<[1], [0], [0], [1], [0, 0, 1, 1], [], []>} : vector<1x8xf32>, vector<8x64xf32>, vector<1x64xf32> -> vector<1x64xf32>
    %59 = vector.broadcast %58 : vector<1x64xf32> to vector<16x64xf32>
    %60 = arith.mulf %48, %59 : vector<16x64xf32>
    %c0_34 = arith.constant 0 : index
    %c0_35 = arith.constant 0 : index
    %61 = vector.load %arg7[%c0_34, %c0_35] : memref<1x64xf32, #tpu.memory_space<vmem>>, vector<1x64xf32>
    %62 = vector.broadcast %61 : vector<1x64xf32> to vector<16x64xf32>
    %63 = arith.mulf %60, %62 : vector<16x64xf32>
    %c0_36 = arith.constant 0 : index
    %c0_37 = arith.constant 0 : index
    %64 = vector.load %arg8[%c0_36, %c0_37] : memref<1x64xf32, #tpu.memory_space<vmem>>, vector<1x64xf32>
    %65 = vector.broadcast %64 : vector<1x64xf32> to vector<16x64xf32>
    %66 = arith.addf %63, %65 : vector<16x64xf32>
    %67 = math.absf %66 : vector<16x64xf32>
    %cst_38 = arith.constant 0.000000e+00 : f32
    %68 = vector.broadcast %cst_38 : f32 to vector<16x64xf32>
    %69 = arith.subf %68, %67 : vector<16x64xf32>
    %70 = math.exp %69 : vector<16x64xf32>
    %cst_39 = arith.constant 0.000000e+00 : f32
    %71 = vector.broadcast %cst_39 : f32 to vector<16x64xf32>
    %72 = arith.cmpf oge, %66, %71 : vector<16x64xf32>
    %cst_40 = arith.constant 1.000000e+00 : f32
    %73 = vector.broadcast %cst_40 : f32 to vector<16x64xf32>
    %74 = arith.select %72, %70, %73 : vector<16x64xi1>, vector<16x64xf32>
    %cst_41 = arith.constant 1.000000e+00 : f32
    %75 = vector.broadcast %cst_41 : f32 to vector<16x64xf32>
    %76 = arith.addf %75, %70 : vector<16x64xf32>
    %77 = tpu.reciprocal %76 {approx = true} : vector<16x64xf32> -> vector<16x64xf32>
    %78 = arith.mulf %74, %77 : vector<16x64xf32>
    %79 = arith.mulf %78, %78 : vector<16x64xf32>
    %cst_42 = arith.constant 1.000000e+00 : f32
    %80 = vector.broadcast %cst_42 : f32 to vector<16x64xf32>
    %81 = arith.subf %80, %79 : vector<16x64xf32>
    %82 = arith.mulf %66, %81 : vector<16x64xf32>
    %cst_43 = arith.constant 1.000000e+00 : f32
    %83 = vector.broadcast %cst_43 : f32 to vector<16x64xf32>
    %84 = arith.addf %83, %79 : vector<16x64xf32>
    %85 = tpu.reciprocal %84 {approx = true} : vector<16x64xf32> -> vector<16x64xf32>
    %86 = arith.mulf %82, %85 : vector<16x64xf32>
    %87 = vector.broadcast %29 : vector<1x64xf32> to vector<16x64xf32>
    %88 = arith.addf %86, %87 : vector<16x64xf32>
    %cst_44 = arith.constant 0.000000e+00 : f32
    %89 = vector.broadcast %cst_44 : f32 to vector<1x64xf32>
    %90 = tpu.concatenate %89, %88, %89 in 0 : vector<1x64xf32>, vector<16x64xf32>, vector<1x64xf32> -> vector<18x64xf32>
    %91 = vector.extract_strided_slice %90 {offsets = [0, 0], sizes = [16, 64], strides = [1, 1]} : vector<18x64xf32> to vector<16x64xf32>
    %92 = vector.extract_strided_slice %90 {offsets = [1, 0], sizes = [16, 64], strides = [1, 1]} : vector<18x64xf32> to vector<16x64xf32>
    %93 = vector.extract_strided_slice %90 {offsets = [2, 0], sizes = [16, 64], strides = [1, 1]} : vector<18x64xf32> to vector<16x64xf32>
    %94 = tpu.concatenate %91, %92, %93 in 1 : vector<16x64xf32>, vector<16x64xf32>, vector<16x64xf32> -> vector<16x192xf32>
    %c0_45 = arith.constant 0 : index
    %c0_46 = arith.constant 0 : index
    %95 = vector.load %arg11[%c0_45, %c0_46] : memref<192x64xf32, #tpu.memory_space<vmem>>, vector<192x64xf32>
    %cst_47 = arith.constant dense<0.000000e+00> : vector<16x64xf32>
    %96 = tpu.matmul %94, %95, %cst_47 {dimension_numbers = #tpu.dot_dimension_numbers<[1], [0], [0], [1], [0, 0, 1, 1], [], []>} : vector<16x192xf32>, vector<192x64xf32>, vector<16x64xf32> -> vector<16x64xf32>
    %c0_48 = arith.constant 0 : index
    %c0_49 = arith.constant 0 : index
    %97 = vector.load %arg12[%c0_48, %c0_49] : memref<1x64xf32, #tpu.memory_space<vmem>>, vector<1x64xf32>
    %98 = vector.broadcast %97 : vector<1x64xf32> to vector<16x64xf32>
    %99 = arith.addf %96, %98 : vector<16x64xf32>
    %cst_50 = arith.constant dense<0.000000e+00> : vector<64xf32>
    %100 = vector.multi_reduction <add>, %99, %cst_50 [0] : vector<16x64xf32> to vector<64xf32>
    %101 = vector.shape_cast %100 : vector<64xf32> to vector<1x64xf32>
    %cst_51 = arith.constant dense<0.000000e+00> : vector<1x8xf32>
    %102 = tpu.matmul %101, %2, %cst_51 {dimension_numbers = #tpu.dot_dimension_numbers<[1], [0], [0], [1], [0, 0, 1, 1], [], []>} : vector<1x64xf32>, vector<64x8xf32>, vector<1x8xf32> -> vector<1x8xf32>
    %cst_52 = arith.constant 7.812500e-03 : f32
    %103 = vector.broadcast %cst_52 : f32 to vector<1x8xf32>
    %104 = arith.mulf %102, %103 : vector<1x8xf32>
    %cst_53 = arith.constant dense<0.000000e+00> : vector<1x64xf32>
    %105 = tpu.matmul %104, %3, %cst_53 {dimension_numbers = #tpu.dot_dimension_numbers<[1], [0], [0], [1], [0, 0, 1, 1], [], []>} : vector<1x8xf32>, vector<8x64xf32>, vector<1x64xf32> -> vector<1x64xf32>
    %106 = vector.broadcast %105 : vector<1x64xf32> to vector<16x64xf32>
    %107 = arith.subf %99, %106 : vector<16x64xf32>
    %108 = arith.mulf %107, %107 : vector<16x64xf32>
    %cst_54 = arith.constant dense<0.000000e+00> : vector<64xf32>
    %109 = vector.multi_reduction <add>, %108, %cst_54 [0] : vector<16x64xf32> to vector<64xf32>
    %110 = vector.shape_cast %109 : vector<64xf32> to vector<1x64xf32>
    %cst_55 = arith.constant dense<0.000000e+00> : vector<1x8xf32>
    %111 = tpu.matmul %110, %2, %cst_55 {dimension_numbers = #tpu.dot_dimension_numbers<[1], [0], [0], [1], [0, 0, 1, 1], [], []>} : vector<1x64xf32>, vector<64x8xf32>, vector<1x8xf32> -> vector<1x8xf32>
    %cst_56 = arith.constant 7.812500e-03 : f32
    %112 = vector.broadcast %cst_56 : f32 to vector<1x8xf32>
    %113 = arith.mulf %111, %112 : vector<1x8xf32>
    %cst_57 = arith.constant 9.99999974E-6 : f32
    %114 = vector.broadcast %cst_57 : f32 to vector<1x8xf32>
    %115 = arith.addf %113, %114 : vector<1x8xf32>
    %116 = math.rsqrt %115 : vector<1x8xf32>
    %cst_58 = arith.constant dense<0.000000e+00> : vector<1x64xf32>
    %117 = tpu.matmul %116, %3, %cst_58 {dimension_numbers = #tpu.dot_dimension_numbers<[1], [0], [0], [1], [0, 0, 1, 1], [], []>} : vector<1x8xf32>, vector<8x64xf32>, vector<1x64xf32> -> vector<1x64xf32>
    %118 = vector.broadcast %117 : vector<1x64xf32> to vector<16x64xf32>
    %119 = arith.mulf %107, %118 : vector<16x64xf32>
    %c0_59 = arith.constant 0 : index
    %c0_60 = arith.constant 0 : index
    %120 = vector.load %arg13[%c0_59, %c0_60] : memref<1x64xf32, #tpu.memory_space<vmem>>, vector<1x64xf32>
    %121 = vector.broadcast %120 : vector<1x64xf32> to vector<16x64xf32>
    %122 = arith.mulf %119, %121 : vector<16x64xf32>
    %c0_61 = arith.constant 0 : index
    %c0_62 = arith.constant 0 : index
    %123 = vector.load %arg14[%c0_61, %c0_62] : memref<1x64xf32, #tpu.memory_space<vmem>>, vector<1x64xf32>
    %124 = vector.broadcast %123 : vector<1x64xf32> to vector<16x64xf32>
    %125 = arith.addf %122, %124 : vector<16x64xf32>
    %126 = math.absf %125 : vector<16x64xf32>
    %cst_63 = arith.constant 0.000000e+00 : f32
    %127 = vector.broadcast %cst_63 : f32 to vector<16x64xf32>
    %128 = arith.subf %127, %126 : vector<16x64xf32>
    %129 = math.exp %128 : vector<16x64xf32>
    %cst_64 = arith.constant 0.000000e+00 : f32
    %130 = vector.broadcast %cst_64 : f32 to vector<16x64xf32>
    %131 = arith.cmpf oge, %125, %130 : vector<16x64xf32>
    %cst_65 = arith.constant 1.000000e+00 : f32
    %132 = vector.broadcast %cst_65 : f32 to vector<16x64xf32>
    %133 = arith.select %131, %129, %132 : vector<16x64xi1>, vector<16x64xf32>
    %cst_66 = arith.constant 1.000000e+00 : f32
    %134 = vector.broadcast %cst_66 : f32 to vector<16x64xf32>
    %135 = arith.addf %134, %129 : vector<16x64xf32>
    %136 = tpu.reciprocal %135 {approx = true} : vector<16x64xf32> -> vector<16x64xf32>
    %137 = arith.mulf %133, %136 : vector<16x64xf32>
    %138 = arith.mulf %137, %137 : vector<16x64xf32>
    %cst_67 = arith.constant 1.000000e+00 : f32
    %139 = vector.broadcast %cst_67 : f32 to vector<16x64xf32>
    %140 = arith.subf %139, %138 : vector<16x64xf32>
    %141 = arith.mulf %125, %140 : vector<16x64xf32>
    %cst_68 = arith.constant 1.000000e+00 : f32
    %142 = vector.broadcast %cst_68 : f32 to vector<16x64xf32>
    %143 = arith.addf %142, %138 : vector<16x64xf32>
    %144 = tpu.reciprocal %143 {approx = true} : vector<16x64xf32> -> vector<16x64xf32>
    %145 = arith.mulf %141, %144 : vector<16x64xf32>
    %c0_69 = arith.constant 0 : index
    %c0_70 = arith.constant 0 : index
    %146 = vector.load %arg15[%c0_69, %c0_70] : memref<4x64xf32, #tpu.memory_space<vmem>>, vector<4x64xf32>
    %cst_71 = arith.constant dense<0.000000e+00> : vector<16x64xf32>
    %147 = tpu.matmul %1, %146, %cst_71 {dimension_numbers = #tpu.dot_dimension_numbers<[1], [0], [0], [1], [0, 0, 1, 1], [], []>} : vector<16x4xf32>, vector<4x64xf32>, vector<16x64xf32> -> vector<16x64xf32>
    %c0_72 = arith.constant 0 : index
    %c0_73 = arith.constant 0 : index
    %148 = vector.load %arg16[%c0_72, %c0_73] : memref<1x64xf32, #tpu.memory_space<vmem>>, vector<1x64xf32>
    %149 = vector.broadcast %148 : vector<1x64xf32> to vector<16x64xf32>
    %150 = arith.addf %147, %149 : vector<16x64xf32>
    %151 = arith.addf %145, %150 : vector<16x64xf32>
    %c0_74 = arith.constant 0 : index
    %c0_75 = arith.constant 0 : index
    %c0_76 = arith.constant 0 : index
    %152 = vector.load %arg17[%c0_74, %c0_75, %c0_76] : memref<1x16x64xf32, #tpu.memory_space<vmem>>, vector<1x16x64xf32>
    %153 = vector.shape_cast %152 : vector<1x16x64xf32> to vector<16x64xf32>
    %154 = vector.shape_cast %151 : vector<16x64xf32> to vector<1x16x64xf32>
    tpu.vector_store %arg17[%c0_74, %c0_75, %c0_76], %154 {strides = array<i32>} : memref<1x16x64xf32, #tpu.memory_space<vmem>>, vector<1x16x64xf32>,
    return
  }
  func.func @transform_0(%arg0: i32) -> (i32, i32, i32) {
    %c0_i32 = arith.constant 0 : i32
    %c0_i32_0 = arith.constant 0 : i32
    %c0_i32_1 = arith.constant 0 : i32
    return %arg0, %c0_i32, %c0_i32_0 : i32, i32, i32
  }
  func.func @transform_1(%arg0: i32) -> (i32, i32, i32) {
    %c0_i32 = arith.constant 0 : i32
    %c0_i32_0 = arith.constant 0 : i32
    %c0_i32_1 = arith.constant 0 : i32
    return %arg0, %c0_i32, %c0_i32_0 : i32, i32, i32
  }
  func.func @transform_2(%arg0: i32) -> (i32, i32) {
    %c0_i32 = arith.constant 0 : i32
    %c0_i32_0 = arith.constant 0 : i32
    %c0_i32_1 = arith.constant 0 : i32
    return %c0_i32, %c0_i32_0 : i32, i32
  }
  func.func @transform_3(%arg0: i32) -> (i32, i32) {
    %c0_i32 = arith.constant 0 : i32
    %c0_i32_0 = arith.constant 0 : i32
    %c0_i32_1 = arith.constant 0 : i32
    return %c0_i32, %c0_i32_0 : i32, i32
  }
  func.func @transform_4(%arg0: i32) -> (i32, i32) {
    %c0_i32 = arith.constant 0 : i32
    %c0_i32_0 = arith.constant 0 : i32
    %c0_i32_1 = arith.constant 0 : i32
    return %c0_i32, %c0_i32_0 : i32, i32
  }
  func.func @transform_5(%arg0: i32) -> (i32, i32) {
    %c0_i32 = arith.constant 0 : i32
    %c0_i32_0 = arith.constant 0 : i32
    %c0_i32_1 = arith.constant 0 : i32
    return %c0_i32, %c0_i32_0 : i32, i32
  }
  func.func @transform_6(%arg0: i32) -> (i32, i32) {
    %c0_i32 = arith.constant 0 : i32
    %c0_i32_0 = arith.constant 0 : i32
    %c0_i32_1 = arith.constant 0 : i32
    return %c0_i32, %c0_i32_0 : i32, i32
  }
  func.func @transform_7(%arg0: i32) -> (i32, i32) {
    %c0_i32 = arith.constant 0 : i32
    %c0_i32_0 = arith.constant 0 : i32
    %c0_i32_1 = arith.constant 0 : i32
    return %c0_i32, %c0_i32_0 : i32, i32
  }
  func.func @transform_8(%arg0: i32) -> (i32, i32) {
    %c0_i32 = arith.constant 0 : i32
    %c0_i32_0 = arith.constant 0 : i32
    %c0_i32_1 = arith.constant 0 : i32
    return %c0_i32, %c0_i32_0 : i32, i32
  }
  func.func @transform_9(%arg0: i32) -> (i32, i32) {
    %c0_i32 = arith.constant 0 : i32
    %c0_i32_0 = arith.constant 0 : i32
    %c0_i32_1 = arith.constant 0 : i32
    return %c0_i32, %c0_i32_0 : i32, i32
  }
  func.func @transform_10(%arg0: i32) -> (i32, i32) {
    %c0_i32 = arith.constant 0 : i32
    %c0_i32_0 = arith.constant 0 : i32
    %c0_i32_1 = arith.constant 0 : i32
    return %c0_i32, %c0_i32_0 : i32, i32
  }
  func.func @transform_11(%arg0: i32) -> (i32, i32) {
    %c0_i32 = arith.constant 0 : i32
    %c0_i32_0 = arith.constant 0 : i32
    %c0_i32_1 = arith.constant 0 : i32
    return %c0_i32, %c0_i32_0 : i32, i32
  }
  func.func @transform_12(%arg0: i32) -> (i32, i32) {
    %c0_i32 = arith.constant 0 : i32
    %c0_i32_0 = arith.constant 0 : i32
    %c0_i32_1 = arith.constant 0 : i32
    return %c0_i32, %c0_i32_0 : i32, i32
  }
  func.func @transform_13(%arg0: i32) -> (i32, i32) {
    %c0_i32 = arith.constant 0 : i32
    %c0_i32_0 = arith.constant 0 : i32
    %c0_i32_1 = arith.constant 0 : i32
    return %c0_i32, %c0_i32_0 : i32, i32
  }
  func.func @transform_14(%arg0: i32) -> (i32, i32) {
    %c0_i32 = arith.constant 0 : i32
    %c0_i32_0 = arith.constant 0 : i32
    %c0_i32_1 = arith.constant 0 : i32
    return %c0_i32, %c0_i32_0 : i32, i32
  }
  func.func @transform_15(%arg0: i32) -> (i32, i32) {
    %c0_i32 = arith.constant 0 : i32
    %c0_i32_0 = arith.constant 0 : i32
    %c0_i32_1 = arith.constant 0 : i32
    return %c0_i32, %c0_i32_0 : i32, i32
  }
  func.func @transform_16(%arg0: i32) -> (i32, i32, i32) {
    %c0_i32 = arith.constant 0 : i32
    %c0_i32_0 = arith.constant 0 : i32
    %c0_i32_1 = arith.constant 0 : i32
    return %arg0, %c0_i32, %c0_i32_0 : i32, i32, i32
  }
}

module attributes {stable_mosaic.version = 11 : i64} {
  func.func @_downsample_kernel(%arg0: i32, %arg1: memref<1x16x64xf32, #tpu.memory_space<vmem>>, %arg2: memref<192x64xf32, #tpu.memory_space<vmem>>, %arg3: memref<1x64xf32, #tpu.memory_space<vmem>>, %arg4: memref<1x8x64xf32, #tpu.memory_space<vmem>>) attributes {dimension_semantics = [#tpu.dimension_semantics<parallel>], iteration_bounds = array<i64: 2>, scalar_prefetch = 0 : i64, scratch_operands = 0 : i64, tpu.core_type = #tpu.core_type<tc>, window_params = [{transform_indices = @transform_0, window_bounds = array<i64: 1, 16, 64>}, {pipeline_mode = #tpu.pipeline_mode<synchronous>, transform_indices = @transform_1, window_bounds = array<i64: 192, 64>}, {pipeline_mode = #tpu.pipeline_mode<synchronous>, transform_indices = @transform_2, window_bounds = array<i64: 1, 64>}, {transform_indices = @transform_3, window_bounds = array<i64: 1, 8, 64>}]} {
    %c0 = arith.constant 0 : index
    %c0_0 = arith.constant 0 : index
    %c0_1 = arith.constant 0 : index
    %0 = tpu.strided_load %arg1[%c0, %c0_0, %c0_1] {strides = array<i32: 1, 2, 1>} : memref<1x16x64xf32, #tpu.memory_space<vmem>>, vector<1x8x64xf32>
    %1 = vector.shape_cast %0 : vector<1x8x64xf32> to vector<8x64xf32>
    %c0_2 = arith.constant 0 : index
    %c1 = arith.constant 1 : index
    %c0_3 = arith.constant 0 : index
    %2 = tpu.strided_load %arg1[%c0_2, %c1, %c0_3] {strides = array<i32: 1, 2, 1>} : memref<1x16x64xf32, #tpu.memory_space<vmem>>, vector<1x8x64xf32>
    %3 = vector.shape_cast %2 : vector<1x8x64xf32> to vector<8x64xf32>
    %cst = arith.constant 0.000000e+00 : f32
    %4 = vector.broadcast %cst : f32 to vector<1x64xf32>
    %5 = vector.extract_strided_slice %3 {offsets = [0, 0], sizes = [7, 64], strides = [1, 1]} : vector<8x64xf32> to vector<7x64xf32>
    %6 = tpu.concatenate %4, %5 in 0 : vector<1x64xf32>, vector<7x64xf32> -> vector<8x64xf32>
    %7 = tpu.concatenate %6, %1, %3 in 1 : vector<8x64xf32>, vector<8x64xf32>, vector<8x64xf32> -> vector<8x192xf32>
    %c0_4 = arith.constant 0 : index
    %c0_5 = arith.constant 0 : index
    %8 = vector.load %arg2[%c0_4, %c0_5] : memref<192x64xf32, #tpu.memory_space<vmem>>, vector<192x64xf32>
    %cst_6 = arith.constant dense<0.000000e+00> : vector<8x64xf32>
    %9 = tpu.matmul %7, %8, %cst_6 {dimension_numbers = #tpu.dot_dimension_numbers<[1], [0], [0], [1], [0, 0, 1, 1], [], []>} : vector<8x192xf32>, vector<192x64xf32>, vector<8x64xf32> -> vector<8x64xf32>
    %c0_7 = arith.constant 0 : index
    %c0_8 = arith.constant 0 : index
    %10 = vector.load %arg3[%c0_7, %c0_8] : memref<1x64xf32, #tpu.memory_space<vmem>>, vector<1x64xf32>
    %11 = vector.broadcast %10 : vector<1x64xf32> to vector<8x64xf32>
    %12 = arith.addf %9, %11 : vector<8x64xf32>
    %c0_9 = arith.constant 0 : index
    %c0_10 = arith.constant 0 : index
    %c0_11 = arith.constant 0 : index
    %13 = vector.load %arg4[%c0_9, %c0_10, %c0_11] : memref<1x8x64xf32, #tpu.memory_space<vmem>>, vector<1x8x64xf32>
    %14 = vector.shape_cast %13 : vector<1x8x64xf32> to vector<8x64xf32>
    %15 = vector.shape_cast %12 : vector<8x64xf32> to vector<1x8x64xf32>
    tpu.vector_store %arg4[%c0_9, %c0_10, %c0_11], %15 {strides = array<i32>} : memref<1x8x64xf32, #tpu.memory_space<vmem>>, vector<1x8x64xf32>,
    return
  }
  func.func @transform_0(%arg0: i32) -> (i32, i32, i32) {
    %c0_i32 = arith.constant 0 : i32
    %c0_i32_0 = arith.constant 0 : i32
    %c0_i32_1 = arith.constant 0 : i32
    return %arg0, %c0_i32, %c0_i32_0 : i32, i32, i32
  }
  func.func @transform_1(%arg0: i32) -> (i32, i32) {
    %c0_i32 = arith.constant 0 : i32
    %c0_i32_0 = arith.constant 0 : i32
    %c0_i32_1 = arith.constant 0 : i32
    return %c0_i32, %c0_i32_0 : i32, i32
  }
  func.func @transform_2(%arg0: i32) -> (i32, i32) {
    %c0_i32 = arith.constant 0 : i32
    %c0_i32_0 = arith.constant 0 : i32
    %c0_i32_1 = arith.constant 0 : i32
    return %c0_i32, %c0_i32_0 : i32, i32
  }
  func.func @transform_3(%arg0: i32) -> (i32, i32, i32) {
    %c0_i32 = arith.constant 0 : i32
    %c0_i32_0 = arith.constant 0 : i32
    %c0_i32_1 = arith.constant 0 : i32
    return %arg0, %c0_i32, %c0_i32_0 : i32, i32, i32
  }
}

module attributes {stable_mosaic.version = 11 : i64} {
  func.func @_res_block_kernel(%arg0: i32, %arg1: memref<1x16x64xf32, #tpu.memory_space<vmem>>, %arg2: memref<1x1x80xf32, #tpu.memory_space<vmem>>, %arg3: memref<64x8xf32, #tpu.memory_space<vmem>>, %arg4: memref<8x64xf32, #tpu.memory_space<vmem>>, %arg5: memref<192x64xf32, #tpu.memory_space<vmem>>, %arg6: memref<1x64xf32, #tpu.memory_space<vmem>>, %arg7: memref<1x64xf32, #tpu.memory_space<vmem>>, %arg8: memref<1x64xf32, #tpu.memory_space<vmem>>, %arg9: memref<80x64xf32, #tpu.memory_space<vmem>>, %arg10: memref<1x64xf32, #tpu.memory_space<vmem>>, %arg11: memref<192x64xf32, #tpu.memory_space<vmem>>, %arg12: memref<1x64xf32, #tpu.memory_space<vmem>>, %arg13: memref<1x64xf32, #tpu.memory_space<vmem>>, %arg14: memref<1x64xf32, #tpu.memory_space<vmem>>, %arg15: memref<1x16x64xf32, #tpu.memory_space<vmem>>) attributes {dimension_semantics = [#tpu.dimension_semantics<parallel>], iteration_bounds = array<i64: 2>, scalar_prefetch = 0 : i64, scratch_operands = 0 : i64, tpu.core_type = #tpu.core_type<tc>, window_params = [{transform_indices = @transform_0, window_bounds = array<i64: 1, 16, 64>}, {transform_indices = @transform_1, window_bounds = array<i64: 1, 1, 80>}, {pipeline_mode = #tpu.pipeline_mode<synchronous>, transform_indices = @transform_2, window_bounds = array<i64: 64, 8>}, {pipeline_mode = #tpu.pipeline_mode<synchronous>, transform_indices = @transform_3, window_bounds = array<i64: 8, 64>}, {pipeline_mode = #tpu.pipeline_mode<synchronous>, transform_indices = @transform_4, window_bounds = array<i64: 192, 64>}, {pipeline_mode = #tpu.pipeline_mode<synchronous>, transform_indices = @transform_5, window_bounds = array<i64: 1, 64>}, {pipeline_mode = #tpu.pipeline_mode<synchronous>, transform_indices = @transform_6, window_bounds = array<i64: 1, 64>}, {pipeline_mode = #tpu.pipeline_mode<synchronous>, transform_indices = @transform_7, window_bounds = array<i64: 1, 64>}, {pipeline_mode = #tpu.pipeline_mode<synchronous>, transform_indices = @transform_8, window_bounds = array<i64: 80, 64>}, {pipeline_mode = #tpu.pipeline_mode<synchronous>, transform_indices = @transform_9, window_bounds = array<i64: 1, 64>}, {pipeline_mode = #tpu.pipeline_mode<synchronous>, transform_indices = @transform_10, window_bounds = array<i64: 192, 64>}, {pipeline_mode = #tpu.pipeline_mode<synchronous>, transform_indices = @transform_11, window_bounds = array<i64: 1, 64>}, {pipeline_mode = #tpu.pipeline_mode<synchronous>, transform_indices = @transform_12, window_bounds = array<i64: 1, 64>}, {pipeline_mode = #tpu.pipeline_mode<synchronous>, transform_indices = @transform_13, window_bounds = array<i64: 1, 64>}, {transform_indices = @transform_14, window_bounds = array<i64: 1, 16, 64>}]} {
    %c0 = arith.constant 0 : index
    %c0_0 = arith.constant 0 : index
    %c0_1 = arith.constant 0 : index
    %0 = vector.load %arg1[%c0, %c0_0, %c0_1] : memref<1x16x64xf32, #tpu.memory_space<vmem>>, vector<1x16x64xf32>
    %1 = vector.shape_cast %0 : vector<1x16x64xf32> to vector<16x64xf32>
    %c0_2 = arith.constant 0 : index
    %c0_3 = arith.constant 0 : index
    %2 = vector.load %arg3[%c0_2, %c0_3] : memref<64x8xf32, #tpu.memory_space<vmem>>, vector<64x8xf32>
    %c0_4 = arith.constant 0 : index
    %c0_5 = arith.constant 0 : index
    %3 = vector.load %arg4[%c0_4, %c0_5] : memref<8x64xf32, #tpu.memory_space<vmem>>, vector<8x64xf32>
    %c0_6 = arith.constant 0 : index
    %c0_7 = arith.constant 0 : index
    %c0_8 = arith.constant 0 : index
    %4 = vector.load %arg2[%c0_6, %c0_7, %c0_8] : memref<1x1x80xf32, #tpu.memory_space<vmem>>, vector<1x1x80xf32>
    %5 = vector.shape_cast %4 : vector<1x1x80xf32> to vector<1x80xf32>
    %6 = math.absf %5 : vector<1x80xf32>
    %cst = arith.constant 0.000000e+00 : f32
    %7 = vector.broadcast %cst : f32 to vector<1x80xf32>
    %8 = arith.subf %7, %6 : vector<1x80xf32>
    %9 = math.exp %8 : vector<1x80xf32>
    %cst_9 = arith.constant 0.000000e+00 : f32
    %10 = vector.broadcast %cst_9 : f32 to vector<1x80xf32>
    %11 = arith.cmpf oge, %5, %10 : vector<1x80xf32>
    %cst_10 = arith.constant 1.000000e+00 : f32
    %12 = vector.broadcast %cst_10 : f32 to vector<1x80xf32>
    %13 = arith.select %11, %9, %12 : vector<1x80xi1>, vector<1x80xf32>
    %cst_11 = arith.constant 1.000000e+00 : f32
    %14 = vector.broadcast %cst_11 : f32 to vector<1x80xf32>
    %15 = arith.addf %14, %9 : vector<1x80xf32>
    %16 = tpu.reciprocal %15 {approx = true} : vector<1x80xf32> -> vector<1x80xf32>
    %17 = arith.mulf %13, %16 : vector<1x80xf32>
    %18 = arith.mulf %17, %17 : vector<1x80xf32>
    %cst_12 = arith.constant 1.000000e+00 : f32
    %19 = vector.broadcast %cst_12 : f32 to vector<1x80xf32>
    %20 = arith.subf %19, %18 : vector<1x80xf32>
    %21 = arith.mulf %5, %20 : vector<1x80xf32>
    %cst_13 = arith.constant 1.000000e+00 : f32
    %22 = vector.broadcast %cst_13 : f32 to vector<1x80xf32>
    %23 = arith.addf %22, %18 : vector<1x80xf32>
    %24 = tpu.reciprocal %23 {approx = true} : vector<1x80xf32> -> vector<1x80xf32>
    %25 = arith.mulf %21, %24 : vector<1x80xf32>
    %c0_14 = arith.constant 0 : index
    %c0_15 = arith.constant 0 : index
    %26 = vector.load %arg9[%c0_14, %c0_15] : memref<80x64xf32, #tpu.memory_space<vmem>>, vector<80x64xf32>
    %cst_16 = arith.constant dense<0.000000e+00> : vector<1x64xf32>
    %27 = tpu.matmul %25, %26, %cst_16 {dimension_numbers = #tpu.dot_dimension_numbers<[1], [0], [0], [1], [0, 0, 1, 1], [], []>} : vector<1x80xf32>, vector<80x64xf32>, vector<1x64xf32> -> vector<1x64xf32>
    %c0_17 = arith.constant 0 : index
    %c0_18 = arith.constant 0 : index
    %28 = vector.load %arg10[%c0_17, %c0_18] : memref<1x64xf32, #tpu.memory_space<vmem>>, vector<1x64xf32>
    %29 = arith.addf %27, %28 : vector<1x64xf32>
    %cst_19 = arith.constant 0.000000e+00 : f32
    %30 = vector.broadcast %cst_19 : f32 to vector<1x64xf32>
    %31 = tpu.concatenate %30, %1, %30 in 0 : vector<1x64xf32>, vector<16x64xf32>, vector<1x64xf32> -> vector<18x64xf32>
    %32 = vector.extract_strided_slice %31 {offsets = [0, 0], sizes = [16, 64], strides = [1, 1]} : vector<18x64xf32> to vector<16x64xf32>
    %33 = vector.extract_strided_slice %31 {offsets = [1, 0], sizes = [16, 64], strides = [1, 1]} : vector<18x64xf32> to vector<16x64xf32>
    %34 = vector.extract_strided_slice %31 {offsets = [2, 0], sizes = [16, 64], strides = [1, 1]} : vector<18x64xf32> to vector<16x64xf32>
    %35 = tpu.concatenate %32, %33, %34 in 1 : vector<16x64xf32>, vector<16x64xf32>, vector<16x64xf32> -> vector<16x192xf32>
    %c0_20 = arith.constant 0 : index
    %c0_21 = arith.constant 0 : index
    %36 = vector.load %arg5[%c0_20, %c0_21] : memref<192x64xf32, #tpu.memory_space<vmem>>, vector<192x64xf32>
    %cst_22 = arith.constant dense<0.000000e+00> : vector<16x64xf32>
    %37 = tpu.matmul %35, %36, %cst_22 {dimension_numbers = #tpu.dot_dimension_numbers<[1], [0], [0], [1], [0, 0, 1, 1], [], []>} : vector<16x192xf32>, vector<192x64xf32>, vector<16x64xf32> -> vector<16x64xf32>
    %c0_23 = arith.constant 0 : index
    %c0_24 = arith.constant 0 : index
    %38 = vector.load %arg6[%c0_23, %c0_24] : memref<1x64xf32, #tpu.memory_space<vmem>>, vector<1x64xf32>
    %39 = vector.broadcast %38 : vector<1x64xf32> to vector<16x64xf32>
    %40 = arith.addf %37, %39 : vector<16x64xf32>
    %cst_25 = arith.constant dense<0.000000e+00> : vector<64xf32>
    %41 = vector.multi_reduction <add>, %40, %cst_25 [0] : vector<16x64xf32> to vector<64xf32>
    %42 = vector.shape_cast %41 : vector<64xf32> to vector<1x64xf32>
    %cst_26 = arith.constant dense<0.000000e+00> : vector<1x8xf32>
    %43 = tpu.matmul %42, %2, %cst_26 {dimension_numbers = #tpu.dot_dimension_numbers<[1], [0], [0], [1], [0, 0, 1, 1], [], []>} : vector<1x64xf32>, vector<64x8xf32>, vector<1x8xf32> -> vector<1x8xf32>
    %cst_27 = arith.constant 7.812500e-03 : f32
    %44 = vector.broadcast %cst_27 : f32 to vector<1x8xf32>
    %45 = arith.mulf %43, %44 : vector<1x8xf32>
    %cst_28 = arith.constant dense<0.000000e+00> : vector<1x64xf32>
    %46 = tpu.matmul %45, %3, %cst_28 {dimension_numbers = #tpu.dot_dimension_numbers<[1], [0], [0], [1], [0, 0, 1, 1], [], []>} : vector<1x8xf32>, vector<8x64xf32>, vector<1x64xf32> -> vector<1x64xf32>
    %47 = vector.broadcast %46 : vector<1x64xf32> to vector<16x64xf32>
    %48 = arith.subf %40, %47 : vector<16x64xf32>
    %49 = arith.mulf %48, %48 : vector<16x64xf32>
    %cst_29 = arith.constant dense<0.000000e+00> : vector<64xf32>
    %50 = vector.multi_reduction <add>, %49, %cst_29 [0] : vector<16x64xf32> to vector<64xf32>
    %51 = vector.shape_cast %50 : vector<64xf32> to vector<1x64xf32>
    %cst_30 = arith.constant dense<0.000000e+00> : vector<1x8xf32>
    %52 = tpu.matmul %51, %2, %cst_30 {dimension_numbers = #tpu.dot_dimension_numbers<[1], [0], [0], [1], [0, 0, 1, 1], [], []>} : vector<1x64xf32>, vector<64x8xf32>, vector<1x8xf32> -> vector<1x8xf32>
    %cst_31 = arith.constant 7.812500e-03 : f32
    %53 = vector.broadcast %cst_31 : f32 to vector<1x8xf32>
    %54 = arith.mulf %52, %53 : vector<1x8xf32>
    %cst_32 = arith.constant 9.99999974E-6 : f32
    %55 = vector.broadcast %cst_32 : f32 to vector<1x8xf32>
    %56 = arith.addf %54, %55 : vector<1x8xf32>
    %57 = math.rsqrt %56 : vector<1x8xf32>
    %cst_33 = arith.constant dense<0.000000e+00> : vector<1x64xf32>
    %58 = tpu.matmul %57, %3, %cst_33 {dimension_numbers = #tpu.dot_dimension_numbers<[1], [0], [0], [1], [0, 0, 1, 1], [], []>} : vector<1x8xf32>, vector<8x64xf32>, vector<1x64xf32> -> vector<1x64xf32>
    %59 = vector.broadcast %58 : vector<1x64xf32> to vector<16x64xf32>
    %60 = arith.mulf %48, %59 : vector<16x64xf32>
    %c0_34 = arith.constant 0 : index
    %c0_35 = arith.constant 0 : index
    %61 = vector.load %arg7[%c0_34, %c0_35] : memref<1x64xf32, #tpu.memory_space<vmem>>, vector<1x64xf32>
    %62 = vector.broadcast %61 : vector<1x64xf32> to vector<16x64xf32>
    %63 = arith.mulf %60, %62 : vector<16x64xf32>
    %c0_36 = arith.constant 0 : index
    %c0_37 = arith.constant 0 : index
    %64 = vector.load %arg8[%c0_36, %c0_37] : memref<1x64xf32, #tpu.memory_space<vmem>>, vector<1x64xf32>
    %65 = vector.broadcast %64 : vector<1x64xf32> to vector<16x64xf32>
    %66 = arith.addf %63, %65 : vector<16x64xf32>
    %67 = math.absf %66 : vector<16x64xf32>
    %cst_38 = arith.constant 0.000000e+00 : f32
    %68 = vector.broadcast %cst_38 : f32 to vector<16x64xf32>
    %69 = arith.subf %68, %67 : vector<16x64xf32>
    %70 = math.exp %69 : vector<16x64xf32>
    %cst_39 = arith.constant 0.000000e+00 : f32
    %71 = vector.broadcast %cst_39 : f32 to vector<16x64xf32>
    %72 = arith.cmpf oge, %66, %71 : vector<16x64xf32>
    %cst_40 = arith.constant 1.000000e+00 : f32
    %73 = vector.broadcast %cst_40 : f32 to vector<16x64xf32>
    %74 = arith.select %72, %70, %73 : vector<16x64xi1>, vector<16x64xf32>
    %cst_41 = arith.constant 1.000000e+00 : f32
    %75 = vector.broadcast %cst_41 : f32 to vector<16x64xf32>
    %76 = arith.addf %75, %70 : vector<16x64xf32>
    %77 = tpu.reciprocal %76 {approx = true} : vector<16x64xf32> -> vector<16x64xf32>
    %78 = arith.mulf %74, %77 : vector<16x64xf32>
    %79 = arith.mulf %78, %78 : vector<16x64xf32>
    %cst_42 = arith.constant 1.000000e+00 : f32
    %80 = vector.broadcast %cst_42 : f32 to vector<16x64xf32>
    %81 = arith.subf %80, %79 : vector<16x64xf32>
    %82 = arith.mulf %66, %81 : vector<16x64xf32>
    %cst_43 = arith.constant 1.000000e+00 : f32
    %83 = vector.broadcast %cst_43 : f32 to vector<16x64xf32>
    %84 = arith.addf %83, %79 : vector<16x64xf32>
    %85 = tpu.reciprocal %84 {approx = true} : vector<16x64xf32> -> vector<16x64xf32>
    %86 = arith.mulf %82, %85 : vector<16x64xf32>
    %87 = vector.broadcast %29 : vector<1x64xf32> to vector<16x64xf32>
    %88 = arith.addf %86, %87 : vector<16x64xf32>
    %cst_44 = arith.constant 0.000000e+00 : f32
    %89 = vector.broadcast %cst_44 : f32 to vector<1x64xf32>
    %90 = tpu.concatenate %89, %88, %89 in 0 : vector<1x64xf32>, vector<16x64xf32>, vector<1x64xf32> -> vector<18x64xf32>
    %91 = vector.extract_strided_slice %90 {offsets = [0, 0], sizes = [16, 64], strides = [1, 1]} : vector<18x64xf32> to vector<16x64xf32>
    %92 = vector.extract_strided_slice %90 {offsets = [1, 0], sizes = [16, 64], strides = [1, 1]} : vector<18x64xf32> to vector<16x64xf32>
    %93 = vector.extract_strided_slice %90 {offsets = [2, 0], sizes = [16, 64], strides = [1, 1]} : vector<18x64xf32> to vector<16x64xf32>
    %94 = tpu.concatenate %91, %92, %93 in 1 : vector<16x64xf32>, vector<16x64xf32>, vector<16x64xf32> -> vector<16x192xf32>
    %c0_45 = arith.constant 0 : index
    %c0_46 = arith.constant 0 : index
    %95 = vector.load %arg11[%c0_45, %c0_46] : memref<192x64xf32, #tpu.memory_space<vmem>>, vector<192x64xf32>
    %cst_47 = arith.constant dense<0.000000e+00> : vector<16x64xf32>
    %96 = tpu.matmul %94, %95, %cst_47 {dimension_numbers = #tpu.dot_dimension_numbers<[1], [0], [0], [1], [0, 0, 1, 1], [], []>} : vector<16x192xf32>, vector<192x64xf32>, vector<16x64xf32> -> vector<16x64xf32>
    %c0_48 = arith.constant 0 : index
    %c0_49 = arith.constant 0 : index
    %97 = vector.load %arg12[%c0_48, %c0_49] : memref<1x64xf32, #tpu.memory_space<vmem>>, vector<1x64xf32>
    %98 = vector.broadcast %97 : vector<1x64xf32> to vector<16x64xf32>
    %99 = arith.addf %96, %98 : vector<16x64xf32>
    %cst_50 = arith.constant dense<0.000000e+00> : vector<64xf32>
    %100 = vector.multi_reduction <add>, %99, %cst_50 [0] : vector<16x64xf32> to vector<64xf32>
    %101 = vector.shape_cast %100 : vector<64xf32> to vector<1x64xf32>
    %cst_51 = arith.constant dense<0.000000e+00> : vector<1x8xf32>
    %102 = tpu.matmul %101, %2, %cst_51 {dimension_numbers = #tpu.dot_dimension_numbers<[1], [0], [0], [1], [0, 0, 1, 1], [], []>} : vector<1x64xf32>, vector<64x8xf32>, vector<1x8xf32> -> vector<1x8xf32>
    %cst_52 = arith.constant 7.812500e-03 : f32
    %103 = vector.broadcast %cst_52 : f32 to vector<1x8xf32>
    %104 = arith.mulf %102, %103 : vector<1x8xf32>
    %cst_53 = arith.constant dense<0.000000e+00> : vector<1x64xf32>
    %105 = tpu.matmul %104, %3, %cst_53 {dimension_numbers = #tpu.dot_dimension_numbers<[1], [0], [0], [1], [0, 0, 1, 1], [], []>} : vector<1x8xf32>, vector<8x64xf32>, vector<1x64xf32> -> vector<1x64xf32>
    %106 = vector.broadcast %105 : vector<1x64xf32> to vector<16x64xf32>
    %107 = arith.subf %99, %106 : vector<16x64xf32>
    %108 = arith.mulf %107, %107 : vector<16x64xf32>
    %cst_54 = arith.constant dense<0.000000e+00> : vector<64xf32>
    %109 = vector.multi_reduction <add>, %108, %cst_54 [0] : vector<16x64xf32> to vector<64xf32>
    %110 = vector.shape_cast %109 : vector<64xf32> to vector<1x64xf32>
    %cst_55 = arith.constant dense<0.000000e+00> : vector<1x8xf32>
    %111 = tpu.matmul %110, %2, %cst_55 {dimension_numbers = #tpu.dot_dimension_numbers<[1], [0], [0], [1], [0, 0, 1, 1], [], []>} : vector<1x64xf32>, vector<64x8xf32>, vector<1x8xf32> -> vector<1x8xf32>
    %cst_56 = arith.constant 7.812500e-03 : f32
    %112 = vector.broadcast %cst_56 : f32 to vector<1x8xf32>
    %113 = arith.mulf %111, %112 : vector<1x8xf32>
    %cst_57 = arith.constant 9.99999974E-6 : f32
    %114 = vector.broadcast %cst_57 : f32 to vector<1x8xf32>
    %115 = arith.addf %113, %114 : vector<1x8xf32>
    %116 = math.rsqrt %115 : vector<1x8xf32>
    %cst_58 = arith.constant dense<0.000000e+00> : vector<1x64xf32>
    %117 = tpu.matmul %116, %3, %cst_58 {dimension_numbers = #tpu.dot_dimension_numbers<[1], [0], [0], [1], [0, 0, 1, 1], [], []>} : vector<1x8xf32>, vector<8x64xf32>, vector<1x64xf32> -> vector<1x64xf32>
    %118 = vector.broadcast %117 : vector<1x64xf32> to vector<16x64xf32>
    %119 = arith.mulf %107, %118 : vector<16x64xf32>
    %c0_59 = arith.constant 0 : index
    %c0_60 = arith.constant 0 : index
    %120 = vector.load %arg13[%c0_59, %c0_60] : memref<1x64xf32, #tpu.memory_space<vmem>>, vector<1x64xf32>
    %121 = vector.broadcast %120 : vector<1x64xf32> to vector<16x64xf32>
    %122 = arith.mulf %119, %121 : vector<16x64xf32>
    %c0_61 = arith.constant 0 : index
    %c0_62 = arith.constant 0 : index
    %123 = vector.load %arg14[%c0_61, %c0_62] : memref<1x64xf32, #tpu.memory_space<vmem>>, vector<1x64xf32>
    %124 = vector.broadcast %123 : vector<1x64xf32> to vector<16x64xf32>
    %125 = arith.addf %122, %124 : vector<16x64xf32>
    %126 = math.absf %125 : vector<16x64xf32>
    %cst_63 = arith.constant 0.000000e+00 : f32
    %127 = vector.broadcast %cst_63 : f32 to vector<16x64xf32>
    %128 = arith.subf %127, %126 : vector<16x64xf32>
    %129 = math.exp %128 : vector<16x64xf32>
    %cst_64 = arith.constant 0.000000e+00 : f32
    %130 = vector.broadcast %cst_64 : f32 to vector<16x64xf32>
    %131 = arith.cmpf oge, %125, %130 : vector<16x64xf32>
    %cst_65 = arith.constant 1.000000e+00 : f32
    %132 = vector.broadcast %cst_65 : f32 to vector<16x64xf32>
    %133 = arith.select %131, %129, %132 : vector<16x64xi1>, vector<16x64xf32>
    %cst_66 = arith.constant 1.000000e+00 : f32
    %134 = vector.broadcast %cst_66 : f32 to vector<16x64xf32>
    %135 = arith.addf %134, %129 : vector<16x64xf32>
    %136 = tpu.reciprocal %135 {approx = true} : vector<16x64xf32> -> vector<16x64xf32>
    %137 = arith.mulf %133, %136 : vector<16x64xf32>
    %138 = arith.mulf %137, %137 : vector<16x64xf32>
    %cst_67 = arith.constant 1.000000e+00 : f32
    %139 = vector.broadcast %cst_67 : f32 to vector<16x64xf32>
    %140 = arith.subf %139, %138 : vector<16x64xf32>
    %141 = arith.mulf %125, %140 : vector<16x64xf32>
    %cst_68 = arith.constant 1.000000e+00 : f32
    %142 = vector.broadcast %cst_68 : f32 to vector<16x64xf32>
    %143 = arith.addf %142, %138 : vector<16x64xf32>
    %144 = tpu.reciprocal %143 {approx = true} : vector<16x64xf32> -> vector<16x64xf32>
    %145 = arith.mulf %141, %144 : vector<16x64xf32>
    %146 = arith.addf %145, %1 : vector<16x64xf32>
    %c0_69 = arith.constant 0 : index
    %c0_70 = arith.constant 0 : index
    %c0_71 = arith.constant 0 : index
    %147 = vector.load %arg15[%c0_69, %c0_70, %c0_71] : memref<1x16x64xf32, #tpu.memory_space<vmem>>, vector<1x16x64xf32>
    %148 = vector.shape_cast %147 : vector<1x16x64xf32> to vector<16x64xf32>
    %149 = vector.shape_cast %146 : vector<16x64xf32> to vector<1x16x64xf32>
    tpu.vector_store %arg15[%c0_69, %c0_70, %c0_71], %149 {strides = array<i32>} : memref<1x16x64xf32, #tpu.memory_space<vmem>>, vector<1x16x64xf32>,
    return
  }
  func.func @transform_0(%arg0: i32) -> (i32, i32, i32) {
    %c0_i32 = arith.constant 0 : i32
    %c0_i32_0 = arith.constant 0 : i32
    %c0_i32_1 = arith.constant 0 : i32
    return %arg0, %c0_i32, %c0_i32_0 : i32, i32, i32
  }
  func.func @transform_1(%arg0: i32) -> (i32, i32, i32) {
    %c0_i32 = arith.constant 0 : i32
    %c0_i32_0 = arith.constant 0 : i32
    %c0_i32_1 = arith.constant 0 : i32
    return %arg0, %c0_i32, %c0_i32_0 : i32, i32, i32
  }
  func.func @transform_2(%arg0: i32) -> (i32, i32) {
    %c0_i32 = arith.constant 0 : i32
    %c0_i32_0 = arith.constant 0 : i32
    %c0_i32_1 = arith.constant 0 : i32
    return %c0_i32, %c0_i32_0 : i32, i32
  }
  func.func @transform_3(%arg0: i32) -> (i32, i32) {
    %c0_i32 = arith.constant 0 : i32
    %c0_i32_0 = arith.constant 0 : i32
    %c0_i32_1 = arith.constant 0 : i32
    return %c0_i32, %c0_i32_0 : i32, i32
  }
  func.func @transform_4(%arg0: i32) -> (i32, i32) {
    %c0_i32 = arith.constant 0 : i32
    %c0_i32_0 = arith.constant 0 : i32
    %c0_i32_1 = arith.constant 0 : i32
    return %c0_i32, %c0_i32_0 : i32, i32
  }
  func.func @transform_5(%arg0: i32) -> (i32, i32) {
    %c0_i32 = arith.constant 0 : i32
    %c0_i32_0 = arith.constant 0 : i32
    %c0_i32_1 = arith.constant 0 : i32
    return %c0_i32, %c0_i32_0 : i32, i32
  }
  func.func @transform_6(%arg0: i32) -> (i32, i32) {
    %c0_i32 = arith.constant 0 : i32
    %c0_i32_0 = arith.constant 0 : i32
    %c0_i32_1 = arith.constant 0 : i32
    return %c0_i32, %c0_i32_0 : i32, i32
  }
  func.func @transform_7(%arg0: i32) -> (i32, i32) {
    %c0_i32 = arith.constant 0 : i32
    %c0_i32_0 = arith.constant 0 : i32
    %c0_i32_1 = arith.constant 0 : i32
    return %c0_i32, %c0_i32_0 : i32, i32
  }
  func.func @transform_8(%arg0: i32) -> (i32, i32) {
    %c0_i32 = arith.constant 0 : i32
    %c0_i32_0 = arith.constant 0 : i32
    %c0_i32_1 = arith.constant 0 : i32
    return %c0_i32, %c0_i32_0 : i32, i32
  }
  func.func @transform_9(%arg0: i32) -> (i32, i32) {
    %c0_i32 = arith.constant 0 : i32
    %c0_i32_0 = arith.constant 0 : i32
    %c0_i32_1 = arith.constant 0 : i32
    return %c0_i32, %c0_i32_0 : i32, i32
  }
  func.func @transform_10(%arg0: i32) -> (i32, i32) {
    %c0_i32 = arith.constant 0 : i32
    %c0_i32_0 = arith.constant 0 : i32
    %c0_i32_1 = arith.constant 0 : i32
    return %c0_i32, %c0_i32_0 : i32, i32
  }
  func.func @transform_11(%arg0: i32) -> (i32, i32) {
    %c0_i32 = arith.constant 0 : i32
    %c0_i32_0 = arith.constant 0 : i32
    %c0_i32_1 = arith.constant 0 : i32
    return %c0_i32, %c0_i32_0 : i32, i32
  }
  func.func @transform_12(%arg0: i32) -> (i32, i32) {
    %c0_i32 = arith.constant 0 : i32
    %c0_i32_0 = arith.constant 0 : i32
    %c0_i32_1 = arith.constant 0 : i32
    return %c0_i32, %c0_i32_0 : i32, i32
  }
  func.func @transform_13(%arg0: i32) -> (i32, i32) {
    %c0_i32 = arith.constant 0 : i32
    %c0_i32_0 = arith.constant 0 : i32
    %c0_i32_1 = arith.constant 0 : i32
    return %c0_i32, %c0_i32_0 : i32, i32
  }
  func.func @transform_14(%arg0: i32) -> (i32, i32, i32) {
    %c0_i32 = arith.constant 0 : i32
    %c0_i32_0 = arith.constant 0 : i32
    %c0_i32_1 = arith.constant 0 : i32
    return %arg0, %c0_i32, %c0_i32_0 : i32, i32, i32
  }
}

module attributes {stable_mosaic.version = 11 : i64} {
  func.func @_res_block_kernel(%arg0: i32, %arg1: memref<1x8x64xf32, #tpu.memory_space<vmem>>, %arg2: memref<1x1x80xf32, #tpu.memory_space<vmem>>, %arg3: memref<128x8xf32, #tpu.memory_space<vmem>>, %arg4: memref<8x128xf32, #tpu.memory_space<vmem>>, %arg5: memref<192x128xf32, #tpu.memory_space<vmem>>, %arg6: memref<1x128xf32, #tpu.memory_space<vmem>>, %arg7: memref<1x128xf32, #tpu.memory_space<vmem>>, %arg8: memref<1x128xf32, #tpu.memory_space<vmem>>, %arg9: memref<80x128xf32, #tpu.memory_space<vmem>>, %arg10: memref<1x128xf32, #tpu.memory_space<vmem>>, %arg11: memref<384x128xf32, #tpu.memory_space<vmem>>, %arg12: memref<1x128xf32, #tpu.memory_space<vmem>>, %arg13: memref<1x128xf32, #tpu.memory_space<vmem>>, %arg14: memref<1x128xf32, #tpu.memory_space<vmem>>, %arg15: memref<64x128xf32, #tpu.memory_space<vmem>>, %arg16: memref<1x128xf32, #tpu.memory_space<vmem>>, %arg17: memref<1x8x128xf32, #tpu.memory_space<vmem>>) attributes {dimension_semantics = [#tpu.dimension_semantics<parallel>], iteration_bounds = array<i64: 2>, scalar_prefetch = 0 : i64, scratch_operands = 0 : i64, tpu.core_type = #tpu.core_type<tc>, window_params = [{transform_indices = @transform_0, window_bounds = array<i64: 1, 8, 64>}, {transform_indices = @transform_1, window_bounds = array<i64: 1, 1, 80>}, {pipeline_mode = #tpu.pipeline_mode<synchronous>, transform_indices = @transform_2, window_bounds = array<i64: 128, 8>}, {pipeline_mode = #tpu.pipeline_mode<synchronous>, transform_indices = @transform_3, window_bounds = array<i64: 8, 128>}, {pipeline_mode = #tpu.pipeline_mode<synchronous>, transform_indices = @transform_4, window_bounds = array<i64: 192, 128>}, {pipeline_mode = #tpu.pipeline_mode<synchronous>, transform_indices = @transform_5, window_bounds = array<i64: 1, 128>}, {pipeline_mode = #tpu.pipeline_mode<synchronous>, transform_indices = @transform_6, window_bounds = array<i64: 1, 128>}, {pipeline_mode = #tpu.pipeline_mode<synchronous>, transform_indices = @transform_7, window_bounds = array<i64: 1, 128>}, {pipeline_mode = #tpu.pipeline_mode<synchronous>, transform_indices = @transform_8, window_bounds = array<i64: 80, 128>}, {pipeline_mode = #tpu.pipeline_mode<synchronous>, transform_indices = @transform_9, window_bounds = array<i64: 1, 128>}, {pipeline_mode = #tpu.pipeline_mode<synchronous>, transform_indices = @transform_10, window_bounds = array<i64: 384, 128>}, {pipeline_mode = #tpu.pipeline_mode<synchronous>, transform_indices = @transform_11, window_bounds = array<i64: 1, 128>}, {pipeline_mode = #tpu.pipeline_mode<synchronous>, transform_indices = @transform_12, window_bounds = array<i64: 1, 128>}, {pipeline_mode = #tpu.pipeline_mode<synchronous>, transform_indices = @transform_13, window_bounds = array<i64: 1, 128>}, {pipeline_mode = #tpu.pipeline_mode<synchronous>, transform_indices = @transform_14, window_bounds = array<i64: 64, 128>}, {pipeline_mode = #tpu.pipeline_mode<synchronous>, transform_indices = @transform_15, window_bounds = array<i64: 1, 128>}, {transform_indices = @transform_16, window_bounds = array<i64: 1, 8, 128>}]} {
    %c0 = arith.constant 0 : index
    %c0_0 = arith.constant 0 : index
    %c0_1 = arith.constant 0 : index
    %0 = vector.load %arg1[%c0, %c0_0, %c0_1] : memref<1x8x64xf32, #tpu.memory_space<vmem>>, vector<1x8x64xf32>
    %1 = vector.shape_cast %0 : vector<1x8x64xf32> to vector<8x64xf32>
    %c0_2 = arith.constant 0 : index
    %c0_3 = arith.constant 0 : index
    %2 = vector.load %arg3[%c0_2, %c0_3] : memref<128x8xf32, #tpu.memory_space<vmem>>, vector<128x8xf32>
    %c0_4 = arith.constant 0 : index
    %c0_5 = arith.constant 0 : index
    %3 = vector.load %arg4[%c0_4, %c0_5] : memref<8x128xf32, #tpu.memory_space<vmem>>, vector<8x128xf32>
    %c0_6 = arith.constant 0 : index
    %c0_7 = arith.constant 0 : index
    %c0_8 = arith.constant 0 : index
    %4 = vector.load %arg2[%c0_6, %c0_7, %c0_8] : memref<1x1x80xf32, #tpu.memory_space<vmem>>, vector<1x1x80xf32>
    %5 = vector.shape_cast %4 : vector<1x1x80xf32> to vector<1x80xf32>
    %6 = math.absf %5 : vector<1x80xf32>
    %cst = arith.constant 0.000000e+00 : f32
    %7 = vector.broadcast %cst : f32 to vector<1x80xf32>
    %8 = arith.subf %7, %6 : vector<1x80xf32>
    %9 = math.exp %8 : vector<1x80xf32>
    %cst_9 = arith.constant 0.000000e+00 : f32
    %10 = vector.broadcast %cst_9 : f32 to vector<1x80xf32>
    %11 = arith.cmpf oge, %5, %10 : vector<1x80xf32>
    %cst_10 = arith.constant 1.000000e+00 : f32
    %12 = vector.broadcast %cst_10 : f32 to vector<1x80xf32>
    %13 = arith.select %11, %9, %12 : vector<1x80xi1>, vector<1x80xf32>
    %cst_11 = arith.constant 1.000000e+00 : f32
    %14 = vector.broadcast %cst_11 : f32 to vector<1x80xf32>
    %15 = arith.addf %14, %9 : vector<1x80xf32>
    %16 = tpu.reciprocal %15 {approx = true} : vector<1x80xf32> -> vector<1x80xf32>
    %17 = arith.mulf %13, %16 : vector<1x80xf32>
    %18 = arith.mulf %17, %17 : vector<1x80xf32>
    %cst_12 = arith.constant 1.000000e+00 : f32
    %19 = vector.broadcast %cst_12 : f32 to vector<1x80xf32>
    %20 = arith.subf %19, %18 : vector<1x80xf32>
    %21 = arith.mulf %5, %20 : vector<1x80xf32>
    %cst_13 = arith.constant 1.000000e+00 : f32
    %22 = vector.broadcast %cst_13 : f32 to vector<1x80xf32>
    %23 = arith.addf %22, %18 : vector<1x80xf32>
    %24 = tpu.reciprocal %23 {approx = true} : vector<1x80xf32> -> vector<1x80xf32>
    %25 = arith.mulf %21, %24 : vector<1x80xf32>
    %c0_14 = arith.constant 0 : index
    %c0_15 = arith.constant 0 : index
    %26 = vector.load %arg9[%c0_14, %c0_15] : memref<80x128xf32, #tpu.memory_space<vmem>>, vector<80x128xf32>
    %cst_16 = arith.constant dense<0.000000e+00> : vector<1x128xf32>
    %27 = tpu.matmul %25, %26, %cst_16 {dimension_numbers = #tpu.dot_dimension_numbers<[1], [0], [0], [1], [0, 0, 1, 1], [], []>} : vector<1x80xf32>, vector<80x128xf32>, vector<1x128xf32> -> vector<1x128xf32>
    %c0_17 = arith.constant 0 : index
    %c0_18 = arith.constant 0 : index
    %28 = vector.load %arg10[%c0_17, %c0_18] : memref<1x128xf32, #tpu.memory_space<vmem>>, vector<1x128xf32>
    %29 = arith.addf %27, %28 : vector<1x128xf32>
    %cst_19 = arith.constant 0.000000e+00 : f32
    %30 = vector.broadcast %cst_19 : f32 to vector<1x64xf32>
    %31 = tpu.concatenate %30, %1, %30 in 0 : vector<1x64xf32>, vector<8x64xf32>, vector<1x64xf32> -> vector<10x64xf32>
    %32 = vector.extract_strided_slice %31 {offsets = [0, 0], sizes = [8, 64], strides = [1, 1]} : vector<10x64xf32> to vector<8x64xf32>
    %33 = vector.extract_strided_slice %31 {offsets = [1, 0], sizes = [8, 64], strides = [1, 1]} : vector<10x64xf32> to vector<8x64xf32>
    %34 = vector.extract_strided_slice %31 {offsets = [2, 0], sizes = [8, 64], strides = [1, 1]} : vector<10x64xf32> to vector<8x64xf32>
    %35 = tpu.concatenate %32, %33, %34 in 1 : vector<8x64xf32>, vector<8x64xf32>, vector<8x64xf32> -> vector<8x192xf32>
    %c0_20 = arith.constant 0 : index
    %c0_21 = arith.constant 0 : index
    %36 = vector.load %arg5[%c0_20, %c0_21] : memref<192x128xf32, #tpu.memory_space<vmem>>, vector<192x128xf32>
    %cst_22 = arith.constant dense<0.000000e+00> : vector<8x128xf32>
    %37 = tpu.matmul %35, %36, %cst_22 {dimension_numbers = #tpu.dot_dimension_numbers<[1], [0], [0], [1], [0, 0, 1, 1], [], []>} : vector<8x192xf32>, vector<192x128xf32>, vector<8x128xf32> -> vector<8x128xf32>
    %c0_23 = arith.constant 0 : index
    %c0_24 = arith.constant 0 : index
    %38 = vector.load %arg6[%c0_23, %c0_24] : memref<1x128xf32, #tpu.memory_space<vmem>>, vector<1x128xf32>
    %39 = vector.broadcast %38 : vector<1x128xf32> to vector<8x128xf32>
    %40 = arith.addf %37, %39 : vector<8x128xf32>
    %cst_25 = arith.constant dense<0.000000e+00> : vector<128xf32>
    %41 = vector.multi_reduction <add>, %40, %cst_25 [0] : vector<8x128xf32> to vector<128xf32>
    %42 = vector.shape_cast %41 : vector<128xf32> to vector<1x128xf32>
    %cst_26 = arith.constant dense<0.000000e+00> : vector<1x8xf32>
    %43 = tpu.matmul %42, %2, %cst_26 {dimension_numbers = #tpu.dot_dimension_numbers<[1], [0], [0], [1], [0, 0, 1, 1], [], []>} : vector<1x128xf32>, vector<128x8xf32>, vector<1x8xf32> -> vector<1x8xf32>
    %cst_27 = arith.constant 7.812500e-03 : f32
    %44 = vector.broadcast %cst_27 : f32 to vector<1x8xf32>
    %45 = arith.mulf %43, %44 : vector<1x8xf32>
    %cst_28 = arith.constant dense<0.000000e+00> : vector<1x128xf32>
    %46 = tpu.matmul %45, %3, %cst_28 {dimension_numbers = #tpu.dot_dimension_numbers<[1], [0], [0], [1], [0, 0, 1, 1], [], []>} : vector<1x8xf32>, vector<8x128xf32>, vector<1x128xf32> -> vector<1x128xf32>
    %47 = vector.broadcast %46 : vector<1x128xf32> to vector<8x128xf32>
    %48 = arith.subf %40, %47 : vector<8x128xf32>
    %49 = arith.mulf %48, %48 : vector<8x128xf32>
    %cst_29 = arith.constant dense<0.000000e+00> : vector<128xf32>
    %50 = vector.multi_reduction <add>, %49, %cst_29 [0] : vector<8x128xf32> to vector<128xf32>
    %51 = vector.shape_cast %50 : vector<128xf32> to vector<1x128xf32>
    %cst_30 = arith.constant dense<0.000000e+00> : vector<1x8xf32>
    %52 = tpu.matmul %51, %2, %cst_30 {dimension_numbers = #tpu.dot_dimension_numbers<[1], [0], [0], [1], [0, 0, 1, 1], [], []>} : vector<1x128xf32>, vector<128x8xf32>, vector<1x8xf32> -> vector<1x8xf32>
    %cst_31 = arith.constant 7.812500e-03 : f32
    %53 = vector.broadcast %cst_31 : f32 to vector<1x8xf32>
    %54 = arith.mulf %52, %53 : vector<1x8xf32>
    %cst_32 = arith.constant 9.99999974E-6 : f32
    %55 = vector.broadcast %cst_32 : f32 to vector<1x8xf32>
    %56 = arith.addf %54, %55 : vector<1x8xf32>
    %57 = math.rsqrt %56 : vector<1x8xf32>
    %cst_33 = arith.constant dense<0.000000e+00> : vector<1x128xf32>
    %58 = tpu.matmul %57, %3, %cst_33 {dimension_numbers = #tpu.dot_dimension_numbers<[1], [0], [0], [1], [0, 0, 1, 1], [], []>} : vector<1x8xf32>, vector<8x128xf32>, vector<1x128xf32> -> vector<1x128xf32>
    %59 = vector.broadcast %58 : vector<1x128xf32> to vector<8x128xf32>
    %60 = arith.mulf %48, %59 : vector<8x128xf32>
    %c0_34 = arith.constant 0 : index
    %c0_35 = arith.constant 0 : index
    %61 = vector.load %arg7[%c0_34, %c0_35] : memref<1x128xf32, #tpu.memory_space<vmem>>, vector<1x128xf32>
    %62 = vector.broadcast %61 : vector<1x128xf32> to vector<8x128xf32>
    %63 = arith.mulf %60, %62 : vector<8x128xf32>
    %c0_36 = arith.constant 0 : index
    %c0_37 = arith.constant 0 : index
    %64 = vector.load %arg8[%c0_36, %c0_37] : memref<1x128xf32, #tpu.memory_space<vmem>>, vector<1x128xf32>
    %65 = vector.broadcast %64 : vector<1x128xf32> to vector<8x128xf32>
    %66 = arith.addf %63, %65 : vector<8x128xf32>
    %67 = math.absf %66 : vector<8x128xf32>
    %cst_38 = arith.constant 0.000000e+00 : f32
    %68 = vector.broadcast %cst_38 : f32 to vector<8x128xf32>
    %69 = arith.subf %68, %67 : vector<8x128xf32>
    %70 = math.exp %69 : vector<8x128xf32>
    %cst_39 = arith.constant 0.000000e+00 : f32
    %71 = vector.broadcast %cst_39 : f32 to vector<8x128xf32>
    %72 = arith.cmpf oge, %66, %71 : vector<8x128xf32>
    %cst_40 = arith.constant 1.000000e+00 : f32
    %73 = vector.broadcast %cst_40 : f32 to vector<8x128xf32>
    %74 = arith.select %72, %70, %73 : vector<8x128xi1>, vector<8x128xf32>
    %cst_41 = arith.constant 1.000000e+00 : f32
    %75 = vector.broadcast %cst_41 : f32 to vector<8x128xf32>
    %76 = arith.addf %75, %70 : vector<8x128xf32>
    %77 = tpu.reciprocal %76 {approx = true} : vector<8x128xf32> -> vector<8x128xf32>
    %78 = arith.mulf %74, %77 : vector<8x128xf32>
    %79 = arith.mulf %78, %78 : vector<8x128xf32>
    %cst_42 = arith.constant 1.000000e+00 : f32
    %80 = vector.broadcast %cst_42 : f32 to vector<8x128xf32>
    %81 = arith.subf %80, %79 : vector<8x128xf32>
    %82 = arith.mulf %66, %81 : vector<8x128xf32>
    %cst_43 = arith.constant 1.000000e+00 : f32
    %83 = vector.broadcast %cst_43 : f32 to vector<8x128xf32>
    %84 = arith.addf %83, %79 : vector<8x128xf32>
    %85 = tpu.reciprocal %84 {approx = true} : vector<8x128xf32> -> vector<8x128xf32>
    %86 = arith.mulf %82, %85 : vector<8x128xf32>
    %87 = vector.broadcast %29 : vector<1x128xf32> to vector<8x128xf32>
    %88 = arith.addf %86, %87 : vector<8x128xf32>
    %cst_44 = arith.constant 0.000000e+00 : f32
    %89 = vector.broadcast %cst_44 : f32 to vector<1x128xf32>
    %90 = tpu.concatenate %89, %88, %89 in 0 : vector<1x128xf32>, vector<8x128xf32>, vector<1x128xf32> -> vector<10x128xf32>
    %91 = vector.extract_strided_slice %90 {offsets = [0, 0], sizes = [8, 128], strides = [1, 1]} : vector<10x128xf32> to vector<8x128xf32>
    %92 = vector.extract_strided_slice %90 {offsets = [1, 0], sizes = [8, 128], strides = [1, 1]} : vector<10x128xf32> to vector<8x128xf32>
    %93 = vector.extract_strided_slice %90 {offsets = [2, 0], sizes = [8, 128], strides = [1, 1]} : vector<10x128xf32> to vector<8x128xf32>
    %94 = tpu.concatenate %91, %92, %93 in 1 : vector<8x128xf32>, vector<8x128xf32>, vector<8x128xf32> -> vector<8x384xf32>
    %c0_45 = arith.constant 0 : index
    %c0_46 = arith.constant 0 : index
    %95 = vector.load %arg11[%c0_45, %c0_46] : memref<384x128xf32, #tpu.memory_space<vmem>>, vector<384x128xf32>
    %cst_47 = arith.constant dense<0.000000e+00> : vector<8x128xf32>
    %96 = tpu.matmul %94, %95, %cst_47 {dimension_numbers = #tpu.dot_dimension_numbers<[1], [0], [0], [1], [0, 0, 1, 1], [], []>} : vector<8x384xf32>, vector<384x128xf32>, vector<8x128xf32> -> vector<8x128xf32>
    %c0_48 = arith.constant 0 : index
    %c0_49 = arith.constant 0 : index
    %97 = vector.load %arg12[%c0_48, %c0_49] : memref<1x128xf32, #tpu.memory_space<vmem>>, vector<1x128xf32>
    %98 = vector.broadcast %97 : vector<1x128xf32> to vector<8x128xf32>
    %99 = arith.addf %96, %98 : vector<8x128xf32>
    %cst_50 = arith.constant dense<0.000000e+00> : vector<128xf32>
    %100 = vector.multi_reduction <add>, %99, %cst_50 [0] : vector<8x128xf32> to vector<128xf32>
    %101 = vector.shape_cast %100 : vector<128xf32> to vector<1x128xf32>
    %cst_51 = arith.constant dense<0.000000e+00> : vector<1x8xf32>
    %102 = tpu.matmul %101, %2, %cst_51 {dimension_numbers = #tpu.dot_dimension_numbers<[1], [0], [0], [1], [0, 0, 1, 1], [], []>} : vector<1x128xf32>, vector<128x8xf32>, vector<1x8xf32> -> vector<1x8xf32>
    %cst_52 = arith.constant 7.812500e-03 : f32
    %103 = vector.broadcast %cst_52 : f32 to vector<1x8xf32>
    %104 = arith.mulf %102, %103 : vector<1x8xf32>
    %cst_53 = arith.constant dense<0.000000e+00> : vector<1x128xf32>
    %105 = tpu.matmul %104, %3, %cst_53 {dimension_numbers = #tpu.dot_dimension_numbers<[1], [0], [0], [1], [0, 0, 1, 1], [], []>} : vector<1x8xf32>, vector<8x128xf32>, vector<1x128xf32> -> vector<1x128xf32>
    %106 = vector.broadcast %105 : vector<1x128xf32> to vector<8x128xf32>
    %107 = arith.subf %99, %106 : vector<8x128xf32>
    %108 = arith.mulf %107, %107 : vector<8x128xf32>
    %cst_54 = arith.constant dense<0.000000e+00> : vector<128xf32>
    %109 = vector.multi_reduction <add>, %108, %cst_54 [0] : vector<8x128xf32> to vector<128xf32>
    %110 = vector.shape_cast %109 : vector<128xf32> to vector<1x128xf32>
    %cst_55 = arith.constant dense<0.000000e+00> : vector<1x8xf32>
    %111 = tpu.matmul %110, %2, %cst_55 {dimension_numbers = #tpu.dot_dimension_numbers<[1], [0], [0], [1], [0, 0, 1, 1], [], []>} : vector<1x128xf32>, vector<128x8xf32>, vector<1x8xf32> -> vector<1x8xf32>
    %cst_56 = arith.constant 7.812500e-03 : f32
    %112 = vector.broadcast %cst_56 : f32 to vector<1x8xf32>
    %113 = arith.mulf %111, %112 : vector<1x8xf32>
    %cst_57 = arith.constant 9.99999974E-6 : f32
    %114 = vector.broadcast %cst_57 : f32 to vector<1x8xf32>
    %115 = arith.addf %113, %114 : vector<1x8xf32>
    %116 = math.rsqrt %115 : vector<1x8xf32>
    %cst_58 = arith.constant dense<0.000000e+00> : vector<1x128xf32>
    %117 = tpu.matmul %116, %3, %cst_58 {dimension_numbers = #tpu.dot_dimension_numbers<[1], [0], [0], [1], [0, 0, 1, 1], [], []>} : vector<1x8xf32>, vector<8x128xf32>, vector<1x128xf32> -> vector<1x128xf32>
    %118 = vector.broadcast %117 : vector<1x128xf32> to vector<8x128xf32>
    %119 = arith.mulf %107, %118 : vector<8x128xf32>
    %c0_59 = arith.constant 0 : index
    %c0_60 = arith.constant 0 : index
    %120 = vector.load %arg13[%c0_59, %c0_60] : memref<1x128xf32, #tpu.memory_space<vmem>>, vector<1x128xf32>
    %121 = vector.broadcast %120 : vector<1x128xf32> to vector<8x128xf32>
    %122 = arith.mulf %119, %121 : vector<8x128xf32>
    %c0_61 = arith.constant 0 : index
    %c0_62 = arith.constant 0 : index
    %123 = vector.load %arg14[%c0_61, %c0_62] : memref<1x128xf32, #tpu.memory_space<vmem>>, vector<1x128xf32>
    %124 = vector.broadcast %123 : vector<1x128xf32> to vector<8x128xf32>
    %125 = arith.addf %122, %124 : vector<8x128xf32>
    %126 = math.absf %125 : vector<8x128xf32>
    %cst_63 = arith.constant 0.000000e+00 : f32
    %127 = vector.broadcast %cst_63 : f32 to vector<8x128xf32>
    %128 = arith.subf %127, %126 : vector<8x128xf32>
    %129 = math.exp %128 : vector<8x128xf32>
    %cst_64 = arith.constant 0.000000e+00 : f32
    %130 = vector.broadcast %cst_64 : f32 to vector<8x128xf32>
    %131 = arith.cmpf oge, %125, %130 : vector<8x128xf32>
    %cst_65 = arith.constant 1.000000e+00 : f32
    %132 = vector.broadcast %cst_65 : f32 to vector<8x128xf32>
    %133 = arith.select %131, %129, %132 : vector<8x128xi1>, vector<8x128xf32>
    %cst_66 = arith.constant 1.000000e+00 : f32
    %134 = vector.broadcast %cst_66 : f32 to vector<8x128xf32>
    %135 = arith.addf %134, %129 : vector<8x128xf32>
    %136 = tpu.reciprocal %135 {approx = true} : vector<8x128xf32> -> vector<8x128xf32>
    %137 = arith.mulf %133, %136 : vector<8x128xf32>
    %138 = arith.mulf %137, %137 : vector<8x128xf32>
    %cst_67 = arith.constant 1.000000e+00 : f32
    %139 = vector.broadcast %cst_67 : f32 to vector<8x128xf32>
    %140 = arith.subf %139, %138 : vector<8x128xf32>
    %141 = arith.mulf %125, %140 : vector<8x128xf32>
    %cst_68 = arith.constant 1.000000e+00 : f32
    %142 = vector.broadcast %cst_68 : f32 to vector<8x128xf32>
    %143 = arith.addf %142, %138 : vector<8x128xf32>
    %144 = tpu.reciprocal %143 {approx = true} : vector<8x128xf32> -> vector<8x128xf32>
    %145 = arith.mulf %141, %144 : vector<8x128xf32>
    %c0_69 = arith.constant 0 : index
    %c0_70 = arith.constant 0 : index
    %146 = vector.load %arg15[%c0_69, %c0_70] : memref<64x128xf32, #tpu.memory_space<vmem>>, vector<64x128xf32>
    %cst_71 = arith.constant dense<0.000000e+00> : vector<8x128xf32>
    %147 = tpu.matmul %1, %146, %cst_71 {dimension_numbers = #tpu.dot_dimension_numbers<[1], [0], [0], [1], [0, 0, 1, 1], [], []>} : vector<8x64xf32>, vector<64x128xf32>, vector<8x128xf32> -> vector<8x128xf32>
    %c0_72 = arith.constant 0 : index
    %c0_73 = arith.constant 0 : index
    %148 = vector.load %arg16[%c0_72, %c0_73] : memref<1x128xf32, #tpu.memory_space<vmem>>, vector<1x128xf32>
    %149 = vector.broadcast %148 : vector<1x128xf32> to vector<8x128xf32>
    %150 = arith.addf %147, %149 : vector<8x128xf32>
    %151 = arith.addf %145, %150 : vector<8x128xf32>
    %c0_74 = arith.constant 0 : index
    %c0_75 = arith.constant 0 : index
    %c0_76 = arith.constant 0 : index
    %152 = vector.load %arg17[%c0_74, %c0_75, %c0_76] : memref<1x8x128xf32, #tpu.memory_space<vmem>>, vector<1x8x128xf32>
    %153 = vector.shape_cast %152 : vector<1x8x128xf32> to vector<8x128xf32>
    %154 = vector.shape_cast %151 : vector<8x128xf32> to vector<1x8x128xf32>
    tpu.vector_store %arg17[%c0_74, %c0_75, %c0_76], %154 {strides = array<i32>} : memref<1x8x128xf32, #tpu.memory_space<vmem>>, vector<1x8x128xf32>,
    return
  }
  func.func @transform_0(%arg0: i32) -> (i32, i32, i32) {
    %c0_i32 = arith.constant 0 : i32
    %c0_i32_0 = arith.constant 0 : i32
    %c0_i32_1 = arith.constant 0 : i32
    return %arg0, %c0_i32, %c0_i32_0 : i32, i32, i32
  }
  func.func @transform_1(%arg0: i32) -> (i32, i32, i32) {
    %c0_i32 = arith.constant 0 : i32
    %c0_i32_0 = arith.constant 0 : i32
    %c0_i32_1 = arith.constant 0 : i32
    return %arg0, %c0_i32, %c0_i32_0 : i32, i32, i32
  }
  func.func @transform_2(%arg0: i32) -> (i32, i32) {
    %c0_i32 = arith.constant 0 : i32
    %c0_i32_0 = arith.constant 0 : i32
    %c0_i32_1 = arith.constant 0 : i32
    return %c0_i32, %c0_i32_0 : i32, i32
  }
  func.func @transform_3(%arg0: i32) -> (i32, i32) {
    %c0_i32 = arith.constant 0 : i32
    %c0_i32_0 = arith.constant 0 : i32
    %c0_i32_1 = arith.constant 0 : i32
    return %c0_i32, %c0_i32_0 : i32, i32
  }
  func.func @transform_4(%arg0: i32) -> (i32, i32) {
    %c0_i32 = arith.constant 0 : i32
    %c0_i32_0 = arith.constant 0 : i32
    %c0_i32_1 = arith.constant 0 : i32
    return %c0_i32, %c0_i32_0 : i32, i32
  }
  func.func @transform_5(%arg0: i32) -> (i32, i32) {
    %c0_i32 = arith.constant 0 : i32
    %c0_i32_0 = arith.constant 0 : i32
    %c0_i32_1 = arith.constant 0 : i32
    return %c0_i32, %c0_i32_0 : i32, i32
  }
  func.func @transform_6(%arg0: i32) -> (i32, i32) {
    %c0_i32 = arith.constant 0 : i32
    %c0_i32_0 = arith.constant 0 : i32
    %c0_i32_1 = arith.constant 0 : i32
    return %c0_i32, %c0_i32_0 : i32, i32
  }
  func.func @transform_7(%arg0: i32) -> (i32, i32) {
    %c0_i32 = arith.constant 0 : i32
    %c0_i32_0 = arith.constant 0 : i32
    %c0_i32_1 = arith.constant 0 : i32
    return %c0_i32, %c0_i32_0 : i32, i32
  }
  func.func @transform_8(%arg0: i32) -> (i32, i32) {
    %c0_i32 = arith.constant 0 : i32
    %c0_i32_0 = arith.constant 0 : i32
    %c0_i32_1 = arith.constant 0 : i32
    return %c0_i32, %c0_i32_0 : i32, i32
  }
  func.func @transform_9(%arg0: i32) -> (i32, i32) {
    %c0_i32 = arith.constant 0 : i32
    %c0_i32_0 = arith.constant 0 : i32
    %c0_i32_1 = arith.constant 0 : i32
    return %c0_i32, %c0_i32_0 : i32, i32
  }
  func.func @transform_10(%arg0: i32) -> (i32, i32) {
    %c0_i32 = arith.constant 0 : i32
    %c0_i32_0 = arith.constant 0 : i32
    %c0_i32_1 = arith.constant 0 : i32
    return %c0_i32, %c0_i32_0 : i32, i32
  }
  func.func @transform_11(%arg0: i32) -> (i32, i32) {
    %c0_i32 = arith.constant 0 : i32
    %c0_i32_0 = arith.constant 0 : i32
    %c0_i32_1 = arith.constant 0 : i32
    return %c0_i32, %c0_i32_0 : i32, i32
  }
  func.func @transform_12(%arg0: i32) -> (i32, i32) {
    %c0_i32 = arith.constant 0 : i32
    %c0_i32_0 = arith.constant 0 : i32
    %c0_i32_1 = arith.constant 0 : i32
    return %c0_i32, %c0_i32_0 : i32, i32
  }
  func.func @transform_13(%arg0: i32) -> (i32, i32) {
    %c0_i32 = arith.constant 0 : i32
    %c0_i32_0 = arith.constant 0 : i32
    %c0_i32_1 = arith.constant 0 : i32
    return %c0_i32, %c0_i32_0 : i32, i32
  }
  func.func @transform_14(%arg0: i32) -> (i32, i32) {
    %c0_i32 = arith.constant 0 : i32
    %c0_i32_0 = arith.constant 0 : i32
    %c0_i32_1 = arith.constant 0 : i32
    return %c0_i32, %c0_i32_0 : i32, i32
  }
  func.func @transform_15(%arg0: i32) -> (i32, i32) {
    %c0_i32 = arith.constant 0 : i32
    %c0_i32_0 = arith.constant 0 : i32
    %c0_i32_1 = arith.constant 0 : i32
    return %c0_i32, %c0_i32_0 : i32, i32
  }
  func.func @transform_16(%arg0: i32) -> (i32, i32, i32) {
    %c0_i32 = arith.constant 0 : i32
    %c0_i32_0 = arith.constant 0 : i32
    %c0_i32_1 = arith.constant 0 : i32
    return %arg0, %c0_i32, %c0_i32_0 : i32, i32, i32
  }
}

module attributes {stable_mosaic.version = 11 : i64} {
  func.func @_res_block_kernel(%arg0: i32, %arg1: memref<1x8x128xf32, #tpu.memory_space<vmem>>, %arg2: memref<1x1x80xf32, #tpu.memory_space<vmem>>, %arg3: memref<128x8xf32, #tpu.memory_space<vmem>>, %arg4: memref<8x128xf32, #tpu.memory_space<vmem>>, %arg5: memref<384x128xf32, #tpu.memory_space<vmem>>, %arg6: memref<1x128xf32, #tpu.memory_space<vmem>>, %arg7: memref<1x128xf32, #tpu.memory_space<vmem>>, %arg8: memref<1x128xf32, #tpu.memory_space<vmem>>, %arg9: memref<80x128xf32, #tpu.memory_space<vmem>>, %arg10: memref<1x128xf32, #tpu.memory_space<vmem>>, %arg11: memref<384x128xf32, #tpu.memory_space<vmem>>, %arg12: memref<1x128xf32, #tpu.memory_space<vmem>>, %arg13: memref<1x128xf32, #tpu.memory_space<vmem>>, %arg14: memref<1x128xf32, #tpu.memory_space<vmem>>, %arg15: memref<1x8x128xf32, #tpu.memory_space<vmem>>) attributes {dimension_semantics = [#tpu.dimension_semantics<parallel>], iteration_bounds = array<i64: 2>, scalar_prefetch = 0 : i64, scratch_operands = 0 : i64, tpu.core_type = #tpu.core_type<tc>, window_params = [{transform_indices = @transform_0, window_bounds = array<i64: 1, 8, 128>}, {transform_indices = @transform_1, window_bounds = array<i64: 1, 1, 80>}, {pipeline_mode = #tpu.pipeline_mode<synchronous>, transform_indices = @transform_2, window_bounds = array<i64: 128, 8>}, {pipeline_mode = #tpu.pipeline_mode<synchronous>, transform_indices = @transform_3, window_bounds = array<i64: 8, 128>}, {pipeline_mode = #tpu.pipeline_mode<synchronous>, transform_indices = @transform_4, window_bounds = array<i64: 384, 128>}, {pipeline_mode = #tpu.pipeline_mode<synchronous>, transform_indices = @transform_5, window_bounds = array<i64: 1, 128>}, {pipeline_mode = #tpu.pipeline_mode<synchronous>, transform_indices = @transform_6, window_bounds = array<i64: 1, 128>}, {pipeline_mode = #tpu.pipeline_mode<synchronous>, transform_indices = @transform_7, window_bounds = array<i64: 1, 128>}, {pipeline_mode = #tpu.pipeline_mode<synchronous>, transform_indices = @transform_8, window_bounds = array<i64: 80, 128>}, {pipeline_mode = #tpu.pipeline_mode<synchronous>, transform_indices = @transform_9, window_bounds = array<i64: 1, 128>}, {pipeline_mode = #tpu.pipeline_mode<synchronous>, transform_indices = @transform_10, window_bounds = array<i64: 384, 128>}, {pipeline_mode = #tpu.pipeline_mode<synchronous>, transform_indices = @transform_11, window_bounds = array<i64: 1, 128>}, {pipeline_mode = #tpu.pipeline_mode<synchronous>, transform_indices = @transform_12, window_bounds = array<i64: 1, 128>}, {pipeline_mode = #tpu.pipeline_mode<synchronous>, transform_indices = @transform_13, window_bounds = array<i64: 1, 128>}, {transform_indices = @transform_14, window_bounds = array<i64: 1, 8, 128>}]} {
    %c0 = arith.constant 0 : index
    %c0_0 = arith.constant 0 : index
    %c0_1 = arith.constant 0 : index
    %0 = vector.load %arg1[%c0, %c0_0, %c0_1] : memref<1x8x128xf32, #tpu.memory_space<vmem>>, vector<1x8x128xf32>
    %1 = vector.shape_cast %0 : vector<1x8x128xf32> to vector<8x128xf32>
    %c0_2 = arith.constant 0 : index
    %c0_3 = arith.constant 0 : index
    %2 = vector.load %arg3[%c0_2, %c0_3] : memref<128x8xf32, #tpu.memory_space<vmem>>, vector<128x8xf32>
    %c0_4 = arith.constant 0 : index
    %c0_5 = arith.constant 0 : index
    %3 = vector.load %arg4[%c0_4, %c0_5] : memref<8x128xf32, #tpu.memory_space<vmem>>, vector<8x128xf32>
    %c0_6 = arith.constant 0 : index
    %c0_7 = arith.constant 0 : index
    %c0_8 = arith.constant 0 : index
    %4 = vector.load %arg2[%c0_6, %c0_7, %c0_8] : memref<1x1x80xf32, #tpu.memory_space<vmem>>, vector<1x1x80xf32>
    %5 = vector.shape_cast %4 : vector<1x1x80xf32> to vector<1x80xf32>
    %6 = math.absf %5 : vector<1x80xf32>
    %cst = arith.constant 0.000000e+00 : f32
    %7 = vector.broadcast %cst : f32 to vector<1x80xf32>
    %8 = arith.subf %7, %6 : vector<1x80xf32>
    %9 = math.exp %8 : vector<1x80xf32>
    %cst_9 = arith.constant 0.000000e+00 : f32
    %10 = vector.broadcast %cst_9 : f32 to vector<1x80xf32>
    %11 = arith.cmpf oge, %5, %10 : vector<1x80xf32>
    %cst_10 = arith.constant 1.000000e+00 : f32
    %12 = vector.broadcast %cst_10 : f32 to vector<1x80xf32>
    %13 = arith.select %11, %9, %12 : vector<1x80xi1>, vector<1x80xf32>
    %cst_11 = arith.constant 1.000000e+00 : f32
    %14 = vector.broadcast %cst_11 : f32 to vector<1x80xf32>
    %15 = arith.addf %14, %9 : vector<1x80xf32>
    %16 = tpu.reciprocal %15 {approx = true} : vector<1x80xf32> -> vector<1x80xf32>
    %17 = arith.mulf %13, %16 : vector<1x80xf32>
    %18 = arith.mulf %17, %17 : vector<1x80xf32>
    %cst_12 = arith.constant 1.000000e+00 : f32
    %19 = vector.broadcast %cst_12 : f32 to vector<1x80xf32>
    %20 = arith.subf %19, %18 : vector<1x80xf32>
    %21 = arith.mulf %5, %20 : vector<1x80xf32>
    %cst_13 = arith.constant 1.000000e+00 : f32
    %22 = vector.broadcast %cst_13 : f32 to vector<1x80xf32>
    %23 = arith.addf %22, %18 : vector<1x80xf32>
    %24 = tpu.reciprocal %23 {approx = true} : vector<1x80xf32> -> vector<1x80xf32>
    %25 = arith.mulf %21, %24 : vector<1x80xf32>
    %c0_14 = arith.constant 0 : index
    %c0_15 = arith.constant 0 : index
    %26 = vector.load %arg9[%c0_14, %c0_15] : memref<80x128xf32, #tpu.memory_space<vmem>>, vector<80x128xf32>
    %cst_16 = arith.constant dense<0.000000e+00> : vector<1x128xf32>
    %27 = tpu.matmul %25, %26, %cst_16 {dimension_numbers = #tpu.dot_dimension_numbers<[1], [0], [0], [1], [0, 0, 1, 1], [], []>} : vector<1x80xf32>, vector<80x128xf32>, vector<1x128xf32> -> vector<1x128xf32>
    %c0_17 = arith.constant 0 : index
    %c0_18 = arith.constant 0 : index
    %28 = vector.load %arg10[%c0_17, %c0_18] : memref<1x128xf32, #tpu.memory_space<vmem>>, vector<1x128xf32>
    %29 = arith.addf %27, %28 : vector<1x128xf32>
    %cst_19 = arith.constant 0.000000e+00 : f32
    %30 = vector.broadcast %cst_19 : f32 to vector<1x128xf32>
    %31 = tpu.concatenate %30, %1, %30 in 0 : vector<1x128xf32>, vector<8x128xf32>, vector<1x128xf32> -> vector<10x128xf32>
    %32 = vector.extract_strided_slice %31 {offsets = [0, 0], sizes = [8, 128], strides = [1, 1]} : vector<10x128xf32> to vector<8x128xf32>
    %33 = vector.extract_strided_slice %31 {offsets = [1, 0], sizes = [8, 128], strides = [1, 1]} : vector<10x128xf32> to vector<8x128xf32>
    %34 = vector.extract_strided_slice %31 {offsets = [2, 0], sizes = [8, 128], strides = [1, 1]} : vector<10x128xf32> to vector<8x128xf32>
    %35 = tpu.concatenate %32, %33, %34 in 1 : vector<8x128xf32>, vector<8x128xf32>, vector<8x128xf32> -> vector<8x384xf32>
    %c0_20 = arith.constant 0 : index
    %c0_21 = arith.constant 0 : index
    %36 = vector.load %arg5[%c0_20, %c0_21] : memref<384x128xf32, #tpu.memory_space<vmem>>, vector<384x128xf32>
    %cst_22 = arith.constant dense<0.000000e+00> : vector<8x128xf32>
    %37 = tpu.matmul %35, %36, %cst_22 {dimension_numbers = #tpu.dot_dimension_numbers<[1], [0], [0], [1], [0, 0, 1, 1], [], []>} : vector<8x384xf32>, vector<384x128xf32>, vector<8x128xf32> -> vector<8x128xf32>
    %c0_23 = arith.constant 0 : index
    %c0_24 = arith.constant 0 : index
    %38 = vector.load %arg6[%c0_23, %c0_24] : memref<1x128xf32, #tpu.memory_space<vmem>>, vector<1x128xf32>
    %39 = vector.broadcast %38 : vector<1x128xf32> to vector<8x128xf32>
    %40 = arith.addf %37, %39 : vector<8x128xf32>
    %cst_25 = arith.constant dense<0.000000e+00> : vector<128xf32>
    %41 = vector.multi_reduction <add>, %40, %cst_25 [0] : vector<8x128xf32> to vector<128xf32>
    %42 = vector.shape_cast %41 : vector<128xf32> to vector<1x128xf32>
    %cst_26 = arith.constant dense<0.000000e+00> : vector<1x8xf32>
    %43 = tpu.matmul %42, %2, %cst_26 {dimension_numbers = #tpu.dot_dimension_numbers<[1], [0], [0], [1], [0, 0, 1, 1], [], []>} : vector<1x128xf32>, vector<128x8xf32>, vector<1x8xf32> -> vector<1x8xf32>
    %cst_27 = arith.constant 7.812500e-03 : f32
    %44 = vector.broadcast %cst_27 : f32 to vector<1x8xf32>
    %45 = arith.mulf %43, %44 : vector<1x8xf32>
    %cst_28 = arith.constant dense<0.000000e+00> : vector<1x128xf32>
    %46 = tpu.matmul %45, %3, %cst_28 {dimension_numbers = #tpu.dot_dimension_numbers<[1], [0], [0], [1], [0, 0, 1, 1], [], []>} : vector<1x8xf32>, vector<8x128xf32>, vector<1x128xf32> -> vector<1x128xf32>
    %47 = vector.broadcast %46 : vector<1x128xf32> to vector<8x128xf32>
    %48 = arith.subf %40, %47 : vector<8x128xf32>
    %49 = arith.mulf %48, %48 : vector<8x128xf32>
    %cst_29 = arith.constant dense<0.000000e+00> : vector<128xf32>
    %50 = vector.multi_reduction <add>, %49, %cst_29 [0] : vector<8x128xf32> to vector<128xf32>
    %51 = vector.shape_cast %50 : vector<128xf32> to vector<1x128xf32>
    %cst_30 = arith.constant dense<0.000000e+00> : vector<1x8xf32>
    %52 = tpu.matmul %51, %2, %cst_30 {dimension_numbers = #tpu.dot_dimension_numbers<[1], [0], [0], [1], [0, 0, 1, 1], [], []>} : vector<1x128xf32>, vector<128x8xf32>, vector<1x8xf32> -> vector<1x8xf32>
    %cst_31 = arith.constant 7.812500e-03 : f32
    %53 = vector.broadcast %cst_31 : f32 to vector<1x8xf32>
    %54 = arith.mulf %52, %53 : vector<1x8xf32>
    %cst_32 = arith.constant 9.99999974E-6 : f32
    %55 = vector.broadcast %cst_32 : f32 to vector<1x8xf32>
    %56 = arith.addf %54, %55 : vector<1x8xf32>
    %57 = math.rsqrt %56 : vector<1x8xf32>
    %cst_33 = arith.constant dense<0.000000e+00> : vector<1x128xf32>
    %58 = tpu.matmul %57, %3, %cst_33 {dimension_numbers = #tpu.dot_dimension_numbers<[1], [0], [0], [1], [0, 0, 1, 1], [], []>} : vector<1x8xf32>, vector<8x128xf32>, vector<1x128xf32> -> vector<1x128xf32>
    %59 = vector.broadcast %58 : vector<1x128xf32> to vector<8x128xf32>
    %60 = arith.mulf %48, %59 : vector<8x128xf32>
    %c0_34 = arith.constant 0 : index
    %c0_35 = arith.constant 0 : index
    %61 = vector.load %arg7[%c0_34, %c0_35] : memref<1x128xf32, #tpu.memory_space<vmem>>, vector<1x128xf32>
    %62 = vector.broadcast %61 : vector<1x128xf32> to vector<8x128xf32>
    %63 = arith.mulf %60, %62 : vector<8x128xf32>
    %c0_36 = arith.constant 0 : index
    %c0_37 = arith.constant 0 : index
    %64 = vector.load %arg8[%c0_36, %c0_37] : memref<1x128xf32, #tpu.memory_space<vmem>>, vector<1x128xf32>
    %65 = vector.broadcast %64 : vector<1x128xf32> to vector<8x128xf32>
    %66 = arith.addf %63, %65 : vector<8x128xf32>
    %67 = math.absf %66 : vector<8x128xf32>
    %cst_38 = arith.constant 0.000000e+00 : f32
    %68 = vector.broadcast %cst_38 : f32 to vector<8x128xf32>
    %69 = arith.subf %68, %67 : vector<8x128xf32>
    %70 = math.exp %69 : vector<8x128xf32>
    %cst_39 = arith.constant 0.000000e+00 : f32
    %71 = vector.broadcast %cst_39 : f32 to vector<8x128xf32>
    %72 = arith.cmpf oge, %66, %71 : vector<8x128xf32>
    %cst_40 = arith.constant 1.000000e+00 : f32
    %73 = vector.broadcast %cst_40 : f32 to vector<8x128xf32>
    %74 = arith.select %72, %70, %73 : vector<8x128xi1>, vector<8x128xf32>
    %cst_41 = arith.constant 1.000000e+00 : f32
    %75 = vector.broadcast %cst_41 : f32 to vector<8x128xf32>
    %76 = arith.addf %75, %70 : vector<8x128xf32>
    %77 = tpu.reciprocal %76 {approx = true} : vector<8x128xf32> -> vector<8x128xf32>
    %78 = arith.mulf %74, %77 : vector<8x128xf32>
    %79 = arith.mulf %78, %78 : vector<8x128xf32>
    %cst_42 = arith.constant 1.000000e+00 : f32
    %80 = vector.broadcast %cst_42 : f32 to vector<8x128xf32>
    %81 = arith.subf %80, %79 : vector<8x128xf32>
    %82 = arith.mulf %66, %81 : vector<8x128xf32>
    %cst_43 = arith.constant 1.000000e+00 : f32
    %83 = vector.broadcast %cst_43 : f32 to vector<8x128xf32>
    %84 = arith.addf %83, %79 : vector<8x128xf32>
    %85 = tpu.reciprocal %84 {approx = true} : vector<8x128xf32> -> vector<8x128xf32>
    %86 = arith.mulf %82, %85 : vector<8x128xf32>
    %87 = vector.broadcast %29 : vector<1x128xf32> to vector<8x128xf32>
    %88 = arith.addf %86, %87 : vector<8x128xf32>
    %cst_44 = arith.constant 0.000000e+00 : f32
    %89 = vector.broadcast %cst_44 : f32 to vector<1x128xf32>
    %90 = tpu.concatenate %89, %88, %89 in 0 : vector<1x128xf32>, vector<8x128xf32>, vector<1x128xf32> -> vector<10x128xf32>
    %91 = vector.extract_strided_slice %90 {offsets = [0, 0], sizes = [8, 128], strides = [1, 1]} : vector<10x128xf32> to vector<8x128xf32>
    %92 = vector.extract_strided_slice %90 {offsets = [1, 0], sizes = [8, 128], strides = [1, 1]} : vector<10x128xf32> to vector<8x128xf32>
    %93 = vector.extract_strided_slice %90 {offsets = [2, 0], sizes = [8, 128], strides = [1, 1]} : vector<10x128xf32> to vector<8x128xf32>
    %94 = tpu.concatenate %91, %92, %93 in 1 : vector<8x128xf32>, vector<8x128xf32>, vector<8x128xf32> -> vector<8x384xf32>
    %c0_45 = arith.constant 0 : index
    %c0_46 = arith.constant 0 : index
    %95 = vector.load %arg11[%c0_45, %c0_46] : memref<384x128xf32, #tpu.memory_space<vmem>>, vector<384x128xf32>
    %cst_47 = arith.constant dense<0.000000e+00> : vector<8x128xf32>
    %96 = tpu.matmul %94, %95, %cst_47 {dimension_numbers = #tpu.dot_dimension_numbers<[1], [0], [0], [1], [0, 0, 1, 1], [], []>} : vector<8x384xf32>, vector<384x128xf32>, vector<8x128xf32> -> vector<8x128xf32>
    %c0_48 = arith.constant 0 : index
    %c0_49 = arith.constant 0 : index
    %97 = vector.load %arg12[%c0_48, %c0_49] : memref<1x128xf32, #tpu.memory_space<vmem>>, vector<1x128xf32>
    %98 = vector.broadcast %97 : vector<1x128xf32> to vector<8x128xf32>
    %99 = arith.addf %96, %98 : vector<8x128xf32>
    %cst_50 = arith.constant dense<0.000000e+00> : vector<128xf32>
    %100 = vector.multi_reduction <add>, %99, %cst_50 [0] : vector<8x128xf32> to vector<128xf32>
    %101 = vector.shape_cast %100 : vector<128xf32> to vector<1x128xf32>
    %cst_51 = arith.constant dense<0.000000e+00> : vector<1x8xf32>
    %102 = tpu.matmul %101, %2, %cst_51 {dimension_numbers = #tpu.dot_dimension_numbers<[1], [0], [0], [1], [0, 0, 1, 1], [], []>} : vector<1x128xf32>, vector<128x8xf32>, vector<1x8xf32> -> vector<1x8xf32>
    %cst_52 = arith.constant 7.812500e-03 : f32
    %103 = vector.broadcast %cst_52 : f32 to vector<1x8xf32>
    %104 = arith.mulf %102, %103 : vector<1x8xf32>
    %cst_53 = arith.constant dense<0.000000e+00> : vector<1x128xf32>
    %105 = tpu.matmul %104, %3, %cst_53 {dimension_numbers = #tpu.dot_dimension_numbers<[1], [0], [0], [1], [0, 0, 1, 1], [], []>} : vector<1x8xf32>, vector<8x128xf32>, vector<1x128xf32> -> vector<1x128xf32>
    %106 = vector.broadcast %105 : vector<1x128xf32> to vector<8x128xf32>
    %107 = arith.subf %99, %106 : vector<8x128xf32>
    %108 = arith.mulf %107, %107 : vector<8x128xf32>
    %cst_54 = arith.constant dense<0.000000e+00> : vector<128xf32>
    %109 = vector.multi_reduction <add>, %108, %cst_54 [0] : vector<8x128xf32> to vector<128xf32>
    %110 = vector.shape_cast %109 : vector<128xf32> to vector<1x128xf32>
    %cst_55 = arith.constant dense<0.000000e+00> : vector<1x8xf32>
    %111 = tpu.matmul %110, %2, %cst_55 {dimension_numbers = #tpu.dot_dimension_numbers<[1], [0], [0], [1], [0, 0, 1, 1], [], []>} : vector<1x128xf32>, vector<128x8xf32>, vector<1x8xf32> -> vector<1x8xf32>
    %cst_56 = arith.constant 7.812500e-03 : f32
    %112 = vector.broadcast %cst_56 : f32 to vector<1x8xf32>
    %113 = arith.mulf %111, %112 : vector<1x8xf32>
    %cst_57 = arith.constant 9.99999974E-6 : f32
    %114 = vector.broadcast %cst_57 : f32 to vector<1x8xf32>
    %115 = arith.addf %113, %114 : vector<1x8xf32>
    %116 = math.rsqrt %115 : vector<1x8xf32>
    %cst_58 = arith.constant dense<0.000000e+00> : vector<1x128xf32>
    %117 = tpu.matmul %116, %3, %cst_58 {dimension_numbers = #tpu.dot_dimension_numbers<[1], [0], [0], [1], [0, 0, 1, 1], [], []>} : vector<1x8xf32>, vector<8x128xf32>, vector<1x128xf32> -> vector<1x128xf32>
    %118 = vector.broadcast %117 : vector<1x128xf32> to vector<8x128xf32>
    %119 = arith.mulf %107, %118 : vector<8x128xf32>
    %c0_59 = arith.constant 0 : index
    %c0_60 = arith.constant 0 : index
    %120 = vector.load %arg13[%c0_59, %c0_60] : memref<1x128xf32, #tpu.memory_space<vmem>>, vector<1x128xf32>
    %121 = vector.broadcast %120 : vector<1x128xf32> to vector<8x128xf32>
    %122 = arith.mulf %119, %121 : vector<8x128xf32>
    %c0_61 = arith.constant 0 : index
    %c0_62 = arith.constant 0 : index
    %123 = vector.load %arg14[%c0_61, %c0_62] : memref<1x128xf32, #tpu.memory_space<vmem>>, vector<1x128xf32>
    %124 = vector.broadcast %123 : vector<1x128xf32> to vector<8x128xf32>
    %125 = arith.addf %122, %124 : vector<8x128xf32>
    %126 = math.absf %125 : vector<8x128xf32>
    %cst_63 = arith.constant 0.000000e+00 : f32
    %127 = vector.broadcast %cst_63 : f32 to vector<8x128xf32>
    %128 = arith.subf %127, %126 : vector<8x128xf32>
    %129 = math.exp %128 : vector<8x128xf32>
    %cst_64 = arith.constant 0.000000e+00 : f32
    %130 = vector.broadcast %cst_64 : f32 to vector<8x128xf32>
    %131 = arith.cmpf oge, %125, %130 : vector<8x128xf32>
    %cst_65 = arith.constant 1.000000e+00 : f32
    %132 = vector.broadcast %cst_65 : f32 to vector<8x128xf32>
    %133 = arith.select %131, %129, %132 : vector<8x128xi1>, vector<8x128xf32>
    %cst_66 = arith.constant 1.000000e+00 : f32
    %134 = vector.broadcast %cst_66 : f32 to vector<8x128xf32>
    %135 = arith.addf %134, %129 : vector<8x128xf32>
    %136 = tpu.reciprocal %135 {approx = true} : vector<8x128xf32> -> vector<8x128xf32>
    %137 = arith.mulf %133, %136 : vector<8x128xf32>
    %138 = arith.mulf %137, %137 : vector<8x128xf32>
    %cst_67 = arith.constant 1.000000e+00 : f32
    %139 = vector.broadcast %cst_67 : f32 to vector<8x128xf32>
    %140 = arith.subf %139, %138 : vector<8x128xf32>
    %141 = arith.mulf %125, %140 : vector<8x128xf32>
    %cst_68 = arith.constant 1.000000e+00 : f32
    %142 = vector.broadcast %cst_68 : f32 to vector<8x128xf32>
    %143 = arith.addf %142, %138 : vector<8x128xf32>
    %144 = tpu.reciprocal %143 {approx = true} : vector<8x128xf32> -> vector<8x128xf32>
    %145 = arith.mulf %141, %144 : vector<8x128xf32>
    %146 = arith.addf %145, %1 : vector<8x128xf32>
    %c0_69 = arith.constant 0 : index
    %c0_70 = arith.constant 0 : index
    %c0_71 = arith.constant 0 : index
    %147 = vector.load %arg15[%c0_69, %c0_70, %c0_71] : memref<1x8x128xf32, #tpu.memory_space<vmem>>, vector<1x8x128xf32>
    %148 = vector.shape_cast %147 : vector<1x8x128xf32> to vector<8x128xf32>
    %149 = vector.shape_cast %146 : vector<8x128xf32> to vector<1x8x128xf32>
    tpu.vector_store %arg15[%c0_69, %c0_70, %c0_71], %149 {strides = array<i32>} : memref<1x8x128xf32, #tpu.memory_space<vmem>>, vector<1x8x128xf32>,
    return
  }
  func.func @transform_0(%arg0: i32) -> (i32, i32, i32) {
    %c0_i32 = arith.constant 0 : i32
    %c0_i32_0 = arith.constant 0 : i32
    %c0_i32_1 = arith.constant 0 : i32
    return %arg0, %c0_i32, %c0_i32_0 : i32, i32, i32
  }
  func.func @transform_1(%arg0: i32) -> (i32, i32, i32) {
    %c0_i32 = arith.constant 0 : i32
    %c0_i32_0 = arith.constant 0 : i32
    %c0_i32_1 = arith.constant 0 : i32
    return %arg0, %c0_i32, %c0_i32_0 : i32, i32, i32
  }
  func.func @transform_2(%arg0: i32) -> (i32, i32) {
    %c0_i32 = arith.constant 0 : i32
    %c0_i32_0 = arith.constant 0 : i32
    %c0_i32_1 = arith.constant 0 : i32
    return %c0_i32, %c0_i32_0 : i32, i32
  }
  func.func @transform_3(%arg0: i32) -> (i32, i32) {
    %c0_i32 = arith.constant 0 : i32
    %c0_i32_0 = arith.constant 0 : i32
    %c0_i32_1 = arith.constant 0 : i32
    return %c0_i32, %c0_i32_0 : i32, i32
  }
  func.func @transform_4(%arg0: i32) -> (i32, i32) {
    %c0_i32 = arith.constant 0 : i32
    %c0_i32_0 = arith.constant 0 : i32
    %c0_i32_1 = arith.constant 0 : i32
    return %c0_i32, %c0_i32_0 : i32, i32
  }
  func.func @transform_5(%arg0: i32) -> (i32, i32) {
    %c0_i32 = arith.constant 0 : i32
    %c0_i32_0 = arith.constant 0 : i32
    %c0_i32_1 = arith.constant 0 : i32
    return %c0_i32, %c0_i32_0 : i32, i32
  }
  func.func @transform_6(%arg0: i32) -> (i32, i32) {
    %c0_i32 = arith.constant 0 : i32
    %c0_i32_0 = arith.constant 0 : i32
    %c0_i32_1 = arith.constant 0 : i32
    return %c0_i32, %c0_i32_0 : i32, i32
  }
  func.func @transform_7(%arg0: i32) -> (i32, i32) {
    %c0_i32 = arith.constant 0 : i32
    %c0_i32_0 = arith.constant 0 : i32
    %c0_i32_1 = arith.constant 0 : i32
    return %c0_i32, %c0_i32_0 : i32, i32
  }
  func.func @transform_8(%arg0: i32) -> (i32, i32) {
    %c0_i32 = arith.constant 0 : i32
    %c0_i32_0 = arith.constant 0 : i32
    %c0_i32_1 = arith.constant 0 : i32
    return %c0_i32, %c0_i32_0 : i32, i32
  }
  func.func @transform_9(%arg0: i32) -> (i32, i32) {
    %c0_i32 = arith.constant 0 : i32
    %c0_i32_0 = arith.constant 0 : i32
    %c0_i32_1 = arith.constant 0 : i32
    return %c0_i32, %c0_i32_0 : i32, i32
  }
  func.func @transform_10(%arg0: i32) -> (i32, i32) {
    %c0_i32 = arith.constant 0 : i32
    %c0_i32_0 = arith.constant 0 : i32
    %c0_i32_1 = arith.constant 0 : i32
    return %c0_i32, %c0_i32_0 : i32, i32
  }
  func.func @transform_11(%arg0: i32) -> (i32, i32) {
    %c0_i32 = arith.constant 0 : i32
    %c0_i32_0 = arith.constant 0 : i32
    %c0_i32_1 = arith.constant 0 : i32
    return %c0_i32, %c0_i32_0 : i32, i32
  }
  func.func @transform_12(%arg0: i32) -> (i32, i32) {
    %c0_i32 = arith.constant 0 : i32
    %c0_i32_0 = arith.constant 0 : i32
    %c0_i32_1 = arith.constant 0 : i32
    return %c0_i32, %c0_i32_0 : i32, i32
  }
  func.func @transform_13(%arg0: i32) -> (i32, i32) {
    %c0_i32 = arith.constant 0 : i32
    %c0_i32_0 = arith.constant 0 : i32
    %c0_i32_1 = arith.constant 0 : i32
    return %c0_i32, %c0_i32_0 : i32, i32
  }
  func.func @transform_14(%arg0: i32) -> (i32, i32, i32) {
    %c0_i32 = arith.constant 0 : i32
    %c0_i32_0 = arith.constant 0 : i32
    %c0_i32_1 = arith.constant 0 : i32
    return %arg0, %c0_i32, %c0_i32_0 : i32, i32, i32
  }
}

module attributes {stable_mosaic.version = 11 : i64} {
  func.func @_res_block_kernel(%arg0: i32, %arg1: memref<1x8x128xf32, #tpu.memory_space<vmem>>, %arg2: memref<1x8x128xf32, #tpu.memory_space<vmem>>, %arg3: memref<1x1x80xf32, #tpu.memory_space<vmem>>, %arg4: memref<64x8xf32, #tpu.memory_space<vmem>>, %arg5: memref<8x64xf32, #tpu.memory_space<vmem>>, %arg6: memref<768x64xf32, #tpu.memory_space<vmem>>, %arg7: memref<1x64xf32, #tpu.memory_space<vmem>>, %arg8: memref<1x64xf32, #tpu.memory_space<vmem>>, %arg9: memref<1x64xf32, #tpu.memory_space<vmem>>, %arg10: memref<80x64xf32, #tpu.memory_space<vmem>>, %arg11: memref<1x64xf32, #tpu.memory_space<vmem>>, %arg12: memref<192x64xf32, #tpu.memory_space<vmem>>, %arg13: memref<1x64xf32, #tpu.memory_space<vmem>>, %arg14: memref<1x64xf32, #tpu.memory_space<vmem>>, %arg15: memref<1x64xf32, #tpu.memory_space<vmem>>, %arg16: memref<256x64xf32, #tpu.memory_space<vmem>>, %arg17: memref<1x64xf32, #tpu.memory_space<vmem>>, %arg18: memref<1x8x64xf32, #tpu.memory_space<vmem>>) attributes {dimension_semantics = [#tpu.dimension_semantics<parallel>], iteration_bounds = array<i64: 2>, scalar_prefetch = 0 : i64, scratch_operands = 0 : i64, tpu.core_type = #tpu.core_type<tc>, window_params = [{transform_indices = @transform_0, window_bounds = array<i64: 1, 8, 128>}, {transform_indices = @transform_1, window_bounds = array<i64: 1, 8, 128>}, {transform_indices = @transform_2, window_bounds = array<i64: 1, 1, 80>}, {pipeline_mode = #tpu.pipeline_mode<synchronous>, transform_indices = @transform_3, window_bounds = array<i64: 64, 8>}, {pipeline_mode = #tpu.pipeline_mode<synchronous>, transform_indices = @transform_4, window_bounds = array<i64: 8, 64>}, {pipeline_mode = #tpu.pipeline_mode<synchronous>, transform_indices = @transform_5, window_bounds = array<i64: 768, 64>}, {pipeline_mode = #tpu.pipeline_mode<synchronous>, transform_indices = @transform_6, window_bounds = array<i64: 1, 64>}, {pipeline_mode = #tpu.pipeline_mode<synchronous>, transform_indices = @transform_7, window_bounds = array<i64: 1, 64>}, {pipeline_mode = #tpu.pipeline_mode<synchronous>, transform_indices = @transform_8, window_bounds = array<i64: 1, 64>}, {pipeline_mode = #tpu.pipeline_mode<synchronous>, transform_indices = @transform_9, window_bounds = array<i64: 80, 64>}, {pipeline_mode = #tpu.pipeline_mode<synchronous>, transform_indices = @transform_10, window_bounds = array<i64: 1, 64>}, {pipeline_mode = #tpu.pipeline_mode<synchronous>, transform_indices = @transform_11, window_bounds = array<i64: 192, 64>}, {pipeline_mode = #tpu.pipeline_mode<synchronous>, transform_indices = @transform_12, window_bounds = array<i64: 1, 64>}, {pipeline_mode = #tpu.pipeline_mode<synchronous>, transform_indices = @transform_13, window_bounds = array<i64: 1, 64>}, {pipeline_mode = #tpu.pipeline_mode<synchronous>, transform_indices = @transform_14, window_bounds = array<i64: 1, 64>}, {pipeline_mode = #tpu.pipeline_mode<synchronous>, transform_indices = @transform_15, window_bounds = array<i64: 256, 64>}, {pipeline_mode = #tpu.pipeline_mode<synchronous>, transform_indices = @transform_16, window_bounds = array<i64: 1, 64>}, {transform_indices = @transform_17, window_bounds = array<i64: 1, 8, 64>}]} {
    %c0 = arith.constant 0 : index
    %c0_0 = arith.constant 0 : index
    %c0_1 = arith.constant 0 : index
    %0 = vector.load %arg1[%c0, %c0_0, %c0_1] : memref<1x8x128xf32, #tpu.memory_space<vmem>>, vector<1x8x128xf32>
    %1 = vector.shape_cast %0 : vector<1x8x128xf32> to vector<8x128xf32>
    %c0_2 = arith.constant 0 : index
    %c0_3 = arith.constant 0 : index
    %c0_4 = arith.constant 0 : index
    %2 = vector.load %arg2[%c0_2, %c0_3, %c0_4] : memref<1x8x128xf32, #tpu.memory_space<vmem>>, vector<1x8x128xf32>
    %3 = vector.shape_cast %2 : vector<1x8x128xf32> to vector<8x128xf32>
    %4 = tpu.concatenate %1, %3 in 1 : vector<8x128xf32>, vector<8x128xf32> -> vector<8x256xf32>
    %c0_5 = arith.constant 0 : index
    %c0_6 = arith.constant 0 : index
    %5 = vector.load %arg4[%c0_5, %c0_6] : memref<64x8xf32, #tpu.memory_space<vmem>>, vector<64x8xf32>
    %c0_7 = arith.constant 0 : index
    %c0_8 = arith.constant 0 : index
    %6 = vector.load %arg5[%c0_7, %c0_8] : memref<8x64xf32, #tpu.memory_space<vmem>>, vector<8x64xf32>
    %c0_9 = arith.constant 0 : index
    %c0_10 = arith.constant 0 : index
    %c0_11 = arith.constant 0 : index
    %7 = vector.load %arg3[%c0_9, %c0_10, %c0_11] : memref<1x1x80xf32, #tpu.memory_space<vmem>>, vector<1x1x80xf32>
    %8 = vector.shape_cast %7 : vector<1x1x80xf32> to vector<1x80xf32>
    %9 = math.absf %8 : vector<1x80xf32>
    %cst = arith.constant 0.000000e+00 : f32
    %10 = vector.broadcast %cst : f32 to vector<1x80xf32>
    %11 = arith.subf %10, %9 : vector<1x80xf32>
    %12 = math.exp %11 : vector<1x80xf32>
    %cst_12 = arith.constant 0.000000e+00 : f32
    %13 = vector.broadcast %cst_12 : f32 to vector<1x80xf32>
    %14 = arith.cmpf oge, %8, %13 : vector<1x80xf32>
    %cst_13 = arith.constant 1.000000e+00 : f32
    %15 = vector.broadcast %cst_13 : f32 to vector<1x80xf32>
    %16 = arith.select %14, %12, %15 : vector<1x80xi1>, vector<1x80xf32>
    %cst_14 = arith.constant 1.000000e+00 : f32
    %17 = vector.broadcast %cst_14 : f32 to vector<1x80xf32>
    %18 = arith.addf %17, %12 : vector<1x80xf32>
    %19 = tpu.reciprocal %18 {approx = true} : vector<1x80xf32> -> vector<1x80xf32>
    %20 = arith.mulf %16, %19 : vector<1x80xf32>
    %21 = arith.mulf %20, %20 : vector<1x80xf32>
    %cst_15 = arith.constant 1.000000e+00 : f32
    %22 = vector.broadcast %cst_15 : f32 to vector<1x80xf32>
    %23 = arith.subf %22, %21 : vector<1x80xf32>
    %24 = arith.mulf %8, %23 : vector<1x80xf32>
    %cst_16 = arith.constant 1.000000e+00 : f32
    %25 = vector.broadcast %cst_16 : f32 to vector<1x80xf32>
    %26 = arith.addf %25, %21 : vector<1x80xf32>
    %27 = tpu.reciprocal %26 {approx = true} : vector<1x80xf32> -> vector<1x80xf32>
    %28 = arith.mulf %24, %27 : vector<1x80xf32>
    %c0_17 = arith.constant 0 : index
    %c0_18 = arith.constant 0 : index
    %29 = vector.load %arg10[%c0_17, %c0_18] : memref<80x64xf32, #tpu.memory_space<vmem>>, vector<80x64xf32>
    %cst_19 = arith.constant dense<0.000000e+00> : vector<1x64xf32>
    %30 = tpu.matmul %28, %29, %cst_19 {dimension_numbers = #tpu.dot_dimension_numbers<[1], [0], [0], [1], [0, 0, 1, 1], [], []>} : vector<1x80xf32>, vector<80x64xf32>, vector<1x64xf32> -> vector<1x64xf32>
    %c0_20 = arith.constant 0 : index
    %c0_21 = arith.constant 0 : index
    %31 = vector.load %arg11[%c0_20, %c0_21] : memref<1x64xf32, #tpu.memory_space<vmem>>, vector<1x64xf32>
    %32 = arith.addf %30, %31 : vector<1x64xf32>
    %cst_22 = arith.constant 0.000000e+00 : f32
    %33 = vector.broadcast %cst_22 : f32 to vector<1x256xf32>
    %34 = tpu.concatenate %33, %4, %33 in 0 : vector<1x256xf32>, vector<8x256xf32>, vector<1x256xf32> -> vector<10x256xf32>
    %35 = vector.extract_strided_slice %34 {offsets = [0, 0], sizes = [8, 256], strides = [1, 1]} : vector<10x256xf32> to vector<8x256xf32>
    %36 = vector.extract_strided_slice %34 {offsets = [1, 0], sizes = [8, 256], strides = [1, 1]} : vector<10x256xf32> to vector<8x256xf32>
    %37 = vector.extract_strided_slice %34 {offsets = [2, 0], sizes = [8, 256], strides = [1, 1]} : vector<10x256xf32> to vector<8x256xf32>
    %38 = tpu.concatenate %35, %36, %37 in 1 : vector<8x256xf32>, vector<8x256xf32>, vector<8x256xf32> -> vector<8x768xf32>
    %c0_23 = arith.constant 0 : index
    %c0_24 = arith.constant 0 : index
    %39 = vector.load %arg6[%c0_23, %c0_24] : memref<768x64xf32, #tpu.memory_space<vmem>>, vector<768x64xf32>
    %cst_25 = arith.constant dense<0.000000e+00> : vector<8x64xf32>
    %40 = tpu.matmul %38, %39, %cst_25 {dimension_numbers = #tpu.dot_dimension_numbers<[1], [0], [0], [1], [0, 0, 1, 1], [], []>} : vector<8x768xf32>, vector<768x64xf32>, vector<8x64xf32> -> vector<8x64xf32>
    %c0_26 = arith.constant 0 : index
    %c0_27 = arith.constant 0 : index
    %41 = vector.load %arg7[%c0_26, %c0_27] : memref<1x64xf32, #tpu.memory_space<vmem>>, vector<1x64xf32>
    %42 = vector.broadcast %41 : vector<1x64xf32> to vector<8x64xf32>
    %43 = arith.addf %40, %42 : vector<8x64xf32>
    %cst_28 = arith.constant dense<0.000000e+00> : vector<64xf32>
    %44 = vector.multi_reduction <add>, %43, %cst_28 [0] : vector<8x64xf32> to vector<64xf32>
    %45 = vector.shape_cast %44 : vector<64xf32> to vector<1x64xf32>
    %cst_29 = arith.constant dense<0.000000e+00> : vector<1x8xf32>
    %46 = tpu.matmul %45, %5, %cst_29 {dimension_numbers = #tpu.dot_dimension_numbers<[1], [0], [0], [1], [0, 0, 1, 1], [], []>} : vector<1x64xf32>, vector<64x8xf32>, vector<1x8xf32> -> vector<1x8xf32>
    %cst_30 = arith.constant 1.562500e-02 : f32
    %47 = vector.broadcast %cst_30 : f32 to vector<1x8xf32>
    %48 = arith.mulf %46, %47 : vector<1x8xf32>
    %cst_31 = arith.constant dense<0.000000e+00> : vector<1x64xf32>
    %49 = tpu.matmul %48, %6, %cst_31 {dimension_numbers = #tpu.dot_dimension_numbers<[1], [0], [0], [1], [0, 0, 1, 1], [], []>} : vector<1x8xf32>, vector<8x64xf32>, vector<1x64xf32> -> vector<1x64xf32>
    %50 = vector.broadcast %49 : vector<1x64xf32> to vector<8x64xf32>
    %51 = arith.subf %43, %50 : vector<8x64xf32>
    %52 = arith.mulf %51, %51 : vector<8x64xf32>
    %cst_32 = arith.constant dense<0.000000e+00> : vector<64xf32>
    %53 = vector.multi_reduction <add>, %52, %cst_32 [0] : vector<8x64xf32> to vector<64xf32>
    %54 = vector.shape_cast %53 : vector<64xf32> to vector<1x64xf32>
    %cst_33 = arith.constant dense<0.000000e+00> : vector<1x8xf32>
    %55 = tpu.matmul %54, %5, %cst_33 {dimension_numbers = #tpu.dot_dimension_numbers<[1], [0], [0], [1], [0, 0, 1, 1], [], []>} : vector<1x64xf32>, vector<64x8xf32>, vector<1x8xf32> -> vector<1x8xf32>
    %cst_34 = arith.constant 1.562500e-02 : f32
    %56 = vector.broadcast %cst_34 : f32 to vector<1x8xf32>
    %57 = arith.mulf %55, %56 : vector<1x8xf32>
    %cst_35 = arith.constant 9.99999974E-6 : f32
    %58 = vector.broadcast %cst_35 : f32 to vector<1x8xf32>
    %59 = arith.addf %57, %58 : vector<1x8xf32>
    %60 = math.rsqrt %59 : vector<1x8xf32>
    %cst_36 = arith.constant dense<0.000000e+00> : vector<1x64xf32>
    %61 = tpu.matmul %60, %6, %cst_36 {dimension_numbers = #tpu.dot_dimension_numbers<[1], [0], [0], [1], [0, 0, 1, 1], [], []>} : vector<1x8xf32>, vector<8x64xf32>, vector<1x64xf32> -> vector<1x64xf32>
    %62 = vector.broadcast %61 : vector<1x64xf32> to vector<8x64xf32>
    %63 = arith.mulf %51, %62 : vector<8x64xf32>
    %c0_37 = arith.constant 0 : index
    %c0_38 = arith.constant 0 : index
    %64 = vector.load %arg8[%c0_37, %c0_38] : memref<1x64xf32, #tpu.memory_space<vmem>>, vector<1x64xf32>
    %65 = vector.broadcast %64 : vector<1x64xf32> to vector<8x64xf32>
    %66 = arith.mulf %63, %65 : vector<8x64xf32>
    %c0_39 = arith.constant 0 : index
    %c0_40 = arith.constant 0 : index
    %67 = vector.load %arg9[%c0_39, %c0_40] : memref<1x64xf32, #tpu.memory_space<vmem>>, vector<1x64xf32>
    %68 = vector.broadcast %67 : vector<1x64xf32> to vector<8x64xf32>
    %69 = arith.addf %66, %68 : vector<8x64xf32>
    %70 = math.absf %69 : vector<8x64xf32>
    %cst_41 = arith.constant 0.000000e+00 : f32
    %71 = vector.broadcast %cst_41 : f32 to vector<8x64xf32>
    %72 = arith.subf %71, %70 : vector<8x64xf32>
    %73 = math.exp %72 : vector<8x64xf32>
    %cst_42 = arith.constant 0.000000e+00 : f32
    %74 = vector.broadcast %cst_42 : f32 to vector<8x64xf32>
    %75 = arith.cmpf oge, %69, %74 : vector<8x64xf32>
    %cst_43 = arith.constant 1.000000e+00 : f32
    %76 = vector.broadcast %cst_43 : f32 to vector<8x64xf32>
    %77 = arith.select %75, %73, %76 : vector<8x64xi1>, vector<8x64xf32>
    %cst_44 = arith.constant 1.000000e+00 : f32
    %78 = vector.broadcast %cst_44 : f32 to vector<8x64xf32>
    %79 = arith.addf %78, %73 : vector<8x64xf32>
    %80 = tpu.reciprocal %79 {approx = true} : vector<8x64xf32> -> vector<8x64xf32>
    %81 = arith.mulf %77, %80 : vector<8x64xf32>
    %82 = arith.mulf %81, %81 : vector<8x64xf32>
    %cst_45 = arith.constant 1.000000e+00 : f32
    %83 = vector.broadcast %cst_45 : f32 to vector<8x64xf32>
    %84 = arith.subf %83, %82 : vector<8x64xf32>
    %85 = arith.mulf %69, %84 : vector<8x64xf32>
    %cst_46 = arith.constant 1.000000e+00 : f32
    %86 = vector.broadcast %cst_46 : f32 to vector<8x64xf32>
    %87 = arith.addf %86, %82 : vector<8x64xf32>
    %88 = tpu.reciprocal %87 {approx = true} : vector<8x64xf32> -> vector<8x64xf32>
    %89 = arith.mulf %85, %88 : vector<8x64xf32>
    %90 = vector.broadcast %32 : vector<1x64xf32> to vector<8x64xf32>
    %91 = arith.addf %89, %90 : vector<8x64xf32>
    %cst_47 = arith.constant 0.000000e+00 : f32
    %92 = vector.broadcast %cst_47 : f32 to vector<1x64xf32>
    %93 = tpu.concatenate %92, %91, %92 in 0 : vector<1x64xf32>, vector<8x64xf32>, vector<1x64xf32> -> vector<10x64xf32>
    %94 = vector.extract_strided_slice %93 {offsets = [0, 0], sizes = [8, 64], strides = [1, 1]} : vector<10x64xf32> to vector<8x64xf32>
    %95 = vector.extract_strided_slice %93 {offsets = [1, 0], sizes = [8, 64], strides = [1, 1]} : vector<10x64xf32> to vector<8x64xf32>
    %96 = vector.extract_strided_slice %93 {offsets = [2, 0], sizes = [8, 64], strides = [1, 1]} : vector<10x64xf32> to vector<8x64xf32>
    %97 = tpu.concatenate %94, %95, %96 in 1 : vector<8x64xf32>, vector<8x64xf32>, vector<8x64xf32> -> vector<8x192xf32>
    %c0_48 = arith.constant 0 : index
    %c0_49 = arith.constant 0 : index
    %98 = vector.load %arg12[%c0_48, %c0_49] : memref<192x64xf32, #tpu.memory_space<vmem>>, vector<192x64xf32>
    %cst_50 = arith.constant dense<0.000000e+00> : vector<8x64xf32>
    %99 = tpu.matmul %97, %98, %cst_50 {dimension_numbers = #tpu.dot_dimension_numbers<[1], [0], [0], [1], [0, 0, 1, 1], [], []>} : vector<8x192xf32>, vector<192x64xf32>, vector<8x64xf32> -> vector<8x64xf32>
    %c0_51 = arith.constant 0 : index
    %c0_52 = arith.constant 0 : index
    %100 = vector.load %arg13[%c0_51, %c0_52] : memref<1x64xf32, #tpu.memory_space<vmem>>, vector<1x64xf32>
    %101 = vector.broadcast %100 : vector<1x64xf32> to vector<8x64xf32>
    %102 = arith.addf %99, %101 : vector<8x64xf32>
    %cst_53 = arith.constant dense<0.000000e+00> : vector<64xf32>
    %103 = vector.multi_reduction <add>, %102, %cst_53 [0] : vector<8x64xf32> to vector<64xf32>
    %104 = vector.shape_cast %103 : vector<64xf32> to vector<1x64xf32>
    %cst_54 = arith.constant dense<0.000000e+00> : vector<1x8xf32>
    %105 = tpu.matmul %104, %5, %cst_54 {dimension_numbers = #tpu.dot_dimension_numbers<[1], [0], [0], [1], [0, 0, 1, 1], [], []>} : vector<1x64xf32>, vector<64x8xf32>, vector<1x8xf32> -> vector<1x8xf32>
    %cst_55 = arith.constant 1.562500e-02 : f32
    %106 = vector.broadcast %cst_55 : f32 to vector<1x8xf32>
    %107 = arith.mulf %105, %106 : vector<1x8xf32>
    %cst_56 = arith.constant dense<0.000000e+00> : vector<1x64xf32>
    %108 = tpu.matmul %107, %6, %cst_56 {dimension_numbers = #tpu.dot_dimension_numbers<[1], [0], [0], [1], [0, 0, 1, 1], [], []>} : vector<1x8xf32>, vector<8x64xf32>, vector<1x64xf32> -> vector<1x64xf32>
    %109 = vector.broadcast %108 : vector<1x64xf32> to vector<8x64xf32>
    %110 = arith.subf %102, %109 : vector<8x64xf32>
    %111 = arith.mulf %110, %110 : vector<8x64xf32>
    %cst_57 = arith.constant dense<0.000000e+00> : vector<64xf32>
    %112 = vector.multi_reduction <add>, %111, %cst_57 [0] : vector<8x64xf32> to vector<64xf32>
    %113 = vector.shape_cast %112 : vector<64xf32> to vector<1x64xf32>
    %cst_58 = arith.constant dense<0.000000e+00> : vector<1x8xf32>
    %114 = tpu.matmul %113, %5, %cst_58 {dimension_numbers = #tpu.dot_dimension_numbers<[1], [0], [0], [1], [0, 0, 1, 1], [], []>} : vector<1x64xf32>, vector<64x8xf32>, vector<1x8xf32> -> vector<1x8xf32>
    %cst_59 = arith.constant 1.562500e-02 : f32
    %115 = vector.broadcast %cst_59 : f32 to vector<1x8xf32>
    %116 = arith.mulf %114, %115 : vector<1x8xf32>
    %cst_60 = arith.constant 9.99999974E-6 : f32
    %117 = vector.broadcast %cst_60 : f32 to vector<1x8xf32>
    %118 = arith.addf %116, %117 : vector<1x8xf32>
    %119 = math.rsqrt %118 : vector<1x8xf32>
    %cst_61 = arith.constant dense<0.000000e+00> : vector<1x64xf32>
    %120 = tpu.matmul %119, %6, %cst_61 {dimension_numbers = #tpu.dot_dimension_numbers<[1], [0], [0], [1], [0, 0, 1, 1], [], []>} : vector<1x8xf32>, vector<8x64xf32>, vector<1x64xf32> -> vector<1x64xf32>
    %121 = vector.broadcast %120 : vector<1x64xf32> to vector<8x64xf32>
    %122 = arith.mulf %110, %121 : vector<8x64xf32>
    %c0_62 = arith.constant 0 : index
    %c0_63 = arith.constant 0 : index
    %123 = vector.load %arg14[%c0_62, %c0_63] : memref<1x64xf32, #tpu.memory_space<vmem>>, vector<1x64xf32>
    %124 = vector.broadcast %123 : vector<1x64xf32> to vector<8x64xf32>
    %125 = arith.mulf %122, %124 : vector<8x64xf32>
    %c0_64 = arith.constant 0 : index
    %c0_65 = arith.constant 0 : index
    %126 = vector.load %arg15[%c0_64, %c0_65] : memref<1x64xf32, #tpu.memory_space<vmem>>, vector<1x64xf32>
    %127 = vector.broadcast %126 : vector<1x64xf32> to vector<8x64xf32>
    %128 = arith.addf %125, %127 : vector<8x64xf32>
    %129 = math.absf %128 : vector<8x64xf32>
    %cst_66 = arith.constant 0.000000e+00 : f32
    %130 = vector.broadcast %cst_66 : f32 to vector<8x64xf32>
    %131 = arith.subf %130, %129 : vector<8x64xf32>
    %132 = math.exp %131 : vector<8x64xf32>
    %cst_67 = arith.constant 0.000000e+00 : f32
    %133 = vector.broadcast %cst_67 : f32 to vector<8x64xf32>
    %134 = arith.cmpf oge, %128, %133 : vector<8x64xf32>
    %cst_68 = arith.constant 1.000000e+00 : f32
    %135 = vector.broadcast %cst_68 : f32 to vector<8x64xf32>
    %136 = arith.select %134, %132, %135 : vector<8x64xi1>, vector<8x64xf32>
    %cst_69 = arith.constant 1.000000e+00 : f32
    %137 = vector.broadcast %cst_69 : f32 to vector<8x64xf32>
    %138 = arith.addf %137, %132 : vector<8x64xf32>
    %139 = tpu.reciprocal %138 {approx = true} : vector<8x64xf32> -> vector<8x64xf32>
    %140 = arith.mulf %136, %139 : vector<8x64xf32>
    %141 = arith.mulf %140, %140 : vector<8x64xf32>
    %cst_70 = arith.constant 1.000000e+00 : f32
    %142 = vector.broadcast %cst_70 : f32 to vector<8x64xf32>
    %143 = arith.subf %142, %141 : vector<8x64xf32>
    %144 = arith.mulf %128, %143 : vector<8x64xf32>
    %cst_71 = arith.constant 1.000000e+00 : f32
    %145 = vector.broadcast %cst_71 : f32 to vector<8x64xf32>
    %146 = arith.addf %145, %141 : vector<8x64xf32>
    %147 = tpu.reciprocal %146 {approx = true} : vector<8x64xf32> -> vector<8x64xf32>
    %148 = arith.mulf %144, %147 : vector<8x64xf32>
    %c0_72 = arith.constant 0 : index
    %c0_73 = arith.constant 0 : index
    %149 = vector.load %arg16[%c0_72, %c0_73] : memref<256x64xf32, #tpu.memory_space<vmem>>, vector<256x64xf32>
    %cst_74 = arith.constant dense<0.000000e+00> : vector<8x64xf32>
    %150 = tpu.matmul %4, %149, %cst_74 {dimension_numbers = #tpu.dot_dimension_numbers<[1], [0], [0], [1], [0, 0, 1, 1], [], []>} : vector<8x256xf32>, vector<256x64xf32>, vector<8x64xf32> -> vector<8x64xf32>
    %c0_75 = arith.constant 0 : index
    %c0_76 = arith.constant 0 : index
    %151 = vector.load %arg17[%c0_75, %c0_76] : memref<1x64xf32, #tpu.memory_space<vmem>>, vector<1x64xf32>
    %152 = vector.broadcast %151 : vector<1x64xf32> to vector<8x64xf32>
    %153 = arith.addf %150, %152 : vector<8x64xf32>
    %154 = arith.addf %148, %153 : vector<8x64xf32>
    %c0_77 = arith.constant 0 : index
    %c0_78 = arith.constant 0 : index
    %c0_79 = arith.constant 0 : index
    %155 = vector.load %arg18[%c0_77, %c0_78, %c0_79] : memref<1x8x64xf32, #tpu.memory_space<vmem>>, vector<1x8x64xf32>
    %156 = vector.shape_cast %155 : vector<1x8x64xf32> to vector<8x64xf32>
    %157 = vector.shape_cast %154 : vector<8x64xf32> to vector<1x8x64xf32>
    tpu.vector_store %arg18[%c0_77, %c0_78, %c0_79], %157 {strides = array<i32>} : memref<1x8x64xf32, #tpu.memory_space<vmem>>, vector<1x8x64xf32>,
    return
  }
  func.func @transform_0(%arg0: i32) -> (i32, i32, i32) {
    %c0_i32 = arith.constant 0 : i32
    %c0_i32_0 = arith.constant 0 : i32
    %c0_i32_1 = arith.constant 0 : i32
    return %arg0, %c0_i32, %c0_i32_0 : i32, i32, i32
  }
  func.func @transform_1(%arg0: i32) -> (i32, i32, i32) {
    %c0_i32 = arith.constant 0 : i32
    %c0_i32_0 = arith.constant 0 : i32
    %c0_i32_1 = arith.constant 0 : i32
    return %arg0, %c0_i32, %c0_i32_0 : i32, i32, i32
  }
  func.func @transform_2(%arg0: i32) -> (i32, i32, i32) {
    %c0_i32 = arith.constant 0 : i32
    %c0_i32_0 = arith.constant 0 : i32
    %c0_i32_1 = arith.constant 0 : i32
    return %arg0, %c0_i32, %c0_i32_0 : i32, i32, i32
  }
  func.func @transform_3(%arg0: i32) -> (i32, i32) {
    %c0_i32 = arith.constant 0 : i32
    %c0_i32_0 = arith.constant 0 : i32
    %c0_i32_1 = arith.constant 0 : i32
    return %c0_i32, %c0_i32_0 : i32, i32
  }
  func.func @transform_4(%arg0: i32) -> (i32, i32) {
    %c0_i32 = arith.constant 0 : i32
    %c0_i32_0 = arith.constant 0 : i32
    %c0_i32_1 = arith.constant 0 : i32
    return %c0_i32, %c0_i32_0 : i32, i32
  }
  func.func @transform_5(%arg0: i32) -> (i32, i32) {
    %c0_i32 = arith.constant 0 : i32
    %c0_i32_0 = arith.constant 0 : i32
    %c0_i32_1 = arith.constant 0 : i32
    return %c0_i32, %c0_i32_0 : i32, i32
  }
  func.func @transform_6(%arg0: i32) -> (i32, i32) {
    %c0_i32 = arith.constant 0 : i32
    %c0_i32_0 = arith.constant 0 : i32
    %c0_i32_1 = arith.constant 0 : i32
    return %c0_i32, %c0_i32_0 : i32, i32
  }
  func.func @transform_7(%arg0: i32) -> (i32, i32) {
    %c0_i32 = arith.constant 0 : i32
    %c0_i32_0 = arith.constant 0 : i32
    %c0_i32_1 = arith.constant 0 : i32
    return %c0_i32, %c0_i32_0 : i32, i32
  }
  func.func @transform_8(%arg0: i32) -> (i32, i32) {
    %c0_i32 = arith.constant 0 : i32
    %c0_i32_0 = arith.constant 0 : i32
    %c0_i32_1 = arith.constant 0 : i32
    return %c0_i32, %c0_i32_0 : i32, i32
  }
  func.func @transform_9(%arg0: i32) -> (i32, i32) {
    %c0_i32 = arith.constant 0 : i32
    %c0_i32_0 = arith.constant 0 : i32
    %c0_i32_1 = arith.constant 0 : i32
    return %c0_i32, %c0_i32_0 : i32, i32
  }
  func.func @transform_10(%arg0: i32) -> (i32, i32) {
    %c0_i32 = arith.constant 0 : i32
    %c0_i32_0 = arith.constant 0 : i32
    %c0_i32_1 = arith.constant 0 : i32
    return %c0_i32, %c0_i32_0 : i32, i32
  }
  func.func @transform_11(%arg0: i32) -> (i32, i32) {
    %c0_i32 = arith.constant 0 : i32
    %c0_i32_0 = arith.constant 0 : i32
    %c0_i32_1 = arith.constant 0 : i32
    return %c0_i32, %c0_i32_0 : i32, i32
  }
  func.func @transform_12(%arg0: i32) -> (i32, i32) {
    %c0_i32 = arith.constant 0 : i32
    %c0_i32_0 = arith.constant 0 : i32
    %c0_i32_1 = arith.constant 0 : i32
    return %c0_i32, %c0_i32_0 : i32, i32
  }
  func.func @transform_13(%arg0: i32) -> (i32, i32) {
    %c0_i32 = arith.constant 0 : i32
    %c0_i32_0 = arith.constant 0 : i32
    %c0_i32_1 = arith.constant 0 : i32
    return %c0_i32, %c0_i32_0 : i32, i32
  }
  func.func @transform_14(%arg0: i32) -> (i32, i32) {
    %c0_i32 = arith.constant 0 : i32
    %c0_i32_0 = arith.constant 0 : i32
    %c0_i32_1 = arith.constant 0 : i32
    return %c0_i32, %c0_i32_0 : i32, i32
  }
  func.func @transform_15(%arg0: i32) -> (i32, i32) {
    %c0_i32 = arith.constant 0 : i32
    %c0_i32_0 = arith.constant 0 : i32
    %c0_i32_1 = arith.constant 0 : i32
    return %c0_i32, %c0_i32_0 : i32, i32
  }
  func.func @transform_16(%arg0: i32) -> (i32, i32) {
    %c0_i32 = arith.constant 0 : i32
    %c0_i32_0 = arith.constant 0 : i32
    %c0_i32_1 = arith.constant 0 : i32
    return %c0_i32, %c0_i32_0 : i32, i32
  }
  func.func @transform_17(%arg0: i32) -> (i32, i32, i32) {
    %c0_i32 = arith.constant 0 : i32
    %c0_i32_0 = arith.constant 0 : i32
    %c0_i32_1 = arith.constant 0 : i32
    return %arg0, %c0_i32, %c0_i32_0 : i32, i32, i32
  }
}

module attributes {stable_mosaic.version = 11 : i64} {
  func.func @_res_block_kernel(%arg0: i32, %arg1: memref<1x8x64xf32, #tpu.memory_space<vmem>>, %arg2: memref<1x1x80xf32, #tpu.memory_space<vmem>>, %arg3: memref<64x8xf32, #tpu.memory_space<vmem>>, %arg4: memref<8x64xf32, #tpu.memory_space<vmem>>, %arg5: memref<192x64xf32, #tpu.memory_space<vmem>>, %arg6: memref<1x64xf32, #tpu.memory_space<vmem>>, %arg7: memref<1x64xf32, #tpu.memory_space<vmem>>, %arg8: memref<1x64xf32, #tpu.memory_space<vmem>>, %arg9: memref<80x64xf32, #tpu.memory_space<vmem>>, %arg10: memref<1x64xf32, #tpu.memory_space<vmem>>, %arg11: memref<192x64xf32, #tpu.memory_space<vmem>>, %arg12: memref<1x64xf32, #tpu.memory_space<vmem>>, %arg13: memref<1x64xf32, #tpu.memory_space<vmem>>, %arg14: memref<1x64xf32, #tpu.memory_space<vmem>>, %arg15: memref<1x8x64xf32, #tpu.memory_space<vmem>>) attributes {dimension_semantics = [#tpu.dimension_semantics<parallel>], iteration_bounds = array<i64: 2>, scalar_prefetch = 0 : i64, scratch_operands = 0 : i64, tpu.core_type = #tpu.core_type<tc>, window_params = [{transform_indices = @transform_0, window_bounds = array<i64: 1, 8, 64>}, {transform_indices = @transform_1, window_bounds = array<i64: 1, 1, 80>}, {pipeline_mode = #tpu.pipeline_mode<synchronous>, transform_indices = @transform_2, window_bounds = array<i64: 64, 8>}, {pipeline_mode = #tpu.pipeline_mode<synchronous>, transform_indices = @transform_3, window_bounds = array<i64: 8, 64>}, {pipeline_mode = #tpu.pipeline_mode<synchronous>, transform_indices = @transform_4, window_bounds = array<i64: 192, 64>}, {pipeline_mode = #tpu.pipeline_mode<synchronous>, transform_indices = @transform_5, window_bounds = array<i64: 1, 64>}, {pipeline_mode = #tpu.pipeline_mode<synchronous>, transform_indices = @transform_6, window_bounds = array<i64: 1, 64>}, {pipeline_mode = #tpu.pipeline_mode<synchronous>, transform_indices = @transform_7, window_bounds = array<i64: 1, 64>}, {pipeline_mode = #tpu.pipeline_mode<synchronous>, transform_indices = @transform_8, window_bounds = array<i64: 80, 64>}, {pipeline_mode = #tpu.pipeline_mode<synchronous>, transform_indices = @transform_9, window_bounds = array<i64: 1, 64>}, {pipeline_mode = #tpu.pipeline_mode<synchronous>, transform_indices = @transform_10, window_bounds = array<i64: 192, 64>}, {pipeline_mode = #tpu.pipeline_mode<synchronous>, transform_indices = @transform_11, window_bounds = array<i64: 1, 64>}, {pipeline_mode = #tpu.pipeline_mode<synchronous>, transform_indices = @transform_12, window_bounds = array<i64: 1, 64>}, {pipeline_mode = #tpu.pipeline_mode<synchronous>, transform_indices = @transform_13, window_bounds = array<i64: 1, 64>}, {transform_indices = @transform_14, window_bounds = array<i64: 1, 8, 64>}]} {
    %c0 = arith.constant 0 : index
    %c0_0 = arith.constant 0 : index
    %c0_1 = arith.constant 0 : index
    %0 = vector.load %arg1[%c0, %c0_0, %c0_1] : memref<1x8x64xf32, #tpu.memory_space<vmem>>, vector<1x8x64xf32>
    %1 = vector.shape_cast %0 : vector<1x8x64xf32> to vector<8x64xf32>
    %c0_2 = arith.constant 0 : index
    %c0_3 = arith.constant 0 : index
    %2 = vector.load %arg3[%c0_2, %c0_3] : memref<64x8xf32, #tpu.memory_space<vmem>>, vector<64x8xf32>
    %c0_4 = arith.constant 0 : index
    %c0_5 = arith.constant 0 : index
    %3 = vector.load %arg4[%c0_4, %c0_5] : memref<8x64xf32, #tpu.memory_space<vmem>>, vector<8x64xf32>
    %c0_6 = arith.constant 0 : index
    %c0_7 = arith.constant 0 : index
    %c0_8 = arith.constant 0 : index
    %4 = vector.load %arg2[%c0_6, %c0_7, %c0_8] : memref<1x1x80xf32, #tpu.memory_space<vmem>>, vector<1x1x80xf32>
    %5 = vector.shape_cast %4 : vector<1x1x80xf32> to vector<1x80xf32>
    %6 = math.absf %5 : vector<1x80xf32>
    %cst = arith.constant 0.000000e+00 : f32
    %7 = vector.broadcast %cst : f32 to vector<1x80xf32>
    %8 = arith.subf %7, %6 : vector<1x80xf32>
    %9 = math.exp %8 : vector<1x80xf32>
    %cst_9 = arith.constant 0.000000e+00 : f32
    %10 = vector.broadcast %cst_9 : f32 to vector<1x80xf32>
    %11 = arith.cmpf oge, %5, %10 : vector<1x80xf32>
    %cst_10 = arith.constant 1.000000e+00 : f32
    %12 = vector.broadcast %cst_10 : f32 to vector<1x80xf32>
    %13 = arith.select %11, %9, %12 : vector<1x80xi1>, vector<1x80xf32>
    %cst_11 = arith.constant 1.000000e+00 : f32
    %14 = vector.broadcast %cst_11 : f32 to vector<1x80xf32>
    %15 = arith.addf %14, %9 : vector<1x80xf32>
    %16 = tpu.reciprocal %15 {approx = true} : vector<1x80xf32> -> vector<1x80xf32>
    %17 = arith.mulf %13, %16 : vector<1x80xf32>
    %18 = arith.mulf %17, %17 : vector<1x80xf32>
    %cst_12 = arith.constant 1.000000e+00 : f32
    %19 = vector.broadcast %cst_12 : f32 to vector<1x80xf32>
    %20 = arith.subf %19, %18 : vector<1x80xf32>
    %21 = arith.mulf %5, %20 : vector<1x80xf32>
    %cst_13 = arith.constant 1.000000e+00 : f32
    %22 = vector.broadcast %cst_13 : f32 to vector<1x80xf32>
    %23 = arith.addf %22, %18 : vector<1x80xf32>
    %24 = tpu.reciprocal %23 {approx = true} : vector<1x80xf32> -> vector<1x80xf32>
    %25 = arith.mulf %21, %24 : vector<1x80xf32>
    %c0_14 = arith.constant 0 : index
    %c0_15 = arith.constant 0 : index
    %26 = vector.load %arg9[%c0_14, %c0_15] : memref<80x64xf32, #tpu.memory_space<vmem>>, vector<80x64xf32>
    %cst_16 = arith.constant dense<0.000000e+00> : vector<1x64xf32>
    %27 = tpu.matmul %25, %26, %cst_16 {dimension_numbers = #tpu.dot_dimension_numbers<[1], [0], [0], [1], [0, 0, 1, 1], [], []>} : vector<1x80xf32>, vector<80x64xf32>, vector<1x64xf32> -> vector<1x64xf32>
    %c0_17 = arith.constant 0 : index
    %c0_18 = arith.constant 0 : index
    %28 = vector.load %arg10[%c0_17, %c0_18] : memref<1x64xf32, #tpu.memory_space<vmem>>, vector<1x64xf32>
    %29 = arith.addf %27, %28 : vector<1x64xf32>
    %cst_19 = arith.constant 0.000000e+00 : f32
    %30 = vector.broadcast %cst_19 : f32 to vector<1x64xf32>
    %31 = tpu.concatenate %30, %1, %30 in 0 : vector<1x64xf32>, vector<8x64xf32>, vector<1x64xf32> -> vector<10x64xf32>
    %32 = vector.extract_strided_slice %31 {offsets = [0, 0], sizes = [8, 64], strides = [1, 1]} : vector<10x64xf32> to vector<8x64xf32>
    %33 = vector.extract_strided_slice %31 {offsets = [1, 0], sizes = [8, 64], strides = [1, 1]} : vector<10x64xf32> to vector<8x64xf32>
    %34 = vector.extract_strided_slice %31 {offsets = [2, 0], sizes = [8, 64], strides = [1, 1]} : vector<10x64xf32> to vector<8x64xf32>
    %35 = tpu.concatenate %32, %33, %34 in 1 : vector<8x64xf32>, vector<8x64xf32>, vector<8x64xf32> -> vector<8x192xf32>
    %c0_20 = arith.constant 0 : index
    %c0_21 = arith.constant 0 : index
    %36 = vector.load %arg5[%c0_20, %c0_21] : memref<192x64xf32, #tpu.memory_space<vmem>>, vector<192x64xf32>
    %cst_22 = arith.constant dense<0.000000e+00> : vector<8x64xf32>
    %37 = tpu.matmul %35, %36, %cst_22 {dimension_numbers = #tpu.dot_dimension_numbers<[1], [0], [0], [1], [0, 0, 1, 1], [], []>} : vector<8x192xf32>, vector<192x64xf32>, vector<8x64xf32> -> vector<8x64xf32>
    %c0_23 = arith.constant 0 : index
    %c0_24 = arith.constant 0 : index
    %38 = vector.load %arg6[%c0_23, %c0_24] : memref<1x64xf32, #tpu.memory_space<vmem>>, vector<1x64xf32>
    %39 = vector.broadcast %38 : vector<1x64xf32> to vector<8x64xf32>
    %40 = arith.addf %37, %39 : vector<8x64xf32>
    %cst_25 = arith.constant dense<0.000000e+00> : vector<64xf32>
    %41 = vector.multi_reduction <add>, %40, %cst_25 [0] : vector<8x64xf32> to vector<64xf32>
    %42 = vector.shape_cast %41 : vector<64xf32> to vector<1x64xf32>
    %cst_26 = arith.constant dense<0.000000e+00> : vector<1x8xf32>
    %43 = tpu.matmul %42, %2, %cst_26 {dimension_numbers = #tpu.dot_dimension_numbers<[1], [0], [0], [1], [0, 0, 1, 1], [], []>} : vector<1x64xf32>, vector<64x8xf32>, vector<1x8xf32> -> vector<1x8xf32>
    %cst_27 = arith.constant 1.562500e-02 : f32
    %44 = vector.broadcast %cst_27 : f32 to vector<1x8xf32>
    %45 = arith.mulf %43, %44 : vector<1x8xf32>
    %cst_28 = arith.constant dense<0.000000e+00> : vector<1x64xf32>
    %46 = tpu.matmul %45, %3, %cst_28 {dimension_numbers = #tpu.dot_dimension_numbers<[1], [0], [0], [1], [0, 0, 1, 1], [], []>} : vector<1x8xf32>, vector<8x64xf32>, vector<1x64xf32> -> vector<1x64xf32>
    %47 = vector.broadcast %46 : vector<1x64xf32> to vector<8x64xf32>
    %48 = arith.subf %40, %47 : vector<8x64xf32>
    %49 = arith.mulf %48, %48 : vector<8x64xf32>
    %cst_29 = arith.constant dense<0.000000e+00> : vector<64xf32>
    %50 = vector.multi_reduction <add>, %49, %cst_29 [0] : vector<8x64xf32> to vector<64xf32>
    %51 = vector.shape_cast %50 : vector<64xf32> to vector<1x64xf32>
    %cst_30 = arith.constant dense<0.000000e+00> : vector<1x8xf32>
    %52 = tpu.matmul %51, %2, %cst_30 {dimension_numbers = #tpu.dot_dimension_numbers<[1], [0], [0], [1], [0, 0, 1, 1], [], []>} : vector<1x64xf32>, vector<64x8xf32>, vector<1x8xf32> -> vector<1x8xf32>
    %cst_31 = arith.constant 1.562500e-02 : f32
    %53 = vector.broadcast %cst_31 : f32 to vector<1x8xf32>
    %54 = arith.mulf %52, %53 : vector<1x8xf32>
    %cst_32 = arith.constant 9.99999974E-6 : f32
    %55 = vector.broadcast %cst_32 : f32 to vector<1x8xf32>
    %56 = arith.addf %54, %55 : vector<1x8xf32>
    %57 = math.rsqrt %56 : vector<1x8xf32>
    %cst_33 = arith.constant dense<0.000000e+00> : vector<1x64xf32>
    %58 = tpu.matmul %57, %3, %cst_33 {dimension_numbers = #tpu.dot_dimension_numbers<[1], [0], [0], [1], [0, 0, 1, 1], [], []>} : vector<1x8xf32>, vector<8x64xf32>, vector<1x64xf32> -> vector<1x64xf32>
    %59 = vector.broadcast %58 : vector<1x64xf32> to vector<8x64xf32>
    %60 = arith.mulf %48, %59 : vector<8x64xf32>
    %c0_34 = arith.constant 0 : index
    %c0_35 = arith.constant 0 : index
    %61 = vector.load %arg7[%c0_34, %c0_35] : memref<1x64xf32, #tpu.memory_space<vmem>>, vector<1x64xf32>
    %62 = vector.broadcast %61 : vector<1x64xf32> to vector<8x64xf32>
    %63 = arith.mulf %60, %62 : vector<8x64xf32>
    %c0_36 = arith.constant 0 : index
    %c0_37 = arith.constant 0 : index
    %64 = vector.load %arg8[%c0_36, %c0_37] : memref<1x64xf32, #tpu.memory_space<vmem>>, vector<1x64xf32>
    %65 = vector.broadcast %64 : vector<1x64xf32> to vector<8x64xf32>
    %66 = arith.addf %63, %65 : vector<8x64xf32>
    %67 = math.absf %66 : vector<8x64xf32>
    %cst_38 = arith.constant 0.000000e+00 : f32
    %68 = vector.broadcast %cst_38 : f32 to vector<8x64xf32>
    %69 = arith.subf %68, %67 : vector<8x64xf32>
    %70 = math.exp %69 : vector<8x64xf32>
    %cst_39 = arith.constant 0.000000e+00 : f32
    %71 = vector.broadcast %cst_39 : f32 to vector<8x64xf32>
    %72 = arith.cmpf oge, %66, %71 : vector<8x64xf32>
    %cst_40 = arith.constant 1.000000e+00 : f32
    %73 = vector.broadcast %cst_40 : f32 to vector<8x64xf32>
    %74 = arith.select %72, %70, %73 : vector<8x64xi1>, vector<8x64xf32>
    %cst_41 = arith.constant 1.000000e+00 : f32
    %75 = vector.broadcast %cst_41 : f32 to vector<8x64xf32>
    %76 = arith.addf %75, %70 : vector<8x64xf32>
    %77 = tpu.reciprocal %76 {approx = true} : vector<8x64xf32> -> vector<8x64xf32>
    %78 = arith.mulf %74, %77 : vector<8x64xf32>
    %79 = arith.mulf %78, %78 : vector<8x64xf32>
    %cst_42 = arith.constant 1.000000e+00 : f32
    %80 = vector.broadcast %cst_42 : f32 to vector<8x64xf32>
    %81 = arith.subf %80, %79 : vector<8x64xf32>
    %82 = arith.mulf %66, %81 : vector<8x64xf32>
    %cst_43 = arith.constant 1.000000e+00 : f32
    %83 = vector.broadcast %cst_43 : f32 to vector<8x64xf32>
    %84 = arith.addf %83, %79 : vector<8x64xf32>
    %85 = tpu.reciprocal %84 {approx = true} : vector<8x64xf32> -> vector<8x64xf32>
    %86 = arith.mulf %82, %85 : vector<8x64xf32>
    %87 = vector.broadcast %29 : vector<1x64xf32> to vector<8x64xf32>
    %88 = arith.addf %86, %87 : vector<8x64xf32>
    %cst_44 = arith.constant 0.000000e+00 : f32
    %89 = vector.broadcast %cst_44 : f32 to vector<1x64xf32>
    %90 = tpu.concatenate %89, %88, %89 in 0 : vector<1x64xf32>, vector<8x64xf32>, vector<1x64xf32> -> vector<10x64xf32>
    %91 = vector.extract_strided_slice %90 {offsets = [0, 0], sizes = [8, 64], strides = [1, 1]} : vector<10x64xf32> to vector<8x64xf32>
    %92 = vector.extract_strided_slice %90 {offsets = [1, 0], sizes = [8, 64], strides = [1, 1]} : vector<10x64xf32> to vector<8x64xf32>
    %93 = vector.extract_strided_slice %90 {offsets = [2, 0], sizes = [8, 64], strides = [1, 1]} : vector<10x64xf32> to vector<8x64xf32>
    %94 = tpu.concatenate %91, %92, %93 in 1 : vector<8x64xf32>, vector<8x64xf32>, vector<8x64xf32> -> vector<8x192xf32>
    %c0_45 = arith.constant 0 : index
    %c0_46 = arith.constant 0 : index
    %95 = vector.load %arg11[%c0_45, %c0_46] : memref<192x64xf32, #tpu.memory_space<vmem>>, vector<192x64xf32>
    %cst_47 = arith.constant dense<0.000000e+00> : vector<8x64xf32>
    %96 = tpu.matmul %94, %95, %cst_47 {dimension_numbers = #tpu.dot_dimension_numbers<[1], [0], [0], [1], [0, 0, 1, 1], [], []>} : vector<8x192xf32>, vector<192x64xf32>, vector<8x64xf32> -> vector<8x64xf32>
    %c0_48 = arith.constant 0 : index
    %c0_49 = arith.constant 0 : index
    %97 = vector.load %arg12[%c0_48, %c0_49] : memref<1x64xf32, #tpu.memory_space<vmem>>, vector<1x64xf32>
    %98 = vector.broadcast %97 : vector<1x64xf32> to vector<8x64xf32>
    %99 = arith.addf %96, %98 : vector<8x64xf32>
    %cst_50 = arith.constant dense<0.000000e+00> : vector<64xf32>
    %100 = vector.multi_reduction <add>, %99, %cst_50 [0] : vector<8x64xf32> to vector<64xf32>
    %101 = vector.shape_cast %100 : vector<64xf32> to vector<1x64xf32>
    %cst_51 = arith.constant dense<0.000000e+00> : vector<1x8xf32>
    %102 = tpu.matmul %101, %2, %cst_51 {dimension_numbers = #tpu.dot_dimension_numbers<[1], [0], [0], [1], [0, 0, 1, 1], [], []>} : vector<1x64xf32>, vector<64x8xf32>, vector<1x8xf32> -> vector<1x8xf32>
    %cst_52 = arith.constant 1.562500e-02 : f32
    %103 = vector.broadcast %cst_52 : f32 to vector<1x8xf32>
    %104 = arith.mulf %102, %103 : vector<1x8xf32>
    %cst_53 = arith.constant dense<0.000000e+00> : vector<1x64xf32>
    %105 = tpu.matmul %104, %3, %cst_53 {dimension_numbers = #tpu.dot_dimension_numbers<[1], [0], [0], [1], [0, 0, 1, 1], [], []>} : vector<1x8xf32>, vector<8x64xf32>, vector<1x64xf32> -> vector<1x64xf32>
    %106 = vector.broadcast %105 : vector<1x64xf32> to vector<8x64xf32>
    %107 = arith.subf %99, %106 : vector<8x64xf32>
    %108 = arith.mulf %107, %107 : vector<8x64xf32>
    %cst_54 = arith.constant dense<0.000000e+00> : vector<64xf32>
    %109 = vector.multi_reduction <add>, %108, %cst_54 [0] : vector<8x64xf32> to vector<64xf32>
    %110 = vector.shape_cast %109 : vector<64xf32> to vector<1x64xf32>
    %cst_55 = arith.constant dense<0.000000e+00> : vector<1x8xf32>
    %111 = tpu.matmul %110, %2, %cst_55 {dimension_numbers = #tpu.dot_dimension_numbers<[1], [0], [0], [1], [0, 0, 1, 1], [], []>} : vector<1x64xf32>, vector<64x8xf32>, vector<1x8xf32> -> vector<1x8xf32>
    %cst_56 = arith.constant 1.562500e-02 : f32
    %112 = vector.broadcast %cst_56 : f32 to vector<1x8xf32>
    %113 = arith.mulf %111, %112 : vector<1x8xf32>
    %cst_57 = arith.constant 9.99999974E-6 : f32
    %114 = vector.broadcast %cst_57 : f32 to vector<1x8xf32>
    %115 = arith.addf %113, %114 : vector<1x8xf32>
    %116 = math.rsqrt %115 : vector<1x8xf32>
    %cst_58 = arith.constant dense<0.000000e+00> : vector<1x64xf32>
    %117 = tpu.matmul %116, %3, %cst_58 {dimension_numbers = #tpu.dot_dimension_numbers<[1], [0], [0], [1], [0, 0, 1, 1], [], []>} : vector<1x8xf32>, vector<8x64xf32>, vector<1x64xf32> -> vector<1x64xf32>
    %118 = vector.broadcast %117 : vector<1x64xf32> to vector<8x64xf32>
    %119 = arith.mulf %107, %118 : vector<8x64xf32>
    %c0_59 = arith.constant 0 : index
    %c0_60 = arith.constant 0 : index
    %120 = vector.load %arg13[%c0_59, %c0_60] : memref<1x64xf32, #tpu.memory_space<vmem>>, vector<1x64xf32>
    %121 = vector.broadcast %120 : vector<1x64xf32> to vector<8x64xf32>
    %122 = arith.mulf %119, %121 : vector<8x64xf32>
    %c0_61 = arith.constant 0 : index
    %c0_62 = arith.constant 0 : index
    %123 = vector.load %arg14[%c0_61, %c0_62] : memref<1x64xf32, #tpu.memory_space<vmem>>, vector<1x64xf32>
    %124 = vector.broadcast %123 : vector<1x64xf32> to vector<8x64xf32>
    %125 = arith.addf %122, %124 : vector<8x64xf32>
    %126 = math.absf %125 : vector<8x64xf32>
    %cst_63 = arith.constant 0.000000e+00 : f32
    %127 = vector.broadcast %cst_63 : f32 to vector<8x64xf32>
    %128 = arith.subf %127, %126 : vector<8x64xf32>
    %129 = math.exp %128 : vector<8x64xf32>
    %cst_64 = arith.constant 0.000000e+00 : f32
    %130 = vector.broadcast %cst_64 : f32 to vector<8x64xf32>
    %131 = arith.cmpf oge, %125, %130 : vector<8x64xf32>
    %cst_65 = arith.constant 1.000000e+00 : f32
    %132 = vector.broadcast %cst_65 : f32 to vector<8x64xf32>
    %133 = arith.select %131, %129, %132 : vector<8x64xi1>, vector<8x64xf32>
    %cst_66 = arith.constant 1.000000e+00 : f32
    %134 = vector.broadcast %cst_66 : f32 to vector<8x64xf32>
    %135 = arith.addf %134, %129 : vector<8x64xf32>
    %136 = tpu.reciprocal %135 {approx = true} : vector<8x64xf32> -> vector<8x64xf32>
    %137 = arith.mulf %133, %136 : vector<8x64xf32>
    %138 = arith.mulf %137, %137 : vector<8x64xf32>
    %cst_67 = arith.constant 1.000000e+00 : f32
    %139 = vector.broadcast %cst_67 : f32 to vector<8x64xf32>
    %140 = arith.subf %139, %138 : vector<8x64xf32>
    %141 = arith.mulf %125, %140 : vector<8x64xf32>
    %cst_68 = arith.constant 1.000000e+00 : f32
    %142 = vector.broadcast %cst_68 : f32 to vector<8x64xf32>
    %143 = arith.addf %142, %138 : vector<8x64xf32>
    %144 = tpu.reciprocal %143 {approx = true} : vector<8x64xf32> -> vector<8x64xf32>
    %145 = arith.mulf %141, %144 : vector<8x64xf32>
    %146 = arith.addf %145, %1 : vector<8x64xf32>
    %c0_69 = arith.constant 0 : index
    %c0_70 = arith.constant 0 : index
    %c0_71 = arith.constant 0 : index
    %147 = vector.load %arg15[%c0_69, %c0_70, %c0_71] : memref<1x8x64xf32, #tpu.memory_space<vmem>>, vector<1x8x64xf32>
    %148 = vector.shape_cast %147 : vector<1x8x64xf32> to vector<8x64xf32>
    %149 = vector.shape_cast %146 : vector<8x64xf32> to vector<1x8x64xf32>
    tpu.vector_store %arg15[%c0_69, %c0_70, %c0_71], %149 {strides = array<i32>} : memref<1x8x64xf32, #tpu.memory_space<vmem>>, vector<1x8x64xf32>,
    return
  }
  func.func @transform_0(%arg0: i32) -> (i32, i32, i32) {
    %c0_i32 = arith.constant 0 : i32
    %c0_i32_0 = arith.constant 0 : i32
    %c0_i32_1 = arith.constant 0 : i32
    return %arg0, %c0_i32, %c0_i32_0 : i32, i32, i32
  }
  func.func @transform_1(%arg0: i32) -> (i32, i32, i32) {
    %c0_i32 = arith.constant 0 : i32
    %c0_i32_0 = arith.constant 0 : i32
    %c0_i32_1 = arith.constant 0 : i32
    return %arg0, %c0_i32, %c0_i32_0 : i32, i32, i32
  }
  func.func @transform_2(%arg0: i32) -> (i32, i32) {
    %c0_i32 = arith.constant 0 : i32
    %c0_i32_0 = arith.constant 0 : i32
    %c0_i32_1 = arith.constant 0 : i32
    return %c0_i32, %c0_i32_0 : i32, i32
  }
  func.func @transform_3(%arg0: i32) -> (i32, i32) {
    %c0_i32 = arith.constant 0 : i32
    %c0_i32_0 = arith.constant 0 : i32
    %c0_i32_1 = arith.constant 0 : i32
    return %c0_i32, %c0_i32_0 : i32, i32
  }
  func.func @transform_4(%arg0: i32) -> (i32, i32) {
    %c0_i32 = arith.constant 0 : i32
    %c0_i32_0 = arith.constant 0 : i32
    %c0_i32_1 = arith.constant 0 : i32
    return %c0_i32, %c0_i32_0 : i32, i32
  }
  func.func @transform_5(%arg0: i32) -> (i32, i32) {
    %c0_i32 = arith.constant 0 : i32
    %c0_i32_0 = arith.constant 0 : i32
    %c0_i32_1 = arith.constant 0 : i32
    return %c0_i32, %c0_i32_0 : i32, i32
  }
  func.func @transform_6(%arg0: i32) -> (i32, i32) {
    %c0_i32 = arith.constant 0 : i32
    %c0_i32_0 = arith.constant 0 : i32
    %c0_i32_1 = arith.constant 0 : i32
    return %c0_i32, %c0_i32_0 : i32, i32
  }
  func.func @transform_7(%arg0: i32) -> (i32, i32) {
    %c0_i32 = arith.constant 0 : i32
    %c0_i32_0 = arith.constant 0 : i32
    %c0_i32_1 = arith.constant 0 : i32
    return %c0_i32, %c0_i32_0 : i32, i32
  }
  func.func @transform_8(%arg0: i32) -> (i32, i32) {
    %c0_i32 = arith.constant 0 : i32
    %c0_i32_0 = arith.constant 0 : i32
    %c0_i32_1 = arith.constant 0 : i32
    return %c0_i32, %c0_i32_0 : i32, i32
  }
  func.func @transform_9(%arg0: i32) -> (i32, i32) {
    %c0_i32 = arith.constant 0 : i32
    %c0_i32_0 = arith.constant 0 : i32
    %c0_i32_1 = arith.constant 0 : i32
    return %c0_i32, %c0_i32_0 : i32, i32
  }
  func.func @transform_10(%arg0: i32) -> (i32, i32) {
    %c0_i32 = arith.constant 0 : i32
    %c0_i32_0 = arith.constant 0 : i32
    %c0_i32_1 = arith.constant 0 : i32
    return %c0_i32, %c0_i32_0 : i32, i32
  }
  func.func @transform_11(%arg0: i32) -> (i32, i32) {
    %c0_i32 = arith.constant 0 : i32
    %c0_i32_0 = arith.constant 0 : i32
    %c0_i32_1 = arith.constant 0 : i32
    return %c0_i32, %c0_i32_0 : i32, i32
  }
  func.func @transform_12(%arg0: i32) -> (i32, i32) {
    %c0_i32 = arith.constant 0 : i32
    %c0_i32_0 = arith.constant 0 : i32
    %c0_i32_1 = arith.constant 0 : i32
    return %c0_i32, %c0_i32_0 : i32, i32
  }
  func.func @transform_13(%arg0: i32) -> (i32, i32) {
    %c0_i32 = arith.constant 0 : i32
    %c0_i32_0 = arith.constant 0 : i32
    %c0_i32_1 = arith.constant 0 : i32
    return %c0_i32, %c0_i32_0 : i32, i32
  }
  func.func @transform_14(%arg0: i32) -> (i32, i32, i32) {
    %c0_i32 = arith.constant 0 : i32
    %c0_i32_0 = arith.constant 0 : i32
    %c0_i32_1 = arith.constant 0 : i32
    return %arg0, %c0_i32, %c0_i32_0 : i32, i32, i32
  }
}

module attributes {stable_mosaic.version = 11 : i64} {
  func.func @_upsample_kernel(%arg0: i32, %arg1: memref<1x8x64xf32, #tpu.memory_space<vmem>>, %arg2: memref<128x64xf32, #tpu.memory_space<vmem>>, %arg3: memref<128x64xf32, #tpu.memory_space<vmem>>, %arg4: memref<1x64xf32, #tpu.memory_space<vmem>>, %arg5: memref<1x16x64xf32, #tpu.memory_space<vmem>>) attributes {dimension_semantics = [#tpu.dimension_semantics<parallel>], iteration_bounds = array<i64: 2>, scalar_prefetch = 0 : i64, scratch_operands = 0 : i64, tpu.core_type = #tpu.core_type<tc>, window_params = [{transform_indices = @transform_0, window_bounds = array<i64: 1, 8, 64>}, {pipeline_mode = #tpu.pipeline_mode<synchronous>, transform_indices = @transform_1, window_bounds = array<i64: 128, 64>}, {pipeline_mode = #tpu.pipeline_mode<synchronous>, transform_indices = @transform_2, window_bounds = array<i64: 128, 64>}, {pipeline_mode = #tpu.pipeline_mode<synchronous>, transform_indices = @transform_3, window_bounds = array<i64: 1, 64>}, {transform_indices = @transform_4, window_bounds = array<i64: 1, 16, 64>}]} {
    %c0 = arith.constant 0 : index
    %c0_0 = arith.constant 0 : index
    %c0_1 = arith.constant 0 : index
    %0 = vector.load %arg1[%c0, %c0_0, %c0_1] : memref<1x8x64xf32, #tpu.memory_space<vmem>>, vector<1x8x64xf32>
    %1 = vector.shape_cast %0 : vector<1x8x64xf32> to vector<8x64xf32>
    %cst = arith.constant 0.000000e+00 : f32
    %2 = vector.broadcast %cst : f32 to vector<1x64xf32>
    %3 = vector.extract_strided_slice %1 {offsets = [0, 0], sizes = [7, 64], strides = [1, 1]} : vector<8x64xf32> to vector<7x64xf32>
    %4 = tpu.concatenate %2, %3 in 0 : vector<1x64xf32>, vector<7x64xf32> -> vector<8x64xf32>
    %5 = vector.extract_strided_slice %1 {offsets = [1, 0], sizes = [7, 64], strides = [1, 1]} : vector<8x64xf32> to vector<7x64xf32>
    %6 = tpu.concatenate %5, %2 in 0 : vector<7x64xf32>, vector<1x64xf32> -> vector<8x64xf32>
    %c0_2 = arith.constant 0 : index
    %c0_3 = arith.constant 0 : index
    %7 = vector.load %arg4[%c0_2, %c0_3] : memref<1x64xf32, #tpu.memory_space<vmem>>, vector<1x64xf32>
    %8 = tpu.concatenate %1, %4 in 1 : vector<8x64xf32>, vector<8x64xf32> -> vector<8x128xf32>
    %c0_4 = arith.constant 0 : index
    %c0_5 = arith.constant 0 : index
    %9 = vector.load %arg2[%c0_4, %c0_5] : memref<128x64xf32, #tpu.memory_space<vmem>>, vector<128x64xf32>
    %cst_6 = arith.constant dense<0.000000e+00> : vector<8x64xf32>
    %10 = tpu.matmul %8, %9, %cst_6 {dimension_numbers = #tpu.dot_dimension_numbers<[1], [0], [0], [1], [0, 0, 1, 1], [], []>} : vector<8x128xf32>, vector<128x64xf32>, vector<8x64xf32> -> vector<8x64xf32>
    %11 = vector.broadcast %7 : vector<1x64xf32> to vector<8x64xf32>
    %12 = arith.addf %10, %11 : vector<8x64xf32>
    %13 = tpu.concatenate %1, %6 in 1 : vector<8x64xf32>, vector<8x64xf32> -> vector<8x128xf32>
    %c0_7 = arith.constant 0 : index
    %c0_8 = arith.constant 0 : index
    %14 = vector.load %arg3[%c0_7, %c0_8] : memref<128x64xf32, #tpu.memory_space<vmem>>, vector<128x64xf32>
    %cst_9 = arith.constant dense<0.000000e+00> : vector<8x64xf32>
    %15 = tpu.matmul %13, %14, %cst_9 {dimension_numbers = #tpu.dot_dimension_numbers<[1], [0], [0], [1], [0, 0, 1, 1], [], []>} : vector<8x128xf32>, vector<128x64xf32>, vector<8x64xf32> -> vector<8x64xf32>
    %16 = vector.broadcast %7 : vector<1x64xf32> to vector<8x64xf32>
    %17 = arith.addf %15, %16 : vector<8x64xf32>
    %18 = vector.shape_cast %12 : vector<8x64xf32> to vector<8x1x64xf32>
    %19 = vector.shape_cast %17 : vector<8x64xf32> to vector<8x1x64xf32>
    %20 = tpu.concatenate %18, %19 in 1 : vector<8x1x64xf32>, vector<8x1x64xf32> -> vector<8x2x64xf32>
    %21 = vector.shape_cast %20 : vector<8x2x64xf32> to vector<16x64xf32>
    %c0_10 = arith.constant 0 : index
    %c0_11 = arith.constant 0 : index
    %c0_12 = arith.constant 0 : index
    %22 = vector.load %arg5[%c0_10, %c0_11, %c0_12] : memref<1x16x64xf32, #tpu.memory_space<vmem>>, vector<1x16x64xf32>
    %23 = vector.shape_cast %22 : vector<1x16x64xf32> to vector<16x64xf32>
    %24 = vector.shape_cast %21 : vector<16x64xf32> to vector<1x16x64xf32>
    tpu.vector_store %arg5[%c0_10, %c0_11, %c0_12], %24 {strides = array<i32>} : memref<1x16x64xf32, #tpu.memory_space<vmem>>, vector<1x16x64xf32>,
    return
  }
  func.func @transform_0(%arg0: i32) -> (i32, i32, i32) {
    %c0_i32 = arith.constant 0 : i32
    %c0_i32_0 = arith.constant 0 : i32
    %c0_i32_1 = arith.constant 0 : i32
    return %arg0, %c0_i32, %c0_i32_0 : i32, i32, i32
  }
  func.func @transform_1(%arg0: i32) -> (i32, i32) {
    %c0_i32 = arith.constant 0 : i32
    %c0_i32_0 = arith.constant 0 : i32
    %c0_i32_1 = arith.constant 0 : i32
    return %c0_i32, %c0_i32_0 : i32, i32
  }
  func.func @transform_2(%arg0: i32) -> (i32, i32) {
    %c0_i32 = arith.constant 0 : i32
    %c0_i32_0 = arith.constant 0 : i32
    %c0_i32_1 = arith.constant 0 : i32
    return %c0_i32, %c0_i32_0 : i32, i32
  }
  func.func @transform_3(%arg0: i32) -> (i32, i32) {
    %c0_i32 = arith.constant 0 : i32
    %c0_i32_0 = arith.constant 0 : i32
    %c0_i32_1 = arith.constant 0 : i32
    return %c0_i32, %c0_i32_0 : i32, i32
  }
  func.func @transform_4(%arg0: i32) -> (i32, i32, i32) {
    %c0_i32 = arith.constant 0 : i32
    %c0_i32_0 = arith.constant 0 : i32
    %c0_i32_1 = arith.constant 0 : i32
    return %arg0, %c0_i32, %c0_i32_0 : i32, i32, i32
  }
}

module attributes {stable_mosaic.version = 11 : i64} {
  func.func @_final_kernel(%arg0: i32, %arg1: memref<1x16x64xf32, #tpu.memory_space<vmem>>, %arg2: memref<64x8xf32, #tpu.memory_space<vmem>>, %arg3: memref<8x64xf32, #tpu.memory_space<vmem>>, %arg4: memref<192x64xf32, #tpu.memory_space<vmem>>, %arg5: memref<1x64xf32, #tpu.memory_space<vmem>>, %arg6: memref<1x64xf32, #tpu.memory_space<vmem>>, %arg7: memref<1x64xf32, #tpu.memory_space<vmem>>, %arg8: memref<64x4xf32, #tpu.memory_space<vmem>>, %arg9: memref<1x4xf32, #tpu.memory_space<vmem>>, %arg10: memref<1x16x4xf32, #tpu.memory_space<vmem>>) attributes {dimension_semantics = [#tpu.dimension_semantics<parallel>], iteration_bounds = array<i64: 2>, scalar_prefetch = 0 : i64, scratch_operands = 0 : i64, tpu.core_type = #tpu.core_type<tc>, window_params = [{transform_indices = @transform_0, window_bounds = array<i64: 1, 16, 64>}, {pipeline_mode = #tpu.pipeline_mode<synchronous>, transform_indices = @transform_1, window_bounds = array<i64: 64, 8>}, {pipeline_mode = #tpu.pipeline_mode<synchronous>, transform_indices = @transform_2, window_bounds = array<i64: 8, 64>}, {pipeline_mode = #tpu.pipeline_mode<synchronous>, transform_indices = @transform_3, window_bounds = array<i64: 192, 64>}, {pipeline_mode = #tpu.pipeline_mode<synchronous>, transform_indices = @transform_4, window_bounds = array<i64: 1, 64>}, {pipeline_mode = #tpu.pipeline_mode<synchronous>, transform_indices = @transform_5, window_bounds = array<i64: 1, 64>}, {pipeline_mode = #tpu.pipeline_mode<synchronous>, transform_indices = @transform_6, window_bounds = array<i64: 1, 64>}, {pipeline_mode = #tpu.pipeline_mode<synchronous>, transform_indices = @transform_7, window_bounds = array<i64: 64, 4>}, {pipeline_mode = #tpu.pipeline_mode<synchronous>, transform_indices = @transform_8, window_bounds = array<i64: 1, 4>}, {transform_indices = @transform_9, window_bounds = array<i64: 1, 16, 4>}]} {
    %c0 = arith.constant 0 : index
    %c0_0 = arith.constant 0 : index
    %c0_1 = arith.constant 0 : index
    %0 = vector.load %arg1[%c0, %c0_0, %c0_1] : memref<1x16x64xf32, #tpu.memory_space<vmem>>, vector<1x16x64xf32>
    %1 = vector.shape_cast %0 : vector<1x16x64xf32> to vector<16x64xf32>
    %c0_2 = arith.constant 0 : index
    %c0_3 = arith.constant 0 : index
    %2 = vector.load %arg2[%c0_2, %c0_3] : memref<64x8xf32, #tpu.memory_space<vmem>>, vector<64x8xf32>
    %c0_4 = arith.constant 0 : index
    %c0_5 = arith.constant 0 : index
    %3 = vector.load %arg3[%c0_4, %c0_5] : memref<8x64xf32, #tpu.memory_space<vmem>>, vector<8x64xf32>
    %cst = arith.constant 0.000000e+00 : f32
    %4 = vector.broadcast %cst : f32 to vector<1x64xf32>
    %5 = tpu.concatenate %4, %1, %4 in 0 : vector<1x64xf32>, vector<16x64xf32>, vector<1x64xf32> -> vector<18x64xf32>
    %6 = vector.extract_strided_slice %5 {offsets = [0, 0], sizes = [16, 64], strides = [1, 1]} : vector<18x64xf32> to vector<16x64xf32>
    %7 = vector.extract_strided_slice %5 {offsets = [1, 0], sizes = [16, 64], strides = [1, 1]} : vector<18x64xf32> to vector<16x64xf32>
    %8 = vector.extract_strided_slice %5 {offsets = [2, 0], sizes = [16, 64], strides = [1, 1]} : vector<18x64xf32> to vector<16x64xf32>
    %9 = tpu.concatenate %6, %7, %8 in 1 : vector<16x64xf32>, vector<16x64xf32>, vector<16x64xf32> -> vector<16x192xf32>
    %c0_6 = arith.constant 0 : index
    %c0_7 = arith.constant 0 : index
    %10 = vector.load %arg4[%c0_6, %c0_7] : memref<192x64xf32, #tpu.memory_space<vmem>>, vector<192x64xf32>
    %cst_8 = arith.constant dense<0.000000e+00> : vector<16x64xf32>
    %11 = tpu.matmul %9, %10, %cst_8 {dimension_numbers = #tpu.dot_dimension_numbers<[1], [0], [0], [1], [0, 0, 1, 1], [], []>} : vector<16x192xf32>, vector<192x64xf32>, vector<16x64xf32> -> vector<16x64xf32>
    %c0_9 = arith.constant 0 : index
    %c0_10 = arith.constant 0 : index
    %12 = vector.load %arg5[%c0_9, %c0_10] : memref<1x64xf32, #tpu.memory_space<vmem>>, vector<1x64xf32>
    %13 = vector.broadcast %12 : vector<1x64xf32> to vector<16x64xf32>
    %14 = arith.addf %11, %13 : vector<16x64xf32>
    %cst_11 = arith.constant dense<0.000000e+00> : vector<64xf32>
    %15 = vector.multi_reduction <add>, %14, %cst_11 [0] : vector<16x64xf32> to vector<64xf32>
    %16 = vector.shape_cast %15 : vector<64xf32> to vector<1x64xf32>
    %cst_12 = arith.constant dense<0.000000e+00> : vector<1x8xf32>
    %17 = tpu.matmul %16, %2, %cst_12 {dimension_numbers = #tpu.dot_dimension_numbers<[1], [0], [0], [1], [0, 0, 1, 1], [], []>} : vector<1x64xf32>, vector<64x8xf32>, vector<1x8xf32> -> vector<1x8xf32>
    %cst_13 = arith.constant 7.812500e-03 : f32
    %18 = vector.broadcast %cst_13 : f32 to vector<1x8xf32>
    %19 = arith.mulf %17, %18 : vector<1x8xf32>
    %cst_14 = arith.constant dense<0.000000e+00> : vector<1x64xf32>
    %20 = tpu.matmul %19, %3, %cst_14 {dimension_numbers = #tpu.dot_dimension_numbers<[1], [0], [0], [1], [0, 0, 1, 1], [], []>} : vector<1x8xf32>, vector<8x64xf32>, vector<1x64xf32> -> vector<1x64xf32>
    %21 = vector.broadcast %20 : vector<1x64xf32> to vector<16x64xf32>
    %22 = arith.subf %14, %21 : vector<16x64xf32>
    %23 = arith.mulf %22, %22 : vector<16x64xf32>
    %cst_15 = arith.constant dense<0.000000e+00> : vector<64xf32>
    %24 = vector.multi_reduction <add>, %23, %cst_15 [0] : vector<16x64xf32> to vector<64xf32>
    %25 = vector.shape_cast %24 : vector<64xf32> to vector<1x64xf32>
    %cst_16 = arith.constant dense<0.000000e+00> : vector<1x8xf32>
    %26 = tpu.matmul %25, %2, %cst_16 {dimension_numbers = #tpu.dot_dimension_numbers<[1], [0], [0], [1], [0, 0, 1, 1], [], []>} : vector<1x64xf32>, vector<64x8xf32>, vector<1x8xf32> -> vector<1x8xf32>
    %cst_17 = arith.constant 7.812500e-03 : f32
    %27 = vector.broadcast %cst_17 : f32 to vector<1x8xf32>
    %28 = arith.mulf %26, %27 : vector<1x8xf32>
    %cst_18 = arith.constant 9.99999974E-6 : f32
    %29 = vector.broadcast %cst_18 : f32 to vector<1x8xf32>
    %30 = arith.addf %28, %29 : vector<1x8xf32>
    %31 = math.rsqrt %30 : vector<1x8xf32>
    %cst_19 = arith.constant dense<0.000000e+00> : vector<1x64xf32>
    %32 = tpu.matmul %31, %3, %cst_19 {dimension_numbers = #tpu.dot_dimension_numbers<[1], [0], [0], [1], [0, 0, 1, 1], [], []>} : vector<1x8xf32>, vector<8x64xf32>, vector<1x64xf32> -> vector<1x64xf32>
    %33 = vector.broadcast %32 : vector<1x64xf32> to vector<16x64xf32>
    %34 = arith.mulf %22, %33 : vector<16x64xf32>
    %c0_20 = arith.constant 0 : index
    %c0_21 = arith.constant 0 : index
    %35 = vector.load %arg6[%c0_20, %c0_21] : memref<1x64xf32, #tpu.memory_space<vmem>>, vector<1x64xf32>
    %36 = vector.broadcast %35 : vector<1x64xf32> to vector<16x64xf32>
    %37 = arith.mulf %34, %36 : vector<16x64xf32>
    %c0_22 = arith.constant 0 : index
    %c0_23 = arith.constant 0 : index
    %38 = vector.load %arg7[%c0_22, %c0_23] : memref<1x64xf32, #tpu.memory_space<vmem>>, vector<1x64xf32>
    %39 = vector.broadcast %38 : vector<1x64xf32> to vector<16x64xf32>
    %40 = arith.addf %37, %39 : vector<16x64xf32>
    %41 = math.absf %40 : vector<16x64xf32>
    %cst_24 = arith.constant 0.000000e+00 : f32
    %42 = vector.broadcast %cst_24 : f32 to vector<16x64xf32>
    %43 = arith.subf %42, %41 : vector<16x64xf32>
    %44 = math.exp %43 : vector<16x64xf32>
    %cst_25 = arith.constant 0.000000e+00 : f32
    %45 = vector.broadcast %cst_25 : f32 to vector<16x64xf32>
    %46 = arith.cmpf oge, %40, %45 : vector<16x64xf32>
    %cst_26 = arith.constant 1.000000e+00 : f32
    %47 = vector.broadcast %cst_26 : f32 to vector<16x64xf32>
    %48 = arith.select %46, %44, %47 : vector<16x64xi1>, vector<16x64xf32>
    %cst_27 = arith.constant 1.000000e+00 : f32
    %49 = vector.broadcast %cst_27 : f32 to vector<16x64xf32>
    %50 = arith.addf %49, %44 : vector<16x64xf32>
    %51 = tpu.reciprocal %50 {approx = true} : vector<16x64xf32> -> vector<16x64xf32>
    %52 = arith.mulf %48, %51 : vector<16x64xf32>
    %53 = arith.mulf %52, %52 : vector<16x64xf32>
    %cst_28 = arith.constant 1.000000e+00 : f32
    %54 = vector.broadcast %cst_28 : f32 to vector<16x64xf32>
    %55 = arith.subf %54, %53 : vector<16x64xf32>
    %56 = arith.mulf %40, %55 : vector<16x64xf32>
    %cst_29 = arith.constant 1.000000e+00 : f32
    %57 = vector.broadcast %cst_29 : f32 to vector<16x64xf32>
    %58 = arith.addf %57, %53 : vector<16x64xf32>
    %59 = tpu.reciprocal %58 {approx = true} : vector<16x64xf32> -> vector<16x64xf32>
    %60 = arith.mulf %56, %59 : vector<16x64xf32>
    %c0_30 = arith.constant 0 : index
    %c0_31 = arith.constant 0 : index
    %61 = vector.load %arg8[%c0_30, %c0_31] : memref<64x4xf32, #tpu.memory_space<vmem>>, vector<64x4xf32>
    %cst_32 = arith.constant dense<0.000000e+00> : vector<16x4xf32>
    %62 = tpu.matmul %60, %61, %cst_32 {dimension_numbers = #tpu.dot_dimension_numbers<[1], [0], [0], [1], [0, 0, 1, 1], [], []>} : vector<16x64xf32>, vector<64x4xf32>, vector<16x4xf32> -> vector<16x4xf32>
    %c0_33 = arith.constant 0 : index
    %c0_34 = arith.constant 0 : index
    %63 = vector.load %arg9[%c0_33, %c0_34] : memref<1x4xf32, #tpu.memory_space<vmem>>, vector<1x4xf32>
    %64 = vector.broadcast %63 : vector<1x4xf32> to vector<16x4xf32>
    %65 = arith.addf %62, %64 : vector<16x4xf32>
    %c0_35 = arith.constant 0 : index
    %c0_36 = arith.constant 0 : index
    %c0_37 = arith.constant 0 : index
    %66 = vector.load %arg10[%c0_35, %c0_36, %c0_37] : memref<1x16x4xf32, #tpu.memory_space<vmem>>, vector<1x16x4xf32>
    %67 = vector.shape_cast %66 : vector<1x16x4xf32> to vector<16x4xf32>
    %68 = vector.shape_cast %65 : vector<16x4xf32> to vector<1x16x4xf32>
    tpu.vector_store %arg10[%c0_35, %c0_36, %c0_37], %68 {strides = array<i32>} : memref<1x16x4xf32, #tpu.memory_space<vmem>>, vector<1x16x4xf32>,
    return
  }
  func.func @transform_0(%arg0: i32) -> (i32, i32, i32) {
    %c0_i32 = arith.constant 0 : i32
    %c0_i32_0 = arith.constant 0 : i32
    %c0_i32_1 = arith.constant 0 : i32
    return %arg0, %c0_i32, %c0_i32_0 : i32, i32, i32
  }
  func.func @transform_1(%arg0: i32) -> (i32, i32) {
    %c0_i32 = arith.constant 0 : i32
    %c0_i32_0 = arith.constant 0 : i32
    %c0_i32_1 = arith.constant 0 : i32
    return %c0_i32, %c0_i32_0 : i32, i32
  }
  func.func @transform_2(%arg0: i32) -> (i32, i32) {
    %c0_i32 = arith.constant 0 : i32
    %c0_i32_0 = arith.constant 0 : i32
    %c0_i32_1 = arith.constant 0 : i32
    return %c0_i32, %c0_i32_0 : i32, i32
  }
  func.func @transform_3(%arg0: i32) -> (i32, i32) {
    %c0_i32 = arith.constant 0 : i32
    %c0_i32_0 = arith.constant 0 : i32
    %c0_i32_1 = arith.constant 0 : i32
    return %c0_i32, %c0_i32_0 : i32, i32
  }
  func.func @transform_4(%arg0: i32) -> (i32, i32) {
    %c0_i32 = arith.constant 0 : i32
    %c0_i32_0 = arith.constant 0 : i32
    %c0_i32_1 = arith.constant 0 : i32
    return %c0_i32, %c0_i32_0 : i32, i32
  }
  func.func @transform_5(%arg0: i32) -> (i32, i32) {
    %c0_i32 = arith.constant 0 : i32
    %c0_i32_0 = arith.constant 0 : i32
    %c0_i32_1 = arith.constant 0 : i32
    return %c0_i32, %c0_i32_0 : i32, i32
  }
  func.func @transform_6(%arg0: i32) -> (i32, i32) {
    %c0_i32 = arith.constant 0 : i32
    %c0_i32_0 = arith.constant 0 : i32
    %c0_i32_1 = arith.constant 0 : i32
    return %c0_i32, %c0_i32_0 : i32, i32
  }
  func.func @transform_7(%arg0: i32) -> (i32, i32) {
    %c0_i32 = arith.constant 0 : i32
    %c0_i32_0 = arith.constant 0 : i32
    %c0_i32_1 = arith.constant 0 : i32
    return %c0_i32, %c0_i32_0 : i32, i32
  }
  func.func @transform_8(%arg0: i32) -> (i32, i32) {
    %c0_i32 = arith.constant 0 : i32
    %c0_i32_0 = arith.constant 0 : i32
    %c0_i32_1 = arith.constant 0 : i32
    return %c0_i32, %c0_i32_0 : i32, i32
  }
  func.func @transform_9(%arg0: i32) -> (i32, i32, i32) {
    %c0_i32 = arith.constant 0 : i32
    %c0_i32_0 = arith.constant 0 : i32
    %c0_i32_1 = arith.constant 0 : i32
    return %arg0, %c0_i32, %c0_i32_0 : i32, i32, i32
  }
}

</mosaic_0001>

<bundles_post_ra>
// kernel: forward.13
= control target key start
LH: loop header
LB: loop body
LE: loop exit
PB: predicated region body
PF: predicated region fallthrough
CT: control target
= control target key end

     0   :  { %8 = vsyncpa [#allocation3], 0  ;;  %s501_s12 = smov 0   ;;  %s648_s0 = inlined_call_operand.vmem [shape: f32[2,16,64], index: 0, kind: input, shape index: {}]   ;;  %s649_s1 = inlined_call_operand.vmem [shape: f32[192,64], index: 1, kind: input, shape index: {}]   ;;  %s650_s2 = inlined_call_operand.hbm [shape: f32[1,64], index: 2, kind: input, shape index: {}]   ;;  %s651_s3 = inlined_call_operand.vmem [shape: f32[2,8,64], index: 3, kind: output, shape index: {}]  }
   0x1 LB: > { %s507_s13 = sadd.s32 4294967295, %s476_s12   ;;  %p367_p0 = scmp.ge.s32.totalorder %s476_s12, 1  ;;  %s476_s12 = sphi %s501_s12, %s14_s12  }
   0x2   : > { %p113_p1 = scmp.lt.s32.totalorder %s476_s12, 3  ;;  %p652_p3 = scmp.eq.s32.totalorder %s507_s13, 0 }
   0x3   : > { %s478_s15 = smov [#allocation2]   ;;  %s438_s20 = scalar_lea.hbm %s650_s2, 16 }
   0x4   : > { %p511_p2 = pnand %p367_p0, %p113_p1  ;;  %s129_s16 = sshll.u32 %s478_s15, 4  ;;  %s130_s16 = int_to_ptr.vmem [resolvable:$true] %s129_s16 }
   0x5   : > { %p439_p6 = scmp.ne.s32.totalorder %s650_s2, %s438_s20  ;;  %p445_p10 = scmp.lt.u32.totalorder %s438_s20, %s650_s2 }
   0x6   : > { %s654_s14 = scalar_select %p511_p2, 1, 0 }
   0x7   : > { %p421_p4 = pneg %p511_p2 }
   0x9   : > { %p520_p5 = pnand %p652_p3, %p421_p4 }
   0xb   : > { %p440_p7 = pneg %p520_p5 }
   0xd   : > { %p441_p8 = pnand %p440_p7, %p439_p6 }
   0xf   : > { %p442_p9 = pneg %p441_p8 }
  0x11   : > { %p447_p11 = pnand %p445_p10, %p442_p9 }
  0x13   : > { %450 = shalt.err (!%p447_p11)
}
  0x14   : > { %s451_s25 = scalar_lea.vmem %s130_s16, 16  ;;  %s458_s26 = scalar_lea.vmem %s130_s16, 32 }
  0x15   : > { %p452_p12 = scmp.ne.s32.totalorder %s130_s16, %s451_s25  ;;  %p459_p1 = scmp.lt.s32.totalorder %s130_s16, %s130_s16 }
  0x16   : > { %p460_p4 = scmp.lt.s32.totalorder %s458_s26, %s451_s25 }
  0x17   : > { %p454_p13 = pnand %p452_p12, %p440_p7 }
  0x18   : > { %p461_p3 = por %p460_p4, %p459_p1 }
  0x19   : > { %p455_p0 = pneg %p454_p13 }
  0x1b   : > { %p462_p2 = pnand %p461_p3, %p455_p0 }
  0x1d   : > { %465 = shalt.err (!%p462_p2)
}
  0x1e   : > { %424 = dma.hbm_to_vmem [thread:$0]  (!%p520_p5), %s650_s2, 16, %s130_s16, [#allocation3]  }
  0x1f   : > { %p656_p6 = scmp.ne.s32.totalorder %s654_s14, 0 }
  0x20   : > { %p657_p8 = scmp.eq.s32.totalorder (!%p656_p6), %s507_s13, 0 }
  0x21   : > { %150 = sbr.rel (%p656_p6) target bundleno = 378 (0x17a), region = 32 }
  0x28   : > { %471 = dma.done.wait (%p657_p8), [#allocation3], 16   ;;  %p658_p7 = pmov %p657_p8 }
  0x29   : > { %p173_p9 = scmp.lt.s32.totalorder %s507_s13, 1  ;;  %v479_v0 = vmov 0.0|0.0   ;;  %v196_v2 = vld [vmem:[%s649_s1] sm:$0xff]  ;;  %v197_v3 = vld [vmem:[%s649_s1 + $0x8] sm:$0xff]  ;;  %s480_s10 = smov 64   ;;  %v198_v5 = vld [vmem:[%s649_s1 + $0x10] sm:$0xff] }
  0x2a   : > { %473 = vsyncadd (%p658_p7), [#allocation3], 4294967280  ;;  %381 = vmatprep.subr.bf16.mxu0 %v479_v0  ;;  %v382_v4 = vpack.c.bf16 %v197_v3, %v196_v2  ;;  %v199_v6 = vld [vmem:[%s649_s1 + $0x18] sm:$0xff]  ;;  %v200_v8 = vld [vmem:[%s649_s1 + $0x20] sm:$0xff]  ;;  %vm194_vm0 = vcmask 523264   ;;  %vm188_vm1 = vcmask 1040384  }
  0x2b   : > { %s660_s13 = smov (!%p173_p9, %s507_s13), 1  ;;  %v385_v7 = vpack.c.bf16 %v199_v6, %v198_v5  ;;  %v201_v9 = vld [vmem:[%s649_s1 + $0x28] sm:$0xff]  ;;  %v202_v11 = vld [vmem:[%s649_s1 + $0x30] sm:$0xff]  ;;  %v203_v12 = vld [vmem:[%s649_s1 + $0x38] sm:$0xff] }
  0x2c   : > { %s380_s29 = sshll.u32 %s660_s13, 4  ;;  %383 = vmatpush1.bf16.msra.mxu0 %v382_v4  ;;  %v388_v10 = vpack.c.bf16 %v201_v9, %v200_v8  ;;  %v391_v14 = vpack.c.bf16 %v203_v12, %v202_v11  ;;  %v204_v15 = vld [vmem:[%s649_s1 + $0x40] sm:$0xff]  ;;  %v205_v16 = vld [vmem:[%s649_s1 + $0x48] sm:$0xff]  ;;  %v206_v18 = vld [vmem:[%s649_s1 + $0x50] sm:$0xff] }
  0x2d   : > { %s177_s5 = scalar_lea.vmem %s648_s0, %s380_s29  ;;  %384 = vmatprep.subr.bf16.mxu0 %v479_v0  ;;  %v394_v17 = vpack.c.bf16 %v205_v16, %v204_v15  ;;  %v207_v19 = vld [vmem:[%s649_s1 + $0x58] sm:$0xff]  ;;  %v208_v21 = vld [vmem:[%s649_s1 + $0x60] sm:$0xff]  ;;  %v209_v22 = vld [vmem:[%s649_s1 + $0x68] sm:$0xff] }
  0x2e   : > { %v182_v1 = vld [vmem:[%s177_s5] ss:$2 sm:$0xff]  ;;  %v375_v13 = vld [vmem:[%s177_s5 + $0x1] ss:$2 sm:$0xff]  ;;  %v397_v20 = vpack.c.bf16 %v207_v19, %v206_v18  ;;  %v400_v23 = vpack.c.bf16 %v209_v22, %v208_v21  ;;  %v210_v24 = vld [vmem:[%s649_s1 + $0x70] sm:$0xff]  ;;  %s374_s5 = sshll.u32 %s660_s13, 3 }
  0x2f   : > { %191 = vrot.lane.b32.xlu0 %v182_v1, %s480_s10  ;;  %377 = vmatprep.mubr.msk.f32.mxu0 %vm194_vm0, %v375_v13  ;;  %v211_v25 = vld [vmem:[%s649_s1 + $0x78] sm:$0xff]  ;;  %v212_v27 = vld [vmem:[%s649_s1 + $0x80] sm:$0xff]  ;;  %v213_v28 = vld [vmem:[%s649_s1 + $0x88] sm:$0xff]  ;;  %v186_v39 = vrot.slane %v375_v13, 7  ;;  %s181_s8 = scalar_lea.vmem %s651_s3, %s374_s5 }
  0x30   : > { %386 = vmatpush1.bf16.msra.mxu0 %v385_v7  ;;  %v403_v26 = vpack.c.bf16 %v211_v25, %v210_v24  ;;  %v406_v29 = vpack.c.bf16 %v213_v28, %v212_v27  ;;  %v214_v30 = vld [vmem:[%s649_s1 + $0x90] sm:$0xff]  ;;  %v215_v31 = vld [vmem:[%s649_s1 + $0x98] sm:$0xff]  ;;  %v216_v33 = vld [vmem:[%s649_s1 + $0xa0] sm:$0xff] }
  0x31   : > { %387 = vmatprep.subr.bf16.mxu0 %v479_v0  ;;  %v409_v32 = vpack.c.bf16 %v215_v31, %v214_v30  ;;  %v217_v34 = vld [vmem:[%s649_s1 + $0xa8] sm:$0xff]  ;;  %v218_v36 = vld [vmem:[%s649_s1 + $0xb0] sm:$0xff]  ;;  %v219_v37 = vld [vmem:[%s649_s1 + $0xb8] sm:$0xff]  ;;  %v189_v40 = vsel %vm188_vm1, 0.0, %v186_v39 }
  0x32   : > { %v412_v35 = vpack.c.bf16 %v217_v34, %v216_v33  ;;  %v415_v38 = vpack.c.bf16 %v219_v37, %v218_v36  ;;  %v376_v43 = vld [vmem:[#allocation2] ss:$0 sm:$0xff] }
  0x34   : > { %389 = vmatpush1.bf16.msra.mxu0 %v388_v10 }
  0x35   : > { %390 = vmatprep.subr.bf16.mxu0 %v479_v0 }
  0x38   : > { %392 = vmatpush1.bf16.msra.mxu0 %v391_v14 }
  0x39   : > { %393 = vmatprep.subr.bf16.mxu0 %v479_v0 }
  0x3c   : > { %395 = vmatpush1.bf16.msra.mxu0 %v394_v17 }
  0x3d   : > { %396 = vmatprep.subr.bf16.mxu0 %v479_v0 }
  0x40   : > { %398 = vmatpush1.bf16.msra.mxu0 %v397_v20 }
  0x41   : > { %399 = vmatprep.subr.bf16.mxu0 %v479_v0 }
  0x44   : > { %401 = vmatpush1.bf16.msra.mxu0 %v400_v23 }
  0x45   : > { %402 = vmatprep.subr.bf16.mxu0 %v479_v0 }
  0x48   : > { %404 = vmatpush1.bf16.msra.mxu0 %v403_v26 }
  0x49   : > { %405 = vmatprep.subr.bf16.mxu0 %v479_v0 }
  0x4c   : > { %407 = vmatpush1.bf16.msra.mxu0 %v406_v29 }
  0x4d   : > { %408 = vmatprep.subr.bf16.mxu0 %v479_v0 }
  0x50   : > { %410 = vmatpush1.bf16.msra.mxu0 %v409_v32 }
  0x51   : > { %411 = vmatprep.subr.bf16.mxu0 %v479_v0 }
  0x54   : > { %413 = vmatpush1.bf16.msra.mxu0 %v412_v35 }
  0x55   : > { %414 = vmatprep.subr.bf16.mxu0 %v479_v0 }
  0x58   : > { %416 = vmatpush1.bf16.msra.mxu0 %v415_v38 }
  0xa1   : > { %v192_v41 = vpop.permute.xlu0 %191 }
  0xa2   : > { %v195_v42 = vsel %vm194_vm0, %v189_v40, %v192_v41 }
  0xa3   : > { %294 = vmatmul.mubr.f32.vlgmr.msra.gmra.mrb[0].mxu0 %v195_v42 }
 0x176   : > { %v295_v44 = vpop.f32.mrb[0].mxu0 }
 0x177   : > { %v296_v45 = vadd.f32 %v376_v43, %v295_v44  ;;  %v297_v46 = vpop.f32.mrb[1].mxu0 }
 0x179   : > { %299 = vst.msk [vmem:[%s181_s8] sm:$0xff] %vm194_vm0, %v296_v45 }
 0x17a PF: > { %s14_s12 = sadd.s32 1, %s476_s12  }
 0x17b   : > { %p11_p2 = scmp.ge.s32.totalorder %s14_s12, 4  }
 0x17d   :  { %13 = sbr.rel (!%p11_p2) target bundleno = 1 (0x1), region = 68 }
 0x184   :  { %319 = vsyncpa [#allocation3], 1 }
 0x185   :  { %321 = vsyncpa [#allocation3 + $0x1], 1 }

// kernel: forward.11
= control target key start
LH: loop header
LB: loop body
LE: loop exit
PB: predicated region body
PF: predicated region fallthrough
CT: control target
= control target key end

     0   :  { %s2782_s0 = inlined_call_operand.vmem [shape: f32[2,16,4], index: 0, kind: input, shape index: {}]   ;;  %s2783_s1 = inlined_call_operand.vmem [shape: f32[2,1,80], index: 1, kind: input, shape index: {}]   ;;  %s2784_s2 = inlined_call_operand.vmem [shape: f32[64,8], index: 2, kind: input, shape index: {}]   ;;  %s2785_s3 = inlined_call_operand.vmem [shape: f32[8,64], index: 3, kind: input, shape index: {}]   ;;  %s2786_s4 = inlined_call_operand.vmem [shape: f32[12,64], index: 4, kind: input, shape index: {}]   ;;  %s2787_s5 = inlined_call_operand.hbm [shape: f32[1,64], index: 5, kind: input, shape index: {}]   ;;  %s2788_s6 = inlined_call_operand.vmem [shape: f32[1,64], index: 6, kind: input, shape index: {}]   ;;  %s2789_s7 = inlined_call_operand.vmem [shape: f32[1,64], index: 7, kind: input, shape index: {}]   ;;  %s2790_s8 = inlined_call_operand.vmem [shape: f32[80,64], index: 8, kind: input, shape index: {}]   ;;  %s2791_s9 = inlined_call_operand.vmem [shape: f32[1,64], index: 9, kind: input, shape index: {}]   ;;  %s2792_s10 = inlined_call_operand.vmem [shape: f32[192,64], index: 10, kind: input, shape index: {}]   ;;  %s2793_s11 = inlined_call_operand.vmem [shape: f32[1,64], index: 11, kind: input, shape index: {}]   ;;  %s2794_s12 = inlined_call_operand.vmem [shape: f32[1,64], index: 12, kind: input, shape index: {}]   ;;  %s2795_s13 = inlined_call_operand.vmem [shape: f32[1,64], index: 13, kind: input, shape index: {}]   ;;  %s2796_s14 = inlined_call_operand.vmem [shape: f32[4,64], index: 14, kind: input, shape index: {}]   ;;  %s2797_s15 = inlined_call_operand.vmem [shape: f32[1,64], index: 15, kind: input, shape index: {}]   ;;  %s2798_s16 = inlined_call_operand.vmem [shape: f32[2,16,64], index: 16, kind: output, shape index: {}]  }
   0x1   :  { %2801 = sst [smem:[#allocation5_spill]] %s2782_s0 }
   0x2   :  { %21 = vsyncpa [#allocation3], 0  ;;  %s2398_s21 = smov 0  }
   0x3 LB: > { %s2404_s22 = sadd.s32 4294967295, %s2303_s21   ;;  %p1870_p0 = scmp.ge.s32.totalorder %s2303_s21, 1  ;;  %s2303_s21 = sphi %s2398_s21, %s27_s21  }
   0x4   : > { %p404_p1 = scmp.lt.s32.totalorder %s2303_s21, 3  ;;  %p2799_p3 = scmp.eq.s32.totalorder %s2404_s22, 0 }
   0x5   : > { %s2305_s24 = smov [#allocation2]   ;;  %s2265_s29 = scalar_lea.hbm %s2787_s5, 16 }
   0x6   : > { %p2408_p2 = pnand %p1870_p0, %p404_p1  ;;  %s426_s25 = sshll.u32 %s2305_s24, 4  ;;  %s427_s25 = int_to_ptr.vmem [resolvable:$true] %s426_s25 }
   0x7   : > { %p2266_p6 = scmp.ne.s32.totalorder %s2787_s5, %s2265_s29  ;;  %p2272_p10 = scmp.lt.u32.totalorder %s2265_s29, %s2787_s5 }
   0x8   : > { %s2802_s23 = scalar_select %p2408_p2, 1, 0 }
   0x9   : > { %p2209_p4 = pneg %p2408_p2 }
   0xb   : > { %p2417_p5 = pnand %p2799_p3, %p2209_p4 }
   0xd   : > { %p2267_p7 = pneg %p2417_p5 }
   0xf   : > { %p2268_p8 = pnand %p2267_p7, %p2266_p6 }
  0x11   : > { %p2269_p9 = pneg %p2268_p8 }
  0x13   : > { %p2274_p11 = pnand %p2272_p10, %p2269_p9 }
  0x15   : > { %2277 = shalt.err (!%p2274_p11)
}
  0x16   : > { %s2278_s19 = scalar_lea.vmem %s427_s25, 16  ;;  %s2285_s20 = scalar_lea.vmem %s427_s25, 32 }
  0x17   : > { %p2279_p12 = scmp.ne.s32.totalorder %s427_s25, %s2278_s19  ;;  %p2286_p1 = scmp.lt.s32.totalorder %s427_s25, %s427_s25 }
  0x18   : > { %p2287_p4 = scmp.lt.s32.totalorder %s2285_s20, %s2278_s19 }
  0x19   : > { %p2281_p13 = pnand %p2279_p12, %p2267_p7 }
  0x1a   : > { %p2288_p3 = por %p2287_p4, %p2286_p1 }
  0x1b   : > { %p2282_p0 = pneg %p2281_p13 }
  0x1d   : > { %p2289_p2 = pnand %p2288_p3, %p2282_p0 }
  0x1f   : > { %2292 = shalt.err (!%p2289_p2)
}
  0x20   : > { %2212 = dma.hbm_to_vmem [thread:$0]  (!%p2417_p5), %s2787_s5, 16, %s427_s25, [#allocation3]  }
  0x21   : > { %p2804_p6 = scmp.ne.s32.totalorder %s2802_s23, 0 }
  0x22   : > { %p2805_p8 = scmp.eq.s32.totalorder (!%p2804_p6), %s2404_s22, 0 }
  0x23   : > { %483 = sbr.rel (%p2804_p6) target bundleno = 2657 (0xa61), region = 84 }
  0x2a   : > { %2298 = dma.done.wait (%p2805_p8), [#allocation3], 16   ;;  %p2806_p7 = pmov %p2805_p8 }
  0x2b   : > { %p536_p9 = scmp.lt.s32.totalorder %s2404_s22, 1  ;;  %s2807_s29 = sld [smem:[#allocation5_spill]]  ;;  %vm720_vm0 = vcmask 1043456   ;;  %vm663_vm1 = vcmask 1040384   ;;  %v704_v2 = vld [vmem:[%s2786_s4] sm:$0xff]  ;;  %vm2306_vm2 = vmmov 1  }
  0x2c   : > { %2300 = vsyncadd (%p2806_p7), [#allocation3], 4294967280  ;;  %v705_v5 = vld [vmem:[%s2786_s4 + $0x8] sm:$0xf]  ;;  %vm674_vm4 = vcmask 1046528   ;;  %vm686_vm5 = vcmask 1045504  }
  0x2d   : > { %s2809_s22 = smov (!%p536_p9, %s2404_s22), 1  ;;  %vm2116_vm3 = vmpackc.low %vm720_vm0, %vm2306_vm2  ;;  %v2115_v6 = vpack.c.bf16 %v705_v5, %v704_v2  ;;  %s2307_s19 = smov 4   ;;  %vm698_vm6 = vcmask 31744   ;;  %vm701_vm7 = vcmask 64512   ;;  %vm713_vm8 = vcmask 97280   ;;  %v551_v28 = vld [vmem:[%s2784_s2] sm:$0xff] }
  0x2e   : > { %s1905_s26 = sshll.u32 %s2809_s22, 4  ;;  %s2308_s20 = smov 8   ;;  %v552_v29 = vld [vmem:[%s2784_s2 + $0x8] sm:$0xff]  ;;  %v2309_v31 = vmov 0.0|0.0   ;;  %v553_v32 = vld [vmem:[%s2784_s2 + $0x10] sm:$0xff]  ;;  %v554_v33 = vld [vmem:[%s2784_s2 + $0x18] sm:$0xff] }
  0x2f   : > { %2117 = vmatprep.subr.msk.bf16.mxu1 %vm2116_vm3, %v2115_v6  ;;  %v2483_v30 = vpack.c.bf16 %v552_v29, %v551_v28  ;;  %2100 = vmatprep.subr.bf16.mxu0 %v2309_v31  ;;  %v2495_v34 = vpack.c.bf16 %v554_v33, %v553_v32  ;;  %v555_v35 = vld [vmem:[%s2784_s2 + $0x20] sm:$0xff]  ;;  %v556_v36 = vld [vmem:[%s2784_s2 + $0x28] sm:$0xff]  ;;  %v557_v38 = vld [vmem:[%s2784_s2 + $0x30] sm:$0xff]  ;;  %vm2310_vm9 = vmmov 0   ;;  %v2311_v41 = vmov 0.0   ;;  %s543_s24 = scalar_lea.vmem %s2783_s1, %s2809_s22 }
  0x30   : > { %2120 = vmatpush3.bf16.msk.msra.mxu1 %vm2116_vm3, %v2115_v6  ;;  %v2505_v37 = vpack.c.bf16 %v556_v36, %v555_v35  ;;  %v558_v39 = vld [vmem:[%s2784_s2 + $0x38] sm:$0xff]  ;;  %1989 = vmatprep.mubr.msk.f32.mxu0 %vm2310_vm9, %v2311_v41  ;;  %v576_v42 = vld [vmem:[%s2790_s8] sm:$0xff]  ;;  %v577_v43 = vld [vmem:[%s2790_s8 + $0x8] sm:$0xff]  ;;  %vm587_vm11 = vcmask 654336   ;;  %vm799_vm12 = vcmask 523264   ;;  %v956_v32 = vlaneseq }
  0x31   : > { %s540_s23 = scalar_lea.vmem %s2807_s29, %s1905_s26  ;;  %2121 = vmatprep.subr.bf16.mxu1 %v2309_v31  ;;  %v2515_v40 = vpack.c.bf16 %v558_v39, %v557_v38  ;;  %v578_v44 = vld [vmem:[%s2790_s8 + $0x10] sm:$0xff]  ;;  %v2101_v45 = vpack.c.bf16 %v577_v43, %v576_v42  ;;  %v579_v46 = vld [vmem:[%s2790_s8 + $0x18] sm:$0xff]  ;;  %v560_v48 = vld [vmem:[%s543_s24] sm:$0x1]  ;;  %s548_s24 = scalar_lea.vmem %s2798_s16, %s1905_s26 }
  0x32   : > { %v2453_v0 = vld [vmem:[%s540_s23] sm:$0xff]  ;;  %v2455_v1 = vld [vmem:[%s540_s23 + $0x8] sm:$0xff]  ;;  %v2104_v47 = vpack.c.bf16 %v579_v46, %v578_v44  ;;  %v561_v51 = vand.u32 2147483647, %v560_v48  ;;  %v582_v54 = vld [vmem:[%s2790_s8 + $0x30] sm:$0xff]  ;;  %vm565_vm10 = vcmp.ge.f32.partialorder %v560_v48, 0.0 }
  0x33   : > { %v664_v3 = vrot.slane %v2453_v0, 7  ;;  %v665_v4 = vrot.slane %v2455_v1, 7  ;;  %2102 = vmatpush3.bf16.msra.mxu0 %v2101_v45  ;;  %v580_v49 = vld [vmem:[%s2790_s8 + $0x20] sm:$0xff]  ;;  %v581_v50 = vld [vmem:[%s2790_s8 + $0x28] sm:$0xff]  ;;  %v583_v55 = vld [vmem:[%s2790_s8 + $0x38] sm:$0xff]  ;;  %v957_v33 = vshrl.u32 %v956_v32, 7 }
  0x34   : > { %2103 = vmatprep.subr.bf16.mxu0 %v2309_v31  ;;  %v562_v52 = vsub.f32 0.0, %v561_v51  ;;  %v2107_v53 = vpack.c.bf16 %v581_v50, %v580_v49  ;;  %v2110_v57 = vpack.c.bf16 %v583_v55, %v582_v54  ;;  %v584_v58 = vld [vmem:[%s2790_s8 + $0x40] sm:$0xff]  ;;  %v585_v59 = vld [vmem:[%s2790_s8 + $0x48] sm:$0xff] }
  0x35   : > { %v666_v7 = vsel %vm663_vm1, %v664_v3, %v665_v4  ;;  %v670_v8 = vsel %vm663_vm1, 0.0, %v664_v3  ;;  %v671_v9 = vsel %vm663_vm1, %v665_v4, 0.0  ;;  %v2113_v60 = vpack.c.bf16 %v585_v59, %v584_v58  ;;  %v1232_v32 = vld [vmem:[%s2792_s10 + $0xa0] sm:$0xff] }
  0x36   : > { %v675_v10 = vrot.slane %v670_v8, 1  ;;  %v676_v11 = vrot.slane %v666_v7, 1  ;;  %v687_v12 = vrot.slane %v670_v8, 2  ;;  %v688_v13 = vrot.slane %v666_v7, 2 }
  0x37   : > { %v678_v14 = vrot.slane %v671_v9, 1  ;;  %v690_v15 = vrot.slane %v671_v9, 2  ;;  %2105 = vmatpush3.bf16.msra.mxu0 %v2104_v47  ;;  %v563_v56 = vmul.f32 1.442695, %v562_v52  ;;  %v2591_v35 = vsub.s32 0, %v957_v33  ;;  %v1233_v33 = vld [vmem:[%s2792_s10 + $0xa8] sm:$0xff] }
  0x38   : > { %v677_v16 = vsel %vm674_vm4, %v675_v10, %v676_v11  ;;  %v689_v17 = vsel %vm686_vm5, %v687_v12, %v688_v13  ;;  %2106 = vmatprep.subr.bf16.mxu0 %v2309_v31  ;;  %v2565_v10 = vld [vmem:[%s2785_s3] sm:$0xff] }
  0x39   : > { %680 = vrot.lane.b32.xlu0 %v677_v16, %s2307_s19  ;;  %692 = vrot.lane.b32.xlu1 %v689_v17, %s2308_s20  ;;  %v679_v18 = vsel %vm674_vm4, %v676_v11, %v678_v14  ;;  %v691_v19 = vsel %vm686_vm5, %v688_v13, %v690_v15  ;;  %2231 = vpow2.f32 %v563_v56  ;;  %v1880_v11 = vld [vmem:[#allocation2] ss:$0 sm:$0xff] }
  0x3b   : > { %2108 = vmatpush3.bf16.msra.mxu0 %v2107_v53 }
  0x3c   : > { %2109 = vmatprep.subr.bf16.mxu0 %v2309_v31 }
  0x3d   : > { %682 = vrot.lane.b32.xlu0 %v679_v18, %s2307_s19  ;;  %694 = vrot.lane.b32.xlu1 %v691_v19, %s2308_s20  ;;  %s2312_s20 = smov 64  }
  0x3f   : > { %2111 = vmatpush3.bf16.msra.mxu0 %v2110_v57 }
  0x40   : > { %2112 = vmatprep.subr.bf16.mxu0 %v2309_v31 }
  0x43   : > { %2114 = vmatpush3.bf16.msra.mxu0 %v2113_v60  ;;  %v2232_v61 = vpop.eup %2231  ;;  %v1212_v60 = vld [vmem:[%s2792_s10] sm:$0xff] }
  0x44   : > { %2018 = vmatprep.subr.mxu0 %v2311_v41  ;;  %v567_v62 = vadd.f32 1.0, %v2232_v61  ;;  %v566_v63 = vsel %vm565_vm10, %v2232_v61, 1.0  ;;  %v1213_v61 = vld [vmem:[%s2792_s10 + $0x8] sm:$0xff] }
  0x46   : > { %2233 = vrcp.f32 %v567_v62  ;;  %v1214_v62 = vld [vmem:[%s2792_s10 + $0x10] sm:$0xff] }
  0x50   : > { %v2234_v2 = vpop.eup %2233 }
  0x51   : > { %v569_v3 = vmul.f32 %v2234_v2, %v566_v63  ;;  %v2146_v63 = vpack.c.bf16 %v1213_v61, %v1212_v60  ;;  %v1215_v2 = vld [vmem:[%s2792_s10 + $0x18] sm:$0xff] }
  0x53   : > { %v570_v4 = vmul.f32 %v569_v3, %v569_v3  ;;  %v2149_v3 = vpack.c.bf16 %v1215_v2, %v1214_v62 }
  0x55   : > { %v573_v5 = vadd.f32 1.0, %v570_v4  ;;  %v571_v6 = vsub.f32 1.0, %v570_v4  ;;  %v1216_v4 = vld [vmem:[%s2792_s10 + $0x20] sm:$0xff] }
  0x57   : > { %2235 = vrcp.f32 %v573_v5  ;;  %v1217_v5 = vld [vmem:[%s2792_s10 + $0x28] sm:$0xff] }
  0xab   : > { %v681_v20 = vpop.permute.xlu0 %680  ;;  %v693_v21 = vpop.permute.xlu1 %692 }
  0xac   : > { %v699_v22 = vsel %vm698_vm6, %v670_v8, %v681_v20  ;;  %v2236_v8 = vpop.eup %2235 }
  0xad   : > { %v702_v23 = vsel %vm701_vm7, %v699_v22, %v693_v21 }
  0xae   : > { %1996 = vmatprep.mubr.msk.f32.mxu1 %vm713_vm8, %v702_v23 }
  0xaf   : > { %v683_v24 = vpop.permute.xlu0 %682  ;;  %v695_v25 = vpop.permute.xlu1 %694 }
  0xb0   : > { %v700_v26 = vsel %vm698_vm6, %v666_v7, %v683_v24  ;;  %v572_v7 = vmul.f32 %v571_v6, %v560_v48  ;;  %v2152_v6 = vpack.c.bf16 %v1217_v5, %v1216_v4 }
  0xb1   : > { %v703_v27 = vsel %vm701_vm7, %v700_v26, %v695_v25 }
  0xb2   : > { %1997 = vmatmul.mubr.msk.f32.vlgmr.msra.gmra.mrb[0].mxu1 %vm713_vm8, %v703_v27  ;;  %v575_v9 = vmul.f32 %v2236_v8, %v572_v7  ;;  %v1218_v7 = vld [vmem:[%s2792_s10 + $0x30] sm:$0xff]  ;;  %v1219_v8 = vld [vmem:[%s2792_s10 + $0x38] sm:$0xff] }
  0xb3   : > { %2123 = vmatpush3.bf16.msra.mxu1 %v2483_v30  ;;  %2015 = vmatprep.mubr.msk.f32.mxu1 %vm2310_vm9, %v2311_v41 }
  0xb4   : > { %2124 = vmatprep.subr.bf16.mxu1 %v2309_v31  ;;  %1990 = vmatmul.mubr.msk.f32.vlgmr.msra.gmra.mrb[0].mxu0 %vm587_vm11, %v575_v9  ;;  %v2155_v9 = vpack.c.bf16 %v1219_v8, %v1218_v7 }
  0xb5   : > { %2019 = vmatpush3.msra.mxu0 %v2565_v10  ;;  %2020 = vmatprep.mubr.msk.f32.mxu0 %vm2310_vm9, %v2311_v41 }
  0xb6   : > { %2042 = vmatprep.subr.mxu0 %v2311_v41 }
  0xb7   : > { %2126 = vmatpush3.bf16.msra.mxu1 %v2495_v34 }
  0xb8   : > { %2127 = vmatprep.subr.bf16.mxu1 %v2309_v31 }
  0xbb   : > { %2129 = vmatpush3.bf16.msra.mxu1 %v2505_v37 }
  0xbc   : > { %2130 = vmatprep.subr.bf16.mxu1 %v2309_v31 }
  0xbf   : > { %2132 = vmatpush3.bf16.msra.mxu1 %v2515_v40 }
  0xc0   : > { %2133 = vmatprep.subr.bf16.mxu1 %v2309_v31 }
 0x185   : > { %v1998_v12 = vpop.f32.mrb[0].mxu1 }
 0x186   : > { %v796_v13 = vadd.f32 %v1998_v12, %v1880_v11  ;;  %v790_v14 = vpop.f32.mrb[1].mxu1  ;;  %v1221_v12 = vld [vmem:[%s2792_s10 + $0x48] sm:$0xff] }
 0x187   : > { %v791_v15 = vadd.f32 %v1880_v11, %v790_v14  ;;  %v2584_v25 = vpop.f32.mrb[0].mxu0  ;;  %v1220_v11 = vld [vmem:[%s2792_s10 + $0x40] sm:$0xff]  ;;  %v1222_v14 = vld [vmem:[%s2792_s10 + $0x50] sm:$0xff] }
 0x188   : > { %v801_v16 = vsel %vm799_vm12, %v796_v13, 0.0  ;;  %v1991_v26 = vpop.f32.mrb[1].mxu0 }
 0x189   : > { %v800_v17 = vsel %vm799_vm12, %v791_v15, 0.0 }
 0x18a   : > { %v802_v18 = vadd.f32 %v801_v16, %v800_v17  ;;  %v1224_v17 = vld [vmem:[%s2792_s10 + $0x60] sm:$0xff] }
 0x18c   : > { %v803_v19 = vrot.slane %v802_v18, 4 }
 0x18e   : > { %v804_v20 = vadd.f32 %v803_v19, %v802_v18  ;;  %v1225_v18 = vld [vmem:[%s2792_s10 + $0x68] sm:$0xff] }
 0x18f   : > { %v2164_v19 = vpack.c.bf16 %v1225_v18, %v1224_v17 }
 0x190   : > { %v805_v21 = vrot.slane %v804_v20, 2 }
 0x192   : > { %v806_v22 = vadd.f32 %v805_v21, %v804_v20  ;;  %v1226_v20 = vld [vmem:[%s2792_s10 + $0x70] sm:$0xff]  ;;  %v1227_v21 = vld [vmem:[%s2792_s10 + $0x78] sm:$0xff] }
 0x194   : > { %v807_v23 = vrot.slane %v806_v22, 1 }
 0x196   : > { %v808_v24 = vadd.f32 %v807_v23, %v806_v22  ;;  %v2167_v22 = vpack.c.bf16 %v1227_v21, %v1226_v20  ;;  %v1228_v23 = vld [vmem:[%s2792_s10 + $0x80] sm:$0xff] }
 0x198   : > { %2016 = vmatmul.mubr.msk.f32.vlgmr.msra.gmra.mrb[2].mxu1 %vm799_vm12, %v808_v24  ;;  %v1229_v24 = vld [vmem:[%s2792_s10 + $0x88] sm:$0xff] }
 0x199   : > { %2135 = vmatpush3.bf16.msra.mxu1 %v2483_v30  ;;  %2039 = vmatprep.mubr.msk.f32.mxu1 %vm2310_vm9, %v2311_v41  ;;  %v2170_v26 = vpack.c.bf16 %v1229_v24, %v1228_v23 }
 0x19a   : > { %2136 = vmatprep.subr.bf16.mxu1 %v2309_v31 }
 0x19d   : > { %2138 = vmatpush3.bf16.msra.mxu1 %v2495_v34 }
 0x19e   : > { %2139 = vmatprep.subr.bf16.mxu1 %v2309_v31 }
 0x1a1   : > { %2141 = vmatpush3.bf16.msra.mxu1 %v2505_v37 }
 0x1a2   : > { %2142 = vmatprep.subr.bf16.mxu1 %v2309_v31 }
 0x1a5   : > { %2144 = vmatpush3.bf16.msra.mxu1 %v2515_v40 }
 0x1a6   : > { %2181 = vmatprep.subr.bf16.mxu1 %v2309_v31 }
 0x26b   : > { %v878_v27 = vpop.f32.mrb[2].mxu1 }
 0x26c   : > { %v882_v28 = vmul.f32 0.0078125, %v878_v27  ;;  %v2017_v29 = vpop.f32.mrb[3].mxu1  ;;  %v1230_v27 = vld [vmem:[%s2792_s10 + $0x90] sm:$0xff] }
 0x26e   : > { %2021 = vmatmul.mubr.msk.f32.vlgmr.msra.gmra.mrb[2].mxu0 %vm701_vm7, %v882_v28  ;;  %v1231_v28 = vld [vmem:[%s2792_s10 + $0x98] sm:$0xff] }
 0x26f   : > { %2043 = vmatpush3.msra.mxu0 %v2565_v10  ;;  %2044 = vmatprep.mubr.msk.f32.mxu0 %vm2310_vm9, %v2311_v41  ;;  %v2173_v29 = vpack.c.bf16 %v1231_v28, %v1230_v27 }
 0x270   : > { %2145 = vmatprep.subr.bf16.mxu0 %v2309_v31 }
 0x341   : > { %v952_v36 = vpop.f32.mrb[2].mxu0 }
 0x342   : > { %v959_v38 = vrot.slane %v952_v36, %v2591_v35  ;;  %v2022_v39 = vpop.f32.mrb[3].mxu0  ;;  %v2176_v36 = vpack.c.bf16 %v1233_v33, %v1232_v32 }
 0x343   : > { %v1235_v39 = vld [vmem:[%s2792_s10 + $0xb8] sm:$0xff] }
 0x344   : > { %v2594_v42 = vsub.f32 %v791_v15, %v959_v38  ;;  %v2596_v43 = vsub.f32 %v796_v13, %v959_v38  ;;  %v2158_v13 = vpack.c.bf16 %v1221_v12, %v1220_v11  ;;  %v1223_v15 = vld [vmem:[%s2792_s10 + $0x58] sm:$0xff]  ;;  %v1234_v38 = vld [vmem:[%s2792_s10 + $0xb0] sm:$0xff] }
 0x345   : > { %v2161_v16 = vpack.c.bf16 %v1223_v15, %v1222_v14 }
 0x346   : > { %v962_v44 = vmul.f32 %v2594_v42, %v2594_v42  ;;  %v963_v45 = vmul.f32 %v2596_v43, %v2596_v43 }
 0x348   : > { %v964_v46 = vsel %vm799_vm12, %v962_v44, 0.0  ;;  %v965_v47 = vsel %vm799_vm12, %v963_v45, 0.0  ;;  %v2179_v44 = vpack.c.bf16 %v1235_v39, %v1234_v38 }
 0x349   : > { %v966_v48 = vadd.f32 %v965_v47, %v964_v46 }
 0x34b   : > { %v967_v49 = vrot.slane %v966_v48, 4 }
 0x34d   : > { %v968_v50 = vadd.f32 %v967_v49, %v966_v48  ;;  %v1888_v48 = vld [vmem:[%s2788_s6] ss:$0 sm:$0xff] }
 0x34f   : > { %v969_v51 = vrot.slane %v968_v50, 2 }
 0x351   : > { %v970_v52 = vadd.f32 %v969_v51, %v968_v50  ;;  %v1889_v51 = vld [vmem:[%s2789_s7] ss:$0 sm:$0xff] }
 0x353   : > { %v971_v53 = vrot.slane %v970_v52, 1 }
 0x355   : > { %v972_v54 = vadd.f32 %v971_v53, %v970_v52 }
 0x357   : > { %2040 = vmatmul.mubr.msk.f32.vlgmr.msra.gmra.mrb[4].mxu1 %vm799_vm12, %v972_v54 }
 0x358   : > { %2183 = vmatpush3.bf16.msra.mxu1 %v2483_v30  ;;  %2063 = vmatprep.mubr.msk.f32.mxu1 %vm2310_vm9, %v2311_v41 }
 0x359   : > { %2184 = vmatprep.subr.bf16.mxu1 %v2309_v31 }
 0x35c   : > { %2186 = vmatpush3.bf16.msra.mxu1 %v2495_v34 }
 0x35d   : > { %2187 = vmatprep.subr.bf16.mxu1 %v2309_v31 }
 0x360   : > { %2189 = vmatpush3.bf16.msra.mxu1 %v2505_v37 }
 0x361   : > { %2190 = vmatprep.subr.bf16.mxu1 %v2309_v31 }
 0x364   : > { %2192 = vmatpush3.bf16.msra.mxu1 %v2515_v40 }
 0x365   : > { %2066 = vmatprep.subr.mxu1 %v2311_v41 }
 0x42a   : > { %v1042_v55 = vpop.f32.mrb[4].mxu1 }
 0x42b   : > { %v1046_v56 = vmul.f32 0.0078125, %v1042_v55  ;;  %v2041_v57 = vpop.f32.mrb[5].mxu1 }
 0x42d   : > { %v1047_v58 = vadd.f32 1e-05, %v1046_v56 }
 0x42f   : > { %2237 = vrsqrt.f32 %v1047_v58 }
 0x439   : > { %v2238_v59 = vpop.eup %2237 }
 0x43a   : > { %2045 = vmatmul.mubr.msk.f32.vlgmr.msra.gmra.mrb[4].mxu0 %vm701_vm7, %v2238_v59 }
 0x43b   : > { %2147 = vmatpush1.bf16.msra.mxu0 %v2146_v63 }
 0x43c   : > { %2148 = vmatprep.subr.bf16.mxu0 %v2309_v31 }
 0x43f   : > { %2150 = vmatpush1.bf16.msra.mxu0 %v2149_v3 }
 0x440   : > { %2151 = vmatprep.subr.bf16.mxu0 %v2309_v31 }
 0x443   : > { %2153 = vmatpush1.bf16.msra.mxu0 %v2152_v6 }
 0x444   : > { %2154 = vmatprep.subr.bf16.mxu0 %v2309_v31 }
 0x447   : > { %2156 = vmatpush1.bf16.msra.mxu0 %v2155_v9 }
 0x448   : > { %2157 = vmatprep.subr.bf16.mxu0 %v2309_v31 }
 0x44b   : > { %2159 = vmatpush1.bf16.msra.mxu0 %v2158_v13  ;;  %v586_v13 = vld [vmem:[%s2791_s9] sm:$0x1] }
 0x44c   : > { %2160 = vmatprep.subr.bf16.mxu0 %v2309_v31 }
 0x44f   : > { %2162 = vmatpush1.bf16.msra.mxu0 %v2161_v16  ;;  %v658_v16 = vadd.f32 %v2584_v25, %v586_v13 }
 0x450   : > { %2163 = vmatprep.subr.bf16.mxu0 %v2309_v31 }
 0x451   : > { %v1179_v21 = vrot.slane %v658_v16, %v2591_v35 }
 0x453   : > { %2165 = vmatpush1.bf16.msra.mxu0 %v2164_v19 }
 0x454   : > { %2166 = vmatprep.subr.bf16.mxu0 %v2309_v31 }
 0x457   : > { %2168 = vmatpush1.bf16.msra.mxu0 %v2167_v22 }
 0x458   : > { %2169 = vmatprep.subr.bf16.mxu0 %v2309_v31 }
 0x45b   : > { %2171 = vmatpush1.bf16.msra.mxu0 %v2170_v26 }
 0x45c   : > { %2172 = vmatprep.subr.bf16.mxu0 %v2309_v31 }
 0x45f   : > { %2174 = vmatpush1.bf16.msra.mxu0 %v2173_v29 }
 0x460   : > { %2175 = vmatprep.subr.bf16.mxu0 %v2309_v31 }
 0x463   : > { %2177 = vmatpush1.bf16.msra.mxu0 %v2176_v36 }
 0x464   : > { %2178 = vmatprep.subr.bf16.mxu0 %v2309_v31 }
 0x467   : > { %2180 = vmatpush1.bf16.msra.mxu0 %v2179_v44 }
 0x50d   : > { %v1118_v45 = vpop.f32.mrb[4].mxu0 }
 0x50e   : > { %v1125_v46 = vrot.slane %v1118_v45, %v2591_v35  ;;  %v2046_v47 = vpop.f32.mrb[5].mxu0 }
 0x510   : > { %v1126_v49 = vmul.f32 %v1125_v46, %v2594_v42  ;;  %v1127_v50 = vmul.f32 %v1125_v46, %v2596_v43 }
 0x512   : > { %v1135_v52 = vmul.f32 %v1888_v48, %v1126_v49  ;;  %v1136_v53 = vmul.f32 %v1888_v48, %v1127_v50 }
 0x514   : > { %v1144_v54 = vadd.f32 %v1889_v51, %v1135_v52  ;;  %v1145_v55 = vadd.f32 %v1889_v51, %v1136_v53 }
 0x516   : > { %v1146_v56 = vand.u32 2147483647, %v1144_v54  ;;  %v1147_v57 = vand.u32 2147483647, %v1145_v55  ;;  %vm1154_vm13 = vcmp.ge.f32.partialorder %v1144_v54, 0.0  ;;  %vm1155_vm14 = vcmp.ge.f32.partialorder %v1145_v55, 0.0 }
 0x518   : > { %v1148_v58 = vsub.f32 0.0, %v1146_v56  ;;  %v1149_v59 = vsub.f32 0.0, %v1147_v57 }
 0x51a   : > { %v1150_v60 = vmul.f32 1.442695, %v1148_v58  ;;  %v1152_v61 = vmul.f32 1.442695, %v1149_v59 }
 0x51c   : > { %2239 = vpow2.f32 %v1150_v60 }
 0x51d   : > { %2241 = vpow2.f32 %v1152_v61 }
 0x526   : > { %v2240_v62 = vpop.eup %2239 }
 0x527   : > { %v2242_v42 = vpop.eup %2241  ;;  %v1158_v63 = vadd.f32 1.0, %v2240_v62  ;;  %v1156_v3 = vsel %vm1154_vm13, %v2240_v62, 1.0 }
 0x528   : > { %v1159_v43 = vadd.f32 1.0, %v2242_v42  ;;  %v1157_v5 = vsel %vm1155_vm14, %v2242_v42, 1.0 }
 0x529   : > { %2243 = vrcp.f32 %v1158_v63 }
 0x52a   : > { %2245 = vrcp.f32 %v1159_v43 }
 0x533   : > { %v2244_v2 = vpop.eup %2243 }
 0x534   : > { %v2246_v4 = vpop.eup %2245  ;;  %v1162_v6 = vmul.f32 %v2244_v2, %v1156_v3 }
 0x535   : > { %v1163_v7 = vmul.f32 %v2246_v4, %v1157_v5 }
 0x536   : > { %v1164_v8 = vmul.f32 %v1162_v6, %v1162_v6 }
 0x537   : > { %v1165_v9 = vmul.f32 %v1163_v7, %v1163_v7 }
 0x538   : > { %v1170_v11 = vadd.f32 1.0, %v1164_v8  ;;  %v1166_v14 = vsub.f32 1.0, %v1164_v8 }
 0x539   : > { %v1171_v12 = vadd.f32 1.0, %v1165_v9  ;;  %v1167_v15 = vsub.f32 1.0, %v1165_v9 }
 0x53a   : > { %2247 = vrcp.f32 %v1170_v11  ;;  %v1168_v17 = vmul.f32 %v1166_v14, %v1144_v54  ;;  %v1890_v54 = vld [vmem:[%s2793_s11] ss:$0 sm:$0xff] }
 0x53b   : > { %2249 = vrcp.f32 %v1171_v12  ;;  %v1169_v19 = vmul.f32 %v1167_v15, %v1145_v55 }
 0x544   : > { %v2248_v18 = vpop.eup %2247 }
 0x545   : > { %v2250_v20 = vpop.eup %2249  ;;  %v1174_v22 = vmul.f32 %v2248_v18, %v1168_v17 }
 0x546   : > { %v1175_v23 = vmul.f32 %v2250_v20, %v1169_v19 }
 0x547   : > { %v1180_v24 = vadd.f32 %v1179_v21, %v1174_v22 }
 0x548   : > { %v1181_v26 = vadd.f32 %v1179_v21, %v1175_v23  ;;  %v1698_v21 = vld [vmem:[%s2796_s14] sm:$0xf] }
 0x549   : > { %v1184_v27 = vrot.slane %v1180_v24, 7 }
 0x54a   : > { %v1185_v28 = vrot.slane %v1181_v26, 7 }
 0x54b   : > { %v1190_v29 = vsel %vm663_vm1, 0.0, %v1184_v27 }
 0x54c   : > { %v1186_v32 = vsel %vm663_vm1, %v1184_v27, %v1185_v28  ;;  %v1205_v33 = vrot.slane %v1190_v29, 2  ;;  %v1191_v36 = vsel %vm663_vm1, %v1185_v28, 0.0  ;;  %v1194_v25 = vrot.slane %v1190_v29, 1 }
 0x54d   : > { %v1206_v38 = vrot.slane %v1186_v32, 2  ;;  %v1195_v39 = vrot.slane %v1186_v32, 1  ;;  %v1197_v44 = vrot.slane %v1191_v36, 1  ;;  %v1208_v45 = vrot.slane %v1191_v36, 2  ;;  %v1898_v36 = vld [vmem:[%s2795_s13] ss:$0 sm:$0xff] }
 0x54f   : > { %v1207_v46 = vsel %vm686_vm5, %v1205_v33, %v1206_v38  ;;  %v1198_v47 = vsel %vm674_vm4, %v1195_v39, %v1197_v44  ;;  %v1196_v48 = vsel %vm674_vm4, %v1194_v25, %v1195_v39  ;;  %v1209_v49 = vsel %vm686_vm5, %v1206_v38, %v1208_v45 }
 0x550   : > { %1891 = vmatprep.mubr.msk.f32.mxu0 %vm799_vm12, %v1207_v46  ;;  %1201 = vrot.lane.b32.xlu1 %v1198_v47, %s2312_s20 }
 0x551   : > { %1199 = vrot.lane.b32.xlu0 %v1196_v48, %s2312_s20 }
 0x5c2   : > { %v1202_v52 = vpop.permute.xlu1 %1201 }
 0x5c3   : > { %v1200_v50 = vpop.permute.xlu0 %1199  ;;  %v1211_v53 = vsel %vm799_vm12, %v1186_v32, %v1202_v52 }
 0x5c4   : > { %v1210_v51 = vsel %vm799_vm12, %v1190_v29, %v1200_v50  ;;  %v1897_v29 = vld [vmem:[%s2794_s12] ss:$0 sm:$0xff] }
 0x5c5   : > { %1312 = vmatmul.mubr.f32.vlgmr.msra.gmra.mrb[6].mxu0 %v1210_v51 }
 0x5c6   : > { %1892 = vmatprep.mubr.msk.f32.mxu0 %vm799_vm12, %v1209_v49 }
 0x5c9   : > { %1317 = vmatmul.mubr.f32.gmra.mrb[8].mxu0 %v1211_v53 }
 0x698   : > { %v1313_v55 = vpop.f32.mrb[6].mxu0 }
 0x699   : > { %v1315_v56 = vpop.f32.mrb[7].mxu0  ;;  %v1314_v57 = vadd.f32 %v1890_v54, %v1313_v55 }
 0x69b   : > { %v1322_v61 = vsel %vm799_vm12, %v1314_v57, 0.0 }
 0x69c   : > { %v1318_v58 = vpop.f32.mrb[8].mxu0 }
 0x69d   : > { %v1319_v59 = vadd.f32 %v1890_v54, %v1318_v58  ;;  %v1320_v60 = vpop.f32.mrb[9].mxu0 }
 0x69f   : > { %v1323_v62 = vsel %vm799_vm12, %v1319_v59, 0.0 }
 0x6a0   : > { %v1324_v42 = vadd.f32 %v1323_v62, %v1322_v61 }
 0x6a2   : > { %v1325_v63 = vrot.slane %v1324_v42, 4 }
 0x6a4   : > { %v1326_v43 = vadd.f32 %v1325_v63, %v1324_v42 }
 0x6a6   : > { %v1327_v2 = vrot.slane %v1326_v43, 2 }
 0x6a8   : > { %v1328_v3 = vadd.f32 %v1327_v2, %v1326_v43  ;;  %v1899_v2 = vld [vmem:[%s2797_s15] ss:$0 sm:$0xff] }
 0x6aa   : > { %v1329_v4 = vrot.slane %v1328_v3, 1 }
 0x6ac   : > { %v1330_v5 = vadd.f32 %v1329_v4, %v1328_v3 }
 0x6ae   : > { %2064 = vmatmul.mubr.msk.f32.vlgmr.msra.gmra.mrb[6].mxu1 %vm799_vm12, %v1330_v5 }
 0x6af   : > { %2067 = vmatpush3.msra.mxu1 %v2565_v10  ;;  %2068 = vmatprep.mubr.msk.f32.mxu1 %vm2310_vm9, %v2311_v41 }
 0x6b0   : > { %2193 = vmatprep.subr.bf16.mxu1 %v2309_v31 }
 0x781   : > { %v1400_v6 = vpop.f32.mrb[6].mxu1 }
 0x782   : > { %v1404_v7 = vmul.f32 0.0078125, %v1400_v6  ;;  %v2065_v8 = vpop.f32.mrb[7].mxu1 }
 0x784   : > { %2069 = vmatmul.mubr.msk.f32.vlgmr.msra.gmra.mrb[8].mxu1 %vm701_vm7, %v1404_v7 }
 0x785   : > { %2195 = vmatpush3.bf16.msra.mxu1 %v2483_v30  ;;  %2087 = vmatprep.mubr.msk.f32.mxu1 %vm2310_vm9, %v2311_v41 }
 0x786   : > { %2196 = vmatprep.subr.bf16.mxu1 %v2309_v31 }
 0x789   : > { %2198 = vmatpush3.bf16.msra.mxu1 %v2495_v34 }
 0x78a   : > { %2199 = vmatprep.subr.bf16.mxu1 %v2309_v31 }
 0x78d   : > { %2201 = vmatpush3.bf16.msra.mxu1 %v2505_v37 }
 0x78e   : > { %2202 = vmatprep.subr.bf16.mxu1 %v2309_v31 }
 0x791   : > { %2204 = vmatpush3.bf16.msra.mxu1 %v2515_v40 }
 0x792   : > { %2090 = vmatprep.subr.mxu1 %v2311_v41 }
 0x857   : > { %v1474_v9 = vpop.f32.mrb[8].mxu1 }
 0x858   : > { %v1481_v30 = vrot.slane %v1474_v9, %v2591_v35  ;;  %v2070_v11 = vpop.f32.mrb[9].mxu1 }
 0x85a   : > { %v1482_v12 = vsub.f32 %v1314_v57, %v1481_v30  ;;  %v1483_v13 = vsub.f32 %v1319_v59, %v1481_v30 }
 0x85c   : > { %v1484_v14 = vmul.f32 %v1482_v12, %v1482_v12  ;;  %v1485_v15 = vmul.f32 %v1483_v13, %v1483_v13 }
 0x85e   : > { %v1486_v34 = vsel %vm799_vm12, %v1484_v14, 0.0  ;;  %v1487_v16 = vsel %vm799_vm12, %v1485_v15, 0.0 }
 0x85f   : > { %v1488_v17 = vadd.f32 %v1487_v16, %v1486_v34 }
 0x861   : > { %v1489_v37 = vrot.slane %v1488_v17, 4 }
 0x863   : > { %v1490_v18 = vadd.f32 %v1489_v37, %v1488_v17 }
 0x865   : > { %v1491_v31 = vrot.slane %v1490_v18, 2 }
 0x867   : > { %v1492_v19 = vadd.f32 %v1491_v31, %v1490_v18 }
 0x869   : > { %v1493_v40 = vrot.slane %v1492_v19, 1 }
 0x86b   : > { %v1494_v20 = vadd.f32 %v1493_v40, %v1492_v19 }
 0x86d   : > { %2088 = vmatmul.mubr.msk.f32.vlgmr.msra.gmra.mrb[10].mxu1 %vm799_vm12, %v1494_v20 }
 0x86e   : > { %2091 = vmatpush3.msra.mxu1 %v2565_v10  ;;  %2092 = vmatprep.mubr.msk.f32.mxu1 %vm2310_vm9, %v2311_v41 }
 0x86f   : > { %2095 = vmatprep.subr.msk.mxu1 %vm720_vm0, %v1698_v21 }
 0x940   : > { %v1564_v22 = vpop.f32.mrb[10].mxu1 }
 0x941   : > { %v1568_v23 = vmul.f32 0.0078125, %v1564_v22  ;;  %v2089_v24 = vpop.f32.mrb[11].mxu1 }
 0x943   : > { %v1569_v26 = vadd.f32 1e-05, %v1568_v23 }
 0x945   : > { %2251 = vrsqrt.f32 %v1569_v26 }
 0x94f   : > { %v2252_v27 = vpop.eup %2251 }
 0x950   : > { %2093 = vmatmul.mubr.msk.f32.vlgmr.msra.gmra.mrb[12].mxu1 %vm701_vm7, %v2252_v27 }
 0x951   : > { %2096 = vmatpush3.msk.msra.mxu1 %vm720_vm0, %v1698_v21  ;;  %2097 = vmatprep.mubr.msk.f32.mxu1 %vm698_vm6, %v2453_v0 }
 0x954   : > { %2098 = vmatmul.mubr.msk.f32.vlgmr.msra.gmra.mrb[14].mxu1 %vm698_vm6, %v2455_v1 }
 0xa23   : > { %v1640_v41 = vpop.f32.mrb[12].mxu1 }
 0xa24   : > { %v1647_v10 = vrot.slane %v1640_v41, %v2591_v35  ;;  %v2094_v28 = vpop.f32.mrb[13].mxu1 }
 0xa26   : > { %v1648_v32 = vmul.f32 %v1647_v10, %v1482_v12  ;;  %v1649_v33 = vmul.f32 %v1647_v10, %v1483_v13 }
 0xa27   : > { %v2099_v25 = vpop.f32.mrb[14].mxu1 }
 0xa28   : > { %v1657_v38 = vmul.f32 %v1897_v29, %v1648_v32  ;;  %v1658_v0 = vmul.f32 %v1897_v29, %v1649_v33  ;;  %v1779_v39 = vpop.f32.mrb[15].mxu1  ;;  %v1785_v7 = vadd.f32 %v2099_v25, %v1899_v2 }
 0xa29   : > { %v1780_v4 = vadd.f32 %v1899_v2, %v1779_v39 }
 0xa2a   : > { %v1666_v44 = vadd.f32 %v1898_v36, %v1657_v38  ;;  %v1667_v1 = vadd.f32 %v1898_v36, %v1658_v0 }
 0xa2c   : > { %v1668_v45 = vand.u32 2147483647, %v1666_v44  ;;  %v1669_v46 = vand.u32 2147483647, %v1667_v1  ;;  %vm1676_vm15 = vcmp.ge.f32.partialorder %v1666_v44, 0.0  ;;  %vm1677_vm0 = vcmp.ge.f32.partialorder %v1667_v1, 0.0 }
 0xa2e   : > { %v1670_v35 = vsub.f32 0.0, %v1668_v45  ;;  %v1671_v47 = vsub.f32 0.0, %v1669_v46 }
 0xa30   : > { %v1672_v48 = vmul.f32 1.442695, %v1670_v35  ;;  %v1674_v49 = vmul.f32 1.442695, %v1671_v47 }
 0xa32   : > { %2253 = vpow2.f32 %v1672_v48 }
 0xa33   : > { %2255 = vpow2.f32 %v1674_v49 }
 0xa3c   : > { %v2254_v50 = vpop.eup %2253 }
 0xa3d   : > { %v2256_v51 = vpop.eup %2255  ;;  %v1680_v52 = vadd.f32 1.0, %v2254_v50  ;;  %v1678_v55 = vsel %vm1676_vm15, %v2254_v50, 1.0 }
 0xa3e   : > { %v1681_v53 = vadd.f32 1.0, %v2256_v51  ;;  %v1679_v57 = vsel %vm1677_vm0, %v2256_v51, 1.0 }
 0xa3f   : > { %2257 = vrcp.f32 %v1680_v52 }
 0xa40   : > { %2259 = vrcp.f32 %v1681_v53 }
 0xa49   : > { %v2258_v54 = vpop.eup %2257 }
 0xa4a   : > { %v2260_v56 = vpop.eup %2259  ;;  %v1684_v58 = vmul.f32 %v2258_v54, %v1678_v55 }
 0xa4b   : > { %v1685_v59 = vmul.f32 %v2260_v56, %v1679_v57 }
 0xa4c   : > { %v1686_v60 = vmul.f32 %v1684_v58, %v1684_v58 }
 0xa4d   : > { %v1687_v61 = vmul.f32 %v1685_v59, %v1685_v59 }
 0xa4e   : > { %v1692_v62 = vadd.f32 1.0, %v1686_v60  ;;  %v1688_v63 = vsub.f32 1.0, %v1686_v60 }
 0xa4f   : > { %v1693_v42 = vadd.f32 1.0, %v1687_v61  ;;  %v1689_v43 = vsub.f32 1.0, %v1687_v61 }
 0xa50   : > { %2261 = vrcp.f32 %v1692_v62  ;;  %v1690_v3 = vmul.f32 %v1688_v63, %v1666_v44 }
 0xa51   : > { %2263 = vrcp.f32 %v1693_v42  ;;  %v1691_v6 = vmul.f32 %v1689_v43, %v1667_v1 }
 0xa5a   : > { %v2262_v5 = vpop.eup %2261 }
 0xa5b   : > { %v2264_v8 = vpop.eup %2263  ;;  %v1696_v9 = vmul.f32 %v2262_v5, %v1690_v3 }
 0xa5c   : > { %v1697_v30 = vmul.f32 %v2264_v8, %v1691_v6 }
 0xa5d   : > { %v1788_v11 = vadd.f32 %v1780_v4, %v1696_v9 }
 0xa5e   : > { %v1789_v12 = vadd.f32 %v1785_v7, %v1697_v30 }
 0xa5f   : > { %1790 = vst.msk [vmem:[%s548_s24] sm:$0xff] %vm799_vm12, %v1788_v11 }
 0xa60   : > { %1791 = vst.msk [vmem:[%s548_s24 + $0x8] sm:$0xff] %vm799_vm12, %v1789_v12 }
 0xa61 PF: > { %s27_s21 = sadd.s32 1, %s2303_s21  }
 0xa62   : > { %p24_p2 = scmp.ge.s32.totalorder %s27_s21, 4  }
 0xa64   :  { %26 = sbr.rel (!%p24_p2) target bundleno = 3 (0x3), region = 122 }
 0xa6b   :  { %1813 = vsyncpa [#allocation3], 1 }
 0xa6c   :  { %1815 = vsyncpa [#allocation3 + $0x1], 1 }

// kernel: forward.12
= control target key start
LH: loop header
LB: loop body
LE: loop exit
PB: predicated region body
PF: predicated region fallthrough
CT: control target
= control target key end

     0   :  { %s3250_s0 = inlined_call_operand.vmem [shape: f32[2,16,64], index: 0, kind: input, shape index: {}]   ;;  %s3251_s1 = inlined_call_operand.vmem [shape: f32[2,1,80], index: 1, kind: input, shape index: {}]   ;;  %s3252_s2 = inlined_call_operand.vmem [shape: f32[64,8], index: 2, kind: input, shape index: {}]   ;;  %s3253_s3 = inlined_call_operand.vmem [shape: f32[8,64], index: 3, kind: input, shape index: {}]   ;;  %s3254_s4 = inlined_call_operand.vmem [shape: f32[192,64], index: 4, kind: input, shape index: {}]   ;;  %s3255_s5 = inlined_call_operand.hbm [shape: f32[1,64], index: 5, kind: input, shape index: {}]   ;;  %s3256_s6 = inlined_call_operand.hbm [shape: f32[1,64], index: 6, kind: input, shape index: {}]   ;;  %s3257_s7 = inlined_call_operand.hbm [shape: f32[1,64], index: 7, kind: input, shape index: {}]   ;;  %s3258_s8 = inlined_call_operand.vmem [shape: f32[80,64], index: 8, kind: input, shape index: {}]   ;;  %s3259_s9 = inlined_call_operand.hbm [shape: f32[1,64], index: 9, kind: input, shape index: {}]   ;;  %s3260_s10 = inlined_call_operand.vmem [shape: f32[192,64], index: 10, kind: input, shape index: {}]   ;;  %s3261_s11 = inlined_call_operand.hbm [shape: f32[1,64], index: 11, kind: input, shape index: {}]   ;;  %s3262_s12 = inlined_call_operand.hbm [shape: f32[1,64], index: 12, kind: input, shape index: {}]   ;;  %s3263_s13 = inlined_call_operand.hbm [shape: f32[1,64], index: 13, kind: input, shape index: {}]   ;;  %s3264_s14 = inlined_call_operand.vmem [shape: f32[2,16,64], index: 14, kind: output, shape index: {}]  }
   0x1   :  { %3268 = sst [smem:[#allocation18_spill]] %s3264_s14 }
   0x2   :  { %19 = vsyncpa [#allocation3], 0 }
   0x3   :  { %20 = vsyncpa [#allocation5], 0 }
   0x4   :  { %21 = vsyncpa [#allocation8], 0 }
   0x5   :  { %22 = vsyncpa [#allocation11], 0  ;;  %s2640_s29 = smov 0  }
   0x6 LB: > { %3269 = sst [smem:[#allocation17_spill]] %s2552_s29  ;;  %s2554_s30 = smov [#allocation4]   ;;  %s2552_s29 = sphi %s2640_s29, %s28_s29  }
   0x7   : > { %s396_s15 = sshll.u32 %s2554_s30, 4  ;;  %s2646_s16 = sadd.s32 4294967295, %s2552_s29   ;;  %s2651_s15 = int_to_ptr.vmem [resolvable:$true] %s396_s15 }
   0x8   : > { %p1864_p0 = scmp.ge.s32.totalorder %s2552_s29, 1  ;;  %p363_p1 = scmp.lt.s32.totalorder %s2552_s29, 3 }
   0x9   : > { %p3266_p2 = scmp.eq.s32.totalorder %s2646_s16, 0  ;;  %s2555_s18 = smov [#allocation7]  }
   0xa   : > { %p2653_p3 = pnand %p1864_p0, %p363_p1  ;;  %s421_s19 = sshll.u32 %s2555_s18, 4  ;;  %s2659_s19 = int_to_ptr.vmem [resolvable:$true] %s421_s19 }
   0xb   : > { %s2556_s20 = smov [#allocation10]   ;;  %s2557_s23 = smov [#allocation2]  }
   0xc   : > { %s3270_s17 = scalar_select %p2653_p3, 1, 0 }
   0xd   : > { %p2245_p4 = pneg %p2653_p3  ;;  %s446_s21 = sshll.u32 %s2556_s20, 4  ;;  %s2667_s21 = int_to_ptr.vmem [resolvable:$true] %s446_s21 }
   0xe   : > { %s385_s24 = sshll.u32 %s2557_s23, 4  ;;  %s2334_s27 = scalar_lea.hbm %s3256_s6, 16  ;;  %s2669_s24 = int_to_ptr.vmem [resolvable:$true] %s385_s24 }
   0xf   : > { %p2663_p5 = pnand %p3266_p2, %p2245_p4  ;;  %p2335_p6 = scmp.ne.s32.totalorder %s3256_s6, %s2334_s27 }
  0x10   : > { %p2341_p10 = scmp.lt.u32.totalorder %s2334_s27, %s3256_s6 }
  0x11   : > { %p2679_p7 = pneg %p2663_p5 }
  0x13   : > { %p2337_p8 = pnand %p2679_p7, %p2335_p6 }
  0x15   : > { %p2338_p9 = pneg %p2337_p8 }
  0x17   : > { %p2343_p11 = pnand %p2341_p10, %p2338_p9 }
  0x19   : > { %2346 = shalt.err (!%p2343_p11)
}
  0x1a   : > { %s2347_s25 = scalar_lea.vmem %s2651_s15, 16  ;;  %s2354_s26 = scalar_lea.vmem %s2651_s15, 32 }
  0x1b   : > { %p2348_p12 = scmp.ne.s32.totalorder %s2651_s15, %s2347_s25  ;;  %p2355_p1 = scmp.lt.s32.totalorder %s2651_s15, %s2651_s15 }
  0x1c   : > { %p2356_p4 = scmp.lt.s32.totalorder %s2354_s26, %s2347_s25 }
  0x1d   : > { %p2350_p13 = pnand %p2348_p12, %p2679_p7 }
  0x1e   : > { %p2357_p6 = por %p2356_p4, %p2355_p1 }
  0x1f   : > { %p2351_p0 = pneg %p2350_p13 }
  0x21   : > { %p2358_p8 = pnand %p2357_p6, %p2351_p0 }
  0x23   : > { %2361 = shalt.err (!%p2358_p8)
}
  0x24   : > { %2251 = dma.hbm_to_vmem [thread:$0]  (!%p2663_p5), %s3256_s6, 16, %s2651_s15, [#allocation5]  }
  0x25   : > { %s2362_s23 = scalar_lea.hbm %s3259_s9, 16 }
  0x26   : > { %p2363_p9 = scmp.ne.s32.totalorder %s3259_s9, %s2362_s23  ;;  %p2369_p12 = scmp.lt.u32.totalorder %s2362_s23, %s3259_s9 }
  0x28   : > { %p2365_p10 = pnand %p2363_p9, %p2679_p7 }
  0x2a   : > { %p2366_p11 = pneg %p2365_p10 }
  0x2c   : > { %p2371_p13 = pnand %p2369_p12, %p2366_p11 }
  0x2e   : > { %2374 = shalt.err (!%p2371_p13)
}
  0x2f   : > { %s2375_s15 = scalar_lea.vmem %s2659_s19, 16  ;;  %s2382_s14 = scalar_lea.vmem %s2659_s19, 32 }
  0x30   : > { %p2376_p0 = scmp.ne.s32.totalorder %s2659_s19, %s2375_s15  ;;  %p2383_p6 = scmp.lt.s32.totalorder %s2659_s19, %s2659_s19 }
  0x31   : > { %p2384_p8 = scmp.lt.s32.totalorder %s2382_s14, %s2375_s15 }
  0x32   : > { %p2378_p1 = pnand %p2376_p0, %p2679_p7 }
  0x33   : > { %p2385_p9 = por %p2384_p8, %p2383_p6 }
  0x34   : > { %p2379_p4 = pneg %p2378_p1 }
  0x36   : > { %p2386_p10 = pnand %p2385_p9, %p2379_p4 }
  0x38   : > { %2389 = shalt.err (!%p2386_p10)
}
  0x39   : > { %2257 = dma.hbm_to_vmem [thread:$0]  (!%p2663_p5), %s3259_s9, 16, %s2659_s19, [#allocation8]  }
  0x3a   : > { %s2390_s20 = scalar_lea.hbm %s3262_s12, 16 }
  0x3b   : > { %p2391_p11 = scmp.ne.s32.totalorder %s3262_s12, %s2390_s20  ;;  %p2397_p0 = scmp.lt.u32.totalorder %s2390_s20, %s3262_s12 }
  0x3d   : > { %p2393_p12 = pnand %p2391_p11, %p2679_p7 }
  0x3f   : > { %p2394_p13 = pneg %p2393_p12 }
  0x41   : > { %p2399_p1 = pnand %p2397_p0, %p2394_p13 }
  0x43   : > { %2402 = shalt.err (!%p2399_p1)
}
  0x44   : > { %s2403_s19 = scalar_lea.vmem %s2667_s21, 16  ;;  %s2410_s14 = scalar_lea.vmem %s2667_s21, 32 }
  0x45   : > { %p2404_p4 = scmp.ne.s32.totalorder %s2667_s21, %s2403_s19  ;;  %p2411_p9 = scmp.lt.s32.totalorder %s2667_s21, %s2667_s21 }
  0x46   : > { %p2412_p10 = scmp.lt.s32.totalorder %s2410_s14, %s2403_s19 }
  0x47   : > { %p2406_p6 = pnand %p2404_p4, %p2679_p7 }
  0x48   : > { %p2413_p11 = por %p2412_p10, %p2411_p9 }
  0x49   : > { %p2407_p8 = pneg %p2406_p6 }
  0x4b   : > { %p2414_p12 = pnand %p2413_p11, %p2407_p8 }
  0x4d   : > { %2417 = shalt.err (!%p2414_p12)
}
  0x4e   : > { %2263 = dma.hbm_to_vmem [thread:$0]  (!%p2663_p5), %s3262_s12, 16, %s2667_s21, [#allocation11]  }
  0x4f   : > { %s2418_s20 = scalar_lea.hbm %s3255_s5, 16 }
  0x50   : > { %p2419_p13 = scmp.ne.s32.totalorder %s3255_s5, %s2418_s20  ;;  %p2425_p4 = scmp.lt.u32.totalorder %s2418_s20, %s3255_s5 }
  0x52   : > { %p2421_p0 = pnand %p2419_p13, %p2679_p7 }
  0x54   : > { %p2422_p1 = pneg %p2421_p0 }
  0x56   : > { %p2427_p6 = pnand %p2425_p4, %p2422_p1 }
  0x58   : > { %2430 = shalt.err (!%p2427_p6)
}
  0x59   : > { %s2431_s21 = scalar_lea.vmem %s2669_s24, 16  ;;  %s2438_s19 = scalar_lea.vmem %s2669_s24, 32 }
  0x5a   : > { %p2432_p8 = scmp.ne.s32.totalorder %s2669_s24, %s2431_s21  ;;  %p2439_p11 = scmp.lt.s32.totalorder %s2669_s24, %s2669_s24 }
  0x5b   : > { %p2440_p12 = scmp.lt.s32.totalorder %s2438_s19, %s2431_s21 }
  0x5c   : > { %p2434_p9 = pnand %p2432_p8, %p2679_p7 }
  0x5d   : > { %p2441_p13 = por %p2440_p12, %p2439_p11 }
  0x5e   : > { %p2435_p10 = pneg %p2434_p9 }
  0x60   : > { %p2442_p0 = pnand %p2441_p13, %p2435_p10 }
  0x62   : > { %2445 = shalt.err (!%p2442_p0)
}
  0x63   : > { %2248 = dma.hbm_to_vmem [thread:$0]  (!%p2663_p5), %s3255_s5, 16, %s2669_s24, [#allocation3]  }
  0x64   : > { %s2558_s27 = smov [#allocation6]   ;;  %s2559_s30 = smov [#allocation9]  }
  0x65   : > { %s407_s28 = sshll.u32 %s2558_s27, 4  ;;  %s435_s20 = sshll.u32 %s2559_s30, 4  ;;  %s408_s28 = int_to_ptr.vmem [resolvable:$true] %s407_s28  ;;  %s436_s20 = int_to_ptr.vmem [resolvable:$true] %s435_s20 }
  0x66   : > { %s2446_s26 = scalar_lea.hbm %s3257_s7, 16 }
  0x67   : > { %p2447_p1 = scmp.ne.s32.totalorder %s3257_s7, %s2446_s26  ;;  %p2453_p8 = scmp.lt.u32.totalorder %s2446_s26, %s3257_s7 }
  0x69   : > { %p2449_p4 = pnand %p2447_p1, %p2679_p7 }
  0x6b   : > { %p2450_p6 = pneg %p2449_p4 }
  0x6d   : > { %p2455_p9 = pnand %p2453_p8, %p2450_p6 }
  0x6f   : > { %2458 = shalt.err (!%p2455_p9)
}
  0x70   : > { %s2459_s24 = scalar_lea.vmem %s408_s28, 16  ;;  %s2466_s29 = scalar_lea.vmem %s408_s28, 32 }
  0x71   : > { %p2460_p10 = scmp.ne.s32.totalorder %s408_s28, %s2459_s24  ;;  %p2467_p13 = scmp.lt.s32.totalorder %s408_s28, %s408_s28 }
  0x72   : > { %p2468_p0 = scmp.lt.s32.totalorder %s2466_s29, %s2459_s24 }
  0x73   : > { %p2462_p11 = pnand %p2460_p10, %p2679_p7 }
  0x74   : > { %p2469_p2 = por %p2468_p0, %p2467_p13 }
  0x75   : > { %p2463_p12 = pneg %p2462_p11 }
  0x77   : > { %p2470_p3 = pnand %p2469_p2, %p2463_p12 }
  0x79   : > { %2473 = shalt.err (!%p2470_p3)
}
  0x7a   : > { %2254 = dma.hbm_to_vmem [thread:$0]  (!%p2663_p5), %s3257_s7, 16, %s408_s28, [#allocation5]  }
  0x7b   : > { %s2474_s26 = scalar_lea.hbm %s3261_s11, 16 }
  0x7c   : > { %p2475_p1 = scmp.ne.s32.totalorder %s3261_s11, %s2474_s26  ;;  %p2481_p3 = scmp.lt.u32.totalorder %s2474_s26, %s3261_s11 }
  0x7e   : > { %p2477_p4 = pnand %p2475_p1, %p2679_p7 }
  0x80   : > { %p2478_p2 = pneg %p2477_p4 }
  0x82   : > { %p2483_p6 = pnand %p2481_p3, %p2478_p2 }
  0x84   : > { %2486 = shalt.err (!%p2483_p6)
}
  0x85   : > { %s2487_s24 = scalar_lea.vmem %s436_s20, 16  ;;  %s2494_s28 = scalar_lea.vmem %s436_s20, 32 }
  0x86   : > { %p2488_p8 = scmp.ne.s32.totalorder %s436_s20, %s2487_s24  ;;  %p2495_p11 = scmp.lt.s32.totalorder %s436_s20, %s436_s20 }
  0x87   : > { %p2496_p12 = scmp.lt.s32.totalorder %s2494_s28, %s2487_s24 }
  0x88   : > { %p2490_p9 = pnand %p2488_p8, %p2679_p7 }
  0x89   : > { %p2497_p13 = por %p2496_p12, %p2495_p11 }
  0x8a   : > { %p2491_p10 = pneg %p2490_p9 }
  0x8c   : > { %p2498_p0 = pnand %p2497_p13, %p2491_p10 }
  0x8e   : > { %2501 = shalt.err (!%p2498_p0)
}
  0x8f   : > { %2260 = dma.hbm_to_vmem [thread:$0]  (!%p2663_p5), %s3261_s11, 16, %s436_s20, [#allocation8]  }
  0x90   : > { %s2560_s30 = smov [#allocation12]   ;;  %s2502_s15 = scalar_lea.hbm %s3263_s13, 16 }
  0x91   : > { %s457_s23 = sshll.u32 %s2560_s30, 4  ;;  %p2503_p1 = scmp.ne.s32.totalorder %s3263_s13, %s2502_s15  ;;  %s458_s23 = int_to_ptr.vmem [resolvable:$true] %s457_s23 }
  0x92   : > { %p2509_p3 = scmp.lt.u32.totalorder %s2502_s15, %s3263_s13 }
  0x93   : > { %p2505_p4 = pnand %p2503_p1, %p2679_p7 }
  0x95   : > { %p2506_p2 = pneg %p2505_p4 }
  0x97   : > { %p2511_p6 = pnand %p2509_p3, %p2506_p2 }
  0x99   : > { %2514 = shalt.err (!%p2511_p6)
}
  0x9a   : > { %s2515_s20 = scalar_lea.vmem %s458_s23, 16  ;;  %s2522_s28 = scalar_lea.vmem %s458_s23, 32 }
  0x9b   : > { %p2516_p8 = scmp.ne.s32.totalorder %s458_s23, %s2515_s20  ;;  %p2523_p11 = scmp.lt.s32.totalorder %s458_s23, %s458_s23 }
  0x9c   : > { %p2524_p12 = scmp.lt.s32.totalorder %s2522_s28, %s2515_s20 }
  0x9d   : > { %p2518_p9 = pnand %p2516_p8, %p2679_p7 }
  0x9e   : > { %p2525_p13 = por %p2524_p12, %p2523_p11 }
  0x9f   : > { %p2519_p10 = pneg %p2518_p9 }
  0xa1   : > { %p2526_p0 = pnand %p2525_p13, %p2519_p10 }
  0xa3   : > { %2529 = shalt.err (!%p2526_p0)
}
  0xa4   : > { %2266 = dma.hbm_to_vmem [thread:$0]  (!%p2663_p5), %s3263_s13, 16, %s458_s23, [#allocation11]  }
  0xa5   : > { %p3273_p1 = scmp.ne.s32.totalorder %s3270_s17, 0 }
  0xa6   : > { %p3274_p4 = scmp.eq.s32.totalorder (!%p3273_p1), %s2646_s16, 0 }
  0xa7   : > { %484 = sbr.rel (%p3273_p1) target bundleno = 2793 (0xae9), region = 76 }
  0xae   : > { %2535 = dma.done.wait (%p3274_p4), [#allocation3], 16   ;;  %p3275_p7 = pmov %p3274_p4 }
  0xaf   : > { %p3276_p2 = pmov %p3274_p4 }
  0xb0   : > { %2537 = vsyncadd (%p3275_p7), [#allocation3], 4294967280 }
  0xb1   : > { %2539 = dma.done.wait (%p3276_p2), [#allocation5], 32   ;;  %p3277_p3 = pmov %p3276_p2 }
  0xb2   : > { %p3278_p6 = pmov %p3276_p2 }
  0xb3   : > { %2541 = vsyncadd (%p3277_p3), [#allocation5], 4294967264 }
  0xb4   : > { %2543 = dma.done.wait (%p3278_p6), [#allocation8], 32   ;;  %p3279_p5 = pmov %p3276_p2 }
  0xb5   : > { %p3280_p8 = pmov %p3276_p2 }
  0xb6   : > { %2545 = vsyncadd (%p3279_p5), [#allocation8], 4294967264 }
  0xb7   : > { %2547 = dma.done.wait (%p3280_p8), [#allocation11], 32   ;;  %p3281_p9 = pmov %p3276_p2 }
  0xb8   : > { %p557_p10 = scmp.lt.s32.totalorder %s2646_s16, 1  ;;  %v2561_v0 = vmov 0.0|0.0   ;;  %vm684_vm0 = vcmask 1040384   ;;  %v716_v3 = vld [vmem:[%s3254_s4] sm:$0xff]  ;;  %v717_v6 = vld [vmem:[%s3254_s4 + $0x8] sm:$0xff]  ;;  %v718_v7 = vld [vmem:[%s3254_s4 + $0x10] sm:$0xff] }
  0xb9   : > { %2549 = vsyncadd (%p3281_p9), [#allocation11], 4294967264  ;;  %2097 = vmatprep.subr.bf16.mxu1 %v2561_v0  ;;  %2082 = vmatprep.subr.bf16.mxu0 %v2561_v0  ;;  %v719_v8 = vld [vmem:[%s3254_s4 + $0x18] sm:$0xff]  ;;  %vm695_vm1 = vcmask 1046528   ;;  %v2098_v9 = vpack.c.bf16 %v717_v6, %v716_v3  ;;  %vm707_vm2 = vcmask 1045504   ;;  %v720_v17 = vld [vmem:[%s3254_s4 + $0x20] sm:$0xff] }
  0xba   : > { %s3285_s16 = smov (!%p557_p10, %s2646_s16), 1  ;;  %v2101_v16 = vpack.c.bf16 %v719_v8, %v718_v7  ;;  %v721_v18 = vld [vmem:[%s3254_s4 + $0x28] sm:$0xff]  ;;  %vm713_vm3 = vcmask 523264   ;;  %s2562_s22 = smov 64   ;;  %v722_v26 = vld [vmem:[%s3254_s4 + $0x30] sm:$0xff]  ;;  %v723_v27 = vld [vmem:[%s3254_s4 + $0x38] sm:$0xff] }
  0xbb   : > { %s1906_s17 = sshll.u32 %s3285_s16, 4  ;;  %2099 = vmatpush1.bf16.msra.mxu1 %v2098_v9  ;;  %v2104_v25 = vpack.c.bf16 %v721_v18, %v720_v17  ;;  %v597_v28 = vld [vmem:[%s3258_s8] sm:$0xff]  ;;  %v598_v30 = vld [vmem:[%s3258_s8 + $0x8] sm:$0xff]  ;;  %v599_v31 = vld [vmem:[%s3258_s8 + $0x10] sm:$0xff]  ;;  %v2107_v34 = vpack.c.bf16 %v723_v27, %v722_v26  ;;  %s564_s29 = scalar_lea.vmem %s3251_s1, %s3285_s16  ;;  %vm2563_vm5 = vmmov 0   ;;  %vm608_vm6 = vcmask 654336  }
  0xbc   : > { %s561_s30 = scalar_lea.vmem %s3250_s0, %s1906_s17  ;;  %2100 = vmatprep.subr.bf16.mxu1 %v2561_v0  ;;  %v600_v32 = vld [vmem:[%s3258_s8 + $0x18] sm:$0xff]  ;;  %v2083_v33 = vpack.c.bf16 %v598_v30, %v597_v28  ;;  %v724_v35 = vld [vmem:[%s3254_s4 + $0x40] sm:$0xff]  ;;  %v725_v37 = vld [vmem:[%s3254_s4 + $0x48] sm:$0xff]  ;;  %vm909_vm7 = vcmask 64512   ;;  %s3282_s18 = sld [smem:[#allocation18_spill]] }
  0xbd   : > { %v2857_v1 = vld [vmem:[%s561_s30] sm:$0xff]  ;;  %v2859_v2 = vld [vmem:[%s561_s30 + $0x8] sm:$0xff]  ;;  %v2086_v36 = vpack.c.bf16 %v600_v32, %v599_v31  ;;  %v2110_v40 = vpack.c.bf16 %v725_v37, %v724_v35  ;;  %v726_v41 = vld [vmem:[%s3254_s4 + $0x50] sm:$0xff] }
  0xbe   : > { %v685_v4 = vrot.slane %v2857_v1, 7  ;;  %v686_v5 = vrot.slane %v2859_v2, 7  ;;  %2084 = vmatpush3.bf16.msra.mxu0 %v2083_v33  ;;  %v601_v38 = vld [vmem:[%s3258_s8 + $0x20] sm:$0xff]  ;;  %v602_v39 = vld [vmem:[%s3258_s8 + $0x28] sm:$0xff]  ;;  %v727_v43 = vld [vmem:[%s3254_s4 + $0x58] sm:$0xff] }
  0xbf   : > { %2102 = vmatpush1.bf16.msra.mxu1 %v2101_v16  ;;  %2085 = vmatprep.subr.bf16.mxu0 %v2561_v0  ;;  %v2089_v42 = vpack.c.bf16 %v602_v39, %v601_v38  ;;  %v603_v44 = vld [vmem:[%s3258_s8 + $0x30] sm:$0xff]  ;;  %v604_v45 = vld [vmem:[%s3258_s8 + $0x38] sm:$0xff]  ;;  %v2113_v46 = vpack.c.bf16 %v727_v43, %v726_v41  ;;  %v728_v48 = vld [vmem:[%s3254_s4 + $0x60] sm:$0xff] }
  0xc0   : > { %v2876_v10 = vsel %vm684_vm0, %v685_v4, %v686_v5  ;;  %v2879_v11 = vsel %vm684_vm0, 0.0, %v685_v4  ;;  %v692_v12 = vsel %vm684_vm0, %v686_v5, 0.0  ;;  %2103 = vmatprep.subr.bf16.mxu1 %v2561_v0  ;;  %v2092_v47 = vpack.c.bf16 %v604_v45, %v603_v44  ;;  %v729_v49 = vld [vmem:[%s3254_s4 + $0x68] sm:$0xff]  ;;  %v730_v51 = vld [vmem:[%s3254_s4 + $0x70] sm:$0xff]  ;;  %v731_v52 = vld [vmem:[%s3254_s4 + $0x78] sm:$0xff] }
  0xc1   : > { %v696_v13 = vrot.slane %v2879_v11, 1  ;;  %v697_v14 = vrot.slane %v2876_v10, 1  ;;  %v699_v15 = vrot.slane %v692_v12, 1  ;;  %v708_v19 = vrot.slane %v2879_v11, 2  ;;  %v732_v54 = vld [vmem:[%s3254_s4 + $0x80] sm:$0xff]  ;;  %v733_v55 = vld [vmem:[%s3254_s4 + $0x88] sm:$0xff] }
  0xc2   : > { %v709_v20 = vrot.slane %v2876_v10, 2  ;;  %v711_v23 = vrot.slane %v692_v12, 2  ;;  %2087 = vmatpush3.bf16.msra.mxu0 %v2086_v36  ;;  %v2116_v50 = vpack.c.bf16 %v729_v49, %v728_v48  ;;  %v2119_v53 = vpack.c.bf16 %v731_v52, %v730_v51  ;;  %v734_v57 = vld [vmem:[%s3254_s4 + $0x90] sm:$0xff]  ;;  %v735_v58 = vld [vmem:[%s3254_s4 + $0x98] sm:$0xff]  ;;  %v736_v60 = vld [vmem:[%s3254_s4 + $0xa0] sm:$0xff]  ;;  %s569_s30 = scalar_lea.vmem %s3282_s18, %s1906_s17 }
  0xc3   : > { %v698_v21 = vsel %vm695_vm1, %v696_v13, %v697_v14  ;;  %v700_v24 = vsel %vm695_vm1, %v697_v14, %v699_v15  ;;  %2105 = vmatpush1.bf16.msra.mxu1 %v2104_v25  ;;  %2088 = vmatprep.subr.bf16.mxu0 %v2561_v0  ;;  %v2122_v56 = vpack.c.bf16 %v733_v55, %v732_v54  ;;  %v737_v61 = vld [vmem:[%s3254_s4 + $0xa8] sm:$0xff]  ;;  %v738_v63 = vld [vmem:[%s3254_s4 + $0xb0] sm:$0xff]  ;;  %v739_v3 = vld [vmem:[%s3254_s4 + $0xb8] sm:$0xff] }
  0xc4   : > { %701 = vrot.lane.b32.xlu0 %v698_v21, %s2562_s22  ;;  %v710_v22 = vsel %vm707_vm2, %v708_v19, %v709_v20  ;;  %v2909_v29 = vsel %vm707_vm2, %v709_v20, %v711_v23  ;;  %2106 = vmatprep.subr.bf16.mxu1 %v2561_v0  ;;  %v2125_v59 = vpack.c.bf16 %v735_v58, %v734_v57  ;;  %v581_v9 = vld [vmem:[%s564_s29] sm:$0x1]  ;;  %v606_v21 = vld [vmem:[%s3258_s8 + $0x48] sm:$0xff]  ;;  %v574_v31 = vld [vmem:[%s3252_s2 + $0x10] sm:$0xff] }
  0xc5   : > { %1887 = vmatprep.mubr.msk.f32.mxu1 %vm713_vm3, %v710_v22  ;;  %v2128_v62 = vpack.c.bf16 %v737_v61, %v736_v60  ;;  %v2131_v4 = vpack.c.bf16 %v739_v3, %v738_v63  ;;  %v582_v12 = vand.u32 2147483647, %v581_v9  ;;  %vm586_vm4 = vcmp.ge.f32.partialorder %v581_v9, 0.0  ;;  %v572_v27 = vld [vmem:[%s3252_s2] sm:$0xff]  ;;  %v573_v28 = vld [vmem:[%s3252_s2 + $0x8] sm:$0xff]  ;;  %v575_v32 = vld [vmem:[%s3252_s2 + $0x18] sm:$0xff] }
  0xc6   : > { %2090 = vmatpush3.bf16.msra.mxu0 %v2089_v42  ;;  %v3019_v30 = vpack.c.bf16 %v573_v28, %v572_v27  ;;  %v3034_v33 = vpack.c.bf16 %v575_v32, %v574_v31  ;;  %v577_v35 = vld [vmem:[%s3252_s2 + $0x28] sm:$0xff]  ;;  %v578_v37 = vld [vmem:[%s3252_s2 + $0x30] sm:$0xff]  ;;  %v579_v38 = vld [vmem:[%s3252_s2 + $0x38] sm:$0xff] }
  0xc7   : > { %2108 = vmatpush1.bf16.msra.mxu1 %v2107_v34  ;;  %2091 = vmatprep.subr.bf16.mxu0 %v2561_v0  ;;  %v583_v13 = vsub.f32 0.0, %v582_v12  ;;  %v576_v34 = vld [vmem:[%s3252_s2 + $0x20] sm:$0xff]  ;;  %v3054_v39 = vpack.c.bf16 %v579_v38, %v578_v37  ;;  %v1241_v27 = vld [vmem:[%s3260_s10 + $0x10] sm:$0xff]  ;;  %v1242_v31 = vld [vmem:[%s3260_s10 + $0x18] sm:$0xff] }
  0xc8   : > { %703 = vrot.lane.b32.xlu0 %v700_v24, %s2562_s22  ;;  %2109 = vmatprep.subr.bf16.mxu1 %v2561_v0  ;;  %v3044_v36 = vpack.c.bf16 %v577_v35, %v576_v34  ;;  %v1886_v41 = vld [vmem:[#allocation2] ss:$0 sm:$0xff]  ;;  %v2161_v32 = vpack.c.bf16 %v1242_v31, %v1241_v27  ;;  %v1244_v35 = vld [vmem:[%s3260_s10 + $0x28] sm:$0xff]  ;;  %v1245_v38 = vld [vmem:[%s3260_s10 + $0x30] sm:$0xff] }
  0xc9   : > { %v584_v14 = vmul.f32 1.442695, %v583_v13  ;;  %v1243_v34 = vld [vmem:[%s3260_s10 + $0x20] sm:$0xff] }
  0xca   : > { %2093 = vmatpush3.bf16.msra.mxu0 %v2092_v47  ;;  %v2164_v37 = vpack.c.bf16 %v1244_v35, %v1243_v34 }
  0xcb   : > { %2111 = vmatpush1.bf16.msra.mxu1 %v2110_v40  ;;  %2094 = vmatprep.subr.bf16.mxu0 %v2561_v0  ;;  %2300 = vpow2.f32 %v584_v14  ;;  %v3061_v40 = vld [vmem:[%s3253_s3] sm:$0xff] }
  0xcc   : > { %2112 = vmatprep.subr.bf16.mxu1 %v2561_v0 }
  0xcf   : > { %2114 = vmatpush1.bf16.msra.mxu1 %v2113_v46 }
  0xd0   : > { %2115 = vmatprep.subr.bf16.mxu1 %v2561_v0 }
  0xd3   : > { %2117 = vmatpush1.bf16.msra.mxu1 %v2116_v50 }
  0xd4   : > { %2118 = vmatprep.subr.bf16.mxu1 %v2561_v0 }
  0xd5   : > { %v2301_v15 = vpop.eup %2300 }
  0xd6   : > { %v587_v17 = vsel %vm586_vm4, %v2301_v15, 1.0 }
  0xd7   : > { %2120 = vmatpush1.bf16.msra.mxu1 %v2119_v53 }
  0xd8   : > { %2121 = vmatprep.subr.bf16.mxu1 %v2561_v0 }
  0xdb   : > { %2123 = vmatpush1.bf16.msra.mxu1 %v2122_v56 }
  0xdc   : > { %2124 = vmatprep.subr.bf16.mxu1 %v2561_v0 }
  0xdf   : > { %2126 = vmatpush1.bf16.msra.mxu1 %v2125_v59 }
  0xe0   : > { %2127 = vmatprep.subr.bf16.mxu1 %v2561_v0 }
  0xe3   : > { %2129 = vmatpush1.bf16.msra.mxu1 %v2128_v62  ;;  %v983_v62 = vlaneseq }
  0xe4   : > { %2130 = vmatprep.subr.bf16.mxu1 %v2561_v0 }
  0xe5   : > { %v984_v63 = vshrl.u32 %v983_v62, 7  ;;  %v1259_v62 = vld [vmem:[%s3260_s10 + $0xa0] sm:$0xff] }
  0xe7   : > { %2132 = vmatpush1.bf16.msra.mxu1 %v2131_v4  ;;  %v3085_v3 = vsub.s32 0, %v984_v63  ;;  %v1260_v63 = vld [vmem:[%s3260_s10 + $0xa8] sm:$0xff] }
 0x136   : > { %v702_v5 = vpop.permute.xlu0 %701 }
 0x137   : > { %v714_v6 = vsel %vm713_vm3, %v2879_v11, %v702_v5  ;;  %v588_v11 = vadd.f32 1.0, %v2301_v15 }
 0x138   : > { %816 = vmatmul.mubr.f32.vlgmr.msra.gmra.mrb[0].mxu1 %v714_v6 }
 0x139   : > { %1888 = vmatprep.mubr.msk.f32.mxu1 %vm713_vm3, %v2909_v29  ;;  %2302 = vrcp.f32 %v588_v11  ;;  %v2564_v29 = vmov 0.0  }
 0x13a   : > { %v704_v7 = vpop.permute.xlu0 %703  ;;  %1983 = vmatprep.mubr.msk.f32.mxu0 %vm2563_vm5, %v2564_v29  ;;  %2005 = vmatprep.subr.mxu1 %v2564_v29 }
 0x13b   : > { %v715_v8 = vsel %vm713_vm3, %v2876_v10, %v704_v7  ;;  %v605_v10 = vld [vmem:[%s3258_s8 + $0x40] sm:$0xff]  ;;  %2006 = vmatpush3.msra.mxu1 %v3061_v40 }
 0x13c   : > { %821 = vmatmul.mubr.f32.gmra.mrb[2].mxu1 %v715_v8  ;;  %v2095_v23 = vpack.c.bf16 %v606_v21, %v605_v10  ;;  %2029 = vmatprep.subr.mxu1 %v2564_v29 }
 0x13d   : > { %2007 = vmatprep.mubr.msk.f32.mxu1 %vm2563_vm5, %v2564_v29 }
 0x13e   : > { %2096 = vmatpush3.bf16.msra.mxu0 %v2095_v23 }
 0x13f   : > { %2133 = vmatprep.subr.bf16.mxu0 %v2561_v0 }
 0x143   : > { %v2303_v16 = vpop.eup %2302 }
 0x144   : > { %v590_v18 = vmul.f32 %v2303_v16, %v587_v17 }
 0x146   : > { %v591_v19 = vmul.f32 %v590_v18, %v590_v18 }
 0x148   : > { %v594_v20 = vadd.f32 1.0, %v591_v19  ;;  %v592_v22 = vsub.f32 1.0, %v591_v19 }
 0x14a   : > { %2304 = vrcp.f32 %v594_v20  ;;  %v593_v24 = vmul.f32 %v592_v22, %v581_v9 }
 0x154   : > { %v2305_v25 = vpop.eup %2304 }
 0x155   : > { %v596_v26 = vmul.f32 %v2305_v25, %v593_v24  ;;  %v1239_v25 = vld [vmem:[%s3260_s10] sm:$0xff] }
 0x157   : > { %1984 = vmatmul.mubr.msk.f32.vlgmr.msra.gmra.mrb[0].mxu0 %vm608_vm6, %v596_v26  ;;  %v1240_v26 = vld [vmem:[%s3260_s10 + $0x8] sm:$0xff] }
 0x158   : > { %2135 = vmatpush3.bf16.msra.mxu0 %v3019_v30  ;;  %2002 = vmatprep.mubr.msk.f32.mxu0 %vm2563_vm5, %v2564_v29  ;;  %v2158_v28 = vpack.c.bf16 %v1240_v26, %v1239_v25 }
 0x159   : > { %2136 = vmatprep.subr.bf16.mxu0 %v2561_v0 }
 0x15c   : > { %2138 = vmatpush3.bf16.msra.mxu0 %v3034_v33 }
 0x15d   : > { %2139 = vmatprep.subr.bf16.mxu0 %v2561_v0 }
 0x160   : > { %2141 = vmatpush3.bf16.msra.mxu0 %v3044_v36 }
 0x161   : > { %2142 = vmatprep.subr.bf16.mxu0 %v2561_v0 }
 0x164   : > { %2144 = vmatpush3.bf16.msra.mxu0 %v3054_v39 }
 0x165   : > { %2145 = vmatprep.subr.bf16.mxu0 %v2561_v0 }
 0x20b   : > { %v817_v42 = vpop.f32.mrb[0].mxu1 }
 0x20c   : > { %v819_v43 = vpop.f32.mrb[1].mxu1  ;;  %v818_v44 = vadd.f32 %v1886_v41, %v817_v42 }
 0x20d   : > { %v1247_v43 = vld [vmem:[%s3260_s10 + $0x40] sm:$0xff] }
 0x20e   : > { %v826_v48 = vsel %vm713_vm3, %v818_v44, 0.0 }
 0x20f   : > { %v822_v45 = vpop.f32.mrb[2].mxu1 }
 0x210   : > { %v823_v46 = vadd.f32 %v1886_v41, %v822_v45  ;;  %v824_v47 = vpop.f32.mrb[3].mxu1  ;;  %v1246_v41 = vld [vmem:[%s3260_s10 + $0x38] sm:$0xff] }
 0x211   : > { %v2167_v42 = vpack.c.bf16 %v1246_v41, %v1245_v38  ;;  %v1250_v47 = vld [vmem:[%s3260_s10 + $0x58] sm:$0xff] }
 0x212   : > { %v827_v49 = vsel %vm713_vm3, %v823_v46, 0.0 }
 0x213   : > { %v828_v50 = vadd.f32 %v827_v49, %v826_v48  ;;  %v1251_v49 = vld [vmem:[%s3260_s10 + $0x60] sm:$0xff] }
 0x215   : > { %v829_v51 = vrot.slane %v828_v50, 4 }
 0x217   : > { %v830_v52 = vadd.f32 %v829_v51, %v828_v50  ;;  %v1252_v50 = vld [vmem:[%s3260_s10 + $0x68] sm:$0xff] }
 0x218   : > { %v2176_v51 = vpack.c.bf16 %v1252_v50, %v1251_v49 }
 0x219   : > { %v831_v53 = vrot.slane %v830_v52, 2 }
 0x21b   : > { %v832_v54 = vadd.f32 %v831_v53, %v830_v52  ;;  %v1253_v52 = vld [vmem:[%s3260_s10 + $0x70] sm:$0xff]  ;;  %v1254_v53 = vld [vmem:[%s3260_s10 + $0x78] sm:$0xff] }
 0x21d   : > { %v833_v55 = vrot.slane %v832_v54, 1 }
 0x21f   : > { %v834_v56 = vadd.f32 %v833_v55, %v832_v54  ;;  %v2179_v54 = vpack.c.bf16 %v1254_v53, %v1253_v52  ;;  %v1255_v55 = vld [vmem:[%s3260_s10 + $0x80] sm:$0xff] }
 0x221   : > { %2003 = vmatmul.mubr.msk.f32.vlgmr.msra.gmra.mrb[2].mxu0 %vm713_vm3, %v834_v56  ;;  %v1256_v56 = vld [vmem:[%s3260_s10 + $0x88] sm:$0xff] }
 0x222   : > { %2147 = vmatpush3.bf16.msra.mxu0 %v3019_v30  ;;  %2026 = vmatprep.mubr.msk.f32.mxu0 %vm2563_vm5, %v2564_v29 }
 0x223   : > { %2148 = vmatprep.subr.bf16.mxu0 %v2561_v0 }
 0x226   : > { %2150 = vmatpush3.bf16.msra.mxu0 %v3034_v33 }
 0x227   : > { %2151 = vmatprep.subr.bf16.mxu0 %v2561_v0 }
 0x22a   : > { %2153 = vmatpush3.bf16.msra.mxu0 %v3044_v36  ;;  %v3078_v57 = vpop.f32.mrb[0].mxu0 }
 0x22b   : > { %2154 = vmatprep.subr.bf16.mxu0 %v2561_v0  ;;  %v1985_v58 = vpop.f32.mrb[1].mxu0 }
 0x22c   : > { %v2182_v58 = vpack.c.bf16 %v1256_v56, %v1255_v55 }
 0x22e   : > { %2156 = vmatpush3.bf16.msra.mxu0 %v3054_v39 }
 0x22f   : > { %2157 = vmatprep.subr.bf16.mxu0 %v2561_v0 }
 0x2f4   : > { %v904_v59 = vpop.f32.mrb[2].mxu0 }
 0x2f5   : > { %v908_v60 = vmul.f32 0.0078125, %v904_v59  ;;  %v2004_v61 = vpop.f32.mrb[3].mxu0  ;;  %v1257_v59 = vld [vmem:[%s3260_s10 + $0x90] sm:$0xff] }
 0x2f7   : > { %2008 = vmatmul.mubr.msk.f32.vlgmr.msra.gmra.mrb[4].mxu1 %vm909_vm7, %v908_v60  ;;  %v1258_v60 = vld [vmem:[%s3260_s10 + $0x98] sm:$0xff] }
 0x2f8   : > { %2030 = vmatpush3.msra.mxu1 %v3061_v40  ;;  %2031 = vmatprep.mubr.msk.f32.mxu1 %vm2563_vm5, %v2564_v29  ;;  %v2185_v61 = vpack.c.bf16 %v1258_v60, %v1257_v59 }
 0x2f9   : > { %2193 = vmatprep.subr.bf16.mxu1 %v2561_v0 }
 0x3ca   : > { %v979_v4 = vpop.f32.mrb[4].mxu1 }
 0x3cb   : > { %v986_v5 = vrot.slane %v979_v4, %v3085_v3  ;;  %v2009_v6 = vpop.f32.mrb[5].mxu1  ;;  %v2188_v4 = vpack.c.bf16 %v1260_v63, %v1259_v62 }
 0x3cc   : > { %v1262_v6 = vld [vmem:[%s3260_s10 + $0xb8] sm:$0xff] }
 0x3cd   : > { %v3088_v7 = vsub.f32 %v818_v44, %v986_v5  ;;  %v3090_v8 = vsub.f32 %v823_v46, %v986_v5  ;;  %v1248_v44 = vld [vmem:[%s3260_s10 + $0x48] sm:$0xff]  ;;  %v1249_v46 = vld [vmem:[%s3260_s10 + $0x50] sm:$0xff] }
 0x3ce   : > { %v2170_v45 = vpack.c.bf16 %v1248_v44, %v1247_v43  ;;  %v2173_v48 = vpack.c.bf16 %v1250_v47, %v1249_v46  ;;  %v1261_v5 = vld [vmem:[%s3260_s10 + $0xb0] sm:$0xff] }
 0x3cf   : > { %v989_v9 = vmul.f32 %v3088_v7, %v3088_v7  ;;  %v990_v12 = vmul.f32 %v3090_v8, %v3090_v8 }
 0x3d1   : > { %v991_v13 = vsel %vm713_vm3, %v989_v9, 0.0  ;;  %v992_v14 = vsel %vm713_vm3, %v990_v12, 0.0  ;;  %v2191_v9 = vpack.c.bf16 %v1262_v6, %v1261_v5 }
 0x3d2   : > { %v993_v15 = vadd.f32 %v992_v14, %v991_v13 }
 0x3d4   : > { %v994_v11 = vrot.slane %v993_v15, 4 }
 0x3d6   : > { %v995_v16 = vadd.f32 %v994_v11, %v993_v15  ;;  %v1893_v15 = vld [vmem:[#allocation4] ss:$0 sm:$0xff] }
 0x3d8   : > { %v996_v17 = vrot.slane %v995_v16, 2 }
 0x3da   : > { %v997_v18 = vadd.f32 %v996_v17, %v995_v16  ;;  %v1894_v17 = vld [vmem:[#allocation6] ss:$0 sm:$0xff] }
 0x3dc   : > { %v998_v19 = vrot.slane %v997_v18, 1 }
 0x3de   : > { %v999_v20 = vadd.f32 %v998_v19, %v997_v18 }
 0x3e0   : > { %2027 = vmatmul.mubr.msk.f32.vlgmr.msra.gmra.mrb[4].mxu0 %vm713_vm3, %v999_v20 }
 0x3e1   : > { %2159 = vmatpush1.bf16.msra.mxu0 %v2158_v28 }
 0x3e2   : > { %2160 = vmatprep.subr.bf16.mxu0 %v2561_v0 }
 0x3e5   : > { %2162 = vmatpush1.bf16.msra.mxu0 %v2161_v32 }
 0x3e6   : > { %2163 = vmatprep.subr.bf16.mxu0 %v2561_v0 }
 0x3e9   : > { %2165 = vmatpush1.bf16.msra.mxu0 %v2164_v37 }
 0x3ea   : > { %2166 = vmatprep.subr.bf16.mxu0 %v2561_v0 }
 0x3ed   : > { %2168 = vmatpush1.bf16.msra.mxu0 %v2167_v42 }
 0x3ee   : > { %2169 = vmatprep.subr.bf16.mxu0 %v2561_v0 }
 0x3f1   : > { %2171 = vmatpush1.bf16.msra.mxu0 %v2170_v45  ;;  %v607_v45 = vld [vmem:[#allocation7] sm:$0x1] }
 0x3f2   : > { %2172 = vmatprep.subr.bf16.mxu0 %v2561_v0 }
 0x3f5   : > { %2174 = vmatpush1.bf16.msra.mxu0 %v2173_v48  ;;  %v679_v48 = vadd.f32 %v3078_v57, %v607_v45 }
 0x3f6   : > { %2175 = vmatprep.subr.bf16.mxu0 %v2561_v0 }
 0x3f7   : > { %v1206_v53 = vrot.slane %v679_v48, %v3085_v3 }
 0x3f9   : > { %2177 = vmatpush1.bf16.msra.mxu0 %v2176_v51 }
 0x3fa   : > { %2178 = vmatprep.subr.bf16.mxu0 %v2561_v0 }
 0x3fd   : > { %2180 = vmatpush1.bf16.msra.mxu0 %v2179_v54 }
 0x3fe   : > { %2181 = vmatprep.subr.bf16.mxu0 %v2561_v0 }
 0x401   : > { %2183 = vmatpush1.bf16.msra.mxu0 %v2182_v58 }
 0x402   : > { %2184 = vmatprep.subr.bf16.mxu0 %v2561_v0 }
 0x405   : > { %2186 = vmatpush1.bf16.msra.mxu0 %v2185_v61 }
 0x406   : > { %2187 = vmatprep.subr.bf16.mxu0 %v2561_v0 }
 0x409   : > { %2189 = vmatpush1.bf16.msra.mxu0 %v2188_v4 }
 0x40a   : > { %2190 = vmatprep.subr.bf16.mxu0 %v2561_v0 }
 0x40d   : > { %2192 = vmatpush1.bf16.msra.mxu0 %v2191_v9 }
 0x4b3   : > { %v1069_v10 = vpop.f32.mrb[4].mxu0 }
 0x4b4   : > { %v1073_v21 = vmul.f32 0.0078125, %v1069_v10  ;;  %v2028_v22 = vpop.f32.mrb[5].mxu0 }
 0x4b6   : > { %v1074_v23 = vadd.f32 1e-05, %v1073_v21 }
 0x4b8   : > { %2306 = vrsqrt.f32 %v1074_v23 }
 0x4c2   : > { %v2307_v24 = vpop.eup %2306 }
 0x4c3   : > { %2032 = vmatmul.mubr.msk.f32.vlgmr.msra.gmra.mrb[6].mxu1 %vm909_vm7, %v2307_v24 }
 0x4c4   : > { %2195 = vmatpush3.bf16.msra.mxu1 %v3019_v30  ;;  %2050 = vmatprep.mubr.msk.f32.mxu1 %vm2563_vm5, %v2564_v29 }
 0x4c5   : > { %2196 = vmatprep.subr.bf16.mxu1 %v2561_v0 }
 0x4c8   : > { %2198 = vmatpush3.bf16.msra.mxu1 %v3034_v33 }
 0x4c9   : > { %2199 = vmatprep.subr.bf16.mxu1 %v2561_v0 }
 0x4cc   : > { %2201 = vmatpush3.bf16.msra.mxu1 %v3044_v36 }
 0x4cd   : > { %2202 = vmatprep.subr.bf16.mxu1 %v2561_v0 }
 0x4d0   : > { %2204 = vmatpush3.bf16.msra.mxu1 %v3054_v39 }
 0x4d1   : > { %2053 = vmatprep.subr.mxu1 %v2564_v29 }
 0x596   : > { %v1145_v12 = vpop.f32.mrb[6].mxu1 }
 0x597   : > { %v1152_v13 = vrot.slane %v1145_v12, %v3085_v3  ;;  %v2033_v14 = vpop.f32.mrb[7].mxu1 }
 0x599   : > { %v1153_v11 = vmul.f32 %v1152_v13, %v3088_v7  ;;  %v1154_v16 = vmul.f32 %v1152_v13, %v3090_v8 }
 0x59b   : > { %v1162_v18 = vmul.f32 %v1893_v15, %v1153_v11  ;;  %v1163_v19 = vmul.f32 %v1893_v15, %v1154_v16 }
 0x59d   : > { %v1171_v20 = vadd.f32 %v1894_v17, %v1162_v18  ;;  %v1172_v10 = vadd.f32 %v1894_v17, %v1163_v19 }
 0x59f   : > { %v1173_v21 = vand.u32 2147483647, %v1171_v20  ;;  %v1174_v22 = vand.u32 2147483647, %v1172_v10  ;;  %vm1181_vm8 = vcmp.ge.f32.partialorder %v1171_v20, 0.0  ;;  %vm1182_vm9 = vcmp.ge.f32.partialorder %v1172_v10, 0.0 }
 0x5a1   : > { %v1175_v23 = vsub.f32 0.0, %v1173_v21  ;;  %v1176_v24 = vsub.f32 0.0, %v1174_v22 }
 0x5a3   : > { %v1177_v25 = vmul.f32 1.442695, %v1175_v23  ;;  %v1179_v26 = vmul.f32 1.442695, %v1176_v24 }
 0x5a5   : > { %2308 = vpow2.f32 %v1177_v25 }
 0x5a6   : > { %2310 = vpow2.f32 %v1179_v26 }
 0x5af   : > { %v2309_v27 = vpop.eup %2308 }
 0x5b0   : > { %v2311_v28 = vpop.eup %2310  ;;  %v1185_v31 = vadd.f32 1.0, %v2309_v27  ;;  %v1183_v8 = vsel %vm1181_vm8, %v2309_v27, 1.0 }
 0x5b1   : > { %v1186_v32 = vadd.f32 1.0, %v2311_v28  ;;  %v1184_v35 = vsel %vm1182_vm9, %v2311_v28, 1.0 }
 0x5b2   : > { %2312 = vrcp.f32 %v1185_v31 }
 0x5b3   : > { %2314 = vrcp.f32 %v1186_v32 }
 0x5bc   : > { %v2313_v7 = vpop.eup %2312 }
 0x5bd   : > { %v2315_v34 = vpop.eup %2314  ;;  %v1189_v37 = vmul.f32 %v2313_v7, %v1183_v8 }
 0x5be   : > { %v1190_v38 = vmul.f32 %v2315_v34, %v1184_v35 }
 0x5bf   : > { %v1191_v41 = vmul.f32 %v1189_v37, %v1189_v37 }
 0x5c0   : > { %v1192_v42 = vmul.f32 %v1190_v38, %v1190_v38 }
 0x5c1   : > { %v1197_v43 = vadd.f32 1.0, %v1191_v41  ;;  %v1193_v46 = vsub.f32 1.0, %v1191_v41 }
 0x5c2   : > { %v1198_v44 = vadd.f32 1.0, %v1192_v42  ;;  %v1194_v47 = vsub.f32 1.0, %v1192_v42 }
 0x5c3   : > { %2316 = vrcp.f32 %v1197_v43  ;;  %v1195_v49 = vmul.f32 %v1193_v46, %v1171_v20  ;;  %v1895_v20 = vld [vmem:[#allocation9] ss:$0 sm:$0xff] }
 0x5c4   : > { %2318 = vrcp.f32 %v1198_v44  ;;  %v1196_v51 = vmul.f32 %v1194_v47, %v1172_v10 }
 0x5cd   : > { %v2317_v50 = vpop.eup %2316 }
 0x5ce   : > { %v2319_v52 = vpop.eup %2318  ;;  %v1201_v54 = vmul.f32 %v2317_v50, %v1195_v49 }
 0x5cf   : > { %v1202_v55 = vmul.f32 %v2319_v52, %v1196_v51 }
 0x5d0   : > { %v1207_v56 = vadd.f32 %v1206_v53, %v1201_v54 }
 0x5d1   : > { %v1208_v58 = vadd.f32 %v1206_v53, %v1202_v55 }
 0x5d2   : > { %v1211_v59 = vrot.slane %v1207_v56, 7 }
 0x5d3   : > { %v1212_v60 = vrot.slane %v1208_v58, 7 }
 0x5d4   : > { %v1217_v61 = vsel %vm684_vm0, 0.0, %v1211_v59 }
 0x5d5   : > { %v1213_v62 = vsel %vm684_vm0, %v1211_v59, %v1212_v60  ;;  %v1232_v63 = vrot.slane %v1217_v61, 2  ;;  %v1221_v4 = vrot.slane %v1217_v61, 1  ;;  %v1218_v57 = vsel %vm684_vm0, %v1212_v60, 0.0 }
 0x5d6   : > { %v1233_v5 = vrot.slane %v1213_v62, 2  ;;  %v1222_v6 = vrot.slane %v1213_v62, 1  ;;  %v1235_v9 = vrot.slane %v1218_v57, 2  ;;  %v1224_v14 = vrot.slane %v1218_v57, 1  ;;  %v1903_v57 = vld [vmem:[#allocation12] ss:$0 sm:$0xff] }
 0x5d8   : > { %v1234_v12 = vsel %vm707_vm2, %v1232_v63, %v1233_v5  ;;  %v1223_v13 = vsel %vm695_vm1, %v1221_v4, %v1222_v6  ;;  %v1236_v15 = vsel %vm707_vm2, %v1233_v5, %v1235_v9  ;;  %v1225_v11 = vsel %vm695_vm1, %v1222_v6, %v1224_v14 }
 0x5d9   : > { %1896 = vmatprep.mubr.msk.f32.mxu0 %vm713_vm3, %v1234_v12  ;;  %1226 = vrot.lane.b32.xlu1 %v1223_v13, %s2562_s22 }
 0x5dd   : > { %1228 = vrot.lane.b32.xlu1 %v1225_v11, %s2562_s22 }
 0x64b   : > { %v1227_v16 = vpop.permute.xlu1 %1226 }
 0x64c   : > { %v1237_v17 = vsel %vm713_vm3, %v1217_v61, %v1227_v16 }
 0x64d   : > { %1339 = vmatmul.mubr.f32.vlgmr.msra.gmra.mrb[6].mxu0 %v1237_v17 }
 0x64e   : > { %1897 = vmatprep.mubr.msk.f32.mxu0 %vm713_vm3, %v1236_v15 }
 0x64f   : > { %v1229_v18 = vpop.permute.xlu1 %1228 }
 0x650   : > { %v1238_v19 = vsel %vm713_vm3, %v1213_v62, %v1229_v18  ;;  %v1902_v62 = vld [vmem:[#allocation10] ss:$0 sm:$0xff] }
 0x651   : > { %1344 = vmatmul.mubr.f32.gmra.mrb[8].mxu0 %v1238_v19 }
 0x720   : > { %v1340_v10 = vpop.f32.mrb[6].mxu0 }
 0x721   : > { %v1342_v21 = vpop.f32.mrb[7].mxu0  ;;  %v1341_v22 = vadd.f32 %v1895_v20, %v1340_v10 }
 0x723   : > { %v1349_v26 = vsel %vm713_vm3, %v1341_v22, 0.0 }
 0x724   : > { %v1345_v23 = vpop.f32.mrb[8].mxu0 }
 0x725   : > { %v1346_v24 = vadd.f32 %v1895_v20, %v1345_v23  ;;  %v1347_v25 = vpop.f32.mrb[9].mxu0 }
 0x727   : > { %v1350_v27 = vsel %vm713_vm3, %v1346_v24, 0.0 }
 0x728   : > { %v1351_v28 = vadd.f32 %v1350_v27, %v1349_v26 }
 0x72a   : > { %v1352_v31 = vrot.slane %v1351_v28, 4 }
 0x72c   : > { %v1353_v32 = vadd.f32 %v1352_v31, %v1351_v28 }
 0x72e   : > { %v1354_v7 = vrot.slane %v1353_v32, 2 }
 0x730   : > { %v1355_v8 = vadd.f32 %v1354_v7, %v1353_v32 }
 0x732   : > { %v1356_v34 = vrot.slane %v1355_v8, 1 }
 0x734   : > { %v1357_v35 = vadd.f32 %v1356_v34, %v1355_v8 }
 0x736   : > { %2051 = vmatmul.mubr.msk.f32.vlgmr.msra.gmra.mrb[8].mxu1 %vm713_vm3, %v1357_v35 }
 0x737   : > { %2054 = vmatpush3.msra.mxu1 %v3061_v40  ;;  %2055 = vmatprep.mubr.msk.f32.mxu1 %vm2563_vm5, %v2564_v29 }
 0x738   : > { %2205 = vmatprep.subr.bf16.mxu1 %v2561_v0 }
 0x809   : > { %v1427_v37 = vpop.f32.mrb[8].mxu1 }
 0x80a   : > { %v1431_v38 = vmul.f32 0.0078125, %v1427_v37  ;;  %v2052_v41 = vpop.f32.mrb[9].mxu1 }
 0x80c   : > { %2056 = vmatmul.mubr.msk.f32.vlgmr.msra.gmra.mrb[10].mxu1 %vm909_vm7, %v1431_v38 }
 0x80d   : > { %2207 = vmatpush3.bf16.msra.mxu1 %v3019_v30  ;;  %2074 = vmatprep.mubr.msk.f32.mxu1 %vm2563_vm5, %v2564_v29 }
 0x80e   : > { %2208 = vmatprep.subr.bf16.mxu1 %v2561_v0 }
 0x811   : > { %2210 = vmatpush3.bf16.msra.mxu1 %v3034_v33 }
 0x812   : > { %2211 = vmatprep.subr.bf16.mxu1 %v2561_v0 }
 0x815   : > { %2213 = vmatpush3.bf16.msra.mxu1 %v3044_v36 }
 0x816   : > { %2214 = vmatprep.subr.bf16.mxu1 %v2561_v0 }
 0x819   : > { %2216 = vmatpush3.bf16.msra.mxu1 %v3054_v39 }
 0x81a   : > { %2077 = vmatprep.subr.mxu1 %v2564_v29 }
 0x8df   : > { %v1501_v42 = vpop.f32.mrb[10].mxu1 }
 0x8e0   : > { %v1508_v30 = vrot.slane %v1501_v42, %v3085_v3  ;;  %v2057_v43 = vpop.f32.mrb[11].mxu1 }
 0x8e2   : > { %v1509_v44 = vsub.f32 %v1341_v22, %v1508_v30  ;;  %v1510_v45 = vsub.f32 %v1346_v24, %v1508_v30 }
 0x8e4   : > { %v1511_v46 = vmul.f32 %v1509_v44, %v1509_v44  ;;  %v1512_v47 = vmul.f32 %v1510_v45, %v1510_v45 }
 0x8e6   : > { %v1513_v33 = vsel %vm713_vm3, %v1511_v46, 0.0  ;;  %v1514_v48 = vsel %vm713_vm3, %v1512_v47, 0.0 }
 0x8e7   : > { %v1515_v49 = vadd.f32 %v1514_v48, %v1513_v33 }
 0x8e9   : > { %v1516_v36 = vrot.slane %v1515_v49, 4 }
 0x8eb   : > { %v1517_v50 = vadd.f32 %v1516_v36, %v1515_v49 }
 0x8ed   : > { %v1518_v0 = vrot.slane %v1517_v50, 2 }
 0x8ef   : > { %v1519_v51 = vadd.f32 %v1518_v0, %v1517_v50 }
 0x8f1   : > { %v1520_v39 = vrot.slane %v1519_v51, 1 }
 0x8f3   : > { %v1521_v52 = vadd.f32 %v1520_v39, %v1519_v51 }
 0x8f5   : > { %2075 = vmatmul.mubr.msk.f32.vlgmr.msra.gmra.mrb[12].mxu1 %vm713_vm3, %v1521_v52 }
 0x8f6   : > { %2078 = vmatpush3.msra.mxu1 %v3061_v40  ;;  %2079 = vmatprep.mubr.msk.f32.mxu1 %vm2563_vm5, %v2564_v29 }
 0x9c8   : > { %v1591_v53 = vpop.f32.mrb[12].mxu1 }
 0x9c9   : > { %v1595_v54 = vmul.f32 0.0078125, %v1591_v53  ;;  %v2076_v55 = vpop.f32.mrb[13].mxu1 }
 0x9cb   : > { %v1596_v56 = vadd.f32 1e-05, %v1595_v54 }
 0x9cd   : > { %2320 = vrsqrt.f32 %v1596_v56 }
 0x9d7   : > { %v2321_v58 = vpop.eup %2320 }
 0x9d8   : > { %2080 = vmatmul.mubr.msk.f32.vlgmr.msra.gmra.mrb[14].mxu1 %vm909_vm7, %v2321_v58 }
 0xaab   : > { %v1667_v59 = vpop.f32.mrb[14].mxu1 }
 0xaac   : > { %v1674_v60 = vrot.slane %v1667_v59, %v3085_v3  ;;  %v2081_v61 = vpop.f32.mrb[15].mxu1 }
 0xaae   : > { %v1675_v63 = vmul.f32 %v1674_v60, %v1509_v44  ;;  %v1676_v4 = vmul.f32 %v1674_v60, %v1510_v45 }
 0xab0   : > { %v1684_v40 = vmul.f32 %v1902_v62, %v1675_v63  ;;  %v1685_v5 = vmul.f32 %v1902_v62, %v1676_v4 }
 0xab2   : > { %v1693_v6 = vadd.f32 %v1903_v57, %v1684_v40  ;;  %v1694_v29 = vadd.f32 %v1903_v57, %v1685_v5 }
 0xab4   : > { %v1695_v9 = vand.u32 2147483647, %v1693_v6  ;;  %v1696_v12 = vand.u32 2147483647, %v1694_v29  ;;  %vm1703_vm10 = vcmp.ge.f32.partialorder %v1693_v6, 0.0  ;;  %vm1704_vm11 = vcmp.ge.f32.partialorder %v1694_v29, 0.0 }
 0xab6   : > { %v1697_v13 = vsub.f32 0.0, %v1695_v9  ;;  %v1698_v14 = vsub.f32 0.0, %v1696_v12 }
 0xab8   : > { %v1699_v15 = vmul.f32 1.442695, %v1697_v13  ;;  %v1701_v11 = vmul.f32 1.442695, %v1698_v14 }
 0xaba   : > { %2322 = vpow2.f32 %v1699_v15 }
 0xabb   : > { %2324 = vpow2.f32 %v1701_v11 }
 0xac4   : > { %v2323_v16 = vpop.eup %2322 }
 0xac5   : > { %v2325_v17 = vpop.eup %2324  ;;  %v1707_v3 = vadd.f32 1.0, %v2323_v16  ;;  %v1705_v20 = vsel %vm1703_vm10, %v2323_v16, 1.0 }
 0xac6   : > { %v1708_v18 = vadd.f32 1.0, %v2325_v17  ;;  %v1706_v21 = vsel %vm1704_vm11, %v2325_v17, 1.0 }
 0xac7   : > { %2326 = vrcp.f32 %v1707_v3 }
 0xac8   : > { %2328 = vrcp.f32 %v1708_v18 }
 0xad1   : > { %v2327_v19 = vpop.eup %2326 }
 0xad2   : > { %v2329_v10 = vpop.eup %2328  ;;  %v1711_v22 = vmul.f32 %v2327_v19, %v1705_v20 }
 0xad3   : > { %v1712_v23 = vmul.f32 %v2329_v10, %v1706_v21 }
 0xad4   : > { %v1713_v24 = vmul.f32 %v1711_v22, %v1711_v22 }
 0xad5   : > { %v1714_v25 = vmul.f32 %v1712_v23, %v1712_v23 }
 0xad6   : > { %v1719_v26 = vadd.f32 1.0, %v1713_v24  ;;  %v1715_v28 = vsub.f32 1.0, %v1713_v24 }
 0xad7   : > { %v1720_v27 = vadd.f32 1.0, %v1714_v25  ;;  %v1716_v31 = vsub.f32 1.0, %v1714_v25 }
 0xad8   : > { %2330 = vrcp.f32 %v1719_v26  ;;  %v1717_v32 = vmul.f32 %v1715_v28, %v1693_v6 }
 0xad9   : > { %2332 = vrcp.f32 %v1720_v27  ;;  %v1718_v8 = vmul.f32 %v1716_v31, %v1694_v29 }
 0xae2   : > { %v2331_v7 = vpop.eup %2330 }
 0xae3   : > { %v2333_v34 = vpop.eup %2332  ;;  %v1723_v35 = vmul.f32 %v2331_v7, %v1717_v32 }
 0xae4   : > { %v1724_v37 = vmul.f32 %v2333_v34, %v1718_v8 }
 0xae5   : > { %v1725_v38 = vadd.f32 %v1723_v35, %v2857_v1 }
 0xae6   : > { %v1726_v41 = vadd.f32 %v1724_v37, %v2859_v2 }
 0xae7   : > { %1727 = vst.msk [vmem:[%s569_s30] sm:$0xff] %vm713_vm3, %v1725_v38 }
 0xae8   : > { %1728 = vst.msk [vmem:[%s569_s30 + $0x8] sm:$0xff] %vm713_vm3, %v1726_v41 }
 0xae9 PF: > { %s3283_s23 = sld [smem:[#allocation17_spill]] }
 0xaef   : > { %s28_s29 = sadd.s32 1, %s3283_s23  }
 0xaf0   : > { %p25_p11 = scmp.ge.s32.totalorder %s28_s29, 4  }
 0xaf2   :  { %27 = sbr.rel (!%p25_p11) target bundleno = 6 (0x6), region = 138 }
 0xaf9   :  { %1750 = vsyncpa [#allocation3], 1 }
 0xafa   :  { %1752 = vsyncpa [#allocation3 + $0x1], 1 }
 0xafb   :  { %1753 = vsyncpa [#allocation5], 1 }
 0xafc   :  { %1754 = vsyncpa [#allocation8], 1 }
 0xafd   :  { %1755 = vsyncpa [#allocation11], 1 }

// kernel: forward.14
= control target key start
LH: loop header
LB: loop body
LE: loop exit
PB: predicated region body
PF: predicated region fallthrough
CT: control target
= control target key end

     0   :  { %s3931_s0 = inlined_call_operand.vmem [shape: f32[2,8,64], index: 0, kind: input, shape index: {}]   ;;  %s3932_s1 = inlined_call_operand.vmem [shape: f32[2,1,80], index: 1, kind: input, shape index: {}]   ;;  %s3933_s2 = inlined_call_operand.vmem [shape: f32[128,8], index: 2, kind: input, shape index: {}]   ;;  %s3934_s3 = inlined_call_operand.vmem [shape: f32[8,128], index: 3, kind: input, shape index: {}]   ;;  %s3935_s4 = inlined_call_operand.vmem [shape: f32[192,128], index: 4, kind: input, shape index: {}]   ;;  %s3936_s5 = inlined_call_operand.hbm [shape: f32[1,128], index: 5, kind: input, shape index: {}]   ;;  %s3937_s6 = inlined_call_operand.hbm [shape: f32[1,128], index: 6, kind: input, shape index: {}]   ;;  %s3938_s7 = inlined_call_operand.hbm [shape: f32[1,128], index: 7, kind: input, shape index: {}]   ;;  %s3939_s8 = inlined_call_operand.vmem [shape: f32[80,128], index: 8, kind: input, shape index: {}]   ;;  %s3940_s9 = inlined_call_operand.hbm [shape: f32[1,128], index: 9, kind: input, shape index: {}]   ;;  %s3941_s10 = inlined_call_operand.vmem [shape: f32[384,128], index: 10, kind: input, shape index: {}]   ;;  %s3942_s11 = inlined_call_operand.hbm [shape: f32[1,128], index: 11, kind: input, shape index: {}]   ;;  %s3943_s12 = inlined_call_operand.hbm [shape: f32[1,128], index: 12, kind: input, shape index: {}]   ;;  %s3944_s13 = inlined_call_operand.hbm [shape: f32[1,128], index: 13, kind: input, shape index: {}]   ;;  %s3945_s14 = inlined_call_operand.hbm [shape: f32[64,128], index: 14, kind: input, shape index: {}]   ;;  %s3946_s15 = inlined_call_operand.hbm [shape: f32[1,128], index: 15, kind: input, shape index: {}]   ;;  %s3947_s16 = inlined_call_operand.vmem [shape: f32[2,8,128], index: 16, kind: output, shape index: {}]  }
   0x1   :  { %3952 = sst [smem:[#allocation22_spill]] %s3931_s0 }
   0x2   :  { %3953 = sst [smem:[#allocation23_spill]] %s3937_s6 }
   0x3   :  { %3954 = sst [smem:[#allocation24_spill]] %s3940_s9 }
   0x4   :  { %3955 = sst [smem:[#allocation25_spill]] %s3941_s10 }
   0x5   :  { %3956 = sst [smem:[#allocation26_spill]] %s3943_s12 }
   0x6   :  { %3957 = sst [smem:[#allocation27_spill]] %s3947_s16 }
   0x7   :  { %21 = vsyncpa [#allocation3], 0 }
   0x8   :  { %22 = vsyncpa [#allocation5], 0 }
   0x9   :  { %23 = vsyncpa [#allocation8], 0 }
   0xa   :  { %24 = vsyncpa [#allocation11], 0 }
   0xb   :  { %25 = vsyncpa [#allocation14], 0  ;;  %s3182_s21 = smov 0  }
   0xc LB: > { %3958 = sst [smem:[#allocation21_spill]] %s3080_s21  ;;  %s3082_s22 = smov [#allocation4]   ;;  %s3080_s21 = sphi %s3182_s21, %s31_s21  }
   0xd   : > { %s441_s23 = sshll.u32 %s3082_s22, 4  ;;  %s3188_s24 = sadd.s32 4294967295, %s3080_s21   ;;  %s3193_s23 = int_to_ptr.vmem [resolvable:$true] %s441_s23 }
   0xe   : > { %p2034_p0 = scmp.ge.s32.totalorder %s3080_s21, 1  ;;  %p408_p1 = scmp.lt.s32.totalorder %s3080_s21, 3 }
   0xf   : > { %p3950_p2 = scmp.eq.s32.totalorder %s3188_s24, 0  ;;  %s3083_s26 = smov [#allocation7]  }
  0x10   : > { %p3195_p3 = pnand %p2034_p0, %p408_p1  ;;  %s466_s27 = sshll.u32 %s3083_s26, 4  ;;  %s3201_s27 = int_to_ptr.vmem [resolvable:$true] %s466_s27 }
  0x11   : > { %s3084_s28 = smov [#allocation10]   ;;  %s3085_s0 = smov [#allocation13]  }
  0x12   : > { %s3959_s25 = scalar_select %p3195_p3, 1, 0 }
  0x13   : > { %p2711_p4 = pneg %p3195_p3  ;;  %s491_s29 = sshll.u32 %s3084_s28, 4  ;;  %s3209_s29 = int_to_ptr.vmem [resolvable:$true] %s491_s29 }
  0x14   : > { %s512_s17 = sshll.u32 %s3085_s0, 4  ;;  %s3961_s6 = sld [smem:[#allocation23_spill]]  ;;  %s3211_s17 = int_to_ptr.vmem [resolvable:$true] %s512_s17 }
  0x15   : > { %p3205_p5 = pnand %p3950_p2, %p2711_p4 }
  0x17   : > { %p3221_p7 = pneg %p3205_p5 }
  0x1a   : > { %s2802_s20 = scalar_lea.hbm %s3961_s6, 16 }
  0x1b   : > { %p2803_p6 = scmp.ne.s32.totalorder %s3961_s6, %s2802_s20  ;;  %p2809_p10 = scmp.lt.u32.totalorder %s2802_s20, %s3961_s6 }
  0x1d   : > { %p2805_p8 = pnand %p3221_p7, %p2803_p6 }
  0x1f   : > { %p2806_p9 = pneg %p2805_p8 }
  0x21   : > { %p2811_p11 = pnand %p2809_p10, %p2806_p9 }
  0x23   : > { %2814 = shalt.err (!%p2811_p11)
}
  0x24   : > { %s2815_s18 = scalar_lea.vmem %s3193_s23, 16  ;;  %s2822_s19 = scalar_lea.vmem %s3193_s23, 32 }
  0x25   : > { %p2816_p12 = scmp.ne.s32.totalorder %s3193_s23, %s2815_s18  ;;  %p2823_p1 = scmp.lt.s32.totalorder %s3193_s23, %s3193_s23 }
  0x26   : > { %p2824_p4 = scmp.lt.s32.totalorder %s2822_s19, %s2815_s18 }
  0x27   : > { %p2818_p13 = pnand %p2816_p12, %p3221_p7 }
  0x28   : > { %p2825_p6 = por %p2824_p4, %p2823_p1 }
  0x29   : > { %p2819_p0 = pneg %p2818_p13 }
  0x2b   : > { %p2826_p8 = pnand %p2825_p6, %p2819_p0 }
  0x2d   : > { %2829 = shalt.err (!%p2826_p8)
}
  0x2e   : > { %2717 = dma.hbm_to_vmem [thread:$0]  (!%p3205_p5), %s3961_s6, 16, %s3193_s23, [#allocation5]  }
  0x2f   : > { %s3963_s9 = sld [smem:[#allocation24_spill]] }
  0x35   : > { %s2830_s0 = scalar_lea.hbm %s3963_s9, 16 }
  0x36   : > { %p2831_p9 = scmp.ne.s32.totalorder %s3963_s9, %s2830_s0  ;;  %p2837_p12 = scmp.lt.u32.totalorder %s2830_s0, %s3963_s9 }
  0x38   : > { %p2833_p10 = pnand %p2831_p9, %p3221_p7 }
  0x3a   : > { %p2834_p11 = pneg %p2833_p10 }
  0x3c   : > { %p2839_p13 = pnand %p2837_p12, %p2834_p11 }
  0x3e   : > { %2842 = shalt.err (!%p2839_p13)
}
  0x3f   : > { %s2843_s23 = scalar_lea.vmem %s3201_s27, 16  ;;  %s2850_s10 = scalar_lea.vmem %s3201_s27, 32 }
  0x40   : > { %p2844_p0 = scmp.ne.s32.totalorder %s3201_s27, %s2843_s23  ;;  %p2851_p6 = scmp.lt.s32.totalorder %s3201_s27, %s3201_s27 }
  0x41   : > { %p2852_p8 = scmp.lt.s32.totalorder %s2850_s10, %s2843_s23 }
  0x42   : > { %p2846_p1 = pnand %p2844_p0, %p3221_p7 }
  0x43   : > { %p2853_p9 = por %p2852_p8, %p2851_p6 }
  0x44   : > { %p2847_p4 = pneg %p2846_p1 }
  0x46   : > { %p2854_p10 = pnand %p2853_p9, %p2847_p4 }
  0x48   : > { %2857 = shalt.err (!%p2854_p10)
}
  0x49   : > { %2723 = dma.hbm_to_vmem [thread:$0]  (!%p3205_p5), %s3963_s9, 16, %s3201_s27, [#allocation8]  }
  0x4a   : > { %s3964_s12 = sld [smem:[#allocation26_spill]] }
  0x50   : > { %s2858_s26 = scalar_lea.hbm %s3964_s12, 16 }
  0x51   : > { %p2859_p11 = scmp.ne.s32.totalorder %s3964_s12, %s2858_s26  ;;  %p2865_p0 = scmp.lt.u32.totalorder %s2858_s26, %s3964_s12 }
  0x53   : > { %p2861_p12 = pnand %p2859_p11, %p3221_p7 }
  0x55   : > { %p2862_p13 = pneg %p2861_p12 }
  0x57   : > { %p2867_p1 = pnand %p2865_p0, %p2862_p13 }
  0x59   : > { %2870 = shalt.err (!%p2867_p1)
}
  0x5a   : > { %s2871_s27 = scalar_lea.vmem %s3209_s29, 16  ;;  %s2878_s10 = scalar_lea.vmem %s3209_s29, 32 }
  0x5b   : > { %p2872_p4 = scmp.ne.s32.totalorder %s3209_s29, %s2871_s27  ;;  %p2879_p9 = scmp.lt.s32.totalorder %s3209_s29, %s3209_s29 }
  0x5c   : > { %p2880_p10 = scmp.lt.s32.totalorder %s2878_s10, %s2871_s27 }
  0x5d   : > { %p2874_p6 = pnand %p2872_p4, %p3221_p7 }
  0x5e   : > { %p2881_p11 = por %p2880_p10, %p2879_p9 }
  0x5f   : > { %p2875_p8 = pneg %p2874_p6 }
  0x61   : > { %p2882_p12 = pnand %p2881_p11, %p2875_p8 }
  0x63   : > { %2885 = shalt.err (!%p2882_p12)
}
  0x64   : > { %2729 = dma.hbm_to_vmem [thread:$0]  (!%p3205_p5), %s3964_s12, 16, %s3209_s29, [#allocation11]  }
  0x65   : > { %s2886_s26 = scalar_lea.hbm %s3945_s14, 1024 }
  0x66   : > { %p2887_p13 = scmp.ne.s32.totalorder %s3945_s14, %s2886_s26  ;;  %p2893_p4 = scmp.lt.u32.totalorder %s2886_s26, %s3945_s14 }
  0x68   : > { %p2889_p0 = pnand %p2887_p13, %p3221_p7 }
  0x6a   : > { %p2890_p1 = pneg %p2889_p0 }
  0x6c   : > { %p2895_p6 = pnand %p2893_p4, %p2890_p1 }
  0x6e   : > { %2898 = shalt.err (!%p2895_p6)
}
  0x6f   : > { %s2899_s29 = scalar_lea.vmem %s3211_s17, 1024  ;;  %p2907_p11 = scmp.lt.s32.totalorder %s3211_s17, %s3211_s17 }
  0x70   : > { %p2900_p8 = scmp.ne.s32.totalorder %s3211_s17, %s2899_s29  ;;  %p2908_p12 = scmp.lt.s32.totalorder %s2899_s29, %s2899_s29 }
  0x72   : > { %p2902_p9 = pnand %p2900_p8, %p3221_p7  ;;  %p2909_p13 = por %p2908_p12, %p2907_p11 }
  0x74   : > { %p2903_p10 = pneg %p2902_p9 }
  0x76   : > { %p2910_p0 = pnand %p2909_p13, %p2903_p10 }
  0x78   : > { %2913 = shalt.err (!%p2910_p0)
}
  0x79   : > { %s3086_s27 = smov 128   ;;  %s3087_s10 = smov 8  }
  0x7a   : > { %2735 = dma.hbm_to_vmem [thread:$0]  (!%p3205_p5), %s3945_s14, 1024, %s3211_s17, [#allocation14], %s3086_s27, %s3086_s27, %s3087_s10  }
  0x7b   : > { %s3088_s20 = smov [#allocation2]   ;;  %s3089_s26 = smov [#allocation6]  }
  0x7c   : > { %s430_s22 = sshll.u32 %s3088_s20, 4  ;;  %s452_s0 = sshll.u32 %s3089_s26, 4  ;;  %s431_s22 = int_to_ptr.vmem [resolvable:$true] %s430_s22  ;;  %s453_s0 = int_to_ptr.vmem [resolvable:$true] %s452_s0 }
  0x7d   : > { %s2914_s23 = scalar_lea.hbm %s3936_s5, 16 }
  0x7e   : > { %p2915_p1 = scmp.ne.s32.totalorder %s3936_s5, %s2914_s23  ;;  %p2921_p8 = scmp.lt.u32.totalorder %s2914_s23, %s3936_s5 }
  0x80   : > { %p2917_p4 = pnand %p2915_p1, %p3221_p7 }
  0x82   : > { %p2918_p6 = pneg %p2917_p4 }
  0x84   : > { %p2923_p9 = pnand %p2921_p8, %p2918_p6 }
  0x86   : > { %2926 = shalt.err (!%p2923_p9)
}
  0x87   : > { %s2927_s17 = scalar_lea.vmem %s431_s22, 16  ;;  %s2934_s27 = scalar_lea.vmem %s431_s22, 32 }
  0x88   : > { %p2928_p10 = scmp.ne.s32.totalorder %s431_s22, %s2927_s17  ;;  %p2935_p13 = scmp.lt.s32.totalorder %s431_s22, %s431_s22 }
  0x89   : > { %p2936_p0 = scmp.lt.s32.totalorder %s2934_s27, %s2927_s17 }
  0x8a   : > { %p2930_p11 = pnand %p2928_p10, %p3221_p7 }
  0x8b   : > { %p2937_p2 = por %p2936_p0, %p2935_p13 }
  0x8c   : > { %p2931_p12 = pneg %p2930_p11 }
  0x8e   : > { %p2938_p3 = pnand %p2937_p2, %p2931_p12 }
  0x90   : > { %2941 = shalt.err (!%p2938_p3)
}
  0x91   : > { %2714 = dma.hbm_to_vmem [thread:$0]  (!%p3205_p5), %s3936_s5, 16, %s431_s22, [#allocation3]  }
  0x92   : > { %s2942_s16 = scalar_lea.hbm %s3938_s7, 16 }
  0x93   : > { %p2943_p1 = scmp.ne.s32.totalorder %s3938_s7, %s2942_s16  ;;  %p2949_p3 = scmp.lt.u32.totalorder %s2942_s16, %s3938_s7 }
  0x95   : > { %p2945_p4 = pnand %p2943_p1, %p3221_p7 }
  0x97   : > { %p2946_p2 = pneg %p2945_p4 }
  0x99   : > { %p2951_p6 = pnand %p2949_p3, %p2946_p2 }
  0x9b   : > { %2954 = shalt.err (!%p2951_p6)
}
  0x9c   : > { %s2955_s19 = scalar_lea.vmem %s453_s0, 16  ;;  %s2962_s22 = scalar_lea.vmem %s453_s0, 32 }
  0x9d   : > { %p2956_p8 = scmp.ne.s32.totalorder %s453_s0, %s2955_s19  ;;  %p2963_p11 = scmp.lt.s32.totalorder %s453_s0, %s453_s0 }
  0x9e   : > { %p2964_p12 = scmp.lt.s32.totalorder %s2962_s22, %s2955_s19 }
  0x9f   : > { %p2958_p9 = pnand %p2956_p8, %p3221_p7 }
  0xa0   : > { %p2965_p13 = por %p2964_p12, %p2963_p11 }
  0xa1   : > { %p2959_p10 = pneg %p2958_p9 }
  0xa3   : > { %p2966_p0 = pnand %p2965_p13, %p2959_p10 }
  0xa5   : > { %2969 = shalt.err (!%p2966_p0)
}
  0xa6   : > { %2720 = dma.hbm_to_vmem [thread:$0]  (!%p3205_p5), %s3938_s7, 16, %s453_s0, [#allocation5]  }
  0xa7   : > { %s3090_s17 = smov [#allocation9]   ;;  %s3091_s6 = smov [#allocation12]  }
  0xa8   : > { %s480_s27 = sshll.u32 %s3090_s17, 4  ;;  %s502_s10 = sshll.u32 %s3091_s6, 4  ;;  %s481_s27 = int_to_ptr.vmem [resolvable:$true] %s480_s27  ;;  %s503_s10 = int_to_ptr.vmem [resolvable:$true] %s502_s10 }
  0xa9   : > { %s2970_s16 = scalar_lea.hbm %s3942_s11, 16 }
  0xaa   : > { %p2971_p1 = scmp.ne.s32.totalorder %s3942_s11, %s2970_s16  ;;  %p2977_p3 = scmp.lt.u32.totalorder %s2970_s16, %s3942_s11 }
  0xac   : > { %p2973_p4 = pnand %p2971_p1, %p3221_p7 }
  0xae   : > { %p2974_p2 = pneg %p2973_p4 }
  0xb0   : > { %p2979_p6 = pnand %p2977_p3, %p2974_p2 }
  0xb2   : > { %2982 = shalt.err (!%p2979_p6)
}
  0xb3   : > { %s2983_s0 = scalar_lea.vmem %s481_s27, 16  ;;  %s2990_s19 = scalar_lea.vmem %s481_s27, 32 }
  0xb4   : > { %p2984_p8 = scmp.ne.s32.totalorder %s481_s27, %s2983_s0  ;;  %p2991_p11 = scmp.lt.s32.totalorder %s481_s27, %s481_s27 }
  0xb5   : > { %p2992_p12 = scmp.lt.s32.totalorder %s2990_s19, %s2983_s0 }
  0xb6   : > { %p2986_p9 = pnand %p2984_p8, %p3221_p7 }
  0xb7   : > { %p2993_p13 = por %p2992_p12, %p2991_p11 }
  0xb8   : > { %p2987_p10 = pneg %p2986_p9 }
  0xba   : > { %p2994_p0 = pnand %p2993_p13, %p2987_p10 }
  0xbc   : > { %2997 = shalt.err (!%p2994_p0)
}
  0xbd   : > { %2726 = dma.hbm_to_vmem [thread:$0]  (!%p3205_p5), %s3942_s11, 16, %s481_s27, [#allocation8]  }
  0xbe   : > { %s2998_s6 = scalar_lea.hbm %s3944_s13, 16 }
  0xbf   : > { %p2999_p1 = scmp.ne.s32.totalorder %s3944_s13, %s2998_s6  ;;  %p3005_p3 = scmp.lt.u32.totalorder %s2998_s6, %s3944_s13 }
  0xc1   : > { %p3001_p4 = pnand %p2999_p1, %p3221_p7 }
  0xc3   : > { %p3002_p2 = pneg %p3001_p4 }
  0xc5   : > { %p3007_p6 = pnand %p3005_p3, %p3002_p2 }
  0xc7   : > { %3010 = shalt.err (!%p3007_p6)
}
  0xc8   : > { %s3011_s20 = scalar_lea.vmem %s503_s10, 16  ;;  %s3018_s27 = scalar_lea.vmem %s503_s10, 32 }
  0xc9   : > { %p3012_p8 = scmp.ne.s32.totalorder %s503_s10, %s3011_s20  ;;  %p3019_p11 = scmp.lt.s32.totalorder %s503_s10, %s503_s10 }
  0xca   : > { %p3020_p12 = scmp.lt.s32.totalorder %s3018_s27, %s3011_s20 }
  0xcb   : > { %p3014_p9 = pnand %p3012_p8, %p3221_p7 }
  0xcc   : > { %p3021_p13 = por %p3020_p12, %p3019_p11 }
  0xcd   : > { %p3015_p10 = pneg %p3014_p9 }
  0xcf   : > { %p3022_p0 = pnand %p3021_p13, %p3015_p10 }
  0xd1   : > { %3025 = shalt.err (!%p3022_p0)
}
  0xd2   : > { %2732 = dma.hbm_to_vmem [thread:$0]  (!%p3205_p5), %s3944_s13, 16, %s503_s10, [#allocation11]  }
  0xd3   : > { %s3092_s0 = smov [#allocation15]   ;;  %s3026_s29 = scalar_lea.hbm %s3946_s15, 16 }
  0xd4   : > { %s526_s19 = sshll.u32 %s3092_s0, 4  ;;  %p3027_p1 = scmp.ne.s32.totalorder %s3946_s15, %s3026_s29  ;;  %s527_s19 = int_to_ptr.vmem [resolvable:$true] %s526_s19 }
  0xd5   : > { %p3033_p3 = scmp.lt.u32.totalorder %s3026_s29, %s3946_s15 }
  0xd6   : > { %p3029_p4 = pnand %p3027_p1, %p3221_p7 }
  0xd8   : > { %p3030_p2 = pneg %p3029_p4 }
  0xda   : > { %p3035_p6 = pnand %p3033_p3, %p3030_p2 }
  0xdc   : > { %3038 = shalt.err (!%p3035_p6)
}
  0xdd   : > { %s3039_s10 = scalar_lea.vmem %s527_s19, 16  ;;  %s3046_s16 = scalar_lea.vmem %s527_s19, 32 }
  0xde   : > { %p3040_p8 = scmp.ne.s32.totalorder %s527_s19, %s3039_s10  ;;  %p3047_p11 = scmp.lt.s32.totalorder %s527_s19, %s527_s19 }
  0xdf   : > { %p3048_p12 = scmp.lt.s32.totalorder %s3046_s16, %s3039_s10 }
  0xe0   : > { %p3042_p9 = pnand %p3040_p8, %p3221_p7 }
  0xe1   : > { %p3049_p13 = por %p3048_p12, %p3047_p11 }
  0xe2   : > { %p3043_p10 = pneg %p3042_p9 }
  0xe4   : > { %p3050_p0 = pnand %p3049_p13, %p3043_p10 }
  0xe6   : > { %3053 = shalt.err (!%p3050_p0)
}
  0xe7   : > { %2738 = dma.hbm_to_vmem [thread:$0]  (!%p3205_p5), %s3946_s15, 16, %s527_s19, [#allocation14]  }
  0xe8   : > { %p3965_p1 = scmp.ne.s32.totalorder %s3959_s25, 0 }
  0xe9   : > { %p3966_p4 = scmp.eq.s32.totalorder (!%p3965_p1), %s3188_s24, 0 }
  0xea   : > { %552 = sbr.rel (%p3965_p1) target bundleno = 2733 (0xaad), region = 84 }
  0xf1   : > { %3059 = dma.done.wait (%p3966_p4), [#allocation3], 16   ;;  %p3967_p7 = pmov %p3966_p4 }
  0xf2   : > { %p3968_p2 = pmov %p3966_p4 }
  0xf3   : > { %3061 = vsyncadd (%p3967_p7), [#allocation3], 4294967280 }
  0xf4   : > { %3063 = dma.done.wait (%p3968_p2), [#allocation5], 32   ;;  %p3969_p3 = pmov %p3968_p2 }
  0xf5   : > { %p3970_p6 = pmov %p3968_p2 }
  0xf6   : > { %3065 = vsyncadd (%p3969_p3), [#allocation5], 4294967264 }
  0xf7   : > { %3067 = dma.done.wait (%p3970_p6), [#allocation8], 32   ;;  %p3971_p5 = pmov %p3968_p2 }
  0xf8   : > { %p3972_p8 = pmov %p3968_p2 }
  0xf9   : > { %3069 = vsyncadd (%p3971_p5), [#allocation8], 4294967264 }
  0xfa   : > { %3071 = dma.done.wait (%p3972_p8), [#allocation11], 32   ;;  %p3973_p9 = pmov %p3968_p2 }
  0xfb   : > { %p3974_p10 = pmov %p3968_p2 }
  0xfc   : > { %3073 = vsyncadd (%p3973_p9), [#allocation11], 4294967264 }
  0xfd   : > { %3075 = dma.done.wait (%p3974_p10), [#allocation14], 1040   ;;  %p3975_p11 = pmov %p3968_p2 }
  0xfe   : > { %p635_p12 = scmp.lt.s32.totalorder %s3188_s24, 1  ;;  %v3093_v0 = vmov 0.0|0.0   ;;  %vm3094_vm0 = vmmov 0   ;;  %v3095_v1 = vmov 0.0   ;;  %s3976_s27 = sld [smem:[#allocation22_spill]]  ;;  %vm768_vm1 = vcmask 1040384  }
  0xff   : > { %3077 = vsyncadd (%p3975_p11), [#allocation14], 4294966256  ;;  %2475 = vmatprep.subr.bf16.mxu1 %v3093_v0  ;;  %2460 = vmatprep.subr.bf16.mxu0 %v3093_v0  ;;  %v786_v3 = vld [vmem:[%s3935_s4] sm:$0xff]  ;;  %v787_v4 = vld [vmem:[%s3935_s4 + $0x8] sm:$0xff]  ;;  %vm773_vm2 = vcmask 1046528   ;;  %vm780_vm3 = vcmask 1045504  }
 0x100   : > { %s3981_s24 = smov (!%p635_p12, %s3188_s24), 1  ;;  %2243 = vmatprep.mubr.msk.f32.mxu0 %vm3094_vm0, %v3095_v1  ;;  %v2476_v6 = vpack.c.bf16 %v787_v4, %v786_v3  ;;  %v788_v7 = vld [vmem:[%s3935_s4 + $0x10] sm:$0xff]  ;;  %v789_v8 = vld [vmem:[%s3935_s4 + $0x18] sm:$0xff]  ;;  %v790_v14 = vld [vmem:[%s3935_s4 + $0x20] sm:$0xff]  ;;  %vm784_vm4 = vcmask 523264   ;;  %s3096_s21 = smov 64  }
 0x101   : > { %s2055_s25 = sshll.u32 %s3981_s24, 3  ;;  %v2479_v11 = vpack.c.bf16 %v789_v8, %v788_v7  ;;  %v791_v15 = vld [vmem:[%s3935_s4 + $0x28] sm:$0xff]  ;;  %v792_v20 = vld [vmem:[%s3935_s4 + $0x30] sm:$0xff]  ;;  %v793_v22 = vld [vmem:[%s3935_s4 + $0x38] sm:$0xff]  ;;  %s641_s29 = scalar_lea.vmem %s3932_s1, %s3981_s24  ;;  %vm691_vm6 = vcmask 654336   ;;  %vm966_vm7 = vcmask 64512  }
 0x102   : > { %2477 = vmatpush1.bf16.msra.mxu1 %v2476_v6  ;;  %v2482_v19 = vpack.c.bf16 %v791_v15, %v790_v14  ;;  %v680_v23 = vld [vmem:[%s3939_s8] sm:$0xff]  ;;  %v681_v24 = vld [vmem:[%s3939_s8 + $0x8] sm:$0xff]  ;;  %v682_v26 = vld [vmem:[%s3939_s8 + $0x10] sm:$0xff]  ;;  %v2485_v28 = vpack.c.bf16 %v793_v22, %v792_v20  ;;  %s3977_s18 = sld [smem:[#allocation25_spill]] }
 0x103   : > { %2478 = vmatprep.subr.bf16.mxu1 %v3093_v0  ;;  %v2461_v25 = vpack.c.bf16 %v681_v24, %v680_v23  ;;  %v683_v27 = vld [vmem:[%s3939_s8 + $0x18] sm:$0xff]  ;;  %v794_v29 = vld [vmem:[%s3935_s4 + $0x40] sm:$0xff]  ;;  %v795_v32 = vld [vmem:[%s3935_s4 + $0x48] sm:$0xff] }
 0x104   : > { %s638_s26 = scalar_lea.vmem %s3976_s27, %s2055_s25  ;;  %v2464_v30 = vpack.c.bf16 %v683_v27, %v682_v26  ;;  %v3497_v31 = vld [vmem:[%s641_s29] sm:$0x1]  ;;  %v685_v34 = vld [vmem:[%s3939_s8 + $0x28] sm:$0xff]  ;;  %v2488_v37 = vpack.c.bf16 %v795_v32, %v794_v29  ;;  %v796_v38 = vld [vmem:[%s3935_s4 + $0x50] sm:$0xff] }
 0x105   : > { %v3440_v2 = vld [vmem:[%s638_s26] sm:$0xff]  ;;  %2462 = vmatpush3.bf16.msra.mxu0 %v2461_v25  ;;  %v665_v35 = vand.u32 2147483647, %v3497_v31  ;;  %v797_v40 = vld [vmem:[%s3935_s4 + $0x58] sm:$0xff]  ;;  %v686_v41 = vld [vmem:[%s3939_s8 + $0x30] sm:$0xff]  ;;  %vm669_vm5 = vcmp.ge.f32.partialorder %v3497_v31, 0.0 }
 0x106   : > { %v766_v5 = vrot.slane %v3440_v2, 7  ;;  %2480 = vmatpush1.bf16.msra.mxu1 %v2479_v11  ;;  %2463 = vmatprep.subr.bf16.mxu0 %v3093_v0  ;;  %v684_v33 = vld [vmem:[%s3939_s8 + $0x20] sm:$0xff]  ;;  %v687_v42 = vld [vmem:[%s3939_s8 + $0x38] sm:$0xff]  ;;  %v2491_v44 = vpack.c.bf16 %v797_v40, %v796_v38  ;;  %v799_v47 = vld [vmem:[%s3935_s4 + $0x68] sm:$0xff] }
 0x107   : > { %2481 = vmatprep.subr.bf16.mxu1 %v3093_v0  ;;  %v666_v36 = vsub.f32 0.0, %v665_v35  ;;  %v2467_v39 = vpack.c.bf16 %v685_v34, %v684_v33  ;;  %v798_v45 = vld [vmem:[%s3935_s4 + $0x60] sm:$0xff]  ;;  %v2470_v46 = vpack.c.bf16 %v687_v42, %v686_v41  ;;  %v689_v49 = vld [vmem:[%s3939_s8 + $0x48] sm:$0xff]  ;;  %v800_v52 = vld [vmem:[%s3935_s4 + $0x70] sm:$0xff] }
 0x108   : > { %v3456_v9 = vsel %vm768_vm1, 0.0, %v766_v5  ;;  %v770_v10 = vsel %vm768_vm1, %v766_v5, 0.0  ;;  %v688_v48 = vld [vmem:[%s3939_s8 + $0x40] sm:$0xff]  ;;  %v2494_v50 = vpack.c.bf16 %v799_v47, %v798_v45  ;;  %v801_v53 = vld [vmem:[%s3935_s4 + $0x78] sm:$0xff]  ;;  %v803_v57 = vld [vmem:[%s3935_s4 + $0x88] sm:$0xff] }
 0x109   : > { %v774_v12 = vrot.slane %v3456_v9, 1  ;;  %v775_v13 = vrot.slane %v770_v10, 1  ;;  %v781_v16 = vrot.slane %v3456_v9, 2  ;;  %v782_v17 = vrot.slane %v770_v10, 2  ;;  %2465 = vmatpush3.bf16.msra.mxu0 %v2464_v30  ;;  %v802_v56 = vld [vmem:[%s3935_s4 + $0x80] sm:$0xff]  ;;  %v804_v60 = vld [vmem:[%s3935_s4 + $0x90] sm:$0xff]  ;;  %vm2065_vm9 = vmneg %vm768_vm1 }
 0x10a   : > { %2483 = vmatpush1.bf16.msra.mxu1 %v2482_v19  ;;  %2466 = vmatprep.subr.bf16.mxu0 %v3093_v0  ;;  %v667_v43 = vmul.f32 1.442695, %v666_v36  ;;  %v2473_v51 = vpack.c.bf16 %v689_v49, %v688_v48  ;;  %v2497_v54 = vpack.c.bf16 %v801_v53, %v800_v52  ;;  %v2500_v59 = vpack.c.bf16 %v803_v57, %v802_v56  ;;  %v805_v61 = vld [vmem:[%s3935_s4 + $0x98] sm:$0xff]  ;;  %v806_v63 = vld [vmem:[%s3935_s4 + $0xa0] sm:$0xff]  ;;  %v807_v3 = vld [vmem:[%s3935_s4 + $0xa8] sm:$0xff] }
 0x10b   : > { %v776_v18 = vsel %vm773_vm2, %v774_v12, %v775_v13  ;;  %v783_v21 = vsel %vm780_vm3, %v781_v16, %v782_v17  ;;  %2484 = vmatprep.subr.bf16.mxu1 %v3093_v0  ;;  %v2503_v62 = vpack.c.bf16 %v805_v61, %v804_v60  ;;  %v2506_v4 = vpack.c.bf16 %v807_v3, %v806_v63  ;;  %v808_v6 = vld [vmem:[%s3935_s4 + $0xb0] sm:$0xff]  ;;  %v809_v7 = vld [vmem:[%s3935_s4 + $0xb8] sm:$0xff]  ;;  %v647_v16 = vld [vmem:[%s3933_s2] sm:$0xff] }
 0x10c   : > { %777 = vrot.lane.b32.xlu0 %v776_v18, %s3096_s21  ;;  %2059 = vmatprep.mubr.msk.f32.mxu1 %vm784_vm4, %v783_v21  ;;  %2780 = vpow2.f32 %v667_v43  ;;  %v2509_v11 = vpack.c.bf16 %v809_v7, %v808_v6  ;;  %v648_v17 = vld [vmem:[%s3933_s2 + $0x8] sm:$0xff]  ;;  %v649_v21 = vld [vmem:[%s3933_s2 + $0x10] sm:$0xff]  ;;  %v650_v22 = vld [vmem:[%s3933_s2 + $0x18] sm:$0xff]  ;;  %s3978_s21 = sld [smem:[#allocation27_spill]] }
 0x10d   : > { %2468 = vmatpush3.bf16.msra.mxu0 %v2467_v39  ;;  %v3586_v19 = vpack.c.bf16 %v648_v17, %v647_v16  ;;  %v3595_v23 = vpack.c.bf16 %v650_v22, %v649_v21  ;;  %v651_v24 = vld [vmem:[%s3933_s2 + $0x20] sm:$0xff]  ;;  %v652_v25 = vld [vmem:[%s3933_s2 + $0x28] sm:$0xff]  ;;  %v653_v27 = vld [vmem:[%s3933_s2 + $0x30] sm:$0xff] }
 0x10e   : > { %2486 = vmatpush1.bf16.msra.mxu1 %v2485_v28  ;;  %2469 = vmatprep.subr.bf16.mxu0 %v3093_v0  ;;  %v3607_v26 = vpack.c.bf16 %v652_v25, %v651_v24  ;;  %v654_v28 = vld [vmem:[%s3933_s2 + $0x38] sm:$0xff]  ;;  %v655_v32 = vld [vmem:[%s3933_s2 + $0x40] sm:$0xff]  ;;  %v656_v33 = vld [vmem:[%s3933_s2 + $0x48] sm:$0xff] }
 0x10f   : > { %2487 = vmatprep.subr.bf16.mxu1 %v3093_v0  ;;  %v3617_v29 = vpack.c.bf16 %v654_v28, %v653_v27  ;;  %v3632_v34 = vpack.c.bf16 %v656_v33, %v655_v32  ;;  %v658_v35 = vld [vmem:[%s3933_s2 + $0x58] sm:$0xff]  ;;  %v660_v38 = vld [vmem:[%s3933_s2 + $0x68] sm:$0xff]  ;;  %v661_v40 = vld [vmem:[%s3933_s2 + $0x70] sm:$0xff] }
 0x110   : > { %v662_v41 = vld [vmem:[%s3933_s2 + $0x78] sm:$0xff]  ;;  %v3669_v43 = vld [vmem:[%s3934_s3] sm:$0xff]  ;;  %v1287_v24 = vld [vmem:[%s3977_s18 + $0x108] sm:$0xff] }
 0x111   : > { %2471 = vmatpush3.bf16.msra.mxu0 %v2470_v46  ;;  %v3662_v42 = vpack.c.bf16 %v662_v41, %v661_v40  ;;  %v2058_v46 = vld [vmem:[#allocation2] ss:$0 sm:$0xff]  ;;  %v1255_v27 = vld [vmem:[%s3977_s18 + $0x8] sm:$0xff]  ;;  %v1273_v32 = vld [vmem:[%s3977_s18 + $0x98] sm:$0xff] }
 0x112   : > { %2489 = vmatpush1.bf16.msra.mxu1 %v2488_v37  ;;  %2472 = vmatprep.subr.bf16.mxu0 %v3093_v0  ;;  %v659_v37 = vld [vmem:[%s3933_s2 + $0x60] sm:$0xff]  ;;  %v1288_v33 = vld [vmem:[%s3977_s18 + $0x110] sm:$0xff]  ;;  %s645_s20 = scalar_lea.vmem %s3978_s21, %s2055_s25 }
 0x113   : > { %2490 = vmatprep.subr.bf16.mxu1 %v3093_v0  ;;  %v3652_v39 = vpack.c.bf16 %v660_v38, %v659_v37  ;;  %v1286_v21 = vld [vmem:[%s3977_s18 + $0x100] sm:$0xff]  ;;  %v1256_v37 = vld [vmem:[%s3977_s18 + $0x10] sm:$0xff]  ;;  %v1257_v38 = vld [vmem:[%s3977_s18 + $0x18] sm:$0xff] }
 0x114   : > { %v1254_v25 = vld [vmem:[%s3977_s18] sm:$0xff]  ;;  %v2592_v28 = vpack.c.bf16 %v1287_v24, %v1286_v21  ;;  %v2565_v41 = vpack.c.bf16 %v1257_v38, %v1256_v37  ;;  %v1265_v21 = vld [vmem:[%s3977_s18 + $0x58] sm:$0xff]  ;;  %v1284_v37 = vld [vmem:[%s3977_s18 + $0xf0] sm:$0xff] }
 0x115   : > { %2474 = vmatpush3.bf16.msra.mxu0 %v2473_v51  ;;  %v1285_v38 = vld [vmem:[%s3977_s18 + $0xf8] sm:$0xff] }
 0x116   : > { %2492 = vmatpush1.bf16.msra.mxu1 %v2491_v44  ;;  %v2781_v55 = vpop.eup %2780  ;;  %2511 = vmatprep.subr.bf16.mxu0 %v3093_v0 }
 0x117   : > { %2493 = vmatprep.subr.bf16.mxu1 %v3093_v0  ;;  %v671_v58 = vadd.f32 1.0, %v2781_v55  ;;  %v670_v5 = vsel %vm669_vm5, %v2781_v55, 1.0 }
 0x119   : > { %2782 = vrcp.f32 %v671_v58 }
 0x11a   : > { %2495 = vmatpush1.bf16.msra.mxu1 %v2494_v50 }
 0x11b   : > { %2496 = vmatprep.subr.bf16.mxu1 %v3093_v0 }
 0x11e   : > { %2498 = vmatpush1.bf16.msra.mxu1 %v2497_v54 }
 0x11f   : > { %2499 = vmatprep.subr.bf16.mxu1 %v3093_v0 }
 0x122   : > { %2501 = vmatpush1.bf16.msra.mxu1 %v2500_v59  ;;  %v1040_v59 = vlaneseq }
 0x123   : > { %2502 = vmatprep.subr.bf16.mxu1 %v3093_v0  ;;  %v2783_v8 = vpop.eup %2782 }
 0x124   : > { %v673_v10 = vmul.f32 %v2783_v8, %v670_v5  ;;  %v1041_v60 = vshrl.u32 %v1040_v59, 7  ;;  %v1260_v59 = vld [vmem:[%s3977_s18 + $0x30] sm:$0xff] }
 0x126   : > { %2504 = vmatpush1.bf16.msra.mxu1 %v2503_v62  ;;  %v674_v12 = vmul.f32 %v673_v10, %v673_v10  ;;  %v3697_v61 = vsub.s32 0, %v1041_v60  ;;  %v1261_v60 = vld [vmem:[%s3977_s18 + $0x38] sm:$0xff] }
 0x127   : > { %2505 = vmatprep.subr.bf16.mxu1 %v3093_v0 }
 0x128   : > { %v677_v13 = vadd.f32 1.0, %v674_v12  ;;  %v675_v14 = vsub.f32 1.0, %v674_v12 }
 0x12a   : > { %2507 = vmatpush1.bf16.msra.mxu1 %v2506_v4  ;;  %2784 = vrcp.f32 %v677_v13  ;;  %v676_v15 = vmul.f32 %v675_v14, %v3497_v31 }
 0x12b   : > { %2508 = vmatprep.subr.bf16.mxu1 %v3093_v0 }
 0x12e   : > { %2510 = vmatpush1.bf16.msra.mxu1 %v2509_v11 }
 0x12f   : > { %2281 = vmatprep.subr.mxu1 %v3095_v1 }
 0x134   : > { %v2785_v18 = vpop.eup %2784 }
 0x135   : > { %v679_v20 = vmul.f32 %v2785_v18, %v676_v15  ;;  %v1270_v18 = vld [vmem:[%s3977_s18 + $0x80] sm:$0xff] }
 0x137   : > { %2244 = vmatmul.mubr.msk.f32.vlgmr.msra.gmra.mrb[0].mxu0 %vm691_vm6, %v679_v20  ;;  %v1271_v20 = vld [vmem:[%s3977_s18 + $0x88] sm:$0xff] }
 0x138   : > { %2513 = vmatpush3.bf16.msra.mxu0 %v3586_v19  ;;  %2278 = vmatprep.mubr.msk.f32.mxu0 %vm3094_vm0, %v3095_v1  ;;  %v2559_v22 = vpack.c.bf16 %v1271_v20, %v1270_v18  ;;  %v1297_v18 = vld [vmem:[%s3977_s18 + $0x158] sm:$0xff]  ;;  %v1264_v20 = vld [vmem:[%s3977_s18 + $0x50] sm:$0xff] }
 0x139   : > { %2514 = vmatprep.subr.bf16.mxu0 %v3093_v0  ;;  %v2581_v24 = vpack.c.bf16 %v1265_v21, %v1264_v20 }
 0x13c   : > { %2516 = vmatpush3.bf16.msra.mxu0 %v3595_v23 }
 0x13d   : > { %2517 = vmatprep.subr.bf16.mxu0 %v3093_v0 }
 0x140   : > { %2519 = vmatpush3.bf16.msra.mxu0 %v3607_v26 }
 0x141   : > { %2520 = vmatprep.subr.bf16.mxu0 %v3093_v0 }
 0x144   : > { %2522 = vmatpush3.bf16.msra.mxu0 %v3617_v29 }
 0x145   : > { %2523 = vmatprep.subr.bf16.mxu0 %v3093_v0 }
 0x148   : > { %2525 = vmatpush3.bf16.msra.mxu0 %v3632_v34 }
 0x149   : > { %2526 = vmatprep.subr.bf16.mxu0 %v3093_v0 }
 0x17e   : > { %v778_v30 = vpop.permute.xlu0 %777 }
 0x17f   : > { %v785_v31 = vsel %vm784_vm4, %v3456_v9, %v778_v30  ;;  %v657_v9 = vld [vmem:[%s3933_s2 + $0x50] sm:$0xff]  ;;  %v2561_v30 = vpack.c.bf16 %v1255_v27, %v1254_v25  ;;  %v1282_v25 = vld [vmem:[%s3977_s18 + $0xe0] sm:$0xff]  ;;  %v1283_v27 = vld [vmem:[%s3977_s18 + $0xe8] sm:$0xff] }
 0x180   : > { %884 = vmatmul.mubr.f32.vlgmr.msra.gmra.mrb[0].mxu1 %v785_v31  ;;  %v3642_v36 = vpack.c.bf16 %v658_v35, %v657_v9  ;;  %v1272_v31 = vld [vmem:[%s3977_s18 + $0x90] sm:$0xff]  ;;  %v1289_v35 = vld [vmem:[%s3977_s18 + $0x118] sm:$0xff] }
 0x181   : > { %2283 = vmatprep.mubr.msk.f32.mxu1 %vm3094_vm0, %v3095_v1  ;;  %2282 = vmatpush3.msra.mxu1 %v3669_v43  ;;  %v2563_v9 = vpack.c.bf16 %v1273_v32, %v1272_v31  ;;  %v2595_v40 = vpack.c.bf16 %v1289_v35, %v1288_v33  ;;  %v1299_v31 = vld [vmem:[%s3977_s18 + $0x168] sm:$0xff]  ;;  %v1266_v32 = vld [vmem:[%s3977_s18 + $0x60] sm:$0xff] }
 0x182   : > { %2528 = vmatpush3.bf16.msra.mxu0 %v3642_v36  ;;  %2321 = vmatprep.subr.mxu1 %v3095_v1  ;;  %v1267_v33 = vld [vmem:[%s3977_s18 + $0x68] sm:$0xff] }
 0x183   : > { %2529 = vmatprep.subr.bf16.mxu0 %v3093_v0  ;;  %v2585_v35 = vpack.c.bf16 %v1267_v33, %v1266_v32 }
 0x186   : > { %2531 = vmatpush3.bf16.msra.mxu0 %v3652_v39 }
 0x187   : > { %2532 = vmatprep.subr.bf16.mxu0 %v3093_v0 }
 0x18a   : > { %2534 = vmatpush3.bf16.msra.mxu0 %v3662_v42 }
 0x18b   : > { %2535 = vmatprep.subr.bf16.mxu0 %v3093_v0 }
 0x20a   : > { %v3673_v44 = vpop.f32.mrb[0].mxu0 }
 0x20b   : > { %v2245_v45 = vpop.f32.mrb[1].mxu0 }
 0x20c   : > { %v1274_v45 = vld [vmem:[%s3977_s18 + $0xa0] sm:$0xff] }
 0x253   : > { %v885_v47 = vpop.f32.mrb[0].mxu1 }
 0x254   : > { %v886_v48 = vadd.f32 %v2058_v46, %v885_v47  ;;  %v887_v49 = vpop.f32.mrb[1].mxu1  ;;  %v1275_v46 = vld [vmem:[%s3977_s18 + $0xa8] sm:$0xff]  ;;  %v1290_v47 = vld [vmem:[%s3977_s18 + $0x120] sm:$0xff] }
 0x255   : > { %v1291_v49 = vld [vmem:[%s3977_s18 + $0x128] sm:$0xff] }
 0x256   : > { %v889_v50 = vrot.slane %v886_v48, 4 }
 0x258   : > { %v890_v51 = vadd.f32 %v889_v50, %v886_v48  ;;  %v1258_v50 = vld [vmem:[%s3977_s18 + $0x20] sm:$0xff] }
 0x25a   : > { %v891_v52 = vrot.slane %v890_v51, 2 }
 0x25c   : > { %v892_v53 = vadd.f32 %v891_v52, %v890_v51  ;;  %v1259_v51 = vld [vmem:[%s3977_s18 + $0x28] sm:$0xff]  ;;  %v2598_v52 = vpack.c.bf16 %v1291_v49, %v1290_v47  ;;  %v1269_v47 = vld [vmem:[%s3977_s18 + $0x78] sm:$0xff] }
 0x25e   : > { %v893_v54 = vrot.slane %v892_v53, 1 }
 0x260   : > { %v894_v55 = vadd.f32 %v893_v54, %v892_v53  ;;  %v2569_v53 = vpack.c.bf16 %v1259_v51, %v1258_v50  ;;  %v1276_v54 = vld [vmem:[%s3977_s18 + $0xb0] sm:$0xff] }
 0x262   : > { %2279 = vmatmul.mubr.f32.vlgmr.msra.gmra.mrb[2].mxu0 %v894_v55  ;;  %v1277_v55 = vld [vmem:[%s3977_s18 + $0xb8] sm:$0xff] }
 0x263   : > { %2537 = vmatpush3.bf16.msra.mxu0 %v3586_v19  ;;  %2318 = vmatprep.mubr.msk.f32.mxu0 %vm3094_vm0, %v3095_v1 }
 0x264   : > { %2538 = vmatprep.subr.bf16.mxu0 %v3093_v0 }
 0x267   : > { %2540 = vmatpush3.bf16.msra.mxu0 %v3595_v23 }
 0x268   : > { %2541 = vmatprep.subr.bf16.mxu0 %v3093_v0 }
 0x26b   : > { %2543 = vmatpush3.bf16.msra.mxu0 %v3607_v26 }
 0x26c   : > { %2544 = vmatprep.subr.bf16.mxu0 %v3093_v0 }
 0x26f   : > { %2546 = vmatpush3.bf16.msra.mxu0 %v3617_v29 }
 0x270   : > { %2547 = vmatprep.subr.bf16.mxu0 %v3093_v0 }
 0x273   : > { %2549 = vmatpush3.bf16.msra.mxu0 %v3632_v34 }
 0x274   : > { %2550 = vmatprep.subr.bf16.mxu0 %v3093_v0 }
 0x277   : > { %2552 = vmatpush3.bf16.msra.mxu0 %v3642_v36 }
 0x278   : > { %2553 = vmatprep.subr.bf16.mxu0 %v3093_v0 }
 0x27b   : > { %2555 = vmatpush3.bf16.msra.mxu0 %v3652_v39 }
 0x27c   : > { %2556 = vmatprep.subr.bf16.mxu0 %v3093_v0 }
 0x27f   : > { %2558 = vmatpush3.bf16.msra.mxu0 %v3662_v42 }
 0x280   : > { %2591 = vmatprep.subr.bf16.mxu0 %v3093_v0 }
 0x335   : > { %v961_v56 = vpop.f32.mrb[2].mxu0 }
 0x336   : > { %v965_v57 = vmul.f32 0.0078125, %v961_v56  ;;  %v2280_v58 = vpop.f32.mrb[3].mxu0  ;;  %v1292_v56 = vld [vmem:[%s3977_s18 + $0x130] sm:$0xff] }
 0x337   : > { %v1293_v58 = vld [vmem:[%s3977_s18 + $0x138] sm:$0xff] }
 0x338   : > { %2284 = vmatmul.mubr.msk.f32.vlgmr.msra.gmra.mrb[2].mxu1 %vm966_vm7, %v965_v57  ;;  %v2571_v57 = vpack.c.bf16 %v1277_v55, %v1276_v54  ;;  %v2063_v55 = vld [vmem:[#allocation6] ss:$0 sm:$0xff] }
 0x339   : > { %2322 = vmatpush3.msra.mxu1 %v3669_v43  ;;  %2323 = vmatprep.mubr.msk.f32.mxu1 %vm3094_vm0, %v3095_v1 }
 0x33a   : > { %2560 = vmatprep.subr.bf16.mxu1 %v2559_v22 }
 0x40b   : > { %v1036_v62 = vpop.f32.mrb[2].mxu1 }
 0x40c   : > { %v1043_v63 = vrot.slane %v1036_v62, %v3697_v61  ;;  %v2285_v3 = vpop.f32.mrb[3].mxu1  ;;  %v2601_v62 = vpack.c.bf16 %v1293_v58, %v1292_v56 }
 0x40d   : > { %v1278_v3 = vld [vmem:[%s3977_s18 + $0xc0] sm:$0xff] }
 0x40e   : > { %v3700_v4 = vsub.f32 %v886_v48, %v1043_v63  ;;  %v2567_v48 = vpack.c.bf16 %v1275_v46, %v1274_v45  ;;  %v2573_v63 = vpack.c.bf16 %v1261_v60, %v1260_v59  ;;  %v1301_v45 = vld [vmem:[%s3977_s18 + $0x178] sm:$0xff]  ;;  %v1268_v46 = vld [vmem:[%s3977_s18 + $0x70] sm:$0xff] }
 0x40f   : > { %v2589_v49 = vpack.c.bf16 %v1269_v47, %v1268_v46 }
 0x410   : > { %v1045_v5 = vmul.f32 %v3700_v4, %v3700_v4 }
 0x412   : > { %v1046_v6 = vrot.slane %v1045_v5, 4 }
 0x414   : > { %v1047_v7 = vadd.f32 %v1046_v6, %v1045_v5  ;;  %v1279_v5 = vld [vmem:[%s3977_s18 + $0xc8] sm:$0xff]  ;;  %v1294_v6 = vld [vmem:[%s3977_s18 + $0x140] sm:$0xff] }
 0x416   : > { %v1048_v8 = vrot.slane %v1047_v7, 2 }
 0x418   : > { %v1049_v10 = vadd.f32 %v1048_v8, %v1047_v7  ;;  %v2575_v7 = vpack.c.bf16 %v1279_v5, %v1278_v3  ;;  %v1295_v8 = vld [vmem:[%s3977_s18 + $0x148] sm:$0xff] }
 0x41a   : > { %v1050_v11 = vrot.slane %v1049_v10, 1 }
 0x41c   : > { %v1051_v12 = vadd.f32 %v1050_v11, %v1049_v10  ;;  %v1262_v10 = vld [vmem:[%s3977_s18 + $0x40] sm:$0xff]  ;;  %v1263_v11 = vld [vmem:[%s3977_s18 + $0x48] sm:$0xff] }
 0x41e   : > { %2319 = vmatmul.mubr.f32.vlgmr.msra.gmra.mrb[4].mxu0 %v1051_v12  ;;  %v2604_v12 = vpack.c.bf16 %v1295_v8, %v1294_v6 }
 0x41f   : > { %2358 = vmatprep.mubr.msk.f32.mxu0 %vm3094_vm0, %v3095_v1  ;;  %2593 = vmatpush3.bf16.msra.mxu0 %v2592_v28  ;;  %v1298_v28 = vld [vmem:[%s3977_s18 + $0x160] sm:$0xff] }
 0x420   : > { %2594 = vmatprep.subr.bf16.mxu0 %v3093_v0 }
 0x423   : > { %2596 = vmatpush3.bf16.msra.mxu0 %v2595_v40  ;;  %v1300_v40 = vld [vmem:[%s3977_s18 + $0x170] sm:$0xff] }
 0x424   : > { %2597 = vmatprep.subr.bf16.mxu0 %v3093_v0 }
 0x427   : > { %2599 = vmatpush3.bf16.msra.mxu0 %v2598_v52 }
 0x428   : > { %2600 = vmatprep.subr.bf16.mxu0 %v3093_v0 }
 0x42b   : > { %2602 = vmatpush3.bf16.msra.mxu0 %v2601_v62 }
 0x42c   : > { %2603 = vmatprep.subr.bf16.mxu0 %v3093_v0 }
 0x42f   : > { %2605 = vmatpush3.bf16.msra.mxu0 %v2604_v12 }
 0x430   : > { %2606 = vmatprep.subr.bf16.mxu0 %v3093_v0 }
 0x4f1   : > { %v1118_v13 = vpop.f32.mrb[4].mxu0 }
 0x4f2   : > { %v1122_v14 = vmul.f32 0.0078125, %v1118_v13  ;;  %v2320_v15 = vpop.f32.mrb[5].mxu0  ;;  %v2577_v13 = vpack.c.bf16 %v1263_v11, %v1262_v10  ;;  %v690_v10 = vld [vmem:[#allocation7] sm:$0x1] }
 0x4f3   : > { %v1281_v15 = vld [vmem:[%s3977_s18 + $0xd8] sm:$0xff] }
 0x4f4   : > { %v1123_v16 = vadd.f32 1e-05, %v1122_v14  ;;  %v1280_v14 = vld [vmem:[%s3977_s18 + $0xd0] sm:$0xff] }
 0x4f6   : > { %2786 = vrsqrt.f32 %v1123_v16  ;;  %v1296_v16 = vld [vmem:[%s3977_s18 + $0x150] sm:$0xff] }
 0x4f7   : > { %v2607_v22 = vpack.c.bf16 %v1297_v18, %v1296_v16 }
 0x4f9   : > { %2608 = vmatpush3.bf16.msra.mxu0 %v2607_v22 }
 0x4fa   : > { %2609 = vmatprep.subr.bf16.mxu0 %v3093_v0 }
 0x500   : > { %v2787_v17 = vpop.eup %2786 }
 0x501   : > { %2324 = vmatmul.mubr.msk.f32.vlgmr.msra.gmra.mrb[4].mxu1 %vm966_vm7, %v2787_v17  ;;  %v2579_v17 = vpack.c.bf16 %v1281_v15, %v1280_v14 }
 0x502   : > { %2562 = vmatpush3.bf16.msra.mxu1 %v2561_v30  ;;  %v2583_v30 = vpack.c.bf16 %v1283_v27, %v1282_v25 }
 0x503   : > { %2564 = vmatprep.subr.bf16.mxu1 %v2563_v9  ;;  %v2610_v9 = vpack.c.bf16 %v1299_v31, %v1298_v28 }
 0x505   : > { %2611 = vmatpush3.bf16.msra.mxu0 %v2610_v9 }
 0x506   : > { %2566 = vmatpush3.bf16.msra.mxu1 %v2565_v41  ;;  %v2587_v41 = vpack.c.bf16 %v1285_v38, %v1284_v37  ;;  %2612 = vmatprep.subr.bf16.mxu0 %v3093_v0 }
 0x507   : > { %2568 = vmatprep.subr.bf16.mxu1 %v2567_v48  ;;  %v2613_v48 = vpack.c.bf16 %v1301_v45, %v1300_v40 }
 0x509   : > { %2614 = vmatpush3.bf16.msra.mxu0 %v2613_v48 }
 0x50a   : > { %2570 = vmatpush3.bf16.msra.mxu1 %v2569_v53  ;;  %2639 = vmatprep.subr.bf16.mxu0 %v3093_v0  ;;  %v2062_v53 = vld [vmem:[#allocation4] ss:$0 sm:$0xff] }
 0x50b   : > { %2572 = vmatprep.subr.bf16.mxu1 %v2571_v57 }
 0x50e   : > { %2574 = vmatpush3.bf16.msra.mxu1 %v2573_v63 }
 0x50f   : > { %2576 = vmatprep.subr.bf16.mxu1 %v2575_v7 }
 0x512   : > { %2578 = vmatpush3.bf16.msra.mxu1 %v2577_v13 }
 0x513   : > { %2580 = vmatprep.subr.bf16.mxu1 %v2579_v17 }
 0x516   : > { %2582 = vmatpush3.bf16.msra.mxu1 %v2581_v24 }
 0x517   : > { %2584 = vmatprep.subr.bf16.mxu1 %v2583_v30 }
 0x51a   : > { %2586 = vmatpush3.bf16.msra.mxu1 %v2585_v35 }
 0x51b   : > { %2588 = vmatprep.subr.bf16.mxu1 %v2587_v41 }
 0x51e   : > { %2590 = vmatpush3.bf16.msra.mxu1 %v2589_v49 }
 0x51f   : > { %2615 = vmatprep.subr.bf16.mxu1 %v3093_v0 }
 0x5d4   : > { %v1194_v50 = vpop.f32.mrb[4].mxu1 }
 0x5d5   : > { %v1201_v51 = vrot.slane %v1194_v50, %v3697_v61  ;;  %v2325_v52 = vpop.f32.mrb[5].mxu1 }
 0x5d7   : > { %v1202_v54 = vmul.f32 %v1201_v51, %v3700_v4  ;;  %v762_v4 = vadd.f32 %v3673_v44, %v690_v10  ;;  %v1800_v10 = vld [vmem:[#allocation13 + $0x38] sm:$0xff] }
 0x5d9   : > { %v1210_v56 = vmul.f32 %v2062_v53, %v1202_v54  ;;  %v1237_v14 = vrot.slane %v762_v4, %v3697_v61 }
 0x5db   : > { %v1218_v57 = vadd.f32 %v2063_v55, %v1210_v56 }
 0x5dd   : > { %v1219_v58 = vand.u32 2147483647, %v1218_v57  ;;  %vm1223_vm8 = vcmp.ge.f32.partialorder %v1218_v57, 0.0 }
 0x5df   : > { %v1220_v59 = vsub.f32 0.0, %v1219_v58  ;;  %v1794_v58 = vld [vmem:[#allocation13 + $0x8] sm:$0xff] }
 0x5e1   : > { %v1221_v60 = vmul.f32 1.442695, %v1220_v59 }
 0x5e3   : > { %2788 = vpow2.f32 %v1221_v60  ;;  %v1795_v60 = vld [vmem:[#allocation13 + $0x10] sm:$0xff] }
 0x5ed   : > { %v2789_v62 = vpop.eup %2788 }
 0x5ee   : > { %v1225_v63 = vadd.f32 1.0, %v2789_v62  ;;  %v1224_v5 = vsel %vm1223_vm8, %v2789_v62, 1.0  ;;  %v1796_v62 = vld [vmem:[#allocation13 + $0x18] sm:$0xff] }
 0x5f0   : > { %2790 = vrcp.f32 %v1225_v63 }
 0x5fa   : > { %v2791_v3 = vpop.eup %2790 }
 0x5fb   : > { %v1227_v6 = vmul.f32 %v2791_v3, %v1224_v5  ;;  %v2667_v3 = vpack.c.bf16 %v1796_v62, %v1795_v60  ;;  %v1797_v5 = vld [vmem:[#allocation13 + $0x20] sm:$0xff] }
 0x5fd   : > { %v1228_v7 = vmul.f32 %v1227_v6, %v1227_v6  ;;  %v1798_v6 = vld [vmem:[#allocation13 + $0x28] sm:$0xff] }
 0x5ff   : > { %v1231_v8 = vadd.f32 1.0, %v1228_v7  ;;  %v1229_v11 = vsub.f32 1.0, %v1228_v7  ;;  %v2670_v7 = vpack.c.bf16 %v1798_v6, %v1797_v5 }
 0x601   : > { %2792 = vrcp.f32 %v1231_v8  ;;  %v1230_v12 = vmul.f32 %v1229_v11, %v1218_v57  ;;  %v1793_v57 = vld [vmem:[#allocation13] sm:$0xff]  ;;  %v1799_v8 = vld [vmem:[#allocation13 + $0x30] sm:$0xff] }
 0x602   : > { %v2664_v59 = vpack.c.bf16 %v1794_v58, %v1793_v57  ;;  %v2673_v11 = vpack.c.bf16 %v1800_v10, %v1799_v8 }
 0x60b   : > { %v2793_v13 = vpop.eup %2792 }
 0x60c   : > { %v1233_v15 = vmul.f32 %v2793_v13, %v1230_v12  ;;  %v2069_v13 = vld [vmem:[#allocation10] ss:$0 sm:$0xff] }
 0x60e   : > { %v1238_v16 = vadd.f32 %v1237_v14, %v1233_v15  ;;  %v2070_v15 = vld [vmem:[#allocation12] ss:$0 sm:$0xff] }
 0x610   : > { %v1240_v17 = vrot.slane %v1238_v16, 7 }
 0x612   : > { %v1242_v18 = vsel %vm768_vm1, 0.0, %v1240_v17  ;;  %v1243_v20 = vsel %vm768_vm1, %v1240_v17, 0.0 }
 0x613   : > { %v1246_v21 = vrot.slane %v1242_v18, 1  ;;  %v1247_v22 = vrot.slane %v1243_v20, 1  ;;  %v1250_v24 = vrot.slane %v1242_v18, 2  ;;  %v1251_v25 = vrot.slane %v1243_v20, 2 }
 0x615   : > { %v1248_v27 = vsel %vm773_vm2, %v1246_v21, %v1247_v22  ;;  %v1252_v44 = vsel %vm780_vm3, %v1250_v24, %v1251_v25 }
 0x616   : > { %1373 = vmatprep.mubr.f32.mxu1 %v1248_v27  ;;  %2359 = vmatmul.mubr.f32.vlgmr.msra.gmra.mrb[6].mxu0 %v1252_v44 }
 0x617   : > { %2066 = vmatmul.mubr.msk.f32.vlgmr.msra.gmra.mrb[6].mxu1 %vm2065_vm9, %v1240_v17  ;;  %2641 = vmatpush3.bf16.msra.mxu0 %v3586_v19 }
 0x618   : > { %2617 = vmatpush3.bf16.msra.mxu1 %v3586_v19  ;;  %2393 = vmatprep.mubr.msk.f32.mxu1 %vm3094_vm0, %v3095_v1 }
 0x619   : > { %2618 = vmatprep.subr.bf16.mxu1 %v3093_v0  ;;  %2642 = vmatprep.subr.bf16.mxu0 %v3093_v0 }
 0x61a   : > { %2433 = vmatprep.mubr.msk.f32.mxu0 %vm3094_vm0, %v3095_v1 }
 0x61b   : > { %2644 = vmatpush3.bf16.msra.mxu0 %v3595_v23 }
 0x61c   : > { %2620 = vmatpush3.bf16.msra.mxu1 %v3595_v23  ;;  %2645 = vmatprep.subr.bf16.mxu0 %v3093_v0 }
 0x61d   : > { %2621 = vmatprep.subr.bf16.mxu1 %v3093_v0 }
 0x61f   : > { %2647 = vmatpush3.bf16.msra.mxu0 %v3607_v26 }
 0x620   : > { %2623 = vmatpush3.bf16.msra.mxu1 %v3607_v26  ;;  %2648 = vmatprep.subr.bf16.mxu0 %v3093_v0 }
 0x621   : > { %2624 = vmatprep.subr.bf16.mxu1 %v3093_v0 }
 0x623   : > { %2650 = vmatpush3.bf16.msra.mxu0 %v3617_v29 }
 0x624   : > { %2626 = vmatpush3.bf16.msra.mxu1 %v3617_v29  ;;  %2651 = vmatprep.subr.bf16.mxu0 %v3093_v0  ;;  %v2064_v29 = vld [vmem:[#allocation9] ss:$0 sm:$0xff] }
 0x625   : > { %2627 = vmatprep.subr.bf16.mxu1 %v3093_v0 }
 0x627   : > { %2653 = vmatpush3.bf16.msra.mxu0 %v3632_v34 }
 0x628   : > { %2629 = vmatpush3.bf16.msra.mxu1 %v3632_v34  ;;  %2654 = vmatprep.subr.bf16.mxu0 %v3093_v0 }
 0x629   : > { %2630 = vmatprep.subr.bf16.mxu1 %v3093_v0 }
 0x62b   : > { %2656 = vmatpush3.bf16.msra.mxu0 %v3642_v36 }
 0x62c   : > { %2632 = vmatpush3.bf16.msra.mxu1 %v3642_v36  ;;  %2657 = vmatprep.subr.bf16.mxu0 %v3093_v0 }
 0x62d   : > { %2633 = vmatprep.subr.bf16.mxu1 %v3093_v0 }
 0x62f   : > { %2659 = vmatpush3.bf16.msra.mxu0 %v3652_v39 }
 0x630   : > { %2635 = vmatpush3.bf16.msra.mxu1 %v3652_v39  ;;  %2660 = vmatprep.subr.bf16.mxu0 %v3093_v0 }
 0x631   : > { %2636 = vmatprep.subr.bf16.mxu1 %v3093_v0 }
 0x633   : > { %2662 = vmatpush3.bf16.msra.mxu0 %v3662_v42 }
 0x634   : > { %2638 = vmatpush3.bf16.msra.mxu1 %v3662_v42 }
 0x635   : > { %2396 = vmatprep.subr.mxu1 %v3095_v1 }
 0x6e9   : > { %v1445_v19 = vpop.f32.mrb[6].mxu0 }
 0x6ea   : > { %v2156_v23 = vpop.f32.mrb[6].mxu1  ;;  %v2360_v26 = vpop.f32.mrb[7].mxu0 }
 0x6eb   : > { %v2157_v34 = vpop.f32.mrb[7].mxu1  ;;  %v2071_v26 = vld [vmem:[#allocation15] ss:$0 sm:$0xff] }
 0x6ec   : > { %v2158_v36 = vadd.f32 %v2157_v34, %v2156_v23 }
 0x6ee   : > { %v1376_v28 = vadd.f32 %v2158_v36, %v2064_v29 }
 0x6f0   : > { %v1446_v30 = vadd.f32 %v1445_v19, %v1376_v28 }
 0x6f2   : > { %v1449_v31 = vrot.slane %v1446_v30, 4 }
 0x6f4   : > { %v1450_v39 = vadd.f32 %v1449_v31, %v1446_v30 }
 0x6f6   : > { %v1451_v32 = vrot.slane %v1450_v39, 2 }
 0x6f8   : > { %v1452_v33 = vadd.f32 %v1451_v32, %v1450_v39 }
 0x6fa   : > { %v1453_v9 = vrot.slane %v1452_v33, 1 }
 0x6fc   : > { %v1454_v35 = vadd.f32 %v1453_v9, %v1452_v33 }
 0x6fe   : > { %2394 = vmatmul.mubr.f32.vlgmr.msra.gmra.mrb[8].mxu1 %v1454_v35 }
 0x6ff   : > { %2397 = vmatpush3.msra.mxu1 %v3669_v43  ;;  %2398 = vmatprep.mubr.msk.f32.mxu1 %vm3094_vm0, %v3095_v1 }
 0x700   : > { %2436 = vmatprep.subr.mxu1 %v3095_v1 }
 0x7d1   : > { %v1521_v42 = vpop.f32.mrb[8].mxu1 }
 0x7d2   : > { %v1525_v37 = vmul.f32 0.0078125, %v1521_v42  ;;  %v2395_v38 = vpop.f32.mrb[9].mxu1 }
 0x7d4   : > { %2399 = vmatmul.mubr.msk.f32.vlgmr.msra.gmra.mrb[10].mxu1 %vm966_vm7, %v1525_v37 }
 0x7d5   : > { %2437 = vmatpush3.msra.mxu1 %v3669_v43  ;;  %2438 = vmatprep.mubr.msk.f32.mxu1 %vm3094_vm0, %v3095_v1 }
 0x7d6   : > { %2663 = vmatprep.subr.bf16.mxu1 %v3093_v0 }
 0x8a7   : > { %v1595_v40 = vpop.f32.mrb[10].mxu1 }
 0x8a8   : > { %v1602_v41 = vrot.slane %v1595_v40, %v3697_v61  ;;  %v2400_v45 = vpop.f32.mrb[11].mxu1 }
 0x8aa   : > { %v1603_v46 = vsub.f32 %v1446_v30, %v1602_v41 }
 0x8ac   : > { %v1604_v47 = vmul.f32 %v1603_v46, %v1603_v46 }
 0x8ae   : > { %v1605_v48 = vrot.slane %v1604_v47, 4 }
 0x8b0   : > { %v1606_v49 = vadd.f32 %v1605_v48, %v1604_v47 }
 0x8b2   : > { %v1607_v50 = vrot.slane %v1606_v49, 2 }
 0x8b4   : > { %v1608_v51 = vadd.f32 %v1607_v50, %v1606_v49 }
 0x8b6   : > { %v1609_v52 = vrot.slane %v1608_v51, 1 }
 0x8b8   : > { %v1610_v53 = vadd.f32 %v1609_v52, %v1608_v51 }
 0x8ba   : > { %2434 = vmatmul.mubr.f32.vlgmr.msra.gmra.mrb[8].mxu0 %v1610_v53 }
 0x98d   : > { %v1677_v54 = vpop.f32.mrb[8].mxu0 }
 0x98e   : > { %v1681_v43 = vmul.f32 0.0078125, %v1677_v54  ;;  %v2435_v55 = vpop.f32.mrb[9].mxu0 }
 0x990   : > { %v1682_v56 = vadd.f32 1e-05, %v1681_v43 }
 0x992   : > { %2794 = vrsqrt.f32 %v1682_v56 }
 0x99c   : > { %v2795_v63 = vpop.eup %2794 }
 0x99d   : > { %2439 = vmatmul.mubr.msk.f32.vlgmr.msra.gmra.mrb[12].mxu1 %vm966_vm7, %v2795_v63 }
 0x99e   : > { %2665 = vmatpush3.bf16.msra.mxu1 %v2664_v59  ;;  %2457 = vmatprep.mubr.msk.f32.mxu1 %vm3094_vm0, %v3095_v1 }
 0x99f   : > { %2666 = vmatprep.subr.bf16.mxu1 %v3093_v0 }
 0x9a2   : > { %2668 = vmatpush3.bf16.msra.mxu1 %v2667_v3 }
 0x9a3   : > { %2669 = vmatprep.subr.bf16.mxu1 %v3093_v0 }
 0x9a6   : > { %2671 = vmatpush3.bf16.msra.mxu1 %v2670_v7 }
 0x9a7   : > { %2672 = vmatprep.subr.bf16.mxu1 %v3093_v0 }
 0x9aa   : > { %2674 = vmatpush3.bf16.msra.mxu1 %v2673_v11 }
 0x9ad   : > { %2458 = vmatmul.mubr.msk.f32.vlgmr.msra.gmra.mrb[14].mxu1 %vm784_vm4, %v3440_v2 }
 0xa70   : > { %v1753_v4 = vpop.f32.mrb[12].mxu1 }
 0xa71   : > { %v1760_v1 = vrot.slane %v1753_v4, %v3697_v61  ;;  %v2440_v12 = vpop.f32.mrb[13].mxu1 }
 0xa73   : > { %v1761_v14 = vmul.f32 %v1760_v1, %v1603_v46 }
 0xa75   : > { %v1769_v16 = vmul.f32 %v2069_v13, %v1761_v14 }
 0xa77   : > { %v1777_v17 = vadd.f32 %v2070_v15, %v1769_v16 }
 0xa79   : > { %v1778_v18 = vand.u32 2147483647, %v1777_v17  ;;  %vm1782_vm10 = vcmp.ge.f32.partialorder %v1777_v17, 0.0 }
 0xa7b   : > { %v1779_v20 = vsub.f32 0.0, %v1778_v18 }
 0xa7d   : > { %v1780_v21 = vmul.f32 1.442695, %v1779_v20 }
 0xa7f   : > { %2796 = vpow2.f32 %v1780_v21 }
 0xa80   : > { %v1876_v22 = vpop.f32.mrb[14].mxu1 }
 0xa81   : > { %v2459_v24 = vpop.f32.mrb[15].mxu1  ;;  %v1877_v34 = vadd.f32 %v2071_v26, %v1876_v22 }
 0xa89   : > { %v2797_v0 = vpop.eup %2796 }
 0xa8a   : > { %v1784_v25 = vadd.f32 1.0, %v2797_v0  ;;  %v1783_v27 = vsel %vm1782_vm10, %v2797_v0, 1.0 }
 0xa8c   : > { %2798 = vrcp.f32 %v1784_v25 }
 0xa96   : > { %v2799_v2 = vpop.eup %2798 }
 0xa97   : > { %v1786_v61 = vmul.f32 %v2799_v2, %v1783_v27 }
 0xa99   : > { %v1787_v44 = vmul.f32 %v1786_v61, %v1786_v61 }
 0xa9b   : > { %v1790_v19 = vadd.f32 1.0, %v1787_v44  ;;  %v1788_v23 = vsub.f32 1.0, %v1787_v44 }
 0xa9d   : > { %2800 = vrcp.f32 %v1790_v19  ;;  %v1789_v29 = vmul.f32 %v1788_v23, %v1777_v17 }
 0xaa7   : > { %v2801_v36 = vpop.eup %2800 }
 0xaa8   : > { %v1792_v28 = vmul.f32 %v2801_v36, %v1789_v29 }
 0xaaa   : > { %v1880_v30 = vadd.f32 %v1877_v34, %v1792_v28 }
 0xaac   : > { %1881 = vst [vmem:[%s645_s20] sm:$0xff] %v1880_v30 }
 0xaad PF: > { %s3979_s30 = sld [smem:[#allocation21_spill]] }
 0xab3   : > { %s31_s21 = sadd.s32 1, %s3979_s30  }
 0xab4   : > { %p28_p13 = scmp.ge.s32.totalorder %s31_s21, 4  }
 0xab6   :  { %30 = sbr.rel (!%p28_p13) target bundleno = 12 (0xc), region = 154 }
 0xabd   :  { %1901 = vsyncpa [#allocation3], 1 }
 0xabe   :  { %1903 = vsyncpa [#allocation3 + $0x1], 1 }
 0xabf   :  { %1904 = vsyncpa [#allocation5], 1 }
 0xac0   :  { %1905 = vsyncpa [#allocation8], 1 }
 0xac1   :  { %1906 = vsyncpa [#allocation11], 1 }
 0xac2   :  { %1907 = vsyncpa [#allocation14], 1 }

// kernel: forward.15
= control target key start
LH: loop header
LB: loop body
LE: loop exit
PB: predicated region body
PF: predicated region fallthrough
CT: control target
= control target key end

     0   :  { %s2587_s29 = smov 0   ;;  %s3191_s0 = inlined_call_operand.vmem [shape: f32[2,8,128], index: 0, kind: input, shape index: {}]   ;;  %s3192_s1 = inlined_call_operand.vmem [shape: f32[2,1,80], index: 1, kind: input, shape index: {}]   ;;  %s3193_s2 = inlined_call_operand.vmem [shape: f32[128,8], index: 2, kind: input, shape index: {}]   ;;  %s3194_s3 = inlined_call_operand.vmem [shape: f32[8,128], index: 3, kind: input, shape index: {}]   ;;  %s3195_s4 = inlined_call_operand.vmem [shape: f32[384,128], index: 4, kind: input, shape index: {}]   ;;  %s3196_s5 = inlined_call_operand.vmem [shape: f32[1,128], index: 5, kind: input, shape index: {}]   ;;  %s3197_s6 = inlined_call_operand.vmem [shape: f32[1,128], index: 6, kind: input, shape index: {}]   ;;  %s3198_s7 = inlined_call_operand.vmem [shape: f32[1,128], index: 7, kind: input, shape index: {}]   ;;  %s3199_s8 = inlined_call_operand.vmem [shape: f32[80,128], index: 8, kind: input, shape index: {}]   ;;  %s3200_s9 = inlined_call_operand.vmem [shape: f32[1,128], index: 9, kind: input, shape index: {}]   ;;  %s3201_s10 = inlined_call_operand.vmem [shape: f32[384,128], index: 10, kind: input, shape index: {}]   ;;  %s3202_s11 = inlined_call_operand.vmem [shape: f32[1,128], index: 11, kind: input, shape index: {}]   ;;  %s3203_s12 = inlined_call_operand.vmem [shape: f32[1,128], index: 12, kind: input, shape index: {}]   ;;  %s3204_s13 = inlined_call_operand.vmem [shape: f32[1,128], index: 13, kind: input, shape index: {}]   ;;  %s3205_s14 = inlined_call_operand.vmem [shape: f32[2,8,128], index: 14, kind: output, shape index: {}]  }
   0x1 LB: > { %s1777_s30 = sadd.s32 4294967295, %s2507_s29   ;;  %p1781_p0 = scmp.ge.s32.totalorder %s2507_s29, 1  ;;  %s2507_s29 = sphi %s2587_s29, %s24_s29  }
   0x2   : > { %p419_p1 = scmp.lt.s32.totalorder %s2507_s29, 3 }
   0x4   : > { %p420_p2 = pnand %p1781_p0, %p419_p1 }
   0x5   : > { %v511_v0 = vld [vmem:[%s3199_s8] sm:$0xff] (!%p420_p2)  ;;  %v512_v1 = vld [vmem:[%s3199_s8 + $0x8] sm:$0xff] (!%p420_p2)  ;;  %v513_v2 = vld [vmem:[%s3199_s8 + $0x10] sm:$0xff] (!%p420_p2)  ;;  %v2509_v3 = vmov (!%p420_p2), 0.0|0.0   ;;  %vm2510_vm0 = vmmov (!%p420_p2), 0   ;;  %v2511_v6 = vmov (!%p420_p2), 0.0  }
   0x6   : > { %423 = sbr.rel (%p420_p2) target bundleno = 2446 (0x98e), region = 76  ;;  %2245 = vmatprep.subr.bf16.mxu0 (!%p420_p2), %v2509_v3  ;;  %v2246_v4 = vpack.c.bf16 (!%p420_p2), %v512_v1, %v511_v0  ;;  %v514_v5 = vld [vmem:[%s3199_s8 + $0x18] sm:$0xff] (!%p420_p2)  ;;  %2012 = vmatprep.mubr.msk.f32.mxu0 (!%p420_p2), %vm2510_vm0, %v2511_v6  ;;  %p466_p3 = scmp.lt.s32.totalorder (!%p420_p2), %s1777_s30, 1  ;;  %v630_v7 = vld [vmem:[%s3195_s4 + $0x80] sm:$0xff] (!%p420_p2)  ;;  %v631_v9 = vld [vmem:[%s3195_s4 + $0x88] sm:$0xff] (!%p420_p2)  ;;  %vm599_vm1 = vcmask (!%p420_p2), 1040384  }
   0x7   : > { %v2249_v8 = vpack.c.bf16 (!%p420_p2), %v514_v5, %v513_v2  ;;  %v614_v10 = vld [vmem:[%s3195_s4] sm:$0xff] (!%p420_p2)  ;;  %v615_v11 = vld [vmem:[%s3195_s4 + $0x8] sm:$0xff] (!%p420_p2)  ;;  %v2260_v14 = vpack.c.bf16 (!%p420_p2), %v631_v9, %v630_v7  ;;  %v632_v16 = vld [vmem:[%s3195_s4 + $0x90] sm:$0xff] (!%p420_p2)  ;;  %vm604_vm2 = vcmask (!%p420_p2), 1046528   ;;  %vm522_vm5 = vcmask (!%p420_p2), 654336  }
   0x8   : > { %2247 = vmatpush3.bf16.msra.mxu0 (!%p420_p2), %v2246_v4  ;;  %v515_v12 = vld [vmem:[%s3199_s8 + $0x20] sm:$0xff] (!%p420_p2)  ;;  %v516_v13 = vld [vmem:[%s3199_s8 + $0x28] sm:$0xff] (!%p420_p2)  ;;  %v2262_v15 = vpack.c.bf16 (!%p420_p2), %v615_v11, %v614_v10  ;;  %v633_v17 = vld [vmem:[%s3195_s4 + $0x98] sm:$0xff] (!%p420_p2)  ;;  %vm609_vm6 = vcmask (!%p420_p2), 1045504   ;;  %vm886_vm7 = vcmask (!%p420_p2), 64512  }
   0x9   : > { %2248 = vmatprep.subr.bf16.mxu0 (!%p420_p2), %v2509_v3  ;;  %v616_v18 = vld [vmem:[%s3195_s4 + $0x10] sm:$0xff] (!%p420_p2)  ;;  %v617_v19 = vld [vmem:[%s3195_s4 + $0x18] sm:$0xff] (!%p420_p2)  ;;  %2261 = vmatprep.subr.bf16.mxu1 (!%p420_p2), %v2260_v14  ;;  %v2264_v20 = vpack.c.bf16 (!%p420_p2), %v633_v17, %v632_v16  ;;  %v2252_v22 = vpack.c.bf16 (!%p420_p2), %v516_v13, %v515_v12  ;;  %v634_v26 = vld [vmem:[%s3195_s4 + $0xa0] sm:$0xff] (!%p420_p2) }
   0xa   : > { %v517_v23 = vld [vmem:[%s3199_s8 + $0x30] sm:$0xff] (!%p420_p2)  ;;  %2263 = vmatpush3.bf16.msra.mxu1 (!%p420_p2), %v2262_v15  ;;  %v2266_v24 = vpack.c.bf16 (!%p420_p2), %v617_v19, %v616_v18  ;;  %v635_v27 = vld [vmem:[%s3195_s4 + $0xa8] sm:$0xff] (!%p420_p2)  ;;  %v518_v28 = vld [vmem:[%s3199_s8 + $0x38] sm:$0xff] (!%p420_p2) }
   0xb   : > { %2265 = vmatprep.subr.bf16.mxu1 (!%p420_p2), %v2264_v20  ;;  %v2268_v29 = vpack.c.bf16 (!%p420_p2), %v635_v27, %v634_v26  ;;  %v618_v30 = vld [vmem:[%s3195_s4 + $0x20] sm:$0xff] (!%p420_p2)  ;;  %v619_v31 = vld [vmem:[%s3195_s4 + $0x28] sm:$0xff] (!%p420_p2)  ;;  %v636_v33 = vld [vmem:[%s3195_s4 + $0xb0] sm:$0xff] (!%p420_p2)  ;;  %v2255_v35 = vpack.c.bf16 (!%p420_p2), %v518_v28, %v517_v23 }
   0xc   : > { %2250 = vmatpush3.bf16.msra.mxu0 (!%p420_p2), %v2249_v8  ;;  %v637_v34 = vld [vmem:[%s3195_s4 + $0xb8] sm:$0xff] (!%p420_p2)  ;;  %v519_v36 = vld [vmem:[%s3199_s8 + $0x40] sm:$0xff] (!%p420_p2)  ;;  %v2270_v38 = vpack.c.bf16 (!%p420_p2), %v619_v31, %v618_v30  ;;  %v520_v39 = vld [vmem:[%s3199_s8 + $0x48] sm:$0xff] (!%p420_p2) }
   0xd   : > { %s3209_s30 = smov (!%p466_p3, %s1777_s30), 1  ;;  %2251 = vmatprep.subr.bf16.mxu0 %v2509_v3  ;;  %v2272_v40 = vpack.c.bf16 %v637_v34, %v636_v33  ;;  %v620_v41 = vld [vmem:[%s3195_s4 + $0x30] sm:$0xff]  ;;  %v621_v42 = vld [vmem:[%s3195_s4 + $0x38] sm:$0xff]  ;;  %v638_v43 = vld [vmem:[%s3195_s4 + $0xc0] sm:$0xff]  ;;  %v2258_v45 = vpack.c.bf16 %v520_v39, %v519_v36 }
   0xe   : > { %s472_s17 = scalar_lea.vmem %s3192_s1, %s3209_s30  ;;  %2267 = vmatpush3.bf16.msra.mxu1 %v2266_v24  ;;  %s1782_s28 = sshll.u32 %s3209_s30, 3  ;;  %v639_v44 = vld [vmem:[%s3195_s4 + $0xc8] sm:$0xff]  ;;  %v2274_v46 = vpack.c.bf16 %v621_v42, %v620_v41  ;;  %v622_v48 = vld [vmem:[%s3195_s4 + $0x40] sm:$0xff]  ;;  %v640_v50 = vld [vmem:[%s3195_s4 + $0xd0] sm:$0xff] }
   0xf   : > { %v2647_v21 = vld [vmem:[%s472_s17] sm:$0x1]  ;;  %2269 = vmatprep.subr.bf16.mxu1 %v2268_v29  ;;  %s469_s21 = scalar_lea.vmem %s3191_s0, %s1782_s28  ;;  %v2276_v47 = vpack.c.bf16 %v639_v44, %v638_v43  ;;  %v623_v49 = vld [vmem:[%s3195_s4 + $0x48] sm:$0xff]  ;;  %v641_v51 = vld [vmem:[%s3195_s4 + $0xd8] sm:$0xff]  ;;  %s476_s20 = scalar_lea.vmem %s3205_s14, %s1782_s28 }
  0x10   : > { %v496_v25 = vand.u32 2147483647, %v2647_v21  ;;  %2253 = vmatpush3.bf16.msra.mxu0 %v2252_v22  ;;  %v2713_v52 = vld [vmem:[%s469_s21] sm:$0xff]  ;;  %v2278_v53 = vpack.c.bf16 %v623_v49, %v622_v48  ;;  %v2280_v55 = vpack.c.bf16 %v641_v51, %v640_v50  ;;  %v624_v56 = vld [vmem:[%s3195_s4 + $0x50] sm:$0xff]  ;;  %v625_v57 = vld [vmem:[%s3195_s4 + $0x58] sm:$0xff]  ;;  %vm500_vm3 = vcmp.ge.f32.partialorder %v2647_v21, 0.0 }
  0x11   : > { %2254 = vmatprep.subr.bf16.mxu0 %v2509_v3  ;;  %v597_v54 = vrot.slane %v2713_v52, 7  ;;  %v642_v58 = vld [vmem:[%s3195_s4 + $0xe0] sm:$0xff]  ;;  %v643_v59 = vld [vmem:[%s3195_s4 + $0xe8] sm:$0xff]  ;;  %v2282_v1 = vpack.c.bf16 %v625_v57, %v624_v56  ;;  %v644_v9 = vld [vmem:[%s3195_s4 + $0xf0] sm:$0xff] }
  0x12   : > { %v497_v32 = vsub.f32 0.0, %v496_v25  ;;  %2271 = vmatpush3.bf16.msra.mxu1 %v2270_v38  ;;  %v2284_v4 = vpack.c.bf16 %v643_v59, %v642_v58  ;;  %v626_v5 = vld [vmem:[%s3195_s4 + $0x60] sm:$0xff]  ;;  %v627_v7 = vld [vmem:[%s3195_s4 + $0x68] sm:$0xff]  ;;  %v645_v10 = vld [vmem:[%s3195_s4 + $0xf8] sm:$0xff] }
  0x13   : > { %2273 = vmatprep.subr.bf16.mxu1 %v2272_v40  ;;  %v2730_v60 = vsel %vm599_vm1, 0.0, %v597_v54  ;;  %v2733_v61 = vsel %vm599_vm1, %v597_v54, 0.0  ;;  %v2286_v11 = vpack.c.bf16 %v627_v7, %v626_v5  ;;  %v2288_v12 = vpack.c.bf16 %v645_v10, %v644_v9  ;;  %v628_v13 = vld [vmem:[%s3195_s4 + $0x70] sm:$0xff]  ;;  %v629_v14 = vld [vmem:[%s3195_s4 + $0x78] sm:$0xff]  ;;  %vm2758_vm4 = vmneg %vm599_vm1 }
  0x14   : > { %v498_v37 = vmul.f32 1.442695, %v497_v32  ;;  %2256 = vmatpush3.bf16.msra.mxu0 %v2255_v35  ;;  %v605_v62 = vrot.slane %v2730_v60, 1  ;;  %v606_v63 = vrot.slane %v2733_v61, 1  ;;  %v2290_v15 = vpack.c.bf16 %v629_v14, %v628_v13  ;;  %v646_v25 = vld [vmem:[%s3195_s4 + $0x100] sm:$0xff]  ;;  %v647_v26 = vld [vmem:[%s3195_s4 + $0x108] sm:$0xff] }
  0x15   : > { %2257 = vmatprep.subr.bf16.mxu0 %v2509_v3  ;;  %v2293_v28 = vpack.c.bf16 %v647_v26, %v646_v25  ;;  %v648_v30 = vld [vmem:[%s3195_s4 + $0x110] sm:$0xff]  ;;  %v650_v32 = vld [vmem:[%s3195_s4 + $0x120] sm:$0xff]  ;;  %v651_v33 = vld [vmem:[%s3195_s4 + $0x128] sm:$0xff]  ;;  %v610_v49 = vrot.slane %v2730_v60, 2  ;;  %v611_v50 = vrot.slane %v2733_v61, 2 }
  0x16   : > { %2479 = vpow2.f32 %v498_v37  ;;  %2275 = vmatpush3.bf16.msra.mxu1 %v2274_v46  ;;  %v607_v8 = vsel %vm604_vm2, %v605_v62, %v606_v63  ;;  %v2299_v34 = vpack.c.bf16 %v651_v33, %v650_v32  ;;  %v652_v35 = vld [vmem:[%s3195_s4 + $0x130] sm:$0xff]  ;;  %v653_v36 = vld [vmem:[%s3195_s4 + $0x138] sm:$0xff]  ;;  %v654_v38 = vld [vmem:[%s3195_s4 + $0x140] sm:$0xff] }
  0x17   : > { %2277 = vmatprep.subr.bf16.mxu1 %v2276_v47  ;;  %733 = vmatprep.mubr.f32.mxu1 %v607_v8  ;;  %v2302_v37 = vpack.c.bf16 %v653_v36, %v652_v35  ;;  %v655_v39 = vld [vmem:[%s3195_s4 + $0x148] sm:$0xff]  ;;  %v656_v41 = vld [vmem:[%s3195_s4 + $0x150] sm:$0xff]  ;;  %v657_v42 = vld [vmem:[%s3195_s4 + $0x158] sm:$0xff] }
  0x18   : > { %2259 = vmatpush3.bf16.msra.mxu0 %v2258_v45  ;;  %v2305_v40 = vpack.c.bf16 %v655_v39, %v654_v38  ;;  %v2308_v43 = vpack.c.bf16 %v657_v42, %v656_v41  ;;  %v658_v44 = vld [vmem:[%s3195_s4 + $0x160] sm:$0xff]  ;;  %v659_v45 = vld [vmem:[%s3195_s4 + $0x168] sm:$0xff]  ;;  %v660_v47 = vld [vmem:[%s3195_s4 + $0x170] sm:$0xff] }
  0x19   : > { %2292 = vmatprep.subr.bf16.mxu0 %v2509_v3  ;;  %v2311_v46 = vpack.c.bf16 %v659_v45, %v658_v44  ;;  %v661_v48 = vld [vmem:[%s3195_s4 + $0x178] sm:$0xff]  ;;  %v480_v56 = vld [vmem:[%s3193_s2 + $0x10] sm:$0xff]  ;;  %v482_v60 = vld [vmem:[%s3193_s2 + $0x20] sm:$0xff] }
  0x1a   : > { %2279 = vmatpush3.bf16.msra.mxu1 %v2278_v53  ;;  %v2314_v51 = vpack.c.bf16 %v661_v48, %v660_v47  ;;  %v612_v53 = vsel %vm609_vm6, %v610_v49, %v611_v50  ;;  %v481_v58 = vld [vmem:[%s3193_s2 + $0x18] sm:$0xff]  ;;  %v483_v61 = vld [vmem:[%s3193_s2 + $0x28] sm:$0xff]  ;;  %v484_v63 = vld [vmem:[%s3193_s2 + $0x30] sm:$0xff] }
  0x1b   : > { %2281 = vmatprep.subr.bf16.mxu1 %v2280_v55  ;;  %v479_v55 = vld [vmem:[%s3193_s2 + $0x8] sm:$0xff]  ;;  %v2846_v59 = vpack.c.bf16 %v481_v58, %v480_v56  ;;  %v2858_v62 = vpack.c.bf16 %v483_v61, %v482_v60  ;;  %v488_v7 = vld [vmem:[%s3193_s2 + $0x50] sm:$0xff]  ;;  %v489_v8 = vld [vmem:[%s3193_s2 + $0x58] sm:$0xff] }
  0x1c   : > { %v2897_v9 = vpack.c.bf16 %v489_v8, %v488_v7  ;;  %v490_v10 = vld [vmem:[%s3193_s2 + $0x60] sm:$0xff]  ;;  %v492_v13 = vld [vmem:[%s3193_s2 + $0x70] sm:$0xff]  ;;  %v493_v14 = vld [vmem:[%s3193_s2 + $0x78] sm:$0xff] }
  0x1d   : > { %v2935_v33 = vld [vmem:[%s3194_s3] sm:$0xff]  ;;  %v1191_v60 = vld [vmem:[%s3201_s10 + $0x88] sm:$0xff] }
  0x1e   : > { %2283 = vmatpush3.bf16.msra.mxu1 %v2282_v1  ;;  %v1190_v58 = vld [vmem:[%s3201_s10 + $0x80] sm:$0xff] }
  0x1f   : > { %2285 = vmatprep.subr.bf16.mxu1 %v2284_v4  ;;  %v487_v4 = vld [vmem:[%s3193_s2 + $0x48] sm:$0xff]  ;;  %v1206_v61 = vld [vmem:[%s3201_s10 + $0x100] sm:$0xff] }
  0x20   : > { %v2480_v0 = vpop.eup %2479 }
  0x21   : > { %v502_v2 = vadd.f32 1.0, %v2480_v0  ;;  %v501_v16 = vsel %vm500_vm3, %v2480_v0, 1.0  ;;  %v485_v0 = vld [vmem:[%s3193_s2 + $0x38] sm:$0xff] }
  0x22   : > { %2287 = vmatpush3.bf16.msra.mxu1 %v2286_v11  ;;  %v2870_v1 = vpack.c.bf16 %v485_v0, %v484_v63  ;;  %v491_v11 = vld [vmem:[%s3193_s2 + $0x68] sm:$0xff]  ;;  %v2364_v63 = vpack.c.bf16 %v1191_v60, %v1190_v58  ;;  %v1217_v60 = vld [vmem:[%s3201_s10 + $0x158] sm:$0xff] }
  0x23   : > { %2481 = vrcp.f32 %v502_v2  ;;  %2289 = vmatprep.subr.bf16.mxu1 %v2288_v12  ;;  %v486_v2 = vld [vmem:[%s3193_s2 + $0x40] sm:$0xff]  ;;  %v2909_v12 = vpack.c.bf16 %v491_v11, %v490_v10  ;;  %v1207_v0 = vld [vmem:[%s3201_s10 + $0x108] sm:$0xff]  ;;  %v1192_v10 = vld [vmem:[%s3201_s10 + $0x90] sm:$0xff] }
  0x24   : > { %v2885_v5 = vpack.c.bf16 %v487_v4, %v486_v2  ;;  %v1174_v2 = vld [vmem:[%s3201_s10] sm:$0xff]  ;;  %v1175_v4 = vld [vmem:[%s3201_s10 + $0x8] sm:$0xff]  ;;  %v2397_v7 = vpack.c.bf16 %v1207_v0, %v1206_v61  ;;  %v1193_v11 = vld [vmem:[%s3201_s10 + $0x98] sm:$0xff] }
  0x25   : > { %v2366_v8 = vpack.c.bf16 %v1175_v4, %v1174_v2  ;;  %v1184_v61 = vld [vmem:[%s3201_s10 + $0x50] sm:$0xff]  ;;  %v1202_v4 = vld [vmem:[%s3201_s10 + $0xe0] sm:$0xff] }
  0x26   : > { %2291 = vmatpush3.bf16.msra.mxu1 %v2290_v15  ;;  %v2921_v15 = vpack.c.bf16 %v493_v14, %v492_v13  ;;  %v1208_v13 = vld [vmem:[%s3201_s10 + $0x110] sm:$0xff]  ;;  %v2368_v14 = vpack.c.bf16 %v1193_v11, %v1192_v10  ;;  %v1219_v11 = vld [vmem:[%s3201_s10 + $0x168] sm:$0xff] }
  0x27   : > { %2316 = vmatprep.subr.bf16.mxu1 %v2509_v3 }
  0x29   : > { %1787 = vmatmul.mubr.msk.f32.vlgmr.msra.gmra.mrb[0].mxu1 %vm2758_vm4, %v597_v54  ;;  %v478_v54 = vld [vmem:[%s3193_s2] sm:$0xff] }
  0x2a   : > { %2082 = vmatprep.mubr.msk.f32.mxu1 %vm2510_vm0, %v2511_v6  ;;  %v2840_v57 = vpack.c.bf16 %v479_v55, %v478_v54 }
  0x2c   : > { %2318 = vmatpush3.bf16.msra.mxu1 %v2840_v57 }
  0x2d   : > { %v2482_v18 = vpop.eup %2481  ;;  %2319 = vmatprep.subr.bf16.mxu1 %v2509_v3 }
  0x2e   : > { %v504_v19 = vmul.f32 %v2482_v18, %v501_v16 }
  0x30   : > { %v505_v20 = vmul.f32 %v504_v19, %v504_v19  ;;  %2321 = vmatpush3.bf16.msra.mxu1 %v2846_v59 }
  0x31   : > { %2322 = vmatprep.subr.bf16.mxu1 %v2509_v3 }
  0x32   : > { %v508_v22 = vadd.f32 1.0, %v505_v20  ;;  %v506_v23 = vsub.f32 1.0, %v505_v20 }
  0x34   : > { %2483 = vrcp.f32 %v508_v22  ;;  %v507_v24 = vmul.f32 %v506_v23, %v2647_v21  ;;  %v649_v21 = vld [vmem:[%s3195_s4 + $0x118] sm:$0xff]  ;;  %2324 = vmatpush3.bf16.msra.mxu1 %v2858_v62  ;;  %v1785_v23 = vld [vmem:[%s3196_s5] ss:$0 sm:$0xff] }
  0x35   : > { %v2296_v31 = vpack.c.bf16 %v649_v21, %v648_v30  ;;  %2325 = vmatprep.subr.bf16.mxu1 %v2509_v3 }
  0x38   : > { %2327 = vmatpush3.bf16.msra.mxu1 %v2870_v1 }
  0x39   : > { %2328 = vmatprep.subr.bf16.mxu1 %v2509_v3 }
  0x3c   : > { %2330 = vmatpush3.bf16.msra.mxu1 %v2885_v5 }
  0x3d   : > { %2331 = vmatprep.subr.bf16.mxu1 %v2509_v3 }
  0x3e   : > { %v2484_v27 = vpop.eup %2483 }
  0x3f   : > { %v510_v29 = vmul.f32 %v2484_v27, %v507_v24 }
  0x40   : > { %2333 = vmatpush3.bf16.msra.mxu1 %v2897_v9 }
  0x41   : > { %2013 = vmatmul.mubr.msk.f32.vlgmr.msra.gmra.mrb[0].mxu0 %vm522_vm5, %v510_v29  ;;  %2334 = vmatprep.subr.bf16.mxu1 %v2509_v3 }
  0x42   : > { %2294 = vmatpush3.bf16.msra.mxu0 %v2293_v28  ;;  %2047 = vmatprep.mubr.msk.f32.mxu0 %vm2510_vm0, %v2511_v6 }
  0x43   : > { %2295 = vmatprep.subr.bf16.mxu0 %v2509_v3 }
  0x44   : > { %2336 = vmatpush3.bf16.msra.mxu1 %v2909_v12 }
  0x45   : > { %2337 = vmatprep.subr.bf16.mxu1 %v2509_v3 }
  0x46   : > { %2297 = vmatpush3.bf16.msra.mxu0 %v2296_v31 }
  0x47   : > { %2298 = vmatprep.subr.bf16.mxu0 %v2509_v3 }
  0x48   : > { %2339 = vmatpush3.bf16.msra.mxu1 %v2921_v15 }
  0x49   : > { %2085 = vmatprep.subr.mxu1 %v2511_v6 }
  0x4a   : > { %2300 = vmatpush3.bf16.msra.mxu0 %v2299_v34 }
  0x4b   : > { %2301 = vmatprep.subr.bf16.mxu0 %v2509_v3 }
  0x4e   : > { %2303 = vmatpush3.bf16.msra.mxu0 %v2302_v37  ;;  %v960_v37 = vlaneseq }
  0x4f   : > { %2304 = vmatprep.subr.bf16.mxu0 %v2509_v3 }
  0x50   : > { %v961_v38 = vshrl.u32 %v960_v37, 7  ;;  %v1213_v37 = vld [vmem:[%s3201_s10 + $0x138] sm:$0xff] }
  0x52   : > { %2306 = vmatpush3.bf16.msra.mxu0 %v2305_v40  ;;  %v2945_v39 = vsub.s32 0, %v961_v38  ;;  %v1180_v38 = vld [vmem:[%s3201_s10 + $0x30] sm:$0xff] }
  0x53   : > { %2307 = vmatprep.subr.bf16.mxu0 %v2509_v3 }
  0x56   : > { %2309 = vmatpush3.bf16.msra.mxu0 %v2308_v43 }
  0x57   : > { %2310 = vmatprep.subr.bf16.mxu0 %v2509_v3 }
  0x5a   : > { %2312 = vmatpush3.bf16.msra.mxu0 %v2311_v46 }
  0x5b   : > { %2313 = vmatprep.subr.bf16.mxu0 %v2509_v3 }
  0x5e   : > { %2315 = vmatpush3.bf16.msra.mxu0 %v2314_v51 }
  0x5f   : > { %2340 = vmatprep.subr.bf16.mxu0 %v2509_v3 }
  0x61   : > { %2048 = vmatmul.mubr.f32.vlgmr.msra.gmra.mrb[2].mxu0 %v612_v53 }
  0x62   : > { %2122 = vmatprep.mubr.msk.f32.mxu0 %vm2510_vm0, %v2511_v6  ;;  %2342 = vmatpush3.bf16.msra.mxu0 %v2840_v57 }
  0x63   : > { %2343 = vmatprep.subr.bf16.mxu0 %v2509_v3 }
  0x66   : > { %2345 = vmatpush3.bf16.msra.mxu0 %v2846_v59 }
  0x67   : > { %2346 = vmatprep.subr.bf16.mxu0 %v2509_v3 }
  0x6a   : > { %2348 = vmatpush3.bf16.msra.mxu0 %v2858_v62 }
  0x6b   : > { %2349 = vmatprep.subr.bf16.mxu0 %v2509_v3 }
  0x6e   : > { %2351 = vmatpush3.bf16.msra.mxu0 %v2870_v1 }
  0x6f   : > { %2352 = vmatprep.subr.bf16.mxu0 %v2509_v3 }
  0x72   : > { %2354 = vmatpush3.bf16.msra.mxu0 %v2885_v5 }
  0x73   : > { %2355 = vmatprep.subr.bf16.mxu0 %v2509_v3 }
  0x76   : > { %2357 = vmatpush3.bf16.msra.mxu0 %v2897_v9 }
  0x77   : > { %2358 = vmatprep.subr.bf16.mxu0 %v2509_v3 }
  0x7a   : > { %2360 = vmatpush3.bf16.msra.mxu0 %v2909_v12 }
  0x7b   : > { %2361 = vmatprep.subr.bf16.mxu0 %v2509_v3 }
  0x7e   : > { %2363 = vmatpush3.bf16.msra.mxu0 %v2921_v15 }
  0x7f   : > { %2396 = vmatprep.subr.bf16.mxu0 %v2509_v3 }
  0xfc   : > { %v1844_v16 = vpop.f32.mrb[0].mxu1 }
  0xfd   : > { %v1845_v18 = vpop.f32.mrb[1].mxu1 }
  0xfe   : > { %v1846_v19 = vadd.f32 %v1845_v18, %v1844_v16  ;;  %v1209_v16 = vld [vmem:[%s3201_s10 + $0x118] sm:$0xff]  ;;  %v1176_v18 = vld [vmem:[%s3201_s10 + $0x10] sm:$0xff] }
 0x100   : > { %v736_v24 = vadd.f32 %v1846_v19, %v1785_v23  ;;  %v1177_v19 = vld [vmem:[%s3201_s10 + $0x18] sm:$0xff] }
 0x101   : > { %v2370_v23 = vpack.c.bf16 %v1177_v19, %v1176_v18  ;;  %v1204_v19 = vld [vmem:[%s3201_s10 + $0xf0] sm:$0xff] }
 0x114   : > { %v2927_v20 = vpop.f32.mrb[0].mxu0 }
 0x115   : > { %v2014_v22 = vpop.f32.mrb[1].mxu0 }
 0x116   : > { %v2400_v22 = vpack.c.bf16 %v1209_v16, %v1208_v13  ;;  %v1186_v13 = vld [vmem:[%s3201_s10 + $0x60] sm:$0xff] }
 0x134   : > { %v805_v25 = vpop.f32.mrb[2].mxu0 }
 0x135   : > { %v806_v26 = vadd.f32 %v805_v25, %v736_v24  ;;  %v2049_v27 = vpop.f32.mrb[3].mxu0  ;;  %v1194_v24 = vld [vmem:[%s3201_s10 + $0xa0] sm:$0xff]  ;;  %v1195_v25 = vld [vmem:[%s3201_s10 + $0xa8] sm:$0xff] }
 0x136   : > { %v2372_v27 = vpack.c.bf16 %v1195_v25, %v1194_v24  ;;  %v1221_v25 = vld [vmem:[%s3201_s10 + $0x178] sm:$0xff] }
 0x137   : > { %v809_v28 = vrot.slane %v806_v26, 4 }
 0x139   : > { %v810_v29 = vadd.f32 %v809_v28, %v806_v26  ;;  %v1211_v28 = vld [vmem:[%s3201_s10 + $0x128] sm:$0xff] }
 0x13b   : > { %v811_v30 = vrot.slane %v810_v29, 2 }
 0x13d   : > { %v812_v21 = vadd.f32 %v811_v30, %v810_v29  ;;  %v1178_v29 = vld [vmem:[%s3201_s10 + $0x20] sm:$0xff]  ;;  %v1179_v30 = vld [vmem:[%s3201_s10 + $0x28] sm:$0xff] }
 0x13f   : > { %v813_v31 = vrot.slane %v812_v21, 1 }
 0x141   : > { %v814_v32 = vadd.f32 %v813_v31, %v812_v21  ;;  %v2374_v31 = vpack.c.bf16 %v1179_v30, %v1178_v29 }
 0x143   : > { %2083 = vmatmul.mubr.f32.vlgmr.msra.gmra.mrb[2].mxu1 %v814_v32  ;;  %v1196_v32 = vld [vmem:[%s3201_s10 + $0xb0] sm:$0xff] }
 0x144   : > { %2086 = vmatpush3.msra.mxu1 %v2935_v33  ;;  %2087 = vmatprep.mubr.msk.f32.mxu1 %vm2510_vm0, %v2511_v6 }
 0x145   : > { %2125 = vmatprep.subr.mxu1 %v2511_v6 }
 0x216   : > { %v881_v34 = vpop.f32.mrb[2].mxu1 }
 0x217   : > { %v885_v35 = vmul.f32 0.0078125, %v881_v34  ;;  %v2084_v36 = vpop.f32.mrb[3].mxu1  ;;  %v1197_v34 = vld [vmem:[%s3201_s10 + $0xb8] sm:$0xff] }
 0x218   : > { %v2376_v36 = vpack.c.bf16 %v1197_v34, %v1196_v32  ;;  %v1790_v32 = vld [vmem:[%s3197_s6] ss:$0 sm:$0xff] }
 0x219   : > { %2088 = vmatmul.mubr.msk.f32.vlgmr.msra.gmra.mrb[4].mxu1 %vm886_vm7, %v885_v35  ;;  %v1212_v35 = vld [vmem:[%s3201_s10 + $0x130] sm:$0xff] }
 0x21a   : > { %2126 = vmatpush3.msra.mxu1 %v2935_v33  ;;  %2127 = vmatprep.mubr.msk.f32.mxu1 %vm2510_vm0, %v2511_v6 }
 0x21b   : > { %2365 = vmatprep.subr.bf16.mxu1 %v2364_v63  ;;  %v1185_v63 = vld [vmem:[%s3201_s10 + $0x58] sm:$0xff] }
 0x21c   : > { %v2386_v2 = vpack.c.bf16 %v1185_v63, %v1184_v61 }
 0x2ec   : > { %v956_v40 = vpop.f32.mrb[4].mxu1 }
 0x2ed   : > { %v963_v41 = vrot.slane %v956_v40, %v2945_v39  ;;  %v2089_v42 = vpop.f32.mrb[5].mxu1  ;;  %v1181_v40 = vld [vmem:[%s3201_s10 + $0x38] sm:$0xff] }
 0x2ee   : > { %v2378_v42 = vpack.c.bf16 %v1181_v40, %v1180_v38 }
 0x2ef   : > { %v2948_v43 = vsub.f32 %v806_v26, %v963_v41  ;;  %v1210_v26 = vld [vmem:[%s3201_s10 + $0x120] sm:$0xff]  ;;  %v2406_v41 = vpack.c.bf16 %v1213_v37, %v1212_v35 }
 0x2f0   : > { %v2403_v21 = vpack.c.bf16 %v1211_v28, %v1210_v26  ;;  %v1188_v26 = vld [vmem:[%s3201_s10 + $0x70] sm:$0xff]  ;;  %v1791_v35 = vld [vmem:[%s3198_s7] ss:$0 sm:$0xff] }
 0x2f1   : > { %v965_v44 = vmul.f32 %v2948_v43, %v2948_v43 }
 0x2f3   : > { %v966_v45 = vrot.slane %v965_v44, 4 }
 0x2f5   : > { %v967_v46 = vadd.f32 %v966_v45, %v965_v44  ;;  %v1198_v44 = vld [vmem:[%s3201_s10 + $0xc0] sm:$0xff]  ;;  %v1199_v45 = vld [vmem:[%s3201_s10 + $0xc8] sm:$0xff] }
 0x2f7   : > { %v968_v47 = vrot.slane %v967_v46, 2 }
 0x2f9   : > { %v969_v48 = vadd.f32 %v968_v47, %v967_v46  ;;  %v1214_v46 = vld [vmem:[%s3201_s10 + $0x140] sm:$0xff]  ;;  %v2380_v47 = vpack.c.bf16 %v1199_v45, %v1198_v44 }
 0x2fb   : > { %v970_v49 = vrot.slane %v969_v48, 1 }
 0x2fd   : > { %v971_v50 = vadd.f32 %v970_v49, %v969_v48  ;;  %v1215_v48 = vld [vmem:[%s3201_s10 + $0x148] sm:$0xff]  ;;  %v1182_v49 = vld [vmem:[%s3201_s10 + $0x40] sm:$0xff] }
 0x2ff   : > { %2123 = vmatmul.mubr.f32.vlgmr.msra.gmra.mrb[4].mxu0 %v971_v50  ;;  %v1183_v50 = vld [vmem:[%s3201_s10 + $0x48] sm:$0xff] }
 0x300   : > { %2162 = vmatprep.mubr.msk.f32.mxu0 %vm2510_vm0, %v2511_v6  ;;  %2398 = vmatpush3.bf16.msra.mxu0 %v2397_v7  ;;  %v1203_v7 = vld [vmem:[%s3201_s10 + $0xe8] sm:$0xff] }
 0x301   : > { %2399 = vmatprep.subr.bf16.mxu0 %v2509_v3  ;;  %v2388_v10 = vpack.c.bf16 %v1203_v7, %v1202_v4 }
 0x304   : > { %2401 = vmatpush3.bf16.msra.mxu0 %v2400_v22  ;;  %v1205_v22 = vld [vmem:[%s3201_s10 + $0xf8] sm:$0xff] }
 0x305   : > { %2402 = vmatprep.subr.bf16.mxu0 %v2509_v3  ;;  %v2392_v24 = vpack.c.bf16 %v1205_v22, %v1204_v19 }
 0x308   : > { %2404 = vmatpush3.bf16.msra.mxu0 %v2403_v21 }
 0x309   : > { %2405 = vmatprep.subr.bf16.mxu0 %v2509_v3 }
 0x30c   : > { %2407 = vmatpush3.bf16.msra.mxu0 %v2406_v41 }
 0x30d   : > { %2408 = vmatprep.subr.bf16.mxu0 %v2509_v3 }
 0x3d2   : > { %v1038_v51 = vpop.f32.mrb[4].mxu0 }
 0x3d3   : > { %v1042_v53 = vmul.f32 0.0078125, %v1038_v51  ;;  %v2124_v54 = vpop.f32.mrb[5].mxu0  ;;  %v2409_v51 = vpack.c.bf16 %v1215_v48, %v1214_v46 }
 0x3d4   : > { %v1200_v54 = vld [vmem:[%s3201_s10 + $0xd0] sm:$0xff] }
 0x3d5   : > { %v1043_v55 = vadd.f32 1e-05, %v1042_v53  ;;  %v2382_v53 = vpack.c.bf16 %v1183_v50, %v1182_v49  ;;  %2410 = vmatpush3.bf16.msra.mxu0 %v2409_v51 }
 0x3d6   : > { %2411 = vmatprep.subr.bf16.mxu0 %v2509_v3 }
 0x3d7   : > { %2485 = vrsqrt.f32 %v1043_v55  ;;  %v1201_v55 = vld [vmem:[%s3201_s10 + $0xd8] sm:$0xff] }
 0x3d8   : > { %v2384_v58 = vpack.c.bf16 %v1201_v55, %v1200_v54 }
 0x3e1   : > { %v2486_v56 = vpop.eup %2485 }
 0x3e2   : > { %2128 = vmatmul.mubr.msk.f32.vlgmr.msra.gmra.mrb[6].mxu1 %vm886_vm7, %v2486_v56  ;;  %v1216_v56 = vld [vmem:[%s3201_s10 + $0x150] sm:$0xff] }
 0x3e3   : > { %2367 = vmatpush3.bf16.msra.mxu1 %v2366_v8  ;;  %v2412_v0 = vpack.c.bf16 %v1217_v60, %v1216_v56  ;;  %v1218_v8 = vld [vmem:[%s3201_s10 + $0x160] sm:$0xff] }
 0x3e4   : > { %2369 = vmatprep.subr.bf16.mxu1 %v2368_v14  ;;  %v1187_v14 = vld [vmem:[%s3201_s10 + $0x68] sm:$0xff]  ;;  %v2415_v16 = vpack.c.bf16 %v1219_v11, %v1218_v8 }
 0x3e5   : > { %2413 = vmatpush3.bf16.msra.mxu0 %v2412_v0  ;;  %v2390_v18 = vpack.c.bf16 %v1187_v14, %v1186_v13 }
 0x3e6   : > { %2414 = vmatprep.subr.bf16.mxu0 %v2509_v3 }
 0x3e7   : > { %2371 = vmatpush3.bf16.msra.mxu1 %v2370_v23  ;;  %v1220_v23 = vld [vmem:[%s3201_s10 + $0x170] sm:$0xff] }
 0x3e8   : > { %2373 = vmatprep.subr.bf16.mxu1 %v2372_v27  ;;  %v1189_v27 = vld [vmem:[%s3201_s10 + $0x78] sm:$0xff]  ;;  %v2418_v28 = vpack.c.bf16 %v1221_v25, %v1220_v23 }
 0x3e9   : > { %2416 = vmatpush3.bf16.msra.mxu0 %v2415_v16  ;;  %v2394_v29 = vpack.c.bf16 %v1189_v27, %v1188_v26 }
 0x3ea   : > { %2417 = vmatprep.subr.bf16.mxu0 %v2509_v3 }
 0x3eb   : > { %2375 = vmatpush3.bf16.msra.mxu1 %v2374_v31 }
 0x3ec   : > { %2377 = vmatprep.subr.bf16.mxu1 %v2376_v36 }
 0x3ed   : > { %2419 = vmatpush3.bf16.msra.mxu0 %v2418_v28 }
 0x3ee   : > { %2444 = vmatprep.subr.bf16.mxu0 %v2509_v3 }
 0x3ef   : > { %2379 = vmatpush3.bf16.msra.mxu1 %v2378_v42 }
 0x3f0   : > { %2381 = vmatprep.subr.bf16.mxu1 %v2380_v47 }
 0x3f3   : > { %2383 = vmatpush3.bf16.msra.mxu1 %v2382_v53 }
 0x3f4   : > { %2385 = vmatprep.subr.bf16.mxu1 %v2384_v58 }
 0x3f7   : > { %2387 = vmatpush3.bf16.msra.mxu1 %v2386_v2 }
 0x3f8   : > { %2389 = vmatprep.subr.bf16.mxu1 %v2388_v10 }
 0x3fb   : > { %2391 = vmatpush3.bf16.msra.mxu1 %v2390_v18 }
 0x3fc   : > { %2393 = vmatprep.subr.bf16.mxu1 %v2392_v24 }
 0x3ff   : > { %2395 = vmatpush3.bf16.msra.mxu1 %v2394_v29 }
 0x400   : > { %2420 = vmatprep.subr.bf16.mxu1 %v2509_v3 }
 0x4b5   : > { %v1114_v30 = vpop.f32.mrb[6].mxu1 }
 0x4b6   : > { %v1121_v21 = vrot.slane %v1114_v30, %v2945_v39  ;;  %v2129_v31 = vpop.f32.mrb[7].mxu1 }
 0x4b8   : > { %v1122_v34 = vmul.f32 %v1121_v21, %v2948_v43  ;;  %v521_v43 = vld [vmem:[%s3200_s9] sm:$0x1] }
 0x4b9   : > { %v593_v51 = vadd.f32 %v2927_v20, %v521_v43 }
 0x4ba   : > { %v1130_v36 = vmul.f32 %v1790_v32, %v1122_v34 }
 0x4bb   : > { %v1157_v55 = vrot.slane %v593_v51, %v2945_v39 }
 0x4bc   : > { %v1138_v37 = vadd.f32 %v1791_v35, %v1130_v36 }
 0x4be   : > { %v1139_v38 = vand.u32 2147483647, %v1138_v37  ;;  %vm1143_vm8 = vcmp.ge.f32.partialorder %v1138_v37, 0.0 }
 0x4c0   : > { %v1140_v40 = vsub.f32 0.0, %v1139_v38 }
 0x4c2   : > { %v1141_v41 = vmul.f32 1.442695, %v1140_v40  ;;  %v1797_v40 = vld [vmem:[%s3203_s12] ss:$0 sm:$0xff] }
 0x4c4   : > { %2487 = vpow2.f32 %v1141_v41 }
 0x4ce   : > { %v2488_v42 = vpop.eup %2487 }
 0x4cf   : > { %v1145_v44 = vadd.f32 1.0, %v2488_v42  ;;  %v1144_v46 = vsel %vm1143_vm8, %v2488_v42, 1.0  ;;  %v1798_v42 = vld [vmem:[%s3204_s13] ss:$0 sm:$0xff] }
 0x4d1   : > { %2489 = vrcp.f32 %v1145_v44 }
 0x4db   : > { %v2490_v45 = vpop.eup %2489 }
 0x4dc   : > { %v1147_v47 = vmul.f32 %v2490_v45, %v1144_v46 }
 0x4de   : > { %v1148_v48 = vmul.f32 %v1147_v47, %v1147_v47 }
 0x4e0   : > { %v1151_v49 = vadd.f32 1.0, %v1148_v48  ;;  %v1149_v50 = vsub.f32 1.0, %v1148_v48 }
 0x4e2   : > { %2491 = vrcp.f32 %v1151_v49  ;;  %v1150_v53 = vmul.f32 %v1149_v50, %v1138_v37 }
 0x4ec   : > { %v2492_v54 = vpop.eup %2491 }
 0x4ed   : > { %v1153_v56 = vmul.f32 %v2492_v54, %v1150_v53 }
 0x4ef   : > { %v1158_v58 = vadd.f32 %v1157_v55, %v1153_v56 }
 0x4f1   : > { %v1160_v60 = vrot.slane %v1158_v58, 7 }
 0x4f3   : > { %v1162_v61 = vsel %vm599_vm1, 0.0, %v1160_v60  ;;  %v1163_v63 = vsel %vm599_vm1, %v1160_v60, 0.0 }
 0x4f4   : > { %v1166_v0 = vrot.slane %v1162_v61, 1  ;;  %v1167_v2 = vrot.slane %v1163_v63, 1  ;;  %v1170_v4 = vrot.slane %v1162_v61, 2  ;;  %v1171_v7 = vrot.slane %v1163_v63, 2 }
 0x4f6   : > { %v1168_v8 = vsel %vm604_vm2, %v1166_v0, %v1167_v2  ;;  %v1172_v10 = vsel %vm609_vm6, %v1170_v4, %v1171_v7 }
 0x4f7   : > { %1293 = vmatprep.mubr.f32.mxu1 %v1168_v8  ;;  %2163 = vmatmul.mubr.f32.vlgmr.msra.gmra.mrb[6].mxu0 %v1172_v10 }
 0x4f8   : > { %1794 = vmatmul.mubr.msk.f32.vlgmr.msra.gmra.mrb[8].mxu1 %vm2758_vm4, %v1160_v60  ;;  %2446 = vmatpush3.bf16.msra.mxu0 %v2840_v57 }
 0x4f9   : > { %2422 = vmatpush3.bf16.msra.mxu1 %v2840_v57  ;;  %2197 = vmatprep.mubr.msk.f32.mxu1 %vm2510_vm0, %v2511_v6 }
 0x4fa   : > { %2423 = vmatprep.subr.bf16.mxu1 %v2509_v3  ;;  %2447 = vmatprep.subr.bf16.mxu0 %v2509_v3 }
 0x4fb   : > { %2237 = vmatprep.mubr.msk.f32.mxu0 %vm2510_vm0, %v2511_v6 }
 0x4fc   : > { %2449 = vmatpush3.bf16.msra.mxu0 %v2846_v59 }
 0x4fd   : > { %2425 = vmatpush3.bf16.msra.mxu1 %v2846_v59  ;;  %2450 = vmatprep.subr.bf16.mxu0 %v2509_v3 }
 0x4fe   : > { %2426 = vmatprep.subr.bf16.mxu1 %v2509_v3 }
 0x500   : > { %2452 = vmatpush3.bf16.msra.mxu0 %v2858_v62 }
 0x501   : > { %2428 = vmatpush3.bf16.msra.mxu1 %v2858_v62  ;;  %2453 = vmatprep.subr.bf16.mxu0 %v2509_v3  ;;  %v1792_v62 = vld [vmem:[%s3202_s11] ss:$0 sm:$0xff] }
 0x502   : > { %2429 = vmatprep.subr.bf16.mxu1 %v2509_v3 }
 0x504   : > { %2455 = vmatpush3.bf16.msra.mxu0 %v2870_v1 }
 0x505   : > { %2431 = vmatpush3.bf16.msra.mxu1 %v2870_v1  ;;  %2456 = vmatprep.subr.bf16.mxu0 %v2509_v3 }
 0x506   : > { %2432 = vmatprep.subr.bf16.mxu1 %v2509_v3 }
 0x508   : > { %2458 = vmatpush3.bf16.msra.mxu0 %v2885_v5 }
 0x509   : > { %2434 = vmatpush3.bf16.msra.mxu1 %v2885_v5  ;;  %2459 = vmatprep.subr.bf16.mxu0 %v2509_v3 }
 0x50a   : > { %2435 = vmatprep.subr.bf16.mxu1 %v2509_v3 }
 0x50c   : > { %2461 = vmatpush3.bf16.msra.mxu0 %v2897_v9 }
 0x50d   : > { %2437 = vmatpush3.bf16.msra.mxu1 %v2897_v9  ;;  %2462 = vmatprep.subr.bf16.mxu0 %v2509_v3 }
 0x50e   : > { %2438 = vmatprep.subr.bf16.mxu1 %v2509_v3 }
 0x510   : > { %2464 = vmatpush3.bf16.msra.mxu0 %v2909_v12 }
 0x511   : > { %2440 = vmatpush3.bf16.msra.mxu1 %v2909_v12  ;;  %2465 = vmatprep.subr.bf16.mxu0 %v2509_v3 }
 0x512   : > { %2441 = vmatprep.subr.bf16.mxu1 %v2509_v3 }
 0x514   : > { %2467 = vmatpush3.bf16.msra.mxu0 %v2921_v15 }
 0x515   : > { %2443 = vmatpush3.bf16.msra.mxu1 %v2921_v15 }
 0x516   : > { %2200 = vmatprep.subr.mxu1 %v2511_v6 }
 0x5ca   : > { %v1365_v17 = vpop.f32.mrb[6].mxu0 }
 0x5cb   : > { %v1934_v57 = vpop.f32.mrb[8].mxu1  ;;  %v2164_v59 = vpop.f32.mrb[7].mxu0 }
 0x5cc   : > { %v1935_v1 = vpop.f32.mrb[9].mxu1 }
 0x5cd   : > { %v1936_v5 = vadd.f32 %v1935_v1, %v1934_v57 }
 0x5cf   : > { %v1296_v9 = vadd.f32 %v1936_v5, %v1792_v62 }
 0x5d1   : > { %v1366_v12 = vadd.f32 %v1365_v17, %v1296_v9 }
 0x5d3   : > { %v1369_v20 = vrot.slane %v1366_v12, 4 }
 0x5d5   : > { %v1370_v11 = vadd.f32 %v1369_v20, %v1366_v12 }
 0x5d7   : > { %v1371_v3 = vrot.slane %v1370_v11, 2 }
 0x5d9   : > { %v1372_v13 = vadd.f32 %v1371_v3, %v1370_v11 }
 0x5db   : > { %v1373_v14 = vrot.slane %v1372_v13, 1 }
 0x5dd   : > { %v1374_v16 = vadd.f32 %v1373_v14, %v1372_v13 }
 0x5df   : > { %2198 = vmatmul.mubr.f32.vlgmr.msra.gmra.mrb[10].mxu1 %v1374_v16 }
 0x5e0   : > { %2201 = vmatpush3.msra.mxu1 %v2935_v33  ;;  %2202 = vmatprep.mubr.msk.f32.mxu1 %vm2510_vm0, %v2511_v6 }
 0x5e1   : > { %2240 = vmatprep.subr.mxu1 %v2511_v6 }
 0x6b2   : > { %v1441_v15 = vpop.f32.mrb[10].mxu1 }
 0x6b3   : > { %v1445_v18 = vmul.f32 0.0078125, %v1441_v15  ;;  %v2199_v19 = vpop.f32.mrb[11].mxu1 }
 0x6b5   : > { %2203 = vmatmul.mubr.msk.f32.vlgmr.msra.gmra.mrb[12].mxu1 %vm886_vm7, %v1445_v18 }
 0x6b6   : > { %2241 = vmatpush3.msra.mxu1 %v2935_v33  ;;  %2242 = vmatprep.mubr.msk.f32.mxu1 %vm2510_vm0, %v2511_v6 }
 0x788   : > { %v1515_v22 = vpop.f32.mrb[12].mxu1 }
 0x789   : > { %v1522_v23 = vrot.slane %v1515_v22, %v2945_v39  ;;  %v2204_v24 = vpop.f32.mrb[13].mxu1 }
 0x78b   : > { %v1523_v25 = vsub.f32 %v1366_v12, %v1522_v23 }
 0x78d   : > { %v1524_v26 = vmul.f32 %v1523_v25, %v1523_v25 }
 0x78f   : > { %v1525_v27 = vrot.slane %v1524_v26, 4 }
 0x791   : > { %v1526_v28 = vadd.f32 %v1525_v27, %v1524_v26 }
 0x793   : > { %v1527_v29 = vrot.slane %v1526_v28, 2 }
 0x795   : > { %v1528_v30 = vadd.f32 %v1527_v29, %v1526_v28 }
 0x797   : > { %v1529_v21 = vrot.slane %v1528_v30, 1 }
 0x799   : > { %v1530_v31 = vadd.f32 %v1529_v21, %v1528_v30 }
 0x79b   : > { %2238 = vmatmul.mubr.f32.vlgmr.msra.gmra.mrb[8].mxu0 %v1530_v31 }
 0x86e   : > { %v1597_v32 = vpop.f32.mrb[8].mxu0 }
 0x86f   : > { %v1601_v34 = vmul.f32 0.0078125, %v1597_v32  ;;  %v2239_v35 = vpop.f32.mrb[9].mxu0 }
 0x871   : > { %v1602_v33 = vadd.f32 1e-05, %v1601_v34 }
 0x873   : > { %2493 = vrsqrt.f32 %v1602_v33 }
 0x87d   : > { %v2494_v36 = vpop.eup %2493 }
 0x87e   : > { %2243 = vmatmul.mubr.msk.f32.vlgmr.msra.gmra.mrb[14].mxu1 %vm886_vm7, %v2494_v36 }
 0x951   : > { %v1673_v6 = vpop.f32.mrb[14].mxu1 }
 0x952   : > { %v1680_v37 = vrot.slane %v1673_v6, %v2945_v39  ;;  %v2244_v38 = vpop.f32.mrb[15].mxu1 }
 0x954   : > { %v1681_v41 = vmul.f32 %v1680_v37, %v1523_v25 }
 0x956   : > { %v1689_v44 = vmul.f32 %v1797_v40, %v1681_v41 }
 0x958   : > { %v1697_v45 = vadd.f32 %v1798_v42, %v1689_v44 }
 0x95a   : > { %v1698_v46 = vand.u32 2147483647, %v1697_v45  ;;  %vm1702_vm9 = vcmp.ge.f32.partialorder %v1697_v45, 0.0 }
 0x95c   : > { %v1699_v47 = vsub.f32 0.0, %v1698_v46 }
 0x95e   : > { %v1700_v48 = vmul.f32 1.442695, %v1699_v47 }
 0x960   : > { %2495 = vpow2.f32 %v1700_v48 }
 0x96a   : > { %v2496_v49 = vpop.eup %2495 }
 0x96b   : > { %v1704_v43 = vadd.f32 1.0, %v2496_v49  ;;  %v1703_v50 = vsel %vm1702_vm9, %v2496_v49, 1.0 }
 0x96d   : > { %2497 = vrcp.f32 %v1704_v43 }
 0x977   : > { %v2498_v39 = vpop.eup %2497 }
 0x978   : > { %v1706_v51 = vmul.f32 %v2498_v39, %v1703_v50 }
 0x97a   : > { %v1707_v53 = vmul.f32 %v1706_v51, %v1706_v51 }
 0x97c   : > { %v1710_v54 = vadd.f32 1.0, %v1707_v53  ;;  %v1708_v55 = vsub.f32 1.0, %v1707_v53 }
 0x97e   : > { %2499 = vrcp.f32 %v1710_v54  ;;  %v1709_v56 = vmul.f32 %v1708_v55, %v1697_v45 }
 0x988   : > { %v2500_v58 = vpop.eup %2499 }
 0x989   : > { %v1712_v60 = vmul.f32 %v2500_v58, %v1709_v56 }
 0x98b   : > { %v1713_v61 = vadd.f32 %v1712_v60, %v2713_v52 }
 0x98d   : > { %1714 = vst [vmem:[%s476_s20] sm:$0xff] %v1713_v61 }
 0x98e PF: > { %s24_s29 = sadd.s32 1, %s2507_s29  }
 0x98f   : > { %p21_p4 = scmp.ge.s32.totalorder %s24_s29, 4  }
 0x991   :  { %23 = sbr.rel (!%p21_p4) target bundleno = 1 (0x1), region = 109 }

// kernel: forward.20
= control target key start
LH: loop header
LB: loop body
LE: loop exit
PB: predicated region body
PF: predicated region fallthrough
CT: control target
= control target key end

     0   :  { %s869_s15 = smov 0   ;;  %s1024_s0 = inlined_call_operand.vmem [shape: f32[2,8,64], index: 0, kind: input, shape index: {}]   ;;  %s1025_s1 = inlined_call_operand.vmem [shape: f32[128,64], index: 1, kind: input, shape index: {}]   ;;  %s1026_s2 = inlined_call_operand.vmem [shape: f32[128,64], index: 2, kind: input, shape index: {}]   ;;  %s1027_s3 = inlined_call_operand.vmem [shape: f32[1,64], index: 3, kind: input, shape index: {}]   ;;  %s1028_s4 = inlined_call_operand.vmem [shape: f32[2,16,64], index: 4, kind: output, shape index: {}]  }
   0x1 LB: > { %s652_s16 = sadd.s32 4294967295, %s836_s15   ;;  %p656_p0 = scmp.ge.s32.totalorder %s836_s15, 1  ;;  %s836_s15 = sphi %s869_s15, %s14_s15  }
   0x2   : > { %p161_p1 = scmp.lt.s32.totalorder %s836_s15, 3 }
   0x4   : > { %p162_p2 = pnand %p656_p0, %p161_p1 }
   0x5   : > { %p186_p3 = scmp.lt.s32.totalorder (!%p162_p2), %s652_s16, 1  ;;  %v309_v0 = vld [vmem:[%s1026_s2] sm:$0xff] (!%p162_p2)  ;;  %v838_v1 = vmov (!%p162_p2), 0.0|0.0   ;;  %v310_v2 = vld [vmem:[%s1026_s2 + $0x8] sm:$0xff] (!%p162_p2)  ;;  %v311_v7 = vld [vmem:[%s1026_s2 + $0x10] sm:$0xff] (!%p162_p2)  ;;  %vm839_vm0 = vmmov (!%p162_p2), 0   ;;  %v400_v61 = vlaneseq (!%p162_p2) }
   0x6   : > { %165 = sbr.rel (%p162_p2) target bundleno = 373 (0x175), region = 36  ;;  %792 = vmatprep.subr.bf16.mxu1 (!%p162_p2), %v838_v1  ;;  %768 = vmatprep.subr.bf16.mxu0 (!%p162_p2), %v838_v1  ;;  %v212_v3 = vld [vmem:[%s1025_s1] sm:$0xff] (!%p162_p2)  ;;  %v213_v4 = vld [vmem:[%s1025_s1 + $0x8] sm:$0xff] (!%p162_p2)  ;;  %v793_v5 = vpack.c.bf16 (!%p162_p2), %v310_v2, %v309_v0  ;;  %v312_v8 = vld [vmem:[%s1026_s2 + $0x18] sm:$0xff] (!%p162_p2)  ;;  %v840_v10 = vmov (!%p162_p2), 0.0   ;;  %vm203_vm1 = vcmask (!%p162_p2), 1046528  }
   0x7   : > { %v769_v6 = vpack.c.bf16 (!%p162_p2), %v213_v4, %v212_v3  ;;  %v214_v9 = vld [vmem:[%s1025_s1 + $0x10] sm:$0xff] (!%p162_p2)  ;;  %765 = vmatprep.mubr.msk.f32.mxu1 (!%p162_p2), %vm839_vm0, %v840_v10  ;;  %730 = vmatprep.mubr.msk.f32.mxu0 (!%p162_p2), %vm839_vm0, %v840_v10  ;;  %v215_v11 = vld [vmem:[%s1025_s1 + $0x18] sm:$0xff] (!%p162_p2)  ;;  %v796_v12 = vpack.c.bf16 (!%p162_p2), %v312_v8, %v311_v7  ;;  %v313_v14 = vld [vmem:[%s1026_s2 + $0x20] sm:$0xff] (!%p162_p2)  ;;  %vm199_vm2 = vcmask (!%p162_p2), 1040384   ;;  %s841_s29 = smov (!%p162_p2), 64   ;;  %vm210_vm3 = vcmask (!%p162_p2), 523264  }
   0x8   : > { %794 = vmatpush3.bf16.msra.mxu1 (!%p162_p2), %v793_v5  ;;  %v772_v13 = vpack.c.bf16 (!%p162_p2), %v215_v11, %v214_v9  ;;  %v314_v15 = vld [vmem:[%s1026_s2 + $0x28] sm:$0xff] (!%p162_p2)  ;;  %v216_v16 = vld [vmem:[%s1025_s1 + $0x20] sm:$0xff] (!%p162_p2)  ;;  %v315_v23 = vld [vmem:[%s1026_s2 + $0x30] sm:$0xff] (!%p162_p2)  ;;  %v842_v59 = vmov (!%p162_p2), 1966171168   ;;  %v401_v63 = vshrl.u32 (!%p162_p2), %v400_v61, 7 }
   0x9   : > { %770 = vmatpush3.bf16.msra.mxu0 (!%p162_p2), %v769_v6  ;;  %795 = vmatprep.subr.bf16.mxu1 (!%p162_p2), %v838_v1  ;;  %v217_v17 = vld [vmem:[%s1025_s1 + $0x28] sm:$0xff] (!%p162_p2)  ;;  %v799_v21 = vpack.c.bf16 (!%p162_p2), %v314_v15, %v313_v14  ;;  %v316_v25 = vld [vmem:[%s1026_s2 + $0x38] sm:$0xff] (!%p162_p2)  ;;  %v218_v26 = vld [vmem:[%s1025_s1 + $0x30] sm:$0xff] (!%p162_p2)  ;;  %v398_v60 = vunpack.c.l.s4 (!%p162_p2), %v842_v59  ;;  %v843_v5 = vmov (!%p162_p2), 1983009808  }
   0xa   : > { %771 = vmatprep.subr.bf16.mxu0 (!%p162_p2), %v838_v1  ;;  %v775_v22 = vpack.c.bf16 (!%p162_p2), %v217_v17, %v216_v16  ;;  %v219_v27 = vld [vmem:[%s1025_s1 + $0x38] sm:$0xff] (!%p162_p2)  ;;  %v802_v29 = vpack.c.bf16 (!%p162_p2), %v316_v25, %v315_v23  ;;  %v317_v31 = vld [vmem:[%s1026_s2 + $0x40] sm:$0xff] (!%p162_p2)  ;;  %v318_v32 = vld [vmem:[%s1026_s2 + $0x48] sm:$0xff] (!%p162_p2)  ;;  %v562_v6 = vunpack.c.l.s4 (!%p162_p2), %v843_v5  ;;  %v505_v15 = vsub.s32 (!%p162_p2), 0, %v401_v63 }
   0xb   : > { %v778_v30 = vpack.c.bf16 (!%p162_p2), %v219_v27, %v218_v26  ;;  %v220_v33 = vld [vmem:[%s1025_s1 + $0x40] sm:$0xff] (!%p162_p2)  ;;  %v221_v34 = vld [vmem:[%s1025_s1 + $0x48] sm:$0xff] (!%p162_p2)  ;;  %v805_v35 = vpack.c.bf16 (!%p162_p2), %v318_v32, %v317_v31  ;;  %v319_v37 = vld [vmem:[%s1026_s2 + $0x50] sm:$0xff] (!%p162_p2)  ;;  %v399_v62 = vunpack.c.0.s8 (!%p162_p2), %v398_v60 }
   0xc   : > { %797 = vmatpush3.bf16.msra.mxu1 (!%p162_p2), %v796_v12  ;;  %v781_v36 = vpack.c.bf16 (!%p162_p2), %v221_v34, %v220_v33  ;;  %v320_v38 = vld [vmem:[%s1026_s2 + $0x58] sm:$0xff] (!%p162_p2)  ;;  %v222_v39 = vld [vmem:[%s1025_s1 + $0x50] sm:$0xff] (!%p162_p2)  ;;  %v321_v43 = vld [vmem:[%s1026_s2 + $0x60] sm:$0xff] (!%p162_p2)  ;;  %v563_v16 = vunpack.c.0.s8 (!%p162_p2), %v562_v6 }
   0xd   : > { %s1030_s16 = smov (!%p186_p3, %s652_s16), 1  ;;  %773 = vmatpush3.bf16.msra.mxu0 %v772_v13  ;;  %798 = vmatprep.subr.bf16.mxu1 %v838_v1  ;;  %v223_v40 = vld [vmem:[%s1025_s1 + $0x58] sm:$0xff]  ;;  %v808_v41 = vpack.c.bf16 %v320_v38, %v319_v37  ;;  %v322_v44 = vld [vmem:[%s1026_s2 + $0x68] sm:$0xff]  ;;  %v224_v45 = vld [vmem:[%s1025_s1 + $0x60] sm:$0xff] }
   0xe   : > { %s657_s7 = sshll.u32 %s1030_s16, 3  ;;  %774 = vmatprep.subr.bf16.mxu0 %v838_v1  ;;  %v784_v42 = vpack.c.bf16 %v223_v40, %v222_v39  ;;  %v225_v46 = vld [vmem:[%s1025_s1 + $0x68] sm:$0xff]  ;;  %v811_v47 = vpack.c.bf16 %v322_v44, %v321_v43  ;;  %v323_v49 = vld [vmem:[%s1026_s2 + $0x70] sm:$0xff]  ;;  %v324_v50 = vld [vmem:[%s1026_s2 + $0x78] sm:$0xff]  ;;  %s663_s14 = sshll.u32 %s1030_s16, 4 }
   0xf   : > { %s189_s12 = scalar_lea.vmem %s1024_s0, %s657_s7  ;;  %v787_v48 = vpack.c.bf16 %v225_v46, %v224_v45  ;;  %v226_v51 = vld [vmem:[%s1025_s1 + $0x70] sm:$0xff]  ;;  %v227_v52 = vld [vmem:[%s1025_s1 + $0x78] sm:$0xff]  ;;  %v814_v53 = vpack.c.bf16 %v324_v50, %v323_v49  ;;  %v660_v0 = vld [vmem:[%s1027_s3] ss:$0 sm:$0xff]  ;;  %s194_s19 = scalar_lea.vmem %s1028_s4, %s663_s14 }
  0x10   : > { %v923_v18 = vld [vmem:[%s189_s12] sm:$0xff]  ;;  %800 = vmatpush3.bf16.msra.mxu1 %v799_v21  ;;  %v790_v54 = vpack.c.bf16 %v227_v52, %v226_v51 }
  0x11   : > { %v201_v19 = vrot.slane %v923_v18, 1  ;;  %v197_v20 = vrot.slane %v923_v18, 7  ;;  %776 = vmatpush3.bf16.msra.mxu0 %v775_v22  ;;  %801 = vmatprep.subr.bf16.mxu1 %v838_v1 }
  0x12   : > { %777 = vmatprep.subr.bf16.mxu0 %v838_v1 }
  0x13   : > { %v204_v24 = vsel %vm203_vm1, %v201_v19, 0.0  ;;  %v200_v28 = vsel %vm199_vm2, 0.0, %v197_v20 }
  0x14   : > { %305 = vrot.lane.b32.xlu0 %v204_v24, %s841_s29  ;;  %803 = vmatpush3.bf16.msra.mxu1 %v802_v29 }
  0x15   : > { %779 = vmatpush3.bf16.msra.mxu0 %v778_v30  ;;  %804 = vmatprep.subr.bf16.mxu1 %v838_v1 }
  0x16   : > { %780 = vmatprep.subr.bf16.mxu0 %v838_v1 }
  0x18   : > { %207 = vrot.lane.b32.xlu0 %v200_v28, %s841_s29  ;;  %806 = vmatpush3.bf16.msra.mxu1 %v805_v35  ;;  %v566_v28 = vsub.s32 %v563_v16, %v401_v63 }
  0x19   : > { %782 = vmatpush3.bf16.msra.mxu0 %v781_v36  ;;  %807 = vmatprep.subr.bf16.mxu1 %v838_v1 }
  0x1a   : > { %783 = vmatprep.subr.bf16.mxu0 %v838_v1 }
  0x1c   : > { %809 = vmatpush3.bf16.msra.mxu1 %v808_v41 }
  0x1d   : > { %785 = vmatpush3.bf16.msra.mxu0 %v784_v42  ;;  %810 = vmatprep.subr.bf16.mxu1 %v838_v1 }
  0x1e   : > { %786 = vmatprep.subr.bf16.mxu0 %v838_v1 }
  0x20   : > { %812 = vmatpush3.bf16.msra.mxu1 %v811_v47 }
  0x21   : > { %788 = vmatpush3.bf16.msra.mxu0 %v787_v48  ;;  %813 = vmatprep.subr.bf16.mxu1 %v838_v1 }
  0x22   : > { %789 = vmatprep.subr.bf16.mxu0 %v838_v1  ;;  %v402_v1 = vsub.s32 %v399_v62, %v401_v63 }
  0x24   : > { %815 = vmatpush3.bf16.msra.mxu1 %v814_v53 }
  0x25   : > { %791 = vmatpush3.bf16.msra.mxu0 %v790_v54 }
  0x86   : > { %v306_v55 = vpop.permute.xlu0 %305 }
  0x87   : > { %v308_v56 = vsel %vm210_vm3, %v923_v18, %v306_v55 }
  0x88   : > { %766 = vmatmul.mubr.f32.vlgmr.msra.gmra.mrb[0].mxu1 %v308_v56 }
  0x8a   : > { %v208_v57 = vpop.permute.xlu0 %207 }
  0x8b   : > { %v211_v58 = vsel %vm210_vm3, %v923_v18, %v208_v57 }
  0x8c   : > { %731 = vmatmul.mubr.f32.vlgmr.msra.gmra.mrb[0].mxu0 %v211_v58 }
 0x15b   : > { %v391_v2 = vpop.f32.mrb[0].mxu1 }
 0x15c   : > { %v392_v3 = vadd.f32 %v660_v0, %v391_v2  ;;  %v767_v4 = vpop.f32.mrb[1].mxu1 }
 0x15e   : > { %v454_v7 = vcombine.high %v392_v3, %v392_v3  ;;  %v461_v8 = vrot.slane %v392_v3, %v402_v1 }
 0x15f   : > { %v300_v9 = vpop.f32.mrb[0].mxu0 }
 0x160   : > { %v468_v10 = vrot.slane %v454_v7, %v402_v1  ;;  %v469_v11 = vcombine.high %v461_v8, %v461_v8  ;;  %v477_v12 = vrot.slane %v461_v8, %v402_v1  ;;  %v301_v13 = vadd.f32 %v660_v0, %v300_v9  ;;  %v732_v14 = vpop.f32.mrb[1].mxu0 }
 0x162   : > { %v470_v17 = vcombine.high %v468_v10, %v468_v10  ;;  %v484_v18 = vrot.slane %v468_v10, %v402_v1  ;;  %v491_v19 = vrot.slane %v469_v11, %v402_v1  ;;  %v499_v20 = vcombine.high %v477_v12, %v477_v12 }
 0x163   : > { %v396_v21 = vcombine.high %v301_v13, %v301_v13  ;;  %v403_v22 = vrot.slane %v301_v13, %v402_v1  ;;  %v506_v30 = vrot.slane %v477_v12, %v505_v15 }
 0x164   : > { %v498_v23 = vrot.slane %v470_v17, %v402_v1  ;;  %v500_v24 = vcombine.high %v484_v18, %v484_v18  ;;  %v501_v25 = vcombine.high %v491_v19, %v491_v19  ;;  %v510_v31 = vrot.slane %v491_v19, %v505_v15 }
 0x165   : > { %v410_v26 = vrot.slane %v396_v21, %v402_v1  ;;  %v411_v27 = vcombine.high %v403_v22, %v403_v22  ;;  %v514_v32 = vrot.slane %v499_v20, %v505_v15  ;;  %v419_v34 = vrot.slane %v403_v22, %v402_v1 }
 0x166   : > { %v502_v29 = vcombine.high %v498_v23, %v498_v23  ;;  %v518_v37 = vrot.slane %v501_v25, %v505_v15  ;;  %v522_v38 = vrot.slane %v484_v18, %v505_v15  ;;  %v526_v39 = vrot.slane %v498_v23, %v505_v15 }
 0x167   : > { %v412_v33 = vcombine.high %v410_v26, %v410_v26  ;;  %v426_v35 = vrot.slane %v410_v26, %v402_v1  ;;  %v433_v36 = vrot.slane %v411_v27, %v402_v1  ;;  %v530_v40 = vrot.slane %v500_v24, %v505_v15 }
 0x168   : > { %v441_v42 = vcombine.high %v419_v34, %v419_v34  ;;  %v534_v45 = vrot.slane %v502_v29, %v505_v15  ;;  %v543_v46 = vsel %vm199_vm2, %v419_v34, %v506_v30 }
 0x169   : > { %v440_v41 = vrot.slane %v412_v33, %v402_v1  ;;  %v442_v43 = vcombine.high %v426_v35, %v426_v35  ;;  %v443_v44 = vcombine.high %v433_v36, %v433_v36  ;;  %v544_v47 = vsel %vm199_vm2, %v433_v36, %v510_v31 }
 0x16a   : > { %v547_v48 = vsel %vm199_vm2, %v426_v35, %v522_v38  ;;  %v545_v50 = vsel %vm199_vm2, %v441_v42, %v514_v32  ;;  %v559_v54 = vcombine.low %v543_v46, %v544_v47 }
 0x16b   : > { %v444_v49 = vcombine.high %v440_v41, %v440_v41  ;;  %v546_v51 = vsel %vm199_vm2, %v443_v44, %v518_v37  ;;  %v548_v52 = vsel %vm199_vm2, %v440_v41, %v526_v39  ;;  %v549_v53 = vsel %vm199_vm2, %v442_v43, %v530_v40 }
 0x16c   : > { %v560_v55 = vcombine.low %v545_v50, %v546_v51  ;;  %v576_v56 = vcombine.low %v547_v48, %v548_v52  ;;  %v567_v58 = vrot.slane %v559_v54, %v566_v28 }
 0x16d   : > { %v550_v57 = vsel %vm199_vm2, %v444_v49, %v534_v45 }
 0x16e   : > { %v574_v59 = vrot.slane %v560_v55, %v566_v28  ;;  %v577_v60 = vcombine.low %v549_v53, %v550_v57  ;;  %v584_v62 = vrot.slane %v576_v56, %v566_v28 }
 0x170   : > { %v575_v61 = vcombine.low %v567_v58, %v574_v59  ;;  %v591_v63 = vrot.slane %v577_v60, %v566_v28 }
 0x172   : > { %v592_v0 = vcombine.low %v584_v62, %v591_v63  ;;  %595 = vst.msk [vmem:[%s194_s19] sm:$0xff] %vm210_vm3, %v575_v61 }
 0x174   : > { %596 = vst.msk [vmem:[%s194_s19 + $0x8] sm:$0xff] %vm210_vm3, %v592_v0 }
 0x175 PF: > { %s14_s15 = sadd.s32 1, %s836_s15  }
 0x176   : > { %p11_p4 = scmp.ge.s32.totalorder %s14_s15, 4  }
 0x178   :  { %13 = sbr.rel (!%p11_p4) target bundleno = 1 (0x1), region = 66 }

// kernel: forward.19
= control target key start
LH: loop header
LB: loop body
LE: loop exit
PB: predicated region body
PF: predicated region fallthrough
CT: control target
= control target key end

     0   :  { %s2062_s29 = smov 0   ;;  %s2465_s0 = inlined_call_operand.vmem [shape: f32[2,8,64], index: 0, kind: input, shape index: {}]   ;;  %s2466_s1 = inlined_call_operand.vmem [shape: f32[2,1,80], index: 1, kind: input, shape index: {}]   ;;  %s2467_s2 = inlined_call_operand.vmem [shape: f32[64,8], index: 2, kind: input, shape index: {}]   ;;  %s2468_s3 = inlined_call_operand.vmem [shape: f32[8,64], index: 3, kind: input, shape index: {}]   ;;  %s2469_s4 = inlined_call_operand.vmem [shape: f32[192,64], index: 4, kind: input, shape index: {}]   ;;  %s2470_s5 = inlined_call_operand.vmem [shape: f32[1,64], index: 5, kind: input, shape index: {}]   ;;  %s2471_s6 = inlined_call_operand.vmem [shape: f32[1,64], index: 6, kind: input, shape index: {}]   ;;  %s2472_s7 = inlined_call_operand.vmem [shape: f32[1,64], index: 7, kind: input, shape index: {}]   ;;  %s2473_s8 = inlined_call_operand.vmem [shape: f32[80,64], index: 8, kind: input, shape index: {}]   ;;  %s2474_s9 = inlined_call_operand.vmem [shape: f32[1,64], index: 9, kind: input, shape index: {}]   ;;  %s2475_s10 = inlined_call_operand.vmem [shape: f32[192,64], index: 10, kind: input, shape index: {}]   ;;  %s2476_s11 = inlined_call_operand.vmem [shape: f32[1,64], index: 11, kind: input, shape index: {}]   ;;  %s2477_s12 = inlined_call_operand.vmem [shape: f32[1,64], index: 12, kind: input, shape index: {}]   ;;  %s2478_s13 = inlined_call_operand.vmem [shape: f32[1,64], index: 13, kind: input, shape index: {}]   ;;  %s2479_s14 = inlined_call_operand.vmem [shape: f32[2,8,64], index: 14, kind: output, shape index: {}]  }
   0x1 LB: > { %s1606_s30 = sadd.s32 4294967295, %s1981_s29   ;;  %p1610_p0 = scmp.ge.s32.totalorder %s1981_s29, 1  ;;  %s1981_s29 = sphi %s2062_s29, %s24_s29  }
   0x2   : > { %p419_p1 = scmp.lt.s32.totalorder %s1981_s29, 3 }
   0x4   : > { %p420_p2 = pnand %p1610_p0, %p419_p1 }
   0x5   : > { %p466_p3 = scmp.lt.s32.totalorder (!%p420_p2), %s1606_s30, 1  ;;  %v609_v0 = vld [vmem:[%s2469_s4] sm:$0xff] (!%p420_p2)  ;;  %v1983_v1 = vmov (!%p420_p2), 0.0|0.0   ;;  %v610_v2 = vld [vmem:[%s2469_s4 + $0x8] sm:$0xff] (!%p420_p2)  ;;  %v611_v3 = vld [vmem:[%s2469_s4 + $0x10] sm:$0xff] (!%p420_p2)  ;;  %vm1984_vm0 = vmmov (!%p420_p2), 0  }
   0x6   : > { %423 = sbr.rel (%p420_p2) target bundleno = 2602 (0xa2a), region = 76  ;;  %1821 = vmatprep.subr.bf16.mxu1 (!%p420_p2), %v1983_v1  ;;  %v612_v4 = vld [vmem:[%s2469_s4 + $0x18] sm:$0xff] (!%p420_p2)  ;;  %1806 = vmatprep.subr.bf16.mxu0 (!%p420_p2), %v1983_v1  ;;  %v1822_v5 = vpack.c.bf16 (!%p420_p2), %v610_v2, %v609_v0  ;;  %v1985_v6 = vmov (!%p420_p2), 0.0   ;;  %v613_v8 = vld [vmem:[%s2469_s4 + $0x20] sm:$0xff] (!%p420_p2)  ;;  %v614_v9 = vld [vmem:[%s2469_s4 + $0x28] sm:$0xff] (!%p420_p2)  ;;  %vm591_vm1 = vcmask (!%p420_p2), 1040384  }
   0x7   : > { %1707 = vmatprep.mubr.msk.f32.mxu0 (!%p420_p2), %vm1984_vm0, %v1985_v6  ;;  %v1825_v7 = vpack.c.bf16 (!%p420_p2), %v612_v4, %v611_v3  ;;  %vm596_vm2 = vcmask (!%p420_p2), 1046528   ;;  %v1828_v12 = vpack.c.bf16 (!%p420_p2), %v614_v9, %v613_v8  ;;  %v615_v13 = vld [vmem:[%s2469_s4 + $0x30] sm:$0xff] (!%p420_p2)  ;;  %v616_v16 = vld [vmem:[%s2469_s4 + $0x38] sm:$0xff] (!%p420_p2)  ;;  %vm603_vm3 = vcmask (!%p420_p2), 1045504   ;;  %v503_v17 = vld [vmem:[%s2473_s8] sm:$0xff] (!%p420_p2)  ;;  %s1986_s19 = smov (!%p420_p2), 64  }
   0x8   : > { %1823 = vmatpush1.bf16.msra.mxu1 (!%p420_p2), %v1822_v5  ;;  %v504_v18 = vld [vmem:[%s2473_s8 + $0x8] sm:$0xff] (!%p420_p2)  ;;  %vm607_vm4 = vcmask (!%p420_p2), 523264   ;;  %v505_v24 = vld [vmem:[%s2473_s8 + $0x10] sm:$0xff] (!%p420_p2)  ;;  %v506_v25 = vld [vmem:[%s2473_s8 + $0x18] sm:$0xff] (!%p420_p2)  ;;  %v1831_v27 = vpack.c.bf16 (!%p420_p2), %v616_v16, %v615_v13  ;;  %vm514_vm6 = vcmask (!%p420_p2), 654336   ;;  %vm793_vm7 = vcmask (!%p420_p2), 64512  }
   0x9   : > { %1824 = vmatprep.subr.bf16.mxu1 (!%p420_p2), %v1983_v1  ;;  %v1807_v23 = vpack.c.bf16 (!%p420_p2), %v504_v18, %v503_v17  ;;  %v617_v30 = vld [vmem:[%s2469_s4 + $0x40] sm:$0xff] (!%p420_p2)  ;;  %v618_v31 = vld [vmem:[%s2469_s4 + $0x48] sm:$0xff] (!%p420_p2)  ;;  %v1810_v33 = vpack.c.bf16 (!%p420_p2), %v506_v25, %v505_v24  ;;  %v619_v38 = vld [vmem:[%s2469_s4 + $0x50] sm:$0xff] (!%p420_p2) }
   0xa   : > { %v507_v34 = vld [vmem:[%s2473_s8 + $0x20] sm:$0xff] (!%p420_p2)  ;;  %v508_v35 = vld [vmem:[%s2473_s8 + $0x28] sm:$0xff] (!%p420_p2)  ;;  %v1834_v37 = vpack.c.bf16 (!%p420_p2), %v618_v31, %v617_v30  ;;  %v620_v39 = vld [vmem:[%s2469_s4 + $0x58] sm:$0xff] (!%p420_p2) }
   0xb   : > { %1808 = vmatpush3.bf16.msra.mxu0 (!%p420_p2), %v1807_v23  ;;  %v1813_v41 = vpack.c.bf16 (!%p420_p2), %v508_v35, %v507_v34  ;;  %v509_v42 = vld [vmem:[%s2473_s8 + $0x30] sm:$0xff] (!%p420_p2)  ;;  %v510_v43 = vld [vmem:[%s2473_s8 + $0x38] sm:$0xff] (!%p420_p2)  ;;  %v1837_v44 = vpack.c.bf16 (!%p420_p2), %v620_v39, %v619_v38  ;;  %v621_v45 = vld [vmem:[%s2469_s4 + $0x60] sm:$0xff] (!%p420_p2) }
   0xc   : > { %1826 = vmatpush1.bf16.msra.mxu1 (!%p420_p2), %v1825_v7  ;;  %1809 = vmatprep.subr.bf16.mxu0 (!%p420_p2), %v1983_v1  ;;  %v622_v46 = vld [vmem:[%s2469_s4 + $0x68] sm:$0xff] (!%p420_p2)  ;;  %v1816_v47 = vpack.c.bf16 (!%p420_p2), %v510_v43, %v509_v42  ;;  %v511_v48 = vld [vmem:[%s2473_s8 + $0x40] sm:$0xff] (!%p420_p2)  ;;  %v623_v51 = vld [vmem:[%s2469_s4 + $0x70] sm:$0xff] (!%p420_p2) }
   0xd   : > { %s2481_s30 = smov (!%p466_p3, %s1606_s30), 1  ;;  %1827 = vmatprep.subr.bf16.mxu1 %v1983_v1  ;;  %v512_v49 = vld [vmem:[%s2473_s8 + $0x48] sm:$0xff]  ;;  %v1840_v50 = vpack.c.bf16 %v622_v46, %v621_v45  ;;  %v624_v52 = vld [vmem:[%s2469_s4 + $0x78] sm:$0xff]  ;;  %v625_v56 = vld [vmem:[%s2469_s4 + $0x80] sm:$0xff] }
   0xe   : > { %s1611_s23 = sshll.u32 %s2481_s30, 3  ;;  %s472_s28 = scalar_lea.vmem %s2466_s1, %s2481_s30  ;;  %v1819_v53 = vpack.c.bf16 %v512_v49, %v511_v48  ;;  %v1843_v54 = vpack.c.bf16 %v624_v52, %v623_v51  ;;  %v626_v57 = vld [vmem:[%s2469_s4 + $0x88] sm:$0xff]  ;;  %v627_v60 = vld [vmem:[%s2469_s4 + $0x90] sm:$0xff]  ;;  %v628_v61 = vld [vmem:[%s2469_s4 + $0x98] sm:$0xff]  ;;  %v867_v48 = vlaneseq }
   0xf   : > { %s469_s26 = scalar_lea.vmem %s2465_s0, %s1611_s23  ;;  %v2135_v29 = vld [vmem:[%s472_s28] sm:$0x1]  ;;  %1811 = vmatpush3.bf16.msra.mxu0 %v1810_v33  ;;  %v1846_v59 = vpack.c.bf16 %v626_v57, %v625_v56  ;;  %v1849_v62 = vpack.c.bf16 %v628_v61, %v627_v60  ;;  %v630_v0 = vld [vmem:[%s2469_s4 + $0xa8] sm:$0xff]  ;;  %v631_v4 = vld [vmem:[%s2469_s4 + $0xb0] sm:$0xff] }
  0x10   : > { %v2101_v10 = vld [vmem:[%s469_s26] sm:$0xff]  ;;  %1829 = vmatpush1.bf16.msra.mxu1 %v1828_v12  ;;  %v488_v32 = vand.u32 2147483647, %v2135_v29  ;;  %1812 = vmatprep.subr.bf16.mxu0 %v1983_v1  ;;  %vm492_vm5 = vcmp.ge.f32.partialorder %v2135_v29, 0.0  ;;  %v632_v5 = vld [vmem:[%s2469_s4 + $0xb8] sm:$0xff]  ;;  %v868_v49 = vshrl.u32 %v867_v48, 7  ;;  %s476_s26 = scalar_lea.vmem %s2479_s14, %s1611_s23 }
  0x11   : > { %v589_v11 = vrot.slane %v2101_v10, 7  ;;  %1830 = vmatprep.subr.bf16.mxu1 %v1983_v1  ;;  %v629_v63 = vld [vmem:[%s2469_s4 + $0xa0] sm:$0xff]  ;;  %v1855_v9 = vpack.c.bf16 %v632_v5, %v631_v4  ;;  %v481_v23 = vld [vmem:[%s2467_s2 + $0x18] sm:$0xff] }
  0x12   : > { %v489_v36 = vsub.f32 0.0, %v488_v32  ;;  %v1852_v2 = vpack.c.bf16 %v630_v0, %v629_v63  ;;  %v482_v25 = vld [vmem:[%s2467_s2 + $0x20] sm:$0xff] }
  0x13   : > { %v2108_v14 = vsel %vm591_vm1, 0.0, %v589_v11  ;;  %v593_v15 = vsel %vm591_vm1, %v589_v11, 0.0  ;;  %1814 = vmatpush3.bf16.msra.mxu0 %v1813_v41  ;;  %v2272_v31 = vld [vmem:[%s2468_s3] sm:$0xff] }
  0x14   : > { %v597_v19 = vrot.slane %v2108_v14, 1  ;;  %v598_v20 = vrot.slane %v593_v15, 1  ;;  %v604_v21 = vrot.slane %v2108_v14, 2  ;;  %v605_v22 = vrot.slane %v593_v15, 2  ;;  %1832 = vmatpush1.bf16.msra.mxu1 %v1831_v27  ;;  %1815 = vmatprep.subr.bf16.mxu0 %v1983_v1  ;;  %v1614_v34 = vld [vmem:[%s2470_s5] ss:$0 sm:$0xff] }
  0x15   : > { %1833 = vmatprep.subr.bf16.mxu1 %v1983_v1  ;;  %v490_v40 = vmul.f32 1.442695, %v489_v36  ;;  %v1087_v5 = vld [vmem:[%s2475_s10] sm:$0xff] }
  0x16   : > { %v599_v26 = vsel %vm596_vm2, %v597_v19, %v598_v20  ;;  %v606_v28 = vsel %vm603_vm3, %v604_v21, %v605_v22  ;;  %v478_v20 = vld [vmem:[%s2467_s2] sm:$0xff]  ;;  %v479_v21 = vld [vmem:[%s2467_s2 + $0x8] sm:$0xff] }
  0x17   : > { %600 = vrot.lane.b32.xlu0 %v599_v26, %s1986_s19  ;;  %1615 = vmatprep.mubr.msk.f32.mxu1 %vm607_vm4, %v606_v28  ;;  %1953 = vpow2.f32 %v490_v40  ;;  %v2235_v22 = vpack.c.bf16 %v479_v21, %v478_v20  ;;  %v483_v26 = vld [vmem:[%s2467_s2 + $0x28] sm:$0xff]  ;;  %v484_v28 = vld [vmem:[%s2467_s2 + $0x30] sm:$0xff]  ;;  %v1095_v20 = vld [vmem:[%s2475_s10 + $0x40] sm:$0xff] }
  0x18   : > { %1835 = vmatpush1.bf16.msra.mxu1 %v1834_v37  ;;  %1817 = vmatpush3.bf16.msra.mxu0 %v1816_v47  ;;  %v2255_v27 = vpack.c.bf16 %v483_v26, %v482_v25  ;;  %v1096_v21 = vld [vmem:[%s2475_s10 + $0x48] sm:$0xff]  ;;  %v1098_v25 = vld [vmem:[%s2475_s10 + $0x58] sm:$0xff] }
  0x19   : > { %1836 = vmatprep.subr.bf16.mxu1 %v1983_v1  ;;  %1818 = vmatprep.subr.bf16.mxu0 %v1983_v1 }
  0x1c   : > { %1838 = vmatpush1.bf16.msra.mxu1 %v1837_v44  ;;  %1820 = vmatpush3.bf16.msra.mxu0 %v1819_v53 }
  0x1d   : > { %1839 = vmatprep.subr.bf16.mxu1 %v1983_v1  ;;  %1857 = vmatprep.subr.bf16.mxu0 %v1983_v1 }
  0x20   : > { %1841 = vmatpush1.bf16.msra.mxu1 %v1840_v50  ;;  %v2298_v50 = vsub.s32 0, %v868_v49 }
  0x21   : > { %v1954_v55 = vpop.eup %1953  ;;  %1842 = vmatprep.subr.bf16.mxu1 %v1983_v1 }
  0x22   : > { %v494_v58 = vadd.f32 1.0, %v1954_v55  ;;  %v493_v3 = vsel %vm492_vm5, %v1954_v55, 1.0 }
  0x24   : > { %1844 = vmatpush1.bf16.msra.mxu1 %v1843_v54  ;;  %1955 = vrcp.f32 %v494_v58 }
  0x25   : > { %1845 = vmatprep.subr.bf16.mxu1 %v1983_v1 }
  0x28   : > { %1847 = vmatpush1.bf16.msra.mxu1 %v1846_v59 }
  0x29   : > { %1848 = vmatprep.subr.bf16.mxu1 %v1983_v1 }
  0x2c   : > { %1850 = vmatpush1.bf16.msra.mxu1 %v1849_v62 }
  0x2d   : > { %1851 = vmatprep.subr.bf16.mxu1 %v1983_v1 }
  0x2e   : > { %v1956_v7 = vpop.eup %1955 }
  0x2f   : > { %v496_v8 = vmul.f32 %v1956_v7, %v493_v3  ;;  %v1088_v7 = vld [vmem:[%s2475_s10 + $0x8] sm:$0xff] }
  0x30   : > { %1853 = vmatpush1.bf16.msra.mxu1 %v1852_v2 }
  0x31   : > { %1854 = vmatprep.subr.bf16.mxu1 %v1983_v1  ;;  %v497_v11 = vmul.f32 %v496_v8, %v496_v8  ;;  %v1089_v8 = vld [vmem:[%s2475_s10 + $0x10] sm:$0xff] }
  0x33   : > { %v500_v12 = vadd.f32 1.0, %v497_v11  ;;  %v498_v13 = vsub.f32 1.0, %v497_v11  ;;  %v1090_v11 = vld [vmem:[%s2475_s10 + $0x18] sm:$0xff] }
  0x34   : > { %1856 = vmatpush1.bf16.msra.mxu1 %v1855_v9  ;;  %v1882_v9 = vpack.c.bf16 %v1088_v7, %v1087_v5 }
  0x35   : > { %1957 = vrcp.f32 %v500_v12  ;;  %1753 = vmatprep.subr.mxu1 %v1985_v6  ;;  %v499_v15 = vmul.f32 %v498_v13, %v2135_v29  ;;  %v485_v29 = vld [vmem:[%s2467_s2 + $0x38] sm:$0xff]  ;;  %v1885_v12 = vpack.c.bf16 %v1090_v11, %v1089_v8  ;;  %v1091_v13 = vld [vmem:[%s2475_s10 + $0x20] sm:$0xff] }
  0x36   : > { %v2265_v30 = vpack.c.bf16 %v485_v29, %v484_v28  ;;  %v1099_v28 = vld [vmem:[%s2475_s10 + $0x60] sm:$0xff]  ;;  %v1100_v29 = vld [vmem:[%s2475_s10 + $0x68] sm:$0xff] }
  0x3f   : > { %v1958_v16 = vpop.eup %1957 }
  0x40   : > { %v502_v17 = vmul.f32 %v1958_v16, %v499_v15  ;;  %v1092_v15 = vld [vmem:[%s2475_s10 + $0x28] sm:$0xff] }
  0x41   : > { %v1888_v16 = vpack.c.bf16 %v1092_v15, %v1091_v13 }
  0x42   : > { %1708 = vmatmul.mubr.msk.f32.vlgmr.msra.gmra.mrb[0].mxu0 %vm514_vm6, %v502_v17  ;;  %v1093_v17 = vld [vmem:[%s2475_s10 + $0x30] sm:$0xff] }
  0x43   : > { %1726 = vmatprep.mubr.msk.f32.mxu0 %vm1984_vm0, %v1985_v6  ;;  %1859 = vmatpush3.bf16.msra.mxu0 %v2235_v22 }
  0x44   : > { %1860 = vmatprep.subr.bf16.mxu0 %v1983_v1 }
  0x89   : > { %v601_v18 = vpop.permute.xlu0 %600 }
  0x8a   : > { %v608_v19 = vsel %vm607_vm4, %v2108_v14, %v601_v18  ;;  %v480_v14 = vld [vmem:[%s2467_s2 + $0x10] sm:$0xff]  ;;  %v1094_v18 = vld [vmem:[%s2475_s10 + $0x38] sm:$0xff] }
  0x8b   : > { %707 = vmatmul.mubr.f32.vlgmr.msra.gmra.mrb[0].mxu1 %v608_v19  ;;  %v2245_v24 = vpack.c.bf16 %v481_v23, %v480_v14  ;;  %v1891_v19 = vpack.c.bf16 %v1094_v18, %v1093_v17  ;;  %v1894_v14 = vpack.c.bf16 %v1096_v21, %v1095_v20  ;;  %v1097_v23 = vld [vmem:[%s2475_s10 + $0x50] sm:$0xff] }
  0x8c   : > { %1755 = vmatprep.mubr.msk.f32.mxu1 %vm1984_vm0, %v1985_v6  ;;  %1754 = vmatpush3.msra.mxu1 %v2272_v31  ;;  %v1897_v26 = vpack.c.bf16 %v1098_v25, %v1097_v23 }
  0x8d   : > { %1862 = vmatpush3.bf16.msra.mxu0 %v2245_v24  ;;  %1881 = vmatprep.subr.bf16.mxu1 %v1983_v1 }
  0x8e   : > { %1863 = vmatprep.subr.bf16.mxu0 %v1983_v1 }
  0x91   : > { %1865 = vmatpush3.bf16.msra.mxu0 %v2255_v27 }
  0x92   : > { %1866 = vmatprep.subr.bf16.mxu0 %v1983_v1 }
  0x95   : > { %1868 = vmatpush3.bf16.msra.mxu0 %v2265_v30 }
  0x96   : > { %1729 = vmatprep.subr.mxu0 %v1985_v6 }
 0x115   : > { %v2276_v32 = vpop.f32.mrb[0].mxu0 }
 0x116   : > { %v1709_v33 = vpop.f32.mrb[1].mxu0 }
 0x117   : > { %v1900_v33 = vpack.c.bf16 %v1100_v29, %v1099_v28  ;;  %v1622_v28 = vld [vmem:[%s2476_s11] ss:$0 sm:$0xff] }
 0x15e   : > { %v708_v35 = vpop.f32.mrb[0].mxu1 }
 0x15f   : > { %v709_v36 = vadd.f32 %v1614_v34, %v708_v35  ;;  %v710_v37 = vpop.f32.mrb[1].mxu1  ;;  %v1101_v34 = vld [vmem:[%s2475_s10 + $0x70] sm:$0xff]  ;;  %v1102_v35 = vld [vmem:[%s2475_s10 + $0x78] sm:$0xff] }
 0x160   : > { %v1103_v37 = vld [vmem:[%s2475_s10 + $0x80] sm:$0xff] }
 0x161   : > { %v712_v38 = vsel %vm607_vm4, %v709_v36, 0.0 }
 0x162   : > { %v713_v39 = vrot.slane %v712_v38, 4 }
 0x164   : > { %v714_v40 = vadd.f32 %v713_v39, %v712_v38  ;;  %v1104_v38 = vld [vmem:[%s2475_s10 + $0x88] sm:$0xff] }
 0x165   : > { %v1906_v39 = vpack.c.bf16 %v1104_v38, %v1103_v37 }
 0x166   : > { %v715_v41 = vrot.slane %v714_v40, 2 }
 0x168   : > { %v716_v42 = vadd.f32 %v715_v41, %v714_v40  ;;  %v1105_v40 = vld [vmem:[%s2475_s10 + $0x90] sm:$0xff]  ;;  %v1106_v41 = vld [vmem:[%s2475_s10 + $0x98] sm:$0xff] }
 0x16a   : > { %v717_v43 = vrot.slane %v716_v42, 1 }
 0x16c   : > { %v718_v44 = vadd.f32 %v717_v43, %v716_v42  ;;  %v1909_v42 = vpack.c.bf16 %v1106_v41, %v1105_v40  ;;  %v1107_v43 = vld [vmem:[%s2475_s10 + $0xa0] sm:$0xff] }
 0x16e   : > { %1727 = vmatmul.mubr.msk.f32.vlgmr.msra.gmra.mrb[2].mxu0 %vm607_vm4, %v718_v44  ;;  %v1108_v44 = vld [vmem:[%s2475_s10 + $0xa8] sm:$0xff] }
 0x16f   : > { %1730 = vmatpush3.msra.mxu0 %v2272_v31  ;;  %1731 = vmatprep.mubr.msk.f32.mxu0 %vm1984_vm0, %v1985_v6 }
 0x170   : > { %1869 = vmatprep.subr.bf16.mxu0 %v1983_v1 }
 0x241   : > { %v788_v45 = vpop.f32.mrb[2].mxu0 }
 0x242   : > { %v792_v46 = vmul.f32 0.015625, %v788_v45  ;;  %v1728_v47 = vpop.f32.mrb[3].mxu0  ;;  %v1912_v45 = vpack.c.bf16 %v1108_v44, %v1107_v43 }
 0x243   : > { %v1110_v47 = vld [vmem:[%s2475_s10 + $0xb8] sm:$0xff] }
 0x244   : > { %1732 = vmatmul.mubr.msk.f32.vlgmr.msra.gmra.mrb[4].mxu0 %vm793_vm7, %v792_v46  ;;  %v1109_v46 = vld [vmem:[%s2475_s10 + $0xb0] sm:$0xff] }
 0x245   : > { %1871 = vmatpush3.bf16.msra.mxu0 %v2235_v22  ;;  %1750 = vmatprep.mubr.msk.f32.mxu0 %vm1984_vm0, %v1985_v6  ;;  %v1915_v48 = vpack.c.bf16 %v1110_v47, %v1109_v46 }
 0x246   : > { %1872 = vmatprep.subr.bf16.mxu0 %v1983_v1 }
 0x249   : > { %1874 = vmatpush3.bf16.msra.mxu0 %v2245_v24 }
 0x24a   : > { %1875 = vmatprep.subr.bf16.mxu0 %v1983_v1 }
 0x24d   : > { %1877 = vmatpush3.bf16.msra.mxu0 %v2255_v27 }
 0x24e   : > { %1878 = vmatprep.subr.bf16.mxu0 %v1983_v1 }
 0x251   : > { %1880 = vmatpush3.bf16.msra.mxu0 %v2265_v30 }
 0x252   : > { %1917 = vmatprep.subr.bf16.mxu0 %v1983_v1 }
 0x317   : > { %v863_v51 = vpop.f32.mrb[4].mxu0 }
 0x318   : > { %v870_v52 = vrot.slane %v863_v51, %v2298_v50  ;;  %v1733_v53 = vpop.f32.mrb[5].mxu0 }
 0x319   : > { %v1620_v53 = vld [vmem:[%s2471_s6] ss:$0 sm:$0xff] }
 0x31a   : > { %v2301_v54 = vsub.f32 %v709_v36, %v870_v52  ;;  %v1903_v36 = vpack.c.bf16 %v1102_v35, %v1101_v34 }
 0x31c   : > { %v872_v55 = vmul.f32 %v2301_v54, %v2301_v54 }
 0x31e   : > { %v873_v56 = vsel %vm607_vm4, %v872_v55, 0.0 }
 0x31f   : > { %v874_v57 = vrot.slane %v873_v56, 4 }
 0x321   : > { %v875_v58 = vadd.f32 %v874_v57, %v873_v56  ;;  %v1621_v56 = vld [vmem:[%s2472_s7] ss:$0 sm:$0xff] }
 0x323   : > { %v876_v59 = vrot.slane %v875_v58, 2 }
 0x325   : > { %v877_v60 = vadd.f32 %v876_v59, %v875_v58 }
 0x327   : > { %v878_v61 = vrot.slane %v877_v60, 1 }
 0x329   : > { %v879_v62 = vadd.f32 %v878_v61, %v877_v60 }
 0x32b   : > { %1751 = vmatmul.mubr.msk.f32.vlgmr.msra.gmra.mrb[6].mxu0 %vm607_vm4, %v879_v62 }
 0x32c   : > { %1919 = vmatpush3.bf16.msra.mxu0 %v2235_v22  ;;  %1774 = vmatprep.mubr.msk.f32.mxu0 %vm1984_vm0, %v1985_v6 }
 0x32d   : > { %1920 = vmatprep.subr.bf16.mxu0 %v1983_v1 }
 0x330   : > { %1922 = vmatpush3.bf16.msra.mxu0 %v2245_v24 }
 0x331   : > { %1923 = vmatprep.subr.bf16.mxu0 %v1983_v1 }
 0x334   : > { %1925 = vmatpush3.bf16.msra.mxu0 %v2255_v27 }
 0x335   : > { %1926 = vmatprep.subr.bf16.mxu0 %v1983_v1 }
 0x338   : > { %1928 = vmatpush3.bf16.msra.mxu0 %v2265_v30 }
 0x339   : > { %1777 = vmatprep.subr.mxu0 %v1985_v6 }
 0x3fe   : > { %v949_v63 = vpop.f32.mrb[6].mxu0 }
 0x3ff   : > { %v953_v0 = vmul.f32 0.015625, %v949_v63  ;;  %v1752_v2 = vpop.f32.mrb[7].mxu0 }
 0x401   : > { %v954_v3 = vadd.f32 1e-05, %v953_v0 }
 0x403   : > { %1959 = vrsqrt.f32 %v954_v3 }
 0x40d   : > { %v1960_v4 = vpop.eup %1959 }
 0x40e   : > { %1756 = vmatmul.mubr.msk.f32.vlgmr.msra.gmra.mrb[2].mxu1 %vm793_vm7, %v1960_v4 }
 0x40f   : > { %1883 = vmatpush1.bf16.msra.mxu1 %v1882_v9 }
 0x410   : > { %1884 = vmatprep.subr.bf16.mxu1 %v1983_v1 }
 0x413   : > { %1886 = vmatpush1.bf16.msra.mxu1 %v1885_v12 }
 0x414   : > { %1887 = vmatprep.subr.bf16.mxu1 %v1983_v1 }
 0x417   : > { %1889 = vmatpush1.bf16.msra.mxu1 %v1888_v16 }
 0x418   : > { %1890 = vmatprep.subr.bf16.mxu1 %v1983_v1 }
 0x41b   : > { %1892 = vmatpush1.bf16.msra.mxu1 %v1891_v19 }
 0x41c   : > { %1893 = vmatprep.subr.bf16.mxu1 %v1983_v1 }
 0x41f   : > { %1895 = vmatpush1.bf16.msra.mxu1 %v1894_v14 }
 0x420   : > { %1896 = vmatprep.subr.bf16.mxu1 %v1983_v1 }
 0x423   : > { %1898 = vmatpush1.bf16.msra.mxu1 %v1897_v26 }
 0x424   : > { %1899 = vmatprep.subr.bf16.mxu1 %v1983_v1 }
 0x427   : > { %1901 = vmatpush1.bf16.msra.mxu1 %v1900_v33 }
 0x428   : > { %1902 = vmatprep.subr.bf16.mxu1 %v1983_v1 }
 0x42b   : > { %1904 = vmatpush1.bf16.msra.mxu1 %v1903_v36 }
 0x42c   : > { %1905 = vmatprep.subr.bf16.mxu1 %v1983_v1 }
 0x42f   : > { %1907 = vmatpush1.bf16.msra.mxu1 %v1906_v39 }
 0x430   : > { %1908 = vmatprep.subr.bf16.mxu1 %v1983_v1 }
 0x433   : > { %1910 = vmatpush1.bf16.msra.mxu1 %v1909_v42 }
 0x434   : > { %1911 = vmatprep.subr.bf16.mxu1 %v1983_v1 }
 0x437   : > { %1913 = vmatpush1.bf16.msra.mxu1 %v1912_v45 }
 0x438   : > { %1914 = vmatprep.subr.bf16.mxu1 %v1983_v1 }
 0x43b   : > { %1916 = vmatpush1.bf16.msra.mxu1 %v1915_v48 }
 0x4e1   : > { %v1025_v49 = vpop.f32.mrb[2].mxu1 }
 0x4e2   : > { %v1032_v51 = vrot.slane %v1025_v49, %v2298_v50  ;;  %v1757_v52 = vpop.f32.mrb[3].mxu1 }
 0x4e4   : > { %v1033_v55 = vmul.f32 %v1032_v51, %v2301_v54  ;;  %v513_v54 = vld [vmem:[%s2474_s9] sm:$0x1] }
 0x4e5   : > { %v585_v8 = vadd.f32 %v2276_v32, %v513_v54 }
 0x4e6   : > { %v1041_v57 = vmul.f32 %v1620_v53, %v1033_v55 }
 0x4e7   : > { %v1068_v12 = vrot.slane %v585_v8, %v2298_v50 }
 0x4e8   : > { %v1049_v58 = vadd.f32 %v1621_v56, %v1041_v57 }
 0x4ea   : > { %v1050_v59 = vand.u32 2147483647, %v1049_v58  ;;  %vm1054_vm8 = vcmp.ge.f32.partialorder %v1049_v58, 0.0 }
 0x4ec   : > { %v1051_v60 = vsub.f32 0.0, %v1050_v59 }
 0x4ee   : > { %v1052_v61 = vmul.f32 1.442695, %v1051_v60 }
 0x4f0   : > { %1961 = vpow2.f32 %v1052_v61 }
 0x4fa   : > { %v1962_v62 = vpop.eup %1961 }
 0x4fb   : > { %v1056_v63 = vadd.f32 1.0, %v1962_v62  ;;  %v1055_v2 = vsel %vm1054_vm8, %v1962_v62, 1.0  ;;  %v1628_v62 = vld [vmem:[%s2477_s12] ss:$0 sm:$0xff] }
 0x4fd   : > { %1963 = vrcp.f32 %v1056_v63 }
 0x507   : > { %v1964_v0 = vpop.eup %1963 }
 0x508   : > { %v1058_v3 = vmul.f32 %v1964_v0, %v1055_v2 }
 0x50a   : > { %v1059_v4 = vmul.f32 %v1058_v3, %v1058_v3 }
 0x50c   : > { %v1062_v5 = vadd.f32 1.0, %v1059_v4  ;;  %v1060_v7 = vsub.f32 1.0, %v1059_v4 }
 0x50e   : > { %1965 = vrcp.f32 %v1062_v5  ;;  %v1061_v9 = vmul.f32 %v1060_v7, %v1049_v58 }
 0x518   : > { %v1966_v11 = vpop.eup %1965 }
 0x519   : > { %v1064_v13 = vmul.f32 %v1966_v11, %v1061_v9 }
 0x51b   : > { %v1069_v15 = vadd.f32 %v1068_v12, %v1064_v13 }
 0x51d   : > { %v1071_v16 = vrot.slane %v1069_v15, 7 }
 0x51f   : > { %v1073_v17 = vsel %vm591_vm1, 0.0, %v1071_v16  ;;  %v1074_v18 = vsel %vm591_vm1, %v1071_v16, 0.0 }
 0x520   : > { %v1083_v19 = vrot.slane %v1073_v17, 2  ;;  %v1084_v20 = vrot.slane %v1074_v18, 2  ;;  %v1077_v21 = vrot.slane %v1073_v17, 1  ;;  %v1078_v14 = vrot.slane %v1074_v18, 1 }
 0x522   : > { %v1085_v23 = vsel %vm603_vm3, %v1083_v19, %v1084_v20  ;;  %v1079_v25 = vsel %vm596_vm2, %v1077_v21, %v1078_v14 }
 0x523   : > { %1623 = vmatprep.mubr.msk.f32.mxu1 %vm607_vm4, %v1085_v23  ;;  %1080 = vrot.lane.b32.xlu0 %v1079_v25, %s1986_s19 }
 0x595   : > { %v1081_v32 = vpop.permute.xlu0 %1080 }
 0x596   : > { %v1086_v26 = vsel %vm607_vm4, %v1073_v17, %v1081_v32 }
 0x597   : > { %1185 = vmatmul.mubr.f32.vlgmr.msra.gmra.mrb[4].mxu1 %v1086_v26 }
 0x66a   : > { %v1186_v29 = vpop.f32.mrb[4].mxu1 }
 0x66b   : > { %v1187_v33 = vadd.f32 %v1622_v28, %v1186_v29  ;;  %v1188_v34 = vpop.f32.mrb[5].mxu1 }
 0x66d   : > { %v1190_v35 = vsel %vm607_vm4, %v1187_v33, 0.0 }
 0x66e   : > { %v1191_v36 = vrot.slane %v1190_v35, 4 }
 0x670   : > { %v1192_v37 = vadd.f32 %v1191_v36, %v1190_v35 }
 0x672   : > { %v1193_v38 = vrot.slane %v1192_v37, 2 }
 0x674   : > { %v1194_v39 = vadd.f32 %v1193_v38, %v1192_v37 }
 0x676   : > { %v1195_v40 = vrot.slane %v1194_v39, 1 }
 0x678   : > { %v1196_v41 = vadd.f32 %v1195_v40, %v1194_v39 }
 0x67a   : > { %1775 = vmatmul.mubr.msk.f32.vlgmr.msra.gmra.mrb[8].mxu0 %vm607_vm4, %v1196_v41 }
 0x67b   : > { %1778 = vmatpush3.msra.mxu0 %v2272_v31  ;;  %1779 = vmatprep.mubr.msk.f32.mxu0 %vm1984_vm0, %v1985_v6 }
 0x67c   : > { %1929 = vmatprep.subr.bf16.mxu0 %v1983_v1 }
 0x74d   : > { %v1266_v42 = vpop.f32.mrb[8].mxu0 }
 0x74e   : > { %v1270_v43 = vmul.f32 0.015625, %v1266_v42  ;;  %v1776_v44 = vpop.f32.mrb[9].mxu0 }
 0x750   : > { %1780 = vmatmul.mubr.msk.f32.vlgmr.msra.gmra.mrb[10].mxu0 %vm793_vm7, %v1270_v43 }
 0x751   : > { %1931 = vmatpush3.bf16.msra.mxu0 %v2235_v22  ;;  %1798 = vmatprep.mubr.msk.f32.mxu0 %vm1984_vm0, %v1985_v6 }
 0x752   : > { %1932 = vmatprep.subr.bf16.mxu0 %v1983_v1 }
 0x755   : > { %1934 = vmatpush3.bf16.msra.mxu0 %v2245_v24 }
 0x756   : > { %1935 = vmatprep.subr.bf16.mxu0 %v1983_v1 }
 0x759   : > { %1937 = vmatpush3.bf16.msra.mxu0 %v2255_v27 }
 0x75a   : > { %1938 = vmatprep.subr.bf16.mxu0 %v1983_v1 }
 0x75d   : > { %1940 = vmatpush3.bf16.msra.mxu0 %v2265_v30 }
 0x75e   : > { %1801 = vmatprep.subr.mxu0 %v1985_v6 }
 0x823   : > { %v1340_v45 = vpop.f32.mrb[10].mxu0 }
 0x824   : > { %v1347_v22 = vrot.slane %v1340_v45, %v2298_v50  ;;  %v1781_v46 = vpop.f32.mrb[11].mxu0 }
 0x826   : > { %v1348_v47 = vsub.f32 %v1187_v33, %v1347_v22 }
 0x828   : > { %v1349_v48 = vmul.f32 %v1348_v47, %v1348_v47 }
 0x82a   : > { %v1350_v49 = vsel %vm607_vm4, %v1349_v48, 0.0 }
 0x82b   : > { %v1351_v51 = vrot.slane %v1350_v49, 4 }
 0x82d   : > { %v1352_v24 = vadd.f32 %v1351_v51, %v1350_v49 }
 0x82f   : > { %v1353_v52 = vrot.slane %v1352_v24, 2 }
 0x831   : > { %v1354_v53 = vadd.f32 %v1353_v52, %v1352_v24 }
 0x833   : > { %v1355_v55 = vrot.slane %v1354_v53, 1 }
 0x835   : > { %v1356_v27 = vadd.f32 %v1355_v55, %v1354_v53 }
 0x837   : > { %1799 = vmatmul.mubr.msk.f32.vlgmr.msra.gmra.mrb[12].mxu0 %vm607_vm4, %v1356_v27 }
 0x838   : > { %1802 = vmatpush3.msra.mxu0 %v2272_v31  ;;  %1803 = vmatprep.mubr.msk.f32.mxu0 %vm1984_vm0, %v1985_v6  ;;  %v1629_v6 = vld [vmem:[%s2478_s13] ss:$0 sm:$0xff] }
 0x90a   : > { %v1426_v1 = vpop.f32.mrb[12].mxu0 }
 0x90b   : > { %v1430_v30 = vmul.f32 0.015625, %v1426_v1  ;;  %v1800_v56 = vpop.f32.mrb[13].mxu0 }
 0x90d   : > { %v1431_v57 = vadd.f32 1e-05, %v1430_v30 }
 0x90f   : > { %1967 = vrsqrt.f32 %v1431_v57 }
 0x919   : > { %v1968_v58 = vpop.eup %1967 }
 0x91a   : > { %1804 = vmatmul.mubr.msk.f32.vlgmr.msra.gmra.mrb[14].mxu0 %vm793_vm7, %v1968_v58 }
 0x9ed   : > { %v1502_v59 = vpop.f32.mrb[14].mxu0 }
 0x9ee   : > { %v1509_v60 = vrot.slane %v1502_v59, %v2298_v50  ;;  %v1805_v61 = vpop.f32.mrb[15].mxu0 }
 0x9f0   : > { %v1510_v31 = vmul.f32 %v1509_v60, %v1348_v47 }
 0x9f2   : > { %v1518_v63 = vmul.f32 %v1628_v62, %v1510_v31 }
 0x9f4   : > { %v1526_v0 = vadd.f32 %v1629_v6, %v1518_v63 }
 0x9f6   : > { %v1527_v2 = vand.u32 2147483647, %v1526_v0  ;;  %vm1531_vm9 = vcmp.ge.f32.partialorder %v1526_v0, 0.0 }
 0x9f8   : > { %v1528_v3 = vsub.f32 0.0, %v1527_v2 }
 0x9fa   : > { %v1529_v4 = vmul.f32 1.442695, %v1528_v3 }
 0x9fc   : > { %1969 = vpow2.f32 %v1529_v4 }
 0xa06   : > { %v1970_v5 = vpop.eup %1969 }
 0xa07   : > { %v1533_v54 = vadd.f32 1.0, %v1970_v5  ;;  %v1532_v7 = vsel %vm1531_vm9, %v1970_v5, 1.0 }
 0xa09   : > { %1971 = vrcp.f32 %v1533_v54 }
 0xa13   : > { %v1972_v50 = vpop.eup %1971 }
 0xa14   : > { %v1535_v8 = vmul.f32 %v1972_v50, %v1532_v7 }
 0xa16   : > { %v1536_v9 = vmul.f32 %v1535_v8, %v1535_v8 }
 0xa18   : > { %v1539_v11 = vadd.f32 1.0, %v1536_v9  ;;  %v1537_v12 = vsub.f32 1.0, %v1536_v9 }
 0xa1a   : > { %1973 = vrcp.f32 %v1539_v11  ;;  %v1538_v13 = vmul.f32 %v1537_v12, %v1526_v0 }
 0xa24   : > { %v1974_v15 = vpop.eup %1973 }
 0xa25   : > { %v1541_v16 = vmul.f32 %v1974_v15, %v1538_v13 }
 0xa27   : > { %v1542_v17 = vadd.f32 %v1541_v16, %v2101_v10 }
 0xa29   : > { %1543 = vst.msk [vmem:[%s476_s26] sm:$0xff] %vm607_vm4, %v1542_v17 }
 0xa2a PF: > { %s24_s29 = sadd.s32 1, %s1981_s29  }
 0xa2b   : > { %p21_p4 = scmp.ge.s32.totalorder %s24_s29, 4  }
 0xa2d   :  { %23 = sbr.rel (!%p21_p4) target bundleno = 1 (0x1), region = 109 }

// kernel: forward.18
= control target key start
LH: loop header
LB: loop body
LE: loop exit
PB: predicated region body
PF: predicated region fallthrough
CT: control target
= control target key end

     0   :  { %s4142_s0 = inlined_call_operand.vmem [shape: f32[2,8,128], index: 0, kind: input, shape index: {}]   ;;  %s4143_s1 = inlined_call_operand.vmem [shape: f32[2,8,128], index: 1, kind: input, shape index: {}]   ;;  %s4144_s2 = inlined_call_operand.vmem [shape: f32[2,1,80], index: 2, kind: input, shape index: {}]   ;;  %s4145_s3 = inlined_call_operand.vmem [shape: f32[64,8], index: 3, kind: input, shape index: {}]   ;;  %s4146_s4 = inlined_call_operand.vmem [shape: f32[8,64], index: 4, kind: input, shape index: {}]   ;;  %s4147_s5 = inlined_call_operand.vmem [shape: f32[768,64], index: 5, kind: input, shape index: {}]   ;;  %s4148_s6 = inlined_call_operand.hbm [shape: f32[1,64], index: 6, kind: input, shape index: {}]   ;;  %s4149_s7 = inlined_call_operand.hbm [shape: f32[1,64], index: 7, kind: input, shape index: {}]   ;;  %s4150_s8 = inlined_call_operand.hbm [shape: f32[1,64], index: 8, kind: input, shape index: {}]   ;;  %s4151_s9 = inlined_call_operand.vmem [shape: f32[80,64], index: 9, kind: input, shape index: {}]   ;;  %s4152_s10 = inlined_call_operand.hbm [shape: f32[1,64], index: 10, kind: input, shape index: {}]   ;;  %s4153_s11 = inlined_call_operand.vmem [shape: f32[192,64], index: 11, kind: input, shape index: {}]   ;;  %s4154_s12 = inlined_call_operand.hbm [shape: f32[1,64], index: 12, kind: input, shape index: {}]   ;;  %s4155_s13 = inlined_call_operand.hbm [shape: f32[1,64], index: 13, kind: input, shape index: {}]   ;;  %s4156_s14 = inlined_call_operand.hbm [shape: f32[1,64], index: 14, kind: input, shape index: {}]   ;;  %s4157_s15 = inlined_call_operand.vmem [shape: f32[256,64], index: 15, kind: input, shape index: {}]   ;;  %s4158_s16 = inlined_call_operand.vmem [shape: f32[1,64], index: 16, kind: input, shape index: {}]   ;;  %s4159_s17 = inlined_call_operand.vmem [shape: f32[2,8,64], index: 17, kind: output, shape index: {}]  }
   0x1   :  { %4163 = sst [smem:[#allocation18_spill]] %s4142_s0 }
   0x2   :  { %4164 = sst [smem:[#allocation19_spill]] %s4143_s1 }
   0x3   :  { %4165 = sst [smem:[#allocation20_spill]] %s4158_s16 }
   0x4   :  { %4166 = sst [smem:[#allocation21_spill]] %s4159_s17 }
   0x5   :  { %22 = vsyncpa [#allocation3], 0 }
   0x6   :  { %23 = vsyncpa [#allocation5], 0 }
   0x7   :  { %24 = vsyncpa [#allocation8], 0 }
   0x8   :  { %25 = vsyncpa [#allocation11], 0  ;;  %s3218_s24 = smov 0  }
   0x9 LB: > { %4167 = sst [smem:[#allocation17_spill]] %s3115_s24  ;;  %s3117_s25 = smov [#allocation4]   ;;  %s3115_s24 = sphi %s3218_s24, %s31_s24  }
   0xa   : > { %s467_s26 = sshll.u32 %s3117_s25, 4  ;;  %s3224_s27 = sadd.s32 4294967295, %s3115_s24   ;;  %s3229_s26 = int_to_ptr.vmem [resolvable:$true] %s467_s26 }
   0xb   : > { %p2208_p0 = scmp.ge.s32.totalorder %s3115_s24, 1  ;;  %p434_p1 = scmp.lt.s32.totalorder %s3115_s24, 3 }
   0xc   : > { %p4161_p2 = scmp.eq.s32.totalorder %s3224_s27, 0  ;;  %s3118_s29 = smov [#allocation7]  }
   0xd   : > { %p3231_p3 = pnand %p2208_p0, %p434_p1  ;;  %s492_s0 = sshll.u32 %s3118_s29, 4  ;;  %s3237_s0 = int_to_ptr.vmem [resolvable:$true] %s492_s0 }
   0xe   : > { %s3119_s30 = smov [#allocation10]   ;;  %s3120_s1 = smov [#allocation2]  }
   0xf   : > { %s4168_s28 = scalar_select %p3231_p3, 1, 0 }
  0x10   : > { %p2820_p4 = pneg %p3231_p3  ;;  %s517_s18 = sshll.u32 %s3119_s30, 4  ;;  %s3245_s18 = int_to_ptr.vmem [resolvable:$true] %s517_s18 }
  0x11   : > { %s456_s20 = sshll.u32 %s3120_s1, 4  ;;  %s2897_s23 = scalar_lea.hbm %s4149_s7, 16  ;;  %s3247_s20 = int_to_ptr.vmem [resolvable:$true] %s456_s20 }
  0x12   : > { %p3241_p5 = pnand %p4161_p2, %p2820_p4  ;;  %p2898_p6 = scmp.ne.s32.totalorder %s4149_s7, %s2897_s23 }
  0x13   : > { %p2904_p10 = scmp.lt.u32.totalorder %s2897_s23, %s4149_s7 }
  0x14   : > { %p3257_p7 = pneg %p3241_p5 }
  0x16   : > { %p2900_p8 = pnand %p3257_p7, %p2898_p6 }
  0x18   : > { %p2901_p9 = pneg %p2900_p8 }
  0x1a   : > { %p2906_p11 = pnand %p2904_p10, %p2901_p9 }
  0x1c   : > { %2909 = shalt.err (!%p2906_p11)
}
  0x1d   : > { %s2910_s21 = scalar_lea.vmem %s3229_s26, 16  ;;  %s2917_s22 = scalar_lea.vmem %s3229_s26, 32 }
  0x1e   : > { %p2911_p12 = scmp.ne.s32.totalorder %s3229_s26, %s2910_s21  ;;  %p2918_p1 = scmp.lt.s32.totalorder %s3229_s26, %s3229_s26 }
  0x1f   : > { %p2919_p4 = scmp.lt.s32.totalorder %s2917_s22, %s2910_s21 }
  0x20   : > { %p2913_p13 = pnand %p2911_p12, %p3257_p7 }
  0x21   : > { %p2920_p6 = por %p2919_p4, %p2918_p1 }
  0x22   : > { %p2914_p0 = pneg %p2913_p13 }
  0x24   : > { %p2921_p8 = pnand %p2920_p6, %p2914_p0 }
  0x26   : > { %2924 = shalt.err (!%p2921_p8)
}
  0x27   : > { %2826 = dma.hbm_to_vmem [thread:$0]  (!%p3241_p5), %s4149_s7, 16, %s3229_s26, [#allocation5]  }
  0x28   : > { %s2925_s1 = scalar_lea.hbm %s4152_s10, 16 }
  0x29   : > { %p2926_p9 = scmp.ne.s32.totalorder %s4152_s10, %s2925_s1  ;;  %p2932_p12 = scmp.lt.u32.totalorder %s2925_s1, %s4152_s10 }
  0x2b   : > { %p2928_p10 = pnand %p2926_p9, %p3257_p7 }
  0x2d   : > { %p2929_p11 = pneg %p2928_p10 }
  0x2f   : > { %p2934_p13 = pnand %p2932_p12, %p2929_p11 }
  0x31   : > { %2937 = shalt.err (!%p2934_p13)
}
  0x32   : > { %s2938_s26 = scalar_lea.vmem %s3237_s0, 16  ;;  %s2945_s16 = scalar_lea.vmem %s3237_s0, 32 }
  0x33   : > { %p2939_p0 = scmp.ne.s32.totalorder %s3237_s0, %s2938_s26  ;;  %p2946_p6 = scmp.lt.s32.totalorder %s3237_s0, %s3237_s0 }
  0x34   : > { %p2947_p8 = scmp.lt.s32.totalorder %s2945_s16, %s2938_s26 }
  0x35   : > { %p2941_p1 = pnand %p2939_p0, %p3257_p7 }
  0x36   : > { %p2948_p9 = por %p2947_p8, %p2946_p6 }
  0x37   : > { %p2942_p4 = pneg %p2941_p1 }
  0x39   : > { %p2949_p10 = pnand %p2948_p9, %p2942_p4 }
  0x3b   : > { %2952 = shalt.err (!%p2949_p10)
}
  0x3c   : > { %2832 = dma.hbm_to_vmem [thread:$0]  (!%p3241_p5), %s4152_s10, 16, %s3237_s0, [#allocation8]  }
  0x3d   : > { %s2953_s29 = scalar_lea.hbm %s4155_s13, 16 }
  0x3e   : > { %p2954_p11 = scmp.ne.s32.totalorder %s4155_s13, %s2953_s29  ;;  %p2960_p0 = scmp.lt.u32.totalorder %s2953_s29, %s4155_s13 }
  0x40   : > { %p2956_p12 = pnand %p2954_p11, %p3257_p7 }
  0x42   : > { %p2957_p13 = pneg %p2956_p12 }
  0x44   : > { %p2962_p1 = pnand %p2960_p0, %p2957_p13 }
  0x46   : > { %2965 = shalt.err (!%p2962_p1)
}
  0x47   : > { %s2966_s0 = scalar_lea.vmem %s3245_s18, 16  ;;  %s2973_s16 = scalar_lea.vmem %s3245_s18, 32 }
  0x48   : > { %p2967_p4 = scmp.ne.s32.totalorder %s3245_s18, %s2966_s0  ;;  %p2974_p9 = scmp.lt.s32.totalorder %s3245_s18, %s3245_s18 }
  0x49   : > { %p2975_p10 = scmp.lt.s32.totalorder %s2973_s16, %s2966_s0 }
  0x4a   : > { %p2969_p6 = pnand %p2967_p4, %p3257_p7 }
  0x4b   : > { %p2976_p11 = por %p2975_p10, %p2974_p9 }
  0x4c   : > { %p2970_p8 = pneg %p2969_p6 }
  0x4e   : > { %p2977_p12 = pnand %p2976_p11, %p2970_p8 }
  0x50   : > { %2980 = shalt.err (!%p2977_p12)
}
  0x51   : > { %2838 = dma.hbm_to_vmem [thread:$0]  (!%p3241_p5), %s4155_s13, 16, %s3245_s18, [#allocation11]  }
  0x52   : > { %s2981_s29 = scalar_lea.hbm %s4148_s6, 16 }
  0x53   : > { %p2982_p13 = scmp.ne.s32.totalorder %s4148_s6, %s2981_s29  ;;  %p2988_p4 = scmp.lt.u32.totalorder %s2981_s29, %s4148_s6 }
  0x55   : > { %p2984_p0 = pnand %p2982_p13, %p3257_p7 }
  0x57   : > { %p2985_p1 = pneg %p2984_p0 }
  0x59   : > { %p2990_p6 = pnand %p2988_p4, %p2985_p1 }
  0x5b   : > { %2993 = shalt.err (!%p2990_p6)
}
  0x5c   : > { %s2994_s18 = scalar_lea.vmem %s3247_s20, 16  ;;  %s3001_s0 = scalar_lea.vmem %s3247_s20, 32 }
  0x5d   : > { %p2995_p8 = scmp.ne.s32.totalorder %s3247_s20, %s2994_s18  ;;  %p3002_p11 = scmp.lt.s32.totalorder %s3247_s20, %s3247_s20 }
  0x5e   : > { %p3003_p12 = scmp.lt.s32.totalorder %s3001_s0, %s2994_s18 }
  0x5f   : > { %p2997_p9 = pnand %p2995_p8, %p3257_p7 }
  0x60   : > { %p3004_p13 = por %p3003_p12, %p3002_p11 }
  0x61   : > { %p2998_p10 = pneg %p2997_p9 }
  0x63   : > { %p3005_p0 = pnand %p3004_p13, %p2998_p10 }
  0x65   : > { %3008 = shalt.err (!%p3005_p0)
}
  0x66   : > { %2823 = dma.hbm_to_vmem [thread:$0]  (!%p3241_p5), %s4148_s6, 16, %s3247_s20, [#allocation3]  }
  0x67   : > { %s3121_s24 = smov [#allocation6]   ;;  %s3122_s25 = smov [#allocation9]  }
  0x68   : > { %s478_s23 = sshll.u32 %s3121_s24, 4  ;;  %s506_s29 = sshll.u32 %s3122_s25, 4  ;;  %s479_s23 = int_to_ptr.vmem [resolvable:$true] %s478_s23  ;;  %s507_s29 = int_to_ptr.vmem [resolvable:$true] %s506_s29 }
  0x69   : > { %s3009_s22 = scalar_lea.hbm %s4150_s8, 16 }
  0x6a   : > { %p3010_p1 = scmp.ne.s32.totalorder %s4150_s8, %s3009_s22  ;;  %p3016_p8 = scmp.lt.u32.totalorder %s3009_s22, %s4150_s8 }
  0x6c   : > { %p3012_p4 = pnand %p3010_p1, %p3257_p7 }
  0x6e   : > { %p3013_p6 = pneg %p3012_p4 }
  0x70   : > { %p3018_p9 = pnand %p3016_p8, %p3013_p6 }
  0x72   : > { %3021 = shalt.err (!%p3018_p9)
}
  0x73   : > { %s3022_s20 = scalar_lea.vmem %s479_s23, 16  ;;  %s3029_s17 = scalar_lea.vmem %s479_s23, 32 }
  0x74   : > { %p3023_p10 = scmp.ne.s32.totalorder %s479_s23, %s3022_s20  ;;  %p3030_p13 = scmp.lt.s32.totalorder %s479_s23, %s479_s23 }
  0x75   : > { %p3031_p0 = scmp.lt.s32.totalorder %s3029_s17, %s3022_s20 }
  0x76   : > { %p3025_p11 = pnand %p3023_p10, %p3257_p7 }
  0x77   : > { %p3032_p2 = por %p3031_p0, %p3030_p13 }
  0x78   : > { %p3026_p12 = pneg %p3025_p11 }
  0x7a   : > { %p3033_p3 = pnand %p3032_p2, %p3026_p12 }
  0x7c   : > { %3036 = shalt.err (!%p3033_p3)
}
  0x7d   : > { %2829 = dma.hbm_to_vmem [thread:$0]  (!%p3241_p5), %s4150_s8, 16, %s479_s23, [#allocation5]  }
  0x7e   : > { %s3037_s22 = scalar_lea.hbm %s4154_s12, 16 }
  0x7f   : > { %p3038_p1 = scmp.ne.s32.totalorder %s4154_s12, %s3037_s22  ;;  %p3044_p3 = scmp.lt.u32.totalorder %s3037_s22, %s4154_s12 }
  0x81   : > { %p3040_p4 = pnand %p3038_p1, %p3257_p7 }
  0x83   : > { %p3041_p2 = pneg %p3040_p4 }
  0x85   : > { %p3046_p6 = pnand %p3044_p3, %p3041_p2 }
  0x87   : > { %3049 = shalt.err (!%p3046_p6)
}
  0x88   : > { %s3050_s20 = scalar_lea.vmem %s507_s29, 16  ;;  %s3057_s23 = scalar_lea.vmem %s507_s29, 32 }
  0x89   : > { %p3051_p8 = scmp.ne.s32.totalorder %s507_s29, %s3050_s20  ;;  %p3058_p11 = scmp.lt.s32.totalorder %s507_s29, %s507_s29 }
  0x8a   : > { %p3059_p12 = scmp.lt.s32.totalorder %s3057_s23, %s3050_s20 }
  0x8b   : > { %p3053_p9 = pnand %p3051_p8, %p3257_p7 }
  0x8c   : > { %p3060_p13 = por %p3059_p12, %p3058_p11 }
  0x8d   : > { %p3054_p10 = pneg %p3053_p9 }
  0x8f   : > { %p3061_p0 = pnand %p3060_p13, %p3054_p10 }
  0x91   : > { %3064 = shalt.err (!%p3061_p0)
}
  0x92   : > { %2835 = dma.hbm_to_vmem [thread:$0]  (!%p3241_p5), %s4154_s12, 16, %s507_s29, [#allocation8]  }
  0x93   : > { %s3123_s25 = smov [#allocation12]   ;;  %s3065_s26 = scalar_lea.hbm %s4156_s14, 16 }
  0x94   : > { %s528_s1 = sshll.u32 %s3123_s25, 4  ;;  %p3066_p1 = scmp.ne.s32.totalorder %s4156_s14, %s3065_s26  ;;  %s529_s1 = int_to_ptr.vmem [resolvable:$true] %s528_s1 }
  0x95   : > { %p3072_p3 = scmp.lt.u32.totalorder %s3065_s26, %s4156_s14 }
  0x96   : > { %p3068_p4 = pnand %p3066_p1, %p3257_p7 }
  0x98   : > { %p3069_p2 = pneg %p3068_p4 }
  0x9a   : > { %p3074_p6 = pnand %p3072_p3, %p3069_p2 }
  0x9c   : > { %3077 = shalt.err (!%p3074_p6)
}
  0x9d   : > { %s3078_s29 = scalar_lea.vmem %s529_s1, 16  ;;  %s3085_s23 = scalar_lea.vmem %s529_s1, 32 }
  0x9e   : > { %p3079_p8 = scmp.ne.s32.totalorder %s529_s1, %s3078_s29  ;;  %p3086_p11 = scmp.lt.s32.totalorder %s529_s1, %s529_s1 }
  0x9f   : > { %p3087_p12 = scmp.lt.s32.totalorder %s3085_s23, %s3078_s29 }
  0xa0   : > { %p3081_p9 = pnand %p3079_p8, %p3257_p7 }
  0xa1   : > { %p3088_p13 = por %p3087_p12, %p3086_p11 }
  0xa2   : > { %p3082_p10 = pneg %p3081_p9 }
  0xa4   : > { %p3089_p0 = pnand %p3088_p13, %p3082_p10 }
  0xa6   : > { %3092 = shalt.err (!%p3089_p0)
}
  0xa7   : > { %2841 = dma.hbm_to_vmem [thread:$0]  (!%p3241_p5), %s4156_s14, 16, %s529_s1, [#allocation11]  }
  0xa8   : > { %p4171_p1 = scmp.ne.s32.totalorder %s4168_s28, 0 }
  0xa9   : > { %p4172_p4 = scmp.eq.s32.totalorder (!%p4171_p1), %s3224_s27, 0 }
  0xaa   : > { %567 = sbr.rel (%p4171_p1) target bundleno = 2747 (0xabb), region = 88 }
  0xb1   : > { %3098 = dma.done.wait (%p4172_p4), [#allocation3], 16   ;;  %p4173_p7 = pmov %p4172_p4 }
  0xb2   : > { %p4174_p2 = pmov %p4172_p4 }
  0xb3   : > { %3100 = vsyncadd (%p4173_p7), [#allocation3], 4294967280 }
  0xb4   : > { %3102 = dma.done.wait (%p4174_p2), [#allocation5], 32   ;;  %p4175_p3 = pmov %p4174_p2 }
  0xb5   : > { %p4176_p6 = pmov %p4174_p2 }
  0xb6   : > { %3104 = vsyncadd (%p4175_p3), [#allocation5], 4294967264 }
  0xb7   : > { %3106 = dma.done.wait (%p4176_p6), [#allocation8], 32   ;;  %p4177_p5 = pmov %p4174_p2 }
  0xb8   : > { %p4178_p8 = pmov %p4174_p2 }
  0xb9   : > { %3108 = vsyncadd (%p4177_p5), [#allocation8], 4294967264 }
  0xba   : > { %3110 = dma.done.wait (%p4178_p8), [#allocation11], 32   ;;  %p4179_p9 = pmov %p4174_p2 }
  0xbb   : > { %v3124_v0 = vmov 0.0|0.0   ;;  %vm3125_vm0 = vmmov 0   ;;  %v3126_v1 = vmov 0.0   ;;  %v824_v2 = vld [vmem:[%s4147_s5 + $0x80] sm:$0xff]  ;;  %v825_v3 = vld [vmem:[%s4147_s5 + $0x88] sm:$0xff]  ;;  %v826_v7 = vld [vmem:[%s4147_s5 + $0x90] sm:$0xff] }
  0xbc   : > { %3112 = vsyncadd (%p4179_p9), [#allocation11], 4294967264  ;;  %2565 = vmatprep.subr.bf16.mxu0 %v3124_v0  ;;  %2466 = vmatprep.mubr.msk.f32.mxu0 %vm3125_vm0, %v3126_v1  ;;  %v808_v4 = vld [vmem:[%s4147_s5] sm:$0xff]  ;;  %v2580_v5 = vpack.c.bf16 %v825_v3, %v824_v2  ;;  %v809_v6 = vld [vmem:[%s4147_s5 + $0x8] sm:$0xff]  ;;  %p648_p10 = scmp.lt.s32.totalorder %s3224_s27, 1  ;;  %s4180_s16 = sld [smem:[#allocation19_spill]] }
  0xbd   : > { %v827_v8 = vld [vmem:[%s4147_s5 + $0x98] sm:$0xff]  ;;  %v2582_v9 = vpack.c.bf16 %v809_v6, %v808_v4  ;;  %v810_v11 = vld [vmem:[%s4147_s5 + $0x10] sm:$0xff]  ;;  %v828_v13 = vld [vmem:[%s4147_s5 + $0xa0] sm:$0xff]  ;;  %vm781_vm1 = vcmask 1040384   ;;  %s4183_s30 = sld [smem:[#allocation18_spill]]  ;;  %vm799_vm3 = vcmask 1045504  }
  0xbe   : > { %v2584_v10 = vpack.c.bf16 %v827_v8, %v826_v7  ;;  %v811_v12 = vld [vmem:[%s4147_s5 + $0x18] sm:$0xff]  ;;  %2581 = vmatprep.subr.bf16.mxu1 %v2580_v5  ;;  %v829_v14 = vld [vmem:[%s4147_s5 + $0xa8] sm:$0xff]  ;;  %v690_v16 = vld [vmem:[%s4151_s9] sm:$0xff]  ;;  %s4188_s27 = smov (!%p648_p10, %s3224_s27), 1  ;;  %vm790_vm5 = vcmask 1046528   ;;  %vm701_vm6 = vcmask 654336  }
  0xbf   : > { %2583 = vmatpush3.bf16.msra.mxu1 %v2582_v9  ;;  %v2586_v15 = vpack.c.bf16 %v811_v12, %v810_v11  ;;  %v691_v17 = vld [vmem:[%s4151_s9 + $0x8] sm:$0xff]  ;;  %v2588_v18 = vpack.c.bf16 %v829_v14, %v828_v13  ;;  %v812_v19 = vld [vmem:[%s4147_s5 + $0x20] sm:$0xff]  ;;  %v830_v22 = vld [vmem:[%s4147_s5 + $0xb0] sm:$0xff]  ;;  %s3500_s29 = sshll.u32 %s4188_s27, 3  ;;  %s658_s25 = scalar_lea.vmem %s4144_s2, %s4188_s27  ;;  %vm1121_vm7 = vcmask 523264   ;;  %vm1203_vm8 = vcmask 64512  }
  0xc0   : > { %2585 = vmatprep.subr.bf16.mxu1 %v2584_v10  ;;  %v813_v20 = vld [vmem:[%s4147_s5 + $0x28] sm:$0xff]  ;;  %v2566_v21 = vpack.c.bf16 %v691_v17, %v690_v16  ;;  %v831_v23 = vld [vmem:[%s4147_s5 + $0xb8] sm:$0xff]  ;;  %v692_v24 = vld [vmem:[%s4151_s9 + $0x10] sm:$0xff]  ;;  %s4184_s22 = sld [smem:[#allocation20_spill]]  ;;  %s4185_s18 = sld [smem:[#allocation21_spill]] }
  0xc1   : > { %v693_v25 = vld [vmem:[%s4151_s9 + $0x18] sm:$0xff]  ;;  %v2590_v27 = vpack.c.bf16 %v813_v20, %v812_v19  ;;  %v694_v28 = vld [vmem:[%s4151_s9 + $0x20] sm:$0xff]  ;;  %v695_v29 = vld [vmem:[%s4151_s9 + $0x28] sm:$0xff]  ;;  %v2592_v30 = vpack.c.bf16 %v831_v23, %v830_v22 }
  0xc2   : > { %2567 = vmatpush3.bf16.msra.mxu0 %v2566_v21  ;;  %v2569_v26 = vpack.c.bf16 %v693_v25, %v692_v24  ;;  %v814_v31 = vld [vmem:[%s4147_s5 + $0x30] sm:$0xff]  ;;  %v815_v32 = vld [vmem:[%s4147_s5 + $0x38] sm:$0xff]  ;;  %v832_v33 = vld [vmem:[%s4147_s5 + $0xc0] sm:$0xff]  ;;  %v2572_v35 = vpack.c.bf16 %v695_v29, %v694_v28  ;;  %s655_s20 = scalar_lea.vmem %s4180_s16, %s3500_s29 }
  0xc3   : > { %2587 = vmatpush3.bf16.msra.mxu1 %v2586_v15  ;;  %2568 = vmatprep.subr.bf16.mxu0 %v3124_v0  ;;  %v833_v34 = vld [vmem:[%s4147_s5 + $0xc8] sm:$0xff]  ;;  %v2594_v36 = vpack.c.bf16 %v815_v32, %v814_v31  ;;  %v696_v37 = vld [vmem:[%s4151_s9 + $0x30] sm:$0xff]  ;;  %v697_v38 = vld [vmem:[%s4151_s9 + $0x38] sm:$0xff]  ;;  %s651_s1 = scalar_lea.vmem %s4183_s30, %s3500_s29  ;;  %s3127_s30 = smov 64  }
  0xc4   : > { %2589 = vmatprep.subr.bf16.mxu1 %v2588_v18  ;;  %v2596_v39 = vpack.c.bf16 %v833_v34, %v832_v33  ;;  %v816_v40 = vld [vmem:[%s4147_s5 + $0x40] sm:$0xff]  ;;  %v817_v41 = vld [vmem:[%s4147_s5 + $0x48] sm:$0xff]  ;;  %v834_v42 = vld [vmem:[%s4147_s5 + $0xd0] sm:$0xff]  ;;  %v2575_v45 = vpack.c.bf16 %v697_v38, %v696_v37 }
  0xc5   : > { %v835_v43 = vld [vmem:[%s4147_s5 + $0xd8] sm:$0xff]  ;;  %v3535_v44 = vld [vmem:[%s658_s25] sm:$0x1]  ;;  %vm3541_vm2 = vmneg %vm781_vm1  ;;  %v2598_v49 = vpack.c.bf16 %v817_v41, %v816_v40 }
  0xc6   : > { %2570 = vmatpush3.bf16.msra.mxu0 %v2569_v26  ;;  %v675_v46 = vand.u32 2147483647, %v3535_v44  ;;  %v3538_v47 = vld [vmem:[%s655_s20] sm:$0xff]  ;;  %v818_v50 = vld [vmem:[%s4147_s5 + $0x50] sm:$0xff]  ;;  %v699_v52 = vld [vmem:[%s4151_s9 + $0x48] sm:$0xff]  ;;  %v2600_v54 = vpack.c.bf16 %v835_v43, %v834_v42  ;;  %vm679_vm4 = vcmp.ge.f32.partialorder %v3535_v44, 0.0  ;;  %s662_s0 = scalar_lea.vmem %s4185_s18, %s3500_s29 }
  0xc7   : > { %2591 = vmatpush3.bf16.msra.mxu1 %v2590_v27  ;;  %2571 = vmatprep.subr.bf16.mxu0 %v3124_v0  ;;  %v698_v51 = vld [vmem:[%s4151_s9 + $0x40] sm:$0xff]  ;;  %v778_v53 = vrot.slane %v3538_v47, 7  ;;  %v819_v55 = vld [vmem:[%s4147_s5 + $0x58] sm:$0xff]  ;;  %v857_v57 = vld [vmem:[%s4147_s5 + $0x188] sm:$0xff] }
  0xc8   : > { %2593 = vmatprep.subr.bf16.mxu1 %v2592_v30  ;;  %v856_v56 = vld [vmem:[%s4147_s5 + $0x180] sm:$0xff]  ;;  %v676_v58 = vsub.f32 0.0, %v675_v46  ;;  %v837_v60 = vld [vmem:[%s4147_s5 + $0xe8] sm:$0xff]  ;;  %v2578_v61 = vpack.c.bf16 %v699_v52, %v698_v51  ;;  %v2602_v63 = vpack.c.bf16 %v819_v55, %v818_v50  ;;  %v838_v6 = vld [vmem:[%s4147_s5 + $0xf0] sm:$0xff] }
  0xc9   : > { %v836_v59 = vld [vmem:[%s4147_s5 + $0xe0] sm:$0xff]  ;;  %2231 = vmatprep.mubr.msk.f32.mxu1 %vm3541_vm2, %v778_v53  ;;  %v2612_v2 = vpack.c.bf16 %v857_v57, %v856_v56  ;;  %v821_v5 = vld [vmem:[%s4147_s5 + $0x68] sm:$0xff]  ;;  %v839_v7 = vld [vmem:[%s4147_s5 + $0xf8] sm:$0xff]  ;;  %v3603_v14 = vsel %vm781_vm1, 0.0, %v778_v53  ;;  %v3606_v15 = vsel %vm781_vm1, %v778_v53, 0.0 }
  0xca   : > { %2573 = vmatpush3.bf16.msra.mxu0 %v2572_v35  ;;  %v677_v62 = vmul.f32 1.442695, %v676_v58  ;;  %v2604_v3 = vpack.c.bf16 %v837_v60, %v836_v59  ;;  %v820_v4 = vld [vmem:[%s4147_s5 + $0x60] sm:$0xff]  ;;  %v2608_v9 = vpack.c.bf16 %v839_v7, %v838_v6  ;;  %v822_v10 = vld [vmem:[%s4147_s5 + $0x70] sm:$0xff]  ;;  %v823_v11 = vld [vmem:[%s4147_s5 + $0x78] sm:$0xff]  ;;  %v803_v21 = vrot.slane %v3603_v14, 2 }
  0xcb   : > { %2595 = vmatpush3.bf16.msra.mxu1 %v2594_v36  ;;  %2574 = vmatprep.subr.bf16.mxu0 %v3124_v0  ;;  %v2606_v8 = vpack.c.bf16 %v821_v5, %v820_v4  ;;  %v888_v12 = vld [vmem:[%s4147_s5 + $0x280] sm:$0xff]  ;;  %v889_v13 = vld [vmem:[%s4147_s5 + $0x288] sm:$0xff]  ;;  %v2610_v16 = vpack.c.bf16 %v823_v11, %v822_v10  ;;  %v804_v22 = vrot.slane %v3606_v15, 2  ;;  %v890_v23 = vld [vmem:[%s4147_s5 + $0x290] sm:$0xff] }
  0xcc   : > { %2597 = vmatprep.subr.bf16.mxu1 %v2596_v39  ;;  %2875 = vpow2.f32 %v677_v62  ;;  %v3608_v17 = vld [vmem:[%s651_s1] sm:$0xff]  ;;  %v2644_v18 = vpack.c.bf16 %v889_v13, %v888_v12  ;;  %v873_v20 = vld [vmem:[%s4147_s5 + $0x208] sm:$0xff]  ;;  %v891_v24 = vld [vmem:[%s4147_s5 + $0x298] sm:$0xff] }
  0xcd   : > { %v872_v19 = vld [vmem:[%s4147_s5 + $0x200] sm:$0xff]  ;;  %v3625_v26 = vrot.slane %v3608_v17, 7  ;;  %v2648_v29 = vpack.c.bf16 %v891_v24, %v890_v23  ;;  %v874_v30 = vld [vmem:[%s4147_s5 + $0x210] sm:$0xff]  ;;  %v875_v31 = vld [vmem:[%s4147_s5 + $0x218] sm:$0xff]  ;;  %v805_v32 = vsel %vm799_vm3, %v803_v21, %v804_v22  ;;  %v794_v23 = vrot.slane %v3603_v14, 1 }
  0xce   : > { %2576 = vmatpush3.bf16.msra.mxu0 %v2575_v45  ;;  %v2646_v28 = vpack.c.bf16 %v873_v20, %v872_v19  ;;  %v892_v33 = vld [vmem:[%s4147_s5 + $0x2a0] sm:$0xff]  ;;  %v893_v34 = vld [vmem:[%s4147_s5 + $0x2a8] sm:$0xff]  ;;  %v2650_v35 = vpack.c.bf16 %v875_v31, %v874_v30  ;;  %v894_v39 = vld [vmem:[%s4147_s5 + $0x2b0] sm:$0xff]  ;;  %v795_v24 = vrot.slane %v3606_v15, 1 }
  0xcf   : > { %2599 = vmatpush3.bf16.msra.mxu1 %v2598_v49  ;;  %2577 = vmatprep.subr.bf16.mxu0 %v3124_v0  ;;  %v2652_v36 = vpack.c.bf16 %v893_v34, %v892_v33  ;;  %v876_v37 = vld [vmem:[%s4147_s5 + $0x220] sm:$0xff]  ;;  %v877_v38 = vld [vmem:[%s4147_s5 + $0x228] sm:$0xff]  ;;  %v895_v40 = vld [vmem:[%s4147_s5 + $0x2b8] sm:$0xff]  ;;  %v3716_v19 = vsel %vm781_vm1, %v3625_v26, 0.0 }
  0xd0   : > { %2601 = vmatprep.subr.bf16.mxu1 %v2600_v54  ;;  %v2654_v41 = vpack.c.bf16 %v877_v38, %v876_v37  ;;  %v2656_v42 = vpack.c.bf16 %v895_v40, %v894_v39  ;;  %v878_v43 = vld [vmem:[%s4147_s5 + $0x230] sm:$0xff]  ;;  %v879_v45 = vld [vmem:[%s4147_s5 + $0x238] sm:$0xff]  ;;  %v896_v48 = vld [vmem:[%s4147_s5 + $0x2c0] sm:$0xff]  ;;  %v796_v33 = vsel %vm790_vm5, %v794_v23, %v795_v24 }
  0xd1   : > { %v897_v49 = vld [vmem:[%s4147_s5 + $0x2c8] sm:$0xff]  ;;  %v2658_v51 = vpack.c.bf16 %v879_v45, %v878_v43  ;;  %v880_v54 = vld [vmem:[%s4147_s5 + $0x240] sm:$0xff]  ;;  %v898_v56 = vld [vmem:[%s4147_s5 + $0x2d0] sm:$0xff] }
  0xd2   : > { %2579 = vmatpush3.bf16.msra.mxu0 %v2578_v61  ;;  %v2660_v53 = vpack.c.bf16 %v897_v49, %v896_v48  ;;  %v881_v55 = vld [vmem:[%s4147_s5 + $0x248] sm:$0xff]  ;;  %v899_v57 = vld [vmem:[%s4147_s5 + $0x2d8] sm:$0xff]  ;;  %v882_v62 = vld [vmem:[%s4147_s5 + $0x250] sm:$0xff] }
  0xd3   : > { %2603 = vmatpush3.bf16.msra.mxu1 %v2602_v63  ;;  %2613 = vmatprep.subr.bf16.mxu0 %v2612_v2  ;;  %v2662_v59 = vpack.c.bf16 %v881_v55, %v880_v54  ;;  %v2664_v61 = vpack.c.bf16 %v899_v57, %v898_v56  ;;  %v883_v63 = vld [vmem:[%s4147_s5 + $0x258] sm:$0xff]  ;;  %v900_v2 = vld [vmem:[%s4147_s5 + $0x2e0] sm:$0xff]  ;;  %v885_v7 = vld [vmem:[%s4147_s5 + $0x268] sm:$0xff] }
  0xd4   : > { %2605 = vmatprep.subr.bf16.mxu1 %v2604_v3  ;;  %v901_v3 = vld [vmem:[%s4147_s5 + $0x2e8] sm:$0xff]  ;;  %v2666_v4 = vpack.c.bf16 %v883_v63, %v882_v62  ;;  %v884_v6 = vld [vmem:[%s4147_s5 + $0x260] sm:$0xff]  ;;  %v903_v10 = vld [vmem:[%s4147_s5 + $0x2f8] sm:$0xff] }
  0xd5   : > { %v2668_v5 = vpack.c.bf16 %v901_v3, %v900_v2  ;;  %v2670_v11 = vpack.c.bf16 %v885_v7, %v884_v6  ;;  %v886_v13 = vld [vmem:[%s4147_s5 + $0x270] sm:$0xff]  ;;  %v840_v21 = vld [vmem:[%s4147_s5 + $0x100] sm:$0xff]  ;;  %v841_v22 = vld [vmem:[%s4147_s5 + $0x108] sm:$0xff] }
  0xd6   : > { %v2876_v25 = vpop.eup %2875  ;;  %v2614_v14 = vpack.c.bf16 %v841_v22, %v840_v21  ;;  %v842_v31 = vld [vmem:[%s4147_s5 + $0x110] sm:$0xff]  ;;  %v860_v34 = vld [vmem:[%s4147_s5 + $0x1a0] sm:$0xff]  ;;  %v845_v40 = vld [vmem:[%s4147_s5 + $0x128] sm:$0xff] }
  0xd7   : > { %2607 = vmatpush3.bf16.msra.mxu1 %v2606_v8  ;;  %v681_v27 = vadd.f32 1.0, %v2876_v25  ;;  %v680_v46 = vsel %vm679_vm4, %v2876_v25, 1.0  ;;  %v858_v25 = vld [vmem:[%s4147_s5 + $0x190] sm:$0xff]  ;;  %v844_v39 = vld [vmem:[%s4147_s5 + $0x120] sm:$0xff]  ;;  %v847_v48 = vld [vmem:[%s4147_s5 + $0x138] sm:$0xff] }
  0xd8   : > { %2609 = vmatprep.subr.bf16.mxu1 %v2608_v9  ;;  %v902_v9 = vld [vmem:[%s4147_s5 + $0x2f0] sm:$0xff]  ;;  %v2622_v43 = vpack.c.bf16 %v845_v40, %v844_v39  ;;  %v864_v49 = vld [vmem:[%s4147_s5 + $0x1c0] sm:$0xff]  ;;  %v849_v54 = vld [vmem:[%s4147_s5 + $0x148] sm:$0xff] }
  0xd9   : > { %2877 = vrcp.f32 %v681_v27  ;;  %v2672_v12 = vpack.c.bf16 %v903_v10, %v902_v9  ;;  %v866_v55 = vld [vmem:[%s4147_s5 + $0x1d0] sm:$0xff]  ;;  %v867_v56 = vld [vmem:[%s4147_s5 + $0x1d8] sm:$0xff]  ;;  %v869_v62 = vld [vmem:[%s4147_s5 + $0x1e8] sm:$0xff] }
  0xda   : > { %v852_v3 = vld [vmem:[%s4147_s5 + $0x160] sm:$0xff]  ;;  %v871_v6 = vld [vmem:[%s4147_s5 + $0x1f8] sm:$0xff]  ;;  %v854_v9 = vld [vmem:[%s4147_s5 + $0x170] sm:$0xff] }
  0xdb   : > { %2611 = vmatpush3.bf16.msra.mxu1 %v2610_v16  ;;  %v887_v16 = vld [vmem:[%s4147_s5 + $0x278] sm:$0xff]  ;;  %v669_v24 = vld [vmem:[%s4145_s3 + $0x20] sm:$0xff] }
  0xdc   : > { %2645 = vmatprep.subr.bf16.mxu1 %v2644_v18  ;;  %v3712_v18 = vsel %vm781_vm1, 0.0, %v3625_v26  ;;  %v855_v10 = vld [vmem:[%s4147_s5 + $0x178] sm:$0xff] }
  0xdd   : > { %v800_v27 = vrot.slane %v3712_v18, 2  ;;  %v668_v22 = vld [vmem:[%s4145_s3 + $0x18] sm:$0xff] }
  0xde   : > { %2233 = vmatmul.mubr.msk.f32.vlgmr.msra.gmra.mrb[0].mxu1 %vm3541_vm2, %v3625_v26  ;;  %v2674_v26 = vpack.c.bf16 %v887_v16, %v886_v13  ;;  %v792_v13 = vrot.slane %v3716_v19, 1 }
  0xdf   : > { %2647 = vmatpush3.bf16.msra.mxu1 %v2646_v28  ;;  %1115 = vmatprep.mubr.f32.mxu1 %v805_v32  ;;  %v801_v28 = vrot.slane %v3716_v19, 2  ;;  %v843_v32 = vld [vmem:[%s4147_s5 + $0x118] sm:$0xff]  ;;  %v667_v19 = vld [vmem:[%s4145_s3 + $0x10] sm:$0xff] }
  0xe0   : > { %2649 = vmatprep.subr.bf16.mxu1 %v2648_v29  ;;  %v2618_v37 = vpack.c.bf16 %v843_v32, %v842_v31  ;;  %v3838_v23 = vpack.c.bf16 %v668_v22, %v667_v19  ;;  %v1500_v19 = vld [vmem:[%s4153_s11 + $0x18] sm:$0xff] }
  0xe3   : > { %2651 = vmatpush3.bf16.msra.mxu1 %v2650_v35  ;;  %v2878_v50 = vpop.eup %2877  ;;  %v861_v35 = vld [vmem:[%s4147_s5 + $0x1a8] sm:$0xff] }
  0xe4   : > { %2653 = vmatprep.subr.bf16.mxu1 %v2652_v36  ;;  %v683_v52 = vmul.f32 %v2878_v50, %v680_v46  ;;  %v802_v36 = vsel %vm799_vm3, %v800_v27, %v801_v28  ;;  %v2620_v38 = vpack.c.bf16 %v861_v35, %v860_v34  ;;  %v846_v46 = vld [vmem:[%s4147_s5 + $0x130] sm:$0xff]  ;;  %v865_v50 = vld [vmem:[%s4147_s5 + $0x1c8] sm:$0xff]  ;;  %v672_v27 = vld [vmem:[%s4145_s3 + $0x38] sm:$0xff] }
  0xe5   : > { %v2229_v35 = vld [vmem:[#allocation2] ss:$0 sm:$0xff] }
  0xe6   : > { %v684_v58 = vmul.f32 %v683_v52, %v683_v52  ;;  %v2628_v52 = vpack.c.bf16 %v865_v50, %v864_v49 }
  0xe7   : > { %2655 = vmatpush3.bf16.msra.mxu1 %v2654_v41  ;;  %v862_v41 = vld [vmem:[%s4147_s5 + $0x1b0] sm:$0xff] }
  0xe8   : > { %2657 = vmatprep.subr.bf16.mxu1 %v2656_v42  ;;  %v687_v60 = vadd.f32 1.0, %v684_v58  ;;  %v685_v8 = vsub.f32 1.0, %v684_v58  ;;  %v863_v42 = vld [vmem:[%s4147_s5 + $0x1b8] sm:$0xff]  ;;  %v2632_v58 = vpack.c.bf16 %v867_v56, %v866_v55  ;;  %v1277_v55 = vlaneseq }
  0xe9   : > { %v2624_v45 = vpack.c.bf16 %v863_v42, %v862_v41 }
  0xea   : > { %2879 = vrcp.f32 %v687_v60  ;;  %v686_v20 = vmul.f32 %v685_v8, %v3535_v44  ;;  %v859_v44 = vld [vmem:[%s4147_s5 + $0x198] sm:$0xff]  ;;  %v1278_v56 = vshrl.u32 %v1277_v55, 7 }
  0xeb   : > { %2659 = vmatpush3.bf16.msra.mxu1 %v2658_v51  ;;  %v2616_v30 = vpack.c.bf16 %v859_v44, %v858_v25  ;;  %v2626_v51 = vpack.c.bf16 %v847_v48, %v846_v46  ;;  %v851_v60 = vld [vmem:[%s4147_s5 + $0x158] sm:$0xff]  ;;  %v670_v25 = vld [vmem:[%s4145_s3 + $0x28] sm:$0xff] }
  0xec   : > { %2661 = vmatprep.subr.bf16.mxu1 %v2660_v53  ;;  %v848_v53 = vld [vmem:[%s4147_s5 + $0x140] sm:$0xff]  ;;  %v3848_v44 = vpack.c.bf16 %v670_v25, %v669_v24  ;;  %v1502_v25 = vld [vmem:[%s4153_s11 + $0x28] sm:$0xff]  ;;  %v1520_v55 = vld [vmem:[%s4153_s11 + $0xb8] sm:$0xff] }
  0xed   : > { %v2630_v57 = vpack.c.bf16 %v849_v54, %v848_v53  ;;  %v1501_v24 = vld [vmem:[%s4153_s11 + $0x20] sm:$0xff] }
  0xef   : > { %2663 = vmatpush3.bf16.msra.mxu1 %v2662_v59  ;;  %v850_v59 = vld [vmem:[%s4147_s5 + $0x150] sm:$0xff] }
  0xf0   : > { %2665 = vmatprep.subr.bf16.mxu1 %v2664_v61  ;;  %v868_v61 = vld [vmem:[%s4147_s5 + $0x1e0] sm:$0xff]  ;;  %v2634_v63 = vpack.c.bf16 %v851_v60, %v850_v59 }
  0xf1   : > { %v2636_v2 = vpack.c.bf16 %v869_v62, %v868_v61 }
  0xf3   : > { %2667 = vmatpush3.bf16.msra.mxu1 %v2666_v4  ;;  %v853_v4 = vld [vmem:[%s4147_s5 + $0x168] sm:$0xff] }
  0xf4   : > { %2669 = vmatprep.subr.bf16.mxu1 %v2668_v5  ;;  %v2880_v29 = vpop.eup %2879  ;;  %v870_v5 = vld [vmem:[%s4147_s5 + $0x1f0] sm:$0xff]  ;;  %v2638_v7 = vpack.c.bf16 %v853_v4, %v852_v3 }
  0xf5   : > { %v689_v15 = vmul.f32 %v2880_v29, %v686_v20  ;;  %v2640_v8 = vpack.c.bf16 %v871_v6, %v870_v5  ;;  %v665_v20 = vld [vmem:[%s4145_s3] sm:$0xff] }
  0xf7   : > { %2671 = vmatpush3.bf16.msra.mxu1 %v2670_v11  ;;  %2467 = vmatmul.mubr.msk.f32.vlgmr.msra.gmra.mrb[0].mxu0 %vm701_vm6, %v689_v15  ;;  %v2642_v11 = vpack.c.bf16 %v855_v10, %v854_v9 }
  0xf8   : > { %2673 = vmatprep.subr.bf16.mxu1 %v2672_v12  ;;  %2615 = vmatpush3.bf16.msra.mxu0 %v2614_v14  ;;  %v791_v12 = vrot.slane %v3712_v18, 1  ;;  %v666_v18 = vld [vmem:[%s4145_s3 + $0x8] sm:$0xff] }
  0xf9   : > { %1045 = vmatprep.mubr.f32.mxu0 %v796_v33  ;;  %2617 = vmatprep.subr.bf16.mxu0 %v2616_v30  ;;  %v3828_v21 = vpack.c.bf16 %v666_v18, %v665_v20  ;;  %v1499_v20 = vld [vmem:[%s4153_s11 + $0x10] sm:$0xff] }
  0xfa   : > { %v793_v16 = vsel %vm790_vm5, %v791_v12, %v792_v13  ;;  %v1497_v13 = vld [vmem:[%s4153_s11] sm:$0xff]  ;;  %v2704_v22 = vpack.c.bf16 %v1500_v19, %v1499_v20 }
  0xfb   : > { %2675 = vmatpush3.bf16.msra.mxu1 %v2674_v26  ;;  %v671_v26 = vld [vmem:[%s4145_s3 + $0x30] sm:$0xff]  ;;  %v700_v20 = vld [vmem:[#allocation7] sm:$0x1] }
  0xfc   : > { %2700 = vmatprep.subr.bf16.mxu1 %v3124_v0  ;;  %2619 = vmatpush3.bf16.msra.mxu0 %v2618_v37  ;;  %v3858_v28 = vpack.c.bf16 %v672_v27, %v671_v26  ;;  %v2707_v26 = vpack.c.bf16 %v1502_v25, %v1501_v24  ;;  %v1503_v27 = vld [vmem:[%s4153_s11 + $0x30] sm:$0xff] }
  0xfd   : > { %2621 = vmatprep.subr.bf16.mxu0 %v2620_v38 }
  0xfe   : > { %1116 = vmatmul.mubr.f32.vlgmr.msra.gmra.mrb[2].mxu1 %v802_v36 }
 0x100   : > { %2623 = vmatpush3.bf16.msra.mxu0 %v2622_v43 }
 0x101   : > { %2625 = vmatprep.subr.bf16.mxu0 %v2624_v45 }
 0x104   : > { %2627 = vmatpush3.bf16.msra.mxu0 %v2626_v51  ;;  %v3868_v51 = vld [vmem:[%s4146_s4] sm:$0xff] }
 0x105   : > { %2629 = vmatprep.subr.bf16.mxu0 %v2628_v52 }
 0x108   : > { %2631 = vmatpush3.bf16.msra.mxu0 %v2630_v57  ;;  %v3886_v57 = vsub.s32 0, %v1278_v56 }
 0x109   : > { %2633 = vmatprep.subr.bf16.mxu0 %v2632_v58 }
 0x10c   : > { %2635 = vmatpush3.bf16.msra.mxu0 %v2634_v63 }
 0x10d   : > { %2637 = vmatprep.subr.bf16.mxu0 %v2636_v2 }
 0x110   : > { %2639 = vmatpush3.bf16.msra.mxu0 %v2638_v7 }
 0x111   : > { %2641 = vmatprep.subr.bf16.mxu0 %v2640_v8 }
 0x114   : > { %2643 = vmatpush3.bf16.msra.mxu0 %v2642_v11 }
 0x115   : > { %2676 = vmatprep.subr.bf16.mxu0 %v3124_v0 }
 0x117   : > { %1046 = vmatmul.mubr.f32.vlgmr.msra.gmra.mrb[2].mxu0 %v793_v16  ;;  %v1498_v16 = vld [vmem:[%s4153_s11 + $0x8] sm:$0xff] }
 0x118   : > { %2485 = vmatprep.mubr.msk.f32.mxu0 %vm3125_vm0, %v3126_v1  ;;  %2678 = vmatpush3.bf16.msra.mxu0 %v3828_v21  ;;  %v2701_v18 = vpack.c.bf16 %v1498_v16, %v1497_v13 }
 0x119   : > { %2679 = vmatprep.subr.bf16.mxu0 %v3124_v0 }
 0x11a   : > { %2702 = vmatpush1.bf16.msra.mxu1 %v2701_v18 }
 0x11b   : > { %2703 = vmatprep.subr.bf16.mxu1 %v3124_v0 }
 0x11c   : > { %2681 = vmatpush3.bf16.msra.mxu0 %v3838_v23 }
 0x11d   : > { %2682 = vmatprep.subr.bf16.mxu0 %v3124_v0 }
 0x11e   : > { %2705 = vmatpush1.bf16.msra.mxu1 %v2704_v22 }
 0x11f   : > { %2706 = vmatprep.subr.bf16.mxu1 %v3124_v0 }
 0x120   : > { %2684 = vmatpush3.bf16.msra.mxu0 %v3848_v44 }
 0x121   : > { %2685 = vmatprep.subr.bf16.mxu0 %v3124_v0 }
 0x122   : > { %2708 = vmatpush1.bf16.msra.mxu1 %v2707_v26 }
 0x123   : > { %2709 = vmatprep.subr.bf16.mxu1 %v3124_v0 }
 0x124   : > { %2687 = vmatpush3.bf16.msra.mxu0 %v3858_v28 }
 0x125   : > { %2488 = vmatprep.subr.mxu0 %v3126_v1 }
 0x1b1   : > { %v2294_v29 = vpop.f32.mrb[0].mxu1 }
 0x1b2   : > { %v2295_v14 = vpop.f32.mrb[1].mxu1 }
 0x1b3   : > { %v2296_v15 = vadd.f32 %v2295_v14, %v2294_v29  ;;  %v1504_v29 = vld [vmem:[%s4153_s11 + $0x38] sm:$0xff] }
 0x1b4   : > { %v2710_v14 = vpack.c.bf16 %v1504_v29, %v1503_v27 }
 0x1b5   : > { %v978_v38 = vadd.f32 %v2296_v15, %v2229_v35  ;;  %v1505_v15 = vld [vmem:[%s4153_s11 + $0x40] sm:$0xff] }
 0x1b6   : > { %2711 = vmatpush1.bf16.msra.mxu1 %v2710_v14 }
 0x1b7   : > { %2712 = vmatprep.subr.bf16.mxu1 %v3124_v0 }
 0x1ca   : > { %v3862_v30 = vpop.f32.mrb[0].mxu0 }
 0x1cb   : > { %v2468_v31 = vpop.f32.mrb[1].mxu0 }
 0x1cc   : > { %v1506_v31 = vld [vmem:[%s4153_s11 + $0x48] sm:$0xff] }
 0x1d1   : > { %v2364_v32 = vpop.f32.mrb[2].mxu1 }
 0x1d2   : > { %v2365_v33 = vpop.f32.mrb[3].mxu1 }
 0x1d3   : > { %v2366_v34 = vadd.f32 %v2365_v33, %v2364_v32  ;;  %v2713_v32 = vpack.c.bf16 %v1506_v31, %v1505_v15  ;;  %v1507_v33 = vld [vmem:[%s4153_s11 + $0x50] sm:$0xff] }
 0x1d5   : > { %2714 = vmatpush1.bf16.msra.mxu1 %v2713_v32 }
 0x1d6   : > { %2715 = vmatprep.subr.bf16.mxu1 %v3124_v0 }
 0x1ea   : > { %v2329_v36 = vpop.f32.mrb[2].mxu0 }
 0x1eb   : > { %v2330_v37 = vpop.f32.mrb[3].mxu0 }
 0x1ec   : > { %v2331_v39 = vadd.f32 %v2330_v37, %v2329_v36  ;;  %v1509_v36 = vld [vmem:[%s4153_s11 + $0x60] sm:$0xff]  ;;  %v1510_v37 = vld [vmem:[%s4153_s11 + $0x68] sm:$0xff] }
 0x1ee   : > { %v1048_v40 = vadd.f32 %v2331_v39, %v978_v38  ;;  %v2719_v38 = vpack.c.bf16 %v1510_v37, %v1509_v36  ;;  %v1511_v39 = vld [vmem:[%s4153_s11 + $0x70] sm:$0xff]  ;;  %v2240_v37 = vld [vmem:[#allocation9] ss:$0 sm:$0xff] }
 0x1f0   : > { %v1118_v41 = vadd.f32 %v2366_v34, %v1048_v40  ;;  %v1508_v34 = vld [vmem:[%s4153_s11 + $0x58] sm:$0xff] }
 0x1f1   : > { %v2716_v35 = vpack.c.bf16 %v1508_v34, %v1507_v33  ;;  %v1512_v40 = vld [vmem:[%s4153_s11 + $0x78] sm:$0xff] }
 0x1f2   : > { %v1122_v42 = vsel %vm1121_vm7, %v1118_v41, 0.0 }
 0x1f3   : > { %v1123_v43 = vrot.slane %v1122_v42, 4  ;;  %2717 = vmatpush1.bf16.msra.mxu1 %v2716_v35 }
 0x1f4   : > { %2718 = vmatprep.subr.bf16.mxu1 %v3124_v0 }
 0x1f5   : > { %v1124_v45 = vadd.f32 %v1123_v43, %v1122_v42  ;;  %v1513_v42 = vld [vmem:[%s4153_s11 + $0x80] sm:$0xff]  ;;  %v1514_v43 = vld [vmem:[%s4153_s11 + $0x88] sm:$0xff] }
 0x1f7   : > { %v1125_v46 = vrot.slane %v1124_v45, 2  ;;  %2720 = vmatpush1.bf16.msra.mxu1 %v2719_v38 }
 0x1f8   : > { %2721 = vmatprep.subr.bf16.mxu1 %v3124_v0 }
 0x1f9   : > { %v1126_v48 = vadd.f32 %v1125_v46, %v1124_v45  ;;  %v2725_v45 = vpack.c.bf16 %v1514_v43, %v1513_v42  ;;  %v1515_v46 = vld [vmem:[%s4153_s11 + $0x90] sm:$0xff] }
 0x1fb   : > { %v1127_v49 = vrot.slane %v1126_v48, 1 }
 0x1fd   : > { %v1128_v50 = vadd.f32 %v1127_v49, %v1126_v48  ;;  %v1516_v48 = vld [vmem:[%s4153_s11 + $0x98] sm:$0xff] }
 0x1fe   : > { %v2728_v49 = vpack.c.bf16 %v1516_v48, %v1515_v46 }
 0x1ff   : > { %2486 = vmatmul.mubr.msk.f32.vlgmr.msra.gmra.mrb[4].mxu0 %vm1121_vm7, %v1128_v50  ;;  %v1517_v50 = vld [vmem:[%s4153_s11 + $0xa0] sm:$0xff] }
 0x200   : > { %2489 = vmatpush3.msra.mxu0 %v3868_v51  ;;  %2490 = vmatprep.mubr.msk.f32.mxu0 %vm3125_vm0, %v3126_v1 }
 0x201   : > { %2688 = vmatprep.subr.bf16.mxu0 %v3124_v0 }
 0x2d2   : > { %v1198_v52 = vpop.f32.mrb[4].mxu0 }
 0x2d3   : > { %v1202_v53 = vmul.f32 0.015625, %v1198_v52  ;;  %v2487_v54 = vpop.f32.mrb[5].mxu0  ;;  %v1518_v52 = vld [vmem:[%s4153_s11 + $0xa8] sm:$0xff] }
 0x2d4   : > { %v1519_v54 = vld [vmem:[%s4153_s11 + $0xb0] sm:$0xff] }
 0x2d5   : > { %2491 = vmatmul.mubr.msk.f32.vlgmr.msra.gmra.mrb[6].mxu0 %vm1203_vm8, %v1202_v53  ;;  %v2731_v53 = vpack.c.bf16 %v1518_v52, %v1517_v50  ;;  %v2734_v56 = vpack.c.bf16 %v1520_v55, %v1519_v54 }
 0x2d6   : > { %2690 = vmatpush3.bf16.msra.mxu0 %v3828_v21  ;;  %2509 = vmatprep.mubr.msk.f32.mxu0 %vm3125_vm0, %v3126_v1 }
 0x2d7   : > { %2691 = vmatprep.subr.bf16.mxu0 %v3124_v0 }
 0x2da   : > { %2693 = vmatpush3.bf16.msra.mxu0 %v3838_v23 }
 0x2db   : > { %2694 = vmatprep.subr.bf16.mxu0 %v3124_v0 }
 0x2de   : > { %2696 = vmatpush3.bf16.msra.mxu0 %v3848_v44 }
 0x2df   : > { %2697 = vmatprep.subr.bf16.mxu0 %v3124_v0 }
 0x2e2   : > { %2699 = vmatpush3.bf16.msra.mxu0 %v3858_v28 }
 0x2e3   : > { %2512 = vmatprep.subr.mxu0 %v3126_v1 }
 0x3a8   : > { %v1273_v58 = vpop.f32.mrb[6].mxu0 }
 0x3a9   : > { %v1280_v59 = vrot.slane %v1273_v58, %v3886_v57  ;;  %v2492_v60 = vpop.f32.mrb[7].mxu0 }
 0x3ab   : > { %v3889_v61 = vsub.f32 %v1118_v41, %v1280_v59  ;;  %v2722_v41 = vpack.c.bf16 %v1512_v40, %v1511_v39 }
 0x3ad   : > { %v1282_v62 = vmul.f32 %v3889_v61, %v3889_v61  ;;  %2723 = vmatpush1.bf16.msra.mxu1 %v2722_v41 }
 0x3ae   : > { %2724 = vmatprep.subr.bf16.mxu1 %v3124_v0 }
 0x3af   : > { %v1283_v63 = vsel %vm1121_vm7, %v1282_v62, 0.0  ;;  %v2238_v62 = vld [vmem:[#allocation4] ss:$0 sm:$0xff] }
 0x3b0   : > { %v1284_v2 = vrot.slane %v1283_v63, 4 }
 0x3b1   : > { %2726 = vmatpush1.bf16.msra.mxu1 %v2725_v45 }
 0x3b2   : > { %v1285_v3 = vadd.f32 %v1284_v2, %v1283_v63  ;;  %2727 = vmatprep.subr.bf16.mxu1 %v3124_v0  ;;  %v2239_v2 = vld [vmem:[#allocation6] ss:$0 sm:$0xff] }
 0x3b4   : > { %v1286_v4 = vrot.slane %v1285_v3, 2 }
 0x3b5   : > { %2729 = vmatpush1.bf16.msra.mxu1 %v2728_v49 }
 0x3b6   : > { %v1287_v5 = vadd.f32 %v1286_v4, %v1285_v3  ;;  %2730 = vmatprep.subr.bf16.mxu1 %v3124_v0 }
 0x3b8   : > { %v1288_v6 = vrot.slane %v1287_v5, 1 }
 0x3b9   : > { %2732 = vmatpush1.bf16.msra.mxu1 %v2731_v53 }
 0x3ba   : > { %v1289_v7 = vadd.f32 %v1288_v6, %v1287_v5  ;;  %2733 = vmatprep.subr.bf16.mxu1 %v3124_v0 }
 0x3bc   : > { %2510 = vmatmul.mubr.msk.f32.vlgmr.msra.gmra.mrb[8].mxu0 %vm1121_vm7, %v1289_v7 }
 0x3bd   : > { %2513 = vmatpush3.msra.mxu0 %v3868_v51  ;;  %2514 = vmatprep.mubr.msk.f32.mxu0 %vm3125_vm0, %v3126_v1 }
 0x3be   : > { %2736 = vmatprep.subr.bf16.mxu0 %v3124_v0  ;;  %2735 = vmatpush1.bf16.msra.mxu1 %v2734_v56 }
 0x48f   : > { %v1359_v8 = vpop.f32.mrb[8].mxu0 }
 0x490   : > { %v1363_v9 = vmul.f32 0.015625, %v1359_v8  ;;  %v2511_v10 = vpop.f32.mrb[9].mxu0 }
 0x492   : > { %v1364_v11 = vadd.f32 1e-05, %v1363_v9 }
 0x494   : > { %2881 = vrsqrt.f32 %v1364_v11 }
 0x49e   : > { %v2882_v12 = vpop.eup %2881 }
 0x49f   : > { %2515 = vmatmul.mubr.msk.f32.vlgmr.msra.gmra.mrb[10].mxu0 %vm1203_vm8, %v2882_v12 }
 0x4a0   : > { %2738 = vmatpush3.bf16.msra.mxu0 %v3828_v21  ;;  %2533 = vmatprep.mubr.msk.f32.mxu0 %vm3125_vm0, %v3126_v1 }
 0x4a1   : > { %2739 = vmatprep.subr.bf16.mxu0 %v3124_v0 }
 0x4a4   : > { %2741 = vmatpush3.bf16.msra.mxu0 %v3838_v23 }
 0x4a5   : > { %2742 = vmatprep.subr.bf16.mxu0 %v3124_v0 }
 0x4a8   : > { %2744 = vmatpush3.bf16.msra.mxu0 %v3848_v44 }
 0x4a9   : > { %2745 = vmatprep.subr.bf16.mxu0 %v3124_v0 }
 0x4ac   : > { %2747 = vmatpush3.bf16.msra.mxu0 %v3858_v28 }
 0x4ad   : > { %2536 = vmatprep.subr.mxu0 %v3126_v1 }
 0x572   : > { %v1435_v58 = vpop.f32.mrb[10].mxu0 }
 0x573   : > { %v1442_v59 = vrot.slane %v1435_v58, %v3886_v57  ;;  %v2516_v60 = vpop.f32.mrb[11].mxu0 }
 0x575   : > { %v1443_v63 = vmul.f32 %v1442_v59, %v3889_v61  ;;  %v772_v61 = vadd.f32 %v3862_v30, %v700_v20  ;;  %v1974_v20 = vld [vmem:[%s4157_s15 + $0xb0] sm:$0xff] }
 0x577   : > { %v1451_v3 = vmul.f32 %v2238_v62, %v1443_v63  ;;  %v1478_v24 = vrot.slane %v772_v61, %v3886_v57  ;;  %v1969_v63 = vld [vmem:[%s4157_s15 + $0x88] sm:$0xff] }
 0x579   : > { %v1459_v4 = vadd.f32 %v2239_v2, %v1451_v3  ;;  %v1952_v2 = vld [vmem:[%s4157_s15] sm:$0xff] }
 0x57b   : > { %v1460_v5 = vand.u32 2147483647, %v1459_v4  ;;  %vm1464_vm9 = vcmp.ge.f32.partialorder %v1459_v4, 0.0 }
 0x57d   : > { %v1461_v6 = vsub.f32 0.0, %v1460_v5 }
 0x57f   : > { %v1462_v7 = vmul.f32 1.442695, %v1461_v6 }
 0x581   : > { %2883 = vpow2.f32 %v1462_v7  ;;  %v1954_v7 = vld [vmem:[%s4157_s15 + $0x10] sm:$0xff] }
 0x58b   : > { %v2884_v8 = vpop.eup %2883 }
 0x58c   : > { %v1466_v9 = vadd.f32 1.0, %v2884_v8  ;;  %v1465_v11 = vsel %vm1464_vm9, %v2884_v8, 1.0  ;;  %v1955_v8 = vld [vmem:[%s4157_s15 + $0x18] sm:$0xff] }
 0x58e   : > { %2885 = vrcp.f32 %v1466_v9  ;;  %v1972_v9 = vld [vmem:[%s4157_s15 + $0xa0] sm:$0xff] }
 0x598   : > { %v2886_v10 = vpop.eup %2885 }
 0x599   : > { %v1468_v12 = vmul.f32 %v2886_v10, %v1465_v11  ;;  %v1973_v10 = vld [vmem:[%s4157_s15 + $0xa8] sm:$0xff]  ;;  %v2766_v11 = vpack.c.bf16 %v1955_v8, %v1954_v7 }
 0x59b   : > { %v1469_v13 = vmul.f32 %v1468_v12, %v1468_v12  ;;  %v2768_v12 = vpack.c.bf16 %v1973_v10, %v1972_v9 }
 0x59d   : > { %v1472_v16 = vadd.f32 1.0, %v1469_v13  ;;  %v1470_v18 = vsub.f32 1.0, %v1469_v13  ;;  %v1956_v13 = vld [vmem:[%s4157_s15 + $0x20] sm:$0xff] }
 0x59f   : > { %2887 = vrcp.f32 %v1472_v16  ;;  %v1471_v19 = vmul.f32 %v1470_v18, %v1459_v4  ;;  %v1971_v4 = vld [vmem:[%s4157_s15 + $0x98] sm:$0xff]  ;;  %v1957_v16 = vld [vmem:[%s4157_s15 + $0x28] sm:$0xff] }
 0x5a0   : > { %v1975_v18 = vld [vmem:[%s4157_s15 + $0xb8] sm:$0xff]  ;;  %v2770_v61 = vpack.c.bf16 %v1957_v16, %v1956_v13 }
 0x5a9   : > { %v2888_v22 = vpop.eup %2887 }
 0x5aa   : > { %v1474_v25 = vmul.f32 %v2888_v22, %v1471_v19  ;;  %v2772_v19 = vpack.c.bf16 %v1975_v18, %v1974_v20  ;;  %v1958_v22 = vld [vmem:[%s4157_s15 + $0x30] sm:$0xff] }
 0x5ac   : > { %v1479_v26 = vadd.f32 %v1478_v24, %v1474_v25  ;;  %v1959_v24 = vld [vmem:[%s4157_s15 + $0x38] sm:$0xff]  ;;  %v1976_v25 = vld [vmem:[%s4157_s15 + $0xc0] sm:$0xff] }
 0x5ae   : > { %v1481_v27 = vrot.slane %v1479_v26, 7  ;;  %v1977_v26 = vld [vmem:[%s4157_s15 + $0xc8] sm:$0xff] }
 0x5b0   : > { %v1483_v29 = vsel %vm781_vm1, 0.0, %v1481_v27  ;;  %v1484_v14 = vsel %vm781_vm1, %v1481_v27, 0.0  ;;  %v2774_v27 = vpack.c.bf16 %v1959_v24, %v1958_v22 }
 0x5b1   : > { %v1487_v15 = vrot.slane %v1483_v29, 1  ;;  %v1488_v31 = vrot.slane %v1484_v14, 1  ;;  %v1494_v32 = vrot.slane %v1484_v14, 2  ;;  %v1493_v33 = vrot.slane %v1483_v29, 2  ;;  %v1960_v14 = vld [vmem:[%s4157_s15 + $0x40] sm:$0xff] }
 0x5b3   : > { %v1489_v34 = vsel %vm790_vm5, %v1487_v15, %v1488_v31  ;;  %v1495_v35 = vsel %vm799_vm3, %v1493_v33, %v1494_v32  ;;  %v1961_v15 = vld [vmem:[%s4157_s15 + $0x48] sm:$0xff]  ;;  %v1978_v31 = vld [vmem:[%s4157_s15 + $0xd0] sm:$0xff]  ;;  %v1979_v32 = vld [vmem:[%s4157_s15 + $0xd8] sm:$0xff] }
 0x5b4   : > { %1490 = vrot.lane.b32.xlu0 %v1489_v34, %s3127_s30  ;;  %2241 = vmatprep.mubr.msk.f32.mxu1 %vm1121_vm7, %v1495_v35  ;;  %v2778_v33 = vpack.c.bf16 %v1961_v15, %v1960_v14  ;;  %v2780_v34 = vpack.c.bf16 %v1979_v32, %v1978_v31  ;;  %v1962_v35 = vld [vmem:[%s4157_s15 + $0x50] sm:$0xff] }
 0x626   : > { %v1491_v30 = vpop.permute.xlu0 %1490 }
 0x627   : > { %v1496_v36 = vsel %vm1121_vm7, %v1483_v29, %v1491_v30  ;;  %v2776_v29 = vpack.c.bf16 %v1977_v26, %v1976_v25  ;;  %v1963_v30 = vld [vmem:[%s4157_s15 + $0x58] sm:$0xff] }
 0x628   : > { %1595 = vmatmul.mubr.f32.vlgmr.msra.gmra.mrb[4].mxu1 %v1496_v36  ;;  %v1980_v36 = vld [vmem:[%s4157_s15 + $0xe0] sm:$0xff] }
 0x629   : > { %2055 = vmatprep.mubr.f32.mxu1 %v3538_v47 }
 0x6fb   : > { %v1596_v38 = vpop.f32.mrb[4].mxu1 }
 0x6fc   : > { %v1597_v39 = vadd.f32 %v2240_v37, %v1596_v38  ;;  %v1598_v40 = vpop.f32.mrb[5].mxu1  ;;  %v1981_v37 = vld [vmem:[%s4157_s15 + $0xe8] sm:$0xff]  ;;  %v2782_v38 = vpack.c.bf16 %v1963_v30, %v1962_v35 }
 0x6fd   : > { %v1964_v40 = vld [vmem:[%s4157_s15 + $0x60] sm:$0xff] }
 0x6fe   : > { %v1600_v41 = vsel %vm1121_vm7, %v1597_v39, 0.0 }
 0x6ff   : > { %v1601_v42 = vrot.slane %v1600_v41, 4 }
 0x701   : > { %v1602_v43 = vadd.f32 %v1601_v42, %v1600_v41  ;;  %v1965_v41 = vld [vmem:[%s4157_s15 + $0x68] sm:$0xff]  ;;  %v1982_v42 = vld [vmem:[%s4157_s15 + $0xf0] sm:$0xff] }
 0x703   : > { %v1603_v45 = vrot.slane %v1602_v43, 2 }
 0x705   : > { %v1604_v46 = vadd.f32 %v1603_v45, %v1602_v43  ;;  %v1983_v43 = vld [vmem:[%s4157_s15 + $0xf8] sm:$0xff]  ;;  %v2786_v45 = vpack.c.bf16 %v1965_v41, %v1964_v40 }
 0x707   : > { %v1605_v48 = vrot.slane %v1604_v46, 1 }
 0x709   : > { %v1606_v49 = vadd.f32 %v1605_v48, %v1604_v46  ;;  %v2788_v46 = vpack.c.bf16 %v1983_v43, %v1982_v42  ;;  %v1966_v48 = vld [vmem:[%s4157_s15 + $0x70] sm:$0xff] }
 0x70b   : > { %2534 = vmatmul.mubr.msk.f32.vlgmr.msra.gmra.mrb[12].mxu0 %vm1121_vm7, %v1606_v49  ;;  %v1967_v49 = vld [vmem:[%s4157_s15 + $0x78] sm:$0xff] }
 0x70c   : > { %2537 = vmatpush3.msra.mxu0 %v3868_v51  ;;  %2538 = vmatprep.mubr.msk.f32.mxu0 %vm3125_vm0, %v3126_v1 }
 0x70d   : > { %2748 = vmatprep.subr.bf16.mxu0 %v3124_v0 }
 0x7de   : > { %v1676_v47 = vpop.f32.mrb[12].mxu0 }
 0x7df   : > { %v1680_v50 = vmul.f32 0.015625, %v1676_v47  ;;  %v2535_v52 = vpop.f32.mrb[13].mxu0  ;;  %v2790_v47 = vpack.c.bf16 %v1967_v49, %v1966_v48 }
 0x7e1   : > { %2539 = vmatmul.mubr.msk.f32.vlgmr.msra.gmra.mrb[14].mxu0 %vm1203_vm8, %v1680_v50 }
 0x7e2   : > { %2750 = vmatpush3.bf16.msra.mxu0 %v3828_v21  ;;  %2557 = vmatprep.mubr.msk.f32.mxu0 %vm3125_vm0, %v3126_v1 }
 0x7e3   : > { %2751 = vmatprep.subr.bf16.mxu0 %v3124_v0 }
 0x7e6   : > { %2753 = vmatpush3.bf16.msra.mxu0 %v3838_v23 }
 0x7e7   : > { %2754 = vmatprep.subr.bf16.mxu0 %v3124_v0 }
 0x7ea   : > { %2756 = vmatpush3.bf16.msra.mxu0 %v3848_v44 }
 0x7eb   : > { %2757 = vmatprep.subr.bf16.mxu0 %v3124_v0 }
 0x7ee   : > { %2759 = vmatpush3.bf16.msra.mxu0 %v3858_v28  ;;  %v1968_v28 = vld [vmem:[%s4157_s15 + $0x80] sm:$0xff] }
 0x7ef   : > { %2560 = vmatprep.subr.mxu0 %v3126_v1  ;;  %v2760_v3 = vpack.c.bf16 %v1969_v63, %v1968_v28  ;;  %v2247_v28 = vld [vmem:[#allocation12] ss:$0 sm:$0xff] }
 0x7f1   : > { %2761 = vmatprep.subr.bf16.mxu1 %v2760_v3 }
 0x8b4   : > { %v1750_v53 = vpop.f32.mrb[14].mxu0 }
 0x8b5   : > { %v1757_v21 = vrot.slane %v1750_v53, %v3886_v57  ;;  %v2540_v54 = vpop.f32.mrb[15].mxu0 }
 0x8b7   : > { %v4022_v55 = vsub.f32 %v1597_v39, %v1757_v21  ;;  %v2784_v39 = vpack.c.bf16 %v1981_v37, %v1980_v36 }
 0x8b9   : > { %v1759_v56 = vmul.f32 %v4022_v55, %v4022_v55 }
 0x8bb   : > { %v1760_v23 = vsel %vm1121_vm7, %v1759_v56, 0.0 }
 0x8bc   : > { %v1761_v58 = vrot.slane %v1760_v23, 4 }
 0x8be   : > { %v1762_v59 = vadd.f32 %v1761_v58, %v1760_v23 }
 0x8c0   : > { %v1763_v44 = vrot.slane %v1762_v59, 2 }
 0x8c2   : > { %v1764_v60 = vadd.f32 %v1763_v44, %v1762_v59 }
 0x8c4   : > { %v1765_v0 = vrot.slane %v1764_v60, 1 }
 0x8c6   : > { %v1766_v62 = vadd.f32 %v1765_v0, %v1764_v60  ;;  %v2246_v0 = vld [vmem:[#allocation10] ss:$0 sm:$0xff] }
 0x8c8   : > { %2558 = vmatmul.mubr.msk.f32.vlgmr.msra.gmra.mrb[16].mxu0 %vm1121_vm7, %v1766_v62 }
 0x8c9   : > { %2561 = vmatpush3.msra.mxu0 %v3868_v51  ;;  %2562 = vmatprep.mubr.msk.f32.mxu0 %vm3125_vm0, %v3126_v1  ;;  %v1953_v51 = vld [vmem:[%s4157_s15 + $0x8] sm:$0xff]  ;;  %v1970_v1 = vld [vmem:[%s4157_s15 + $0x90] sm:$0xff] }
 0x8ca   : > { %v2762_v5 = vpack.c.bf16 %v1953_v51, %v1952_v2  ;;  %v2764_v6 = vpack.c.bf16 %v1971_v4, %v1970_v1 }
 0x8cc   : > { %2763 = vmatpush3.bf16.msra.mxu1 %v2762_v5 }
 0x8cd   : > { %2765 = vmatprep.subr.bf16.mxu1 %v2764_v6 }
 0x8d0   : > { %2767 = vmatpush3.bf16.msra.mxu1 %v2766_v11 }
 0x8d1   : > { %2769 = vmatprep.subr.bf16.mxu1 %v2768_v12 }
 0x8d4   : > { %2771 = vmatpush3.bf16.msra.mxu1 %v2770_v61 }
 0x8d5   : > { %2773 = vmatprep.subr.bf16.mxu1 %v2772_v19 }
 0x8d8   : > { %2775 = vmatpush3.bf16.msra.mxu1 %v2774_v27 }
 0x8d9   : > { %2777 = vmatprep.subr.bf16.mxu1 %v2776_v29 }
 0x8dc   : > { %2779 = vmatpush3.bf16.msra.mxu1 %v2778_v33 }
 0x8dd   : > { %2781 = vmatprep.subr.bf16.mxu1 %v2780_v34 }
 0x8e0   : > { %2783 = vmatpush3.bf16.msra.mxu1 %v2782_v38 }
 0x8e1   : > { %2785 = vmatprep.subr.bf16.mxu1 %v2784_v39 }
 0x8e4   : > { %2787 = vmatpush3.bf16.msra.mxu1 %v2786_v45 }
 0x8e5   : > { %2789 = vmatprep.subr.bf16.mxu1 %v2788_v46 }
 0x8e8   : > { %2791 = vmatpush3.bf16.msra.mxu1 %v2790_v47 }
 0x8eb   : > { %2056 = vmatmul.mubr.f32.vlgmr.msra.gmra.mrb[6].mxu1 %v3608_v17 }
 0x99b   : > { %v1836_v50 = vpop.f32.mrb[16].mxu0 }
 0x99c   : > { %v1840_v52 = vmul.f32 0.015625, %v1836_v50  ;;  %v2559_v53 = vpop.f32.mrb[17].mxu0 }
 0x99e   : > { %v1841_v21 = vadd.f32 1e-05, %v1840_v52 }
 0x9a0   : > { %2889 = vrsqrt.f32 %v1841_v21 }
 0x9aa   : > { %v2890_v54 = vpop.eup %2889 }
 0x9ab   : > { %2563 = vmatmul.mubr.msk.f32.vlgmr.msra.gmra.mrb[18].mxu0 %vm1203_vm8, %v2890_v54 }
 0x9be   : > { %v2443_v56 = vpop.f32.mrb[6].mxu1 }
 0x9bf   : > { %v2444_v23 = vpop.f32.mrb[7].mxu1 }
 0x9c0   : > { %v2445_v58 = vadd.f32 %v2444_v23, %v2443_v56 }
 0xa7e   : > { %v1912_v59 = vpop.f32.mrb[18].mxu0 }
 0xa7f   : > { %v1919_v44 = vrot.slane %v1912_v59, %v3886_v57  ;;  %v2564_v60 = vpop.f32.mrb[19].mxu0 }
 0xa81   : > { %v1920_v62 = vmul.f32 %v1919_v44, %v4022_v55  ;;  %v2248_v55 = vld [vmem:[%s4184_s22] ss:$0 sm:$0xff] }
 0xa82   : > { %v2058_v11 = vadd.f32 %v2445_v58, %v2248_v55 }
 0xa83   : > { %v1928_v17 = vmul.f32 %v2246_v0, %v1920_v62 }
 0xa85   : > { %v1936_v63 = vadd.f32 %v2247_v28, %v1928_v17 }
 0xa87   : > { %v1937_v2 = vand.u32 2147483647, %v1936_v63  ;;  %vm1941_vm10 = vcmp.ge.f32.partialorder %v1936_v63, 0.0 }
 0xa89   : > { %v1938_v3 = vsub.f32 0.0, %v1937_v2 }
 0xa8b   : > { %v1939_v51 = vmul.f32 1.442695, %v1938_v3 }
 0xa8d   : > { %2891 = vpow2.f32 %v1939_v51 }
 0xa97   : > { %v2892_v1 = vpop.eup %2891 }
 0xa98   : > { %v1943_v4 = vadd.f32 1.0, %v2892_v1  ;;  %v1942_v6 = vsel %vm1941_vm10, %v2892_v1, 1.0 }
 0xa9a   : > { %2893 = vrcp.f32 %v1943_v4 }
 0xaa4   : > { %v2894_v5 = vpop.eup %2893 }
 0xaa5   : > { %v1945_v7 = vmul.f32 %v2894_v5, %v1942_v6 }
 0xaa7   : > { %v1946_v57 = vmul.f32 %v1945_v7, %v1945_v7 }
 0xaa9   : > { %v1949_v8 = vadd.f32 1.0, %v1946_v57  ;;  %v1947_v9 = vsub.f32 1.0, %v1946_v57 }
 0xaab   : > { %2895 = vrcp.f32 %v1949_v8  ;;  %v1948_v10 = vmul.f32 %v1947_v9, %v1936_v63 }
 0xab5   : > { %v2896_v12 = vpop.eup %2895 }
 0xab6   : > { %v1951_v13 = vmul.f32 %v2896_v12, %v1948_v10 }
 0xab8   : > { %v2061_v16 = vadd.f32 %v2058_v11, %v1951_v13 }
 0xaba   : > { %2062 = vst.msk [vmem:[%s662_s0] sm:$0xff] %vm1121_vm7, %v2061_v16 }
 0xabb PF: > { %s4186_s16 = sld [smem:[#allocation17_spill]] }
 0xac1   : > { %s31_s24 = sadd.s32 1, %s4186_s16  }
 0xac2   : > { %p28_p11 = scmp.ge.s32.totalorder %s31_s24, 4  }
 0xac4   :  { %30 = sbr.rel (!%p28_p11) target bundleno = 9 (0x9), region = 153 }
 0xacb   :  { %2082 = vsyncpa [#allocation3], 1 }
 0xacc   :  { %2084 = vsyncpa [#allocation3 + $0x1], 1 }
 0xacd   :  { %2085 = vsyncpa [#allocation5], 1 }
 0xace   :  { %2086 = vsyncpa [#allocation8], 1 }
 0xacf   :  { %2087 = vsyncpa [#allocation11], 1 }

// kernel: forward.21
= control target key start
LH: loop header
LB: loop body
LE: loop exit
PB: predicated region body
PF: predicated region fallthrough
CT: control target
= control target key end

     0   :  { %s1307_s30 = smov 0   ;;  %s1516_s0 = inlined_call_operand.vmem [shape: f32[2,16,64], index: 0, kind: input, shape index: {}]   ;;  %s1517_s1 = inlined_call_operand.vmem [shape: f32[64,8], index: 1, kind: input, shape index: {}]   ;;  %s1518_s2 = inlined_call_operand.vmem [shape: f32[8,64], index: 2, kind: input, shape index: {}]   ;;  %s1519_s3 = inlined_call_operand.vmem [shape: f32[192,64], index: 3, kind: input, shape index: {}]   ;;  %s1520_s4 = inlined_call_operand.vmem [shape: f32[1,64], index: 4, kind: input, shape index: {}]   ;;  %s1521_s5 = inlined_call_operand.vmem [shape: f32[1,64], index: 5, kind: input, shape index: {}]   ;;  %s1522_s6 = inlined_call_operand.vmem [shape: f32[1,64], index: 6, kind: input, shape index: {}]   ;;  %s1523_s7 = inlined_call_operand.vmem [shape: f32[64,4], index: 7, kind: input, shape index: {}]   ;;  %s1524_s8 = inlined_call_operand.vmem [shape: f32[1,4], index: 8, kind: input, shape index: {}]   ;;  %s1525_s9 = inlined_call_operand.vmem [shape: f32[2,16,4], index: 9, kind: output, shape index: {}]  }
   0x1 LB: > { %s1019_s10 = sadd.s32 4294967295, %s1251_s30   ;;  %p1023_p0 = scmp.ge.s32.totalorder %s1251_s30, 1  ;;  %s1251_s30 = sphi %s1307_s30, %s19_s30  }
   0x2   : > { %p287_p1 = scmp.lt.s32.totalorder %s1251_s30, 3 }
   0x4   : > { %p288_p2 = pnand %p1023_p0, %p287_p1 }
   0x5   : > { %p323_p3 = scmp.lt.s32.totalorder (!%p288_p2), %s1019_s10, 1  ;;  %v378_v0 = vld [vmem:[%s1519_s3] sm:$0xff] (!%p288_p2)  ;;  %v1253_v1 = vmov (!%p288_p2), 0.0|0.0   ;;  %v379_v2 = vld [vmem:[%s1519_s3 + $0x8] sm:$0xff] (!%p288_p2)  ;;  %v380_v3 = vld [vmem:[%s1519_s3 + $0x10] sm:$0xff] (!%p288_p2)  ;;  %vm346_vm0 = vcmask (!%p288_p2), 1040384  }
   0x6   : > { %291 = sbr.rel (%p288_p2) target bundleno = 1532 (0x5fc), region = 56  ;;  %1143 = vmatprep.subr.bf16.mxu0 (!%p288_p2), %v1253_v1  ;;  %v381_v4 = vld [vmem:[%s1519_s3 + $0x18] sm:$0xff] (!%p288_p2)  ;;  %1179 = vmatprep.subr.bf16.mxu1 (!%p288_p2), %v1253_v1  ;;  %v1144_v5 = vpack.c.bf16 (!%p288_p2), %v379_v2, %v378_v0  ;;  %v382_v7 = vld [vmem:[%s1519_s3 + $0x20] sm:$0xff] (!%p288_p2)  ;;  %v383_v8 = vld [vmem:[%s1519_s3 + $0x28] sm:$0xff] (!%p288_p2)  ;;  %vm357_vm1 = vcmask (!%p288_p2), 1046528   ;;  %vm369_vm2 = vcmask (!%p288_p2), 1045504  }
   0x7   : > { %v1147_v6 = vpack.c.bf16 (!%p288_p2), %v381_v4, %v380_v3  ;;  %v1150_v13 = vpack.c.bf16 (!%p288_p2), %v383_v8, %v382_v7  ;;  %v384_v17 = vld [vmem:[%s1519_s3 + $0x30] sm:$0xff] (!%p288_p2)  ;;  %v385_v18 = vld [vmem:[%s1519_s3 + $0x38] sm:$0xff] (!%p288_p2)  ;;  %vm375_vm3 = vcmask (!%p288_p2), 523264   ;;  %s1254_s12 = smov (!%p288_p2), 64   ;;  %v386_v27 = vld [vmem:[%s1519_s3 + $0x40] sm:$0xff] (!%p288_p2)  ;;  %vm1255_vm4 = vmmov (!%p288_p2), 0  }
   0x8   : > { %1145 = vmatpush1.bf16.msra.mxu0 (!%p288_p2), %v1144_v5  ;;  %v1153_v26 = vpack.c.bf16 (!%p288_p2), %v385_v18, %v384_v17  ;;  %v387_v28 = vld [vmem:[%s1519_s3 + $0x48] sm:$0xff] (!%p288_p2)  ;;  %v388_v33 = vld [vmem:[%s1519_s3 + $0x50] sm:$0xff] (!%p288_p2)  ;;  %v389_v34 = vld [vmem:[%s1519_s3 + $0x58] sm:$0xff] (!%p288_p2)  ;;  %v1256_v7 = vmov (!%p288_p2), 0.0   ;;  %vm571_vm5 = vcmask (!%p288_p2), 64512   ;;  %vm961_vm8 = vcmask (!%p288_p2), 31744  }
   0x9   : > { %1146 = vmatprep.subr.bf16.mxu0 (!%p288_p2), %v1253_v1  ;;  %v1156_v32 = vpack.c.bf16 (!%p288_p2), %v387_v28, %v386_v27  ;;  %v1159_v35 = vpack.c.bf16 (!%p288_p2), %v389_v34, %v388_v33  ;;  %v390_v36 = vld [vmem:[%s1519_s3 + $0x60] sm:$0xff] (!%p288_p2)  ;;  %v391_v37 = vld [vmem:[%s1519_s3 + $0x68] sm:$0xff] (!%p288_p2)  ;;  %v392_v39 = vld [vmem:[%s1519_s3 + $0x70] sm:$0xff] (!%p288_p2)  ;;  %1092 = vmatprep.mubr.msk.f32.mxu1 (!%p288_p2), %vm1255_vm4, %v1256_v7  ;;  %v645_v28 = vlaneseq (!%p288_p2) }
   0xa   : > { %v1162_v38 = vpack.c.bf16 (!%p288_p2), %v391_v37, %v390_v36  ;;  %v393_v40 = vld [vmem:[%s1519_s3 + $0x78] sm:$0xff] (!%p288_p2)  ;;  %v394_v42 = vld [vmem:[%s1519_s3 + $0x80] sm:$0xff] (!%p288_p2)  ;;  %v395_v43 = vld [vmem:[%s1519_s3 + $0x88] sm:$0xff] (!%p288_p2) }
   0xb   : > { %v1165_v41 = vpack.c.bf16 (!%p288_p2), %v393_v40, %v392_v39  ;;  %v1168_v44 = vpack.c.bf16 (!%p288_p2), %v395_v43, %v394_v42  ;;  %v396_v45 = vld [vmem:[%s1519_s3 + $0x90] sm:$0xff] (!%p288_p2)  ;;  %v397_v46 = vld [vmem:[%s1519_s3 + $0x98] sm:$0xff] (!%p288_p2)  ;;  %v398_v48 = vld [vmem:[%s1519_s3 + $0xa0] sm:$0xff] (!%p288_p2) }
   0xc   : > { %1148 = vmatpush1.bf16.msra.mxu0 (!%p288_p2), %v1147_v6  ;;  %v1171_v47 = vpack.c.bf16 (!%p288_p2), %v397_v46, %v396_v45  ;;  %v399_v49 = vld [vmem:[%s1519_s3 + $0xa8] sm:$0xff] (!%p288_p2)  ;;  %v400_v51 = vld [vmem:[%s1519_s3 + $0xb0] sm:$0xff] (!%p288_p2)  ;;  %v401_v52 = vld [vmem:[%s1519_s3 + $0xb8] sm:$0xff] (!%p288_p2) }
   0xd   : > { %s1527_s10 = smov (!%p323_p3, %s1019_s10), 1  ;;  %1149 = vmatprep.subr.bf16.mxu0 %v1253_v1  ;;  %v1174_v50 = vpack.c.bf16 %v399_v49, %v398_v48  ;;  %v1177_v53 = vpack.c.bf16 %v401_v52, %v400_v51  ;;  %v335_v58 = vld [vmem:[%s1517_s1] sm:$0xff]  ;;  %v336_v59 = vld [vmem:[%s1517_s1 + $0x8] sm:$0xff]  ;;  %v337_v61 = vld [vmem:[%s1517_s1 + $0x10] sm:$0xff] }
   0xe   : > { %s1042_s19 = sshll.u32 %s1527_s10, 4  ;;  %v1180_v60 = vpack.c.bf16 %v336_v59, %v335_v58  ;;  %v338_v62 = vld [vmem:[%s1517_s1 + $0x18] sm:$0xff]  ;;  %v339_v0 = vld [vmem:[%s1517_s1 + $0x20] sm:$0xff]  ;;  %v340_v2 = vld [vmem:[%s1517_s1 + $0x28] sm:$0xff] }
   0xf   : > { %s327_s22 = scalar_lea.vmem %s1516_s0, %s1042_s19  ;;  %v1183_v63 = vpack.c.bf16 %v338_v62, %v337_v61  ;;  %v1186_v3 = vpack.c.bf16 %v340_v2, %v339_v0  ;;  %v341_v4 = vld [vmem:[%s1517_s1 + $0x30] sm:$0xff]  ;;  %v342_v5 = vld [vmem:[%s1517_s1 + $0x38] sm:$0xff]  ;;  %v1028_v8 = vld [vmem:[%s1520_s4] ss:$0 sm:$0xff]  ;;  %s332_s17 = scalar_lea.vmem %s1525_s9, %s1042_s19 }
  0x10   : > { %v333_v9 = vld [vmem:[%s327_s22] sm:$0xff]  ;;  %v334_v10 = vld [vmem:[%s327_s22 + $0x8] sm:$0xff]  ;;  %1151 = vmatpush1.bf16.msra.mxu0 %v1150_v13  ;;  %1181 = vmatpush3.bf16.msra.mxu1 %v1180_v60  ;;  %v1189_v6 = vpack.c.bf16 %v342_v5, %v341_v4  ;;  %v872_v61 = vld [vmem:[%s1523_s7 + $0x38] sm:$0xff] }
  0x11   : > { %v347_v11 = vrot.slane %v333_v9, 7  ;;  %v348_v12 = vrot.slane %v334_v10, 7  ;;  %1152 = vmatprep.subr.bf16.mxu0 %v1253_v1  ;;  %1182 = vmatprep.subr.bf16.mxu1 %v1253_v1  ;;  %v865_v51 = vld [vmem:[%s1523_s7] sm:$0xff]  ;;  %v866_v52 = vld [vmem:[%s1523_s7 + $0x8] sm:$0xff] }
  0x12   : > { %v870_v58 = vld [vmem:[%s1523_s7 + $0x28] sm:$0xff] }
  0x13   : > { %v1344_v14 = vsel %vm346_vm0, %v347_v11, %v348_v12  ;;  %v1346_v15 = vsel %vm346_vm0, 0.0, %v347_v11  ;;  %v354_v16 = vsel %vm346_vm0, %v348_v12, 0.0 }
  0x14   : > { %v358_v19 = vrot.slane %v1346_v15, 1  ;;  %v359_v20 = vrot.slane %v1344_v14, 1  ;;  %v361_v21 = vrot.slane %v354_v16, 1  ;;  %v370_v22 = vrot.slane %v1346_v15, 2  ;;  %1154 = vmatpush1.bf16.msra.mxu0 %v1153_v26  ;;  %1184 = vmatpush3.bf16.msra.mxu1 %v1183_v63 }
  0x15   : > { %v371_v23 = vrot.slane %v1344_v14, 2  ;;  %v373_v24 = vrot.slane %v354_v16, 2  ;;  %1155 = vmatprep.subr.bf16.mxu0 %v1253_v1  ;;  %1185 = vmatprep.subr.bf16.mxu1 %v1253_v1 }
  0x16   : > { %v360_v25 = vsel %vm357_vm1, %v358_v19, %v359_v20  ;;  %v362_v31 = vsel %vm357_vm1, %v359_v20, %v361_v21 }
  0x17   : > { %363 = vrot.lane.b32.xlu0 %v360_v25, %s1254_s12  ;;  %v372_v29 = vsel %vm369_vm2, %v370_v22, %v371_v23  ;;  %v374_v30 = vsel %vm369_vm2, %v371_v23, %v373_v24  ;;  %v343_v24 = vld [vmem:[%s1518_s2] sm:$0xff] }
  0x18   : > { %1029 = vmatprep.mubr.msk.f32.mxu0 %vm375_vm3, %v372_v29  ;;  %1157 = vmatpush1.bf16.msra.mxu0 %v1156_v32  ;;  %v646_v29 = vshrl.u32 %v645_v28, 7 }
  0x19   : > { %1158 = vmatprep.subr.bf16.mxu0 %v1253_v1  ;;  %1187 = vmatpush3.bf16.msra.mxu1 %v1186_v3 }
  0x1a   : > { %1188 = vmatprep.subr.bf16.mxu1 %v1253_v1 }
  0x1b   : > { %365 = vrot.lane.b32.xlu0 %v362_v31, %s1254_s12 }
  0x1c   : > { %1160 = vmatpush1.bf16.msra.mxu0 %v1159_v35 }
  0x1d   : > { %1161 = vmatprep.subr.bf16.mxu0 %v1253_v1  ;;  %1190 = vmatpush3.bf16.msra.mxu1 %v1189_v6 }
  0x1e   : > { %1095 = vmatprep.subr.mxu1 %v1256_v7 }
  0x20   : > { %1163 = vmatpush1.bf16.msra.mxu0 %v1162_v38 }
  0x21   : > { %1164 = vmatprep.subr.bf16.mxu0 %v1253_v1 }
  0x24   : > { %1166 = vmatpush1.bf16.msra.mxu0 %v1165_v41 }
  0x25   : > { %1167 = vmatprep.subr.bf16.mxu0 %v1253_v1 }
  0x28   : > { %1169 = vmatpush1.bf16.msra.mxu0 %v1168_v44 }
  0x29   : > { %1170 = vmatprep.subr.bf16.mxu0 %v1253_v1 }
  0x2c   : > { %1172 = vmatpush1.bf16.msra.mxu0 %v1171_v47 }
  0x2d   : > { %1173 = vmatprep.subr.bf16.mxu0 %v1253_v1 }
  0x30   : > { %1175 = vmatpush1.bf16.msra.mxu0 %v1174_v50 }
  0x31   : > { %1176 = vmatprep.subr.bf16.mxu0 %v1253_v1 }
  0x34   : > { %1178 = vmatpush1.bf16.msra.mxu0 %v1177_v53  ;;  %v1203_v53 = vpack.c.bf16 %v866_v52, %v865_v51 }
  0x89   : > { %v364_v54 = vpop.permute.xlu0 %363 }
  0x8a   : > { %v376_v55 = vsel %vm375_vm3, %v1346_v15, %v364_v54  ;;  %v867_v54 = vld [vmem:[%s1523_s7 + $0x10] sm:$0xff] }
  0x8b   : > { %478 = vmatmul.mubr.f32.vlgmr.msra.gmra.mrb[0].mxu0 %v376_v55  ;;  %v868_v55 = vld [vmem:[%s1523_s7 + $0x18] sm:$0xff] }
  0x8c   : > { %1030 = vmatprep.mubr.msk.f32.mxu0 %vm375_vm3, %v374_v30  ;;  %v647_v30 = vsub.s32 0, %v646_v29 }
  0x8d   : > { %v366_v56 = vpop.permute.xlu0 %365 }
  0x8e   : > { %v377_v57 = vsel %vm375_vm3, %v1344_v14, %v366_v56  ;;  %v1207_v56 = vpack.c.bf16 %v868_v55, %v867_v54 }
  0x8f   : > { %483 = vmatmul.mubr.f32.gmra.mrb[2].mxu0 %v377_v57  ;;  %v869_v57 = vld [vmem:[%s1523_s7 + $0x20] sm:$0xff] }
  0x90   : > { %v1211_v59 = vpack.c.bf16 %v870_v58, %v869_v57 }
 0x15e   : > { %v479_v9 = vpop.f32.mrb[0].mxu0 }
 0x15f   : > { %v481_v10 = vpop.f32.mrb[1].mxu0  ;;  %v480_v11 = vadd.f32 %v1028_v8, %v479_v9 }
 0x161   : > { %v488_v15 = vsel %vm375_vm3, %v480_v11, 0.0 }
 0x162   : > { %v484_v12 = vpop.f32.mrb[2].mxu0 }
 0x163   : > { %v485_v13 = vadd.f32 %v1028_v8, %v484_v12  ;;  %v486_v14 = vpop.f32.mrb[3].mxu0 }
 0x165   : > { %v489_v16 = vsel %vm375_vm3, %v485_v13, 0.0 }
 0x166   : > { %v490_v17 = vadd.f32 %v489_v16, %v488_v15 }
 0x168   : > { %v491_v18 = vrot.slane %v490_v17, 4 }
 0x16a   : > { %v492_v19 = vadd.f32 %v491_v18, %v490_v17 }
 0x16c   : > { %v493_v20 = vrot.slane %v492_v19, 2 }
 0x16e   : > { %v494_v21 = vadd.f32 %v493_v20, %v492_v19 }
 0x170   : > { %v495_v22 = vrot.slane %v494_v21, 1 }
 0x172   : > { %v496_v23 = vadd.f32 %v495_v22, %v494_v21 }
 0x174   : > { %1093 = vmatmul.mubr.msk.f32.vlgmr.msra.gmra.mrb[0].mxu1 %vm375_vm3, %v496_v23 }
 0x175   : > { %1096 = vmatpush3.msra.mxu1 %v343_v24  ;;  %1097 = vmatprep.mubr.msk.f32.mxu1 %vm1255_vm4, %v1256_v7 }
 0x176   : > { %1191 = vmatprep.subr.bf16.mxu1 %v1253_v1 }
 0x247   : > { %v566_v25 = vpop.f32.mrb[0].mxu1 }
 0x248   : > { %v570_v26 = vmul.f32 0.0078125, %v566_v25  ;;  %v1094_v27 = vpop.f32.mrb[1].mxu1 }
 0x24a   : > { %1098 = vmatmul.mubr.msk.f32.vlgmr.msra.gmra.mrb[2].mxu1 %vm571_vm5, %v570_v26 }
 0x24b   : > { %1193 = vmatpush3.bf16.msra.mxu1 %v1180_v60  ;;  %1116 = vmatprep.mubr.msk.f32.mxu1 %vm1255_vm4, %v1256_v7  ;;  %v871_v60 = vld [vmem:[%s1523_s7 + $0x30] sm:$0xff] }
 0x24c   : > { %1194 = vmatprep.subr.bf16.mxu1 %v1253_v1  ;;  %v1215_v62 = vpack.c.bf16 %v872_v61, %v871_v60 }
 0x24f   : > { %1196 = vmatpush3.bf16.msra.mxu1 %v1183_v63 }
 0x250   : > { %1197 = vmatprep.subr.bf16.mxu1 %v1253_v1 }
 0x253   : > { %1199 = vmatpush3.bf16.msra.mxu1 %v1186_v3  ;;  %v1035_v3 = vld [vmem:[%s1521_s5] ss:$0 sm:$0xff] }
 0x254   : > { %1200 = vmatprep.subr.bf16.mxu1 %v1253_v1 }
 0x257   : > { %1202 = vmatpush3.bf16.msra.mxu1 %v1189_v6  ;;  %v1036_v6 = vld [vmem:[%s1522_s6] ss:$0 sm:$0xff] }
 0x258   : > { %1119 = vmatprep.subr.mxu1 %v1256_v7 }
 0x31d   : > { %v641_v31 = vpop.f32.mrb[2].mxu1 }
 0x31e   : > { %v648_v32 = vrot.slane %v641_v31, %v647_v30  ;;  %v1099_v33 = vpop.f32.mrb[3].mxu1 }
 0x320   : > { %v649_v34 = vsub.f32 %v480_v11, %v648_v32  ;;  %v650_v35 = vsub.f32 %v485_v13, %v648_v32 }
 0x322   : > { %v651_v36 = vmul.f32 %v649_v34, %v649_v34  ;;  %v652_v37 = vmul.f32 %v650_v35, %v650_v35 }
 0x324   : > { %v653_v38 = vsel %vm375_vm3, %v651_v36, 0.0  ;;  %v654_v39 = vsel %vm375_vm3, %v652_v37, 0.0 }
 0x325   : > { %v655_v40 = vadd.f32 %v654_v39, %v653_v38  ;;  %v1037_v39 = vld [vmem:[%s1524_s8] ss:$0 sm:$0xff] }
 0x327   : > { %v656_v41 = vrot.slane %v655_v40, 4 }
 0x329   : > { %v657_v42 = vadd.f32 %v656_v41, %v655_v40 }
 0x32b   : > { %v658_v1 = vrot.slane %v657_v42, 2 }
 0x32d   : > { %v659_v43 = vadd.f32 %v658_v1, %v657_v42 }
 0x32f   : > { %v660_v44 = vrot.slane %v659_v43, 1 }
 0x331   : > { %v661_v45 = vadd.f32 %v660_v44, %v659_v43 }
 0x333   : > { %1117 = vmatmul.mubr.msk.f32.vlgmr.msra.gmra.mrb[4].mxu1 %vm375_vm3, %v661_v45 }
 0x334   : > { %1120 = vmatpush3.msra.mxu1 %v343_v24  ;;  %1121 = vmatprep.mubr.msk.f32.mxu1 %vm1255_vm4, %v1256_v7 }
 0x335   : > { %1204 = vmatprep.subr.bf16.mxu1 %v1203_v53 }
 0x406   : > { %v731_v46 = vpop.f32.mrb[4].mxu1 }
 0x407   : > { %v735_v47 = vmul.f32 0.0078125, %v731_v46  ;;  %v1118_v48 = vpop.f32.mrb[5].mxu1 }
 0x409   : > { %v736_v49 = vadd.f32 1e-05, %v735_v47 }
 0x40b   : > { %1231 = vrsqrt.f32 %v736_v49 }
 0x415   : > { %v1232_v50 = vpop.eup %1231 }
 0x416   : > { %1122 = vmatmul.mubr.msk.f32.vlgmr.msra.gmra.mrb[6].mxu1 %vm571_vm5, %v1232_v50 }
 0x417   : > { %1206 = vmatpush3.bf16.msra.mxu1 %v1203_v53 }
 0x418   : > { %1208 = vmatprep.subr.bf16.mxu1 %v1207_v56 }
 0x41b   : > { %1210 = vmatpush3.bf16.msra.mxu1 %v1207_v56 }
 0x41c   : > { %1212 = vmatprep.subr.bf16.mxu1 %v1211_v59 }
 0x41f   : > { %1214 = vmatpush3.bf16.msra.mxu1 %v1211_v59 }
 0x420   : > { %1216 = vmatprep.subr.bf16.mxu1 %v1215_v62 }
 0x423   : > { %1218 = vmatpush3.bf16.msra.mxu1 %v1215_v62 }
 0x4e9   : > { %v807_v63 = vpop.f32.mrb[6].mxu1 }
 0x4ea   : > { %v814_v0 = vrot.slane %v807_v63, %v647_v30  ;;  %v1123_v2 = vpop.f32.mrb[7].mxu1 }
 0x4ec   : > { %v815_v4 = vmul.f32 %v814_v0, %v649_v34  ;;  %v816_v5 = vmul.f32 %v814_v0, %v650_v35 }
 0x4ee   : > { %v824_v7 = vmul.f32 %v1035_v3, %v815_v4  ;;  %v825_v8 = vmul.f32 %v1035_v3, %v816_v5 }
 0x4f0   : > { %v833_v9 = vadd.f32 %v1036_v6, %v824_v7  ;;  %v834_v10 = vadd.f32 %v1036_v6, %v825_v8 }
 0x4f2   : > { %v835_v11 = vand.u32 2147483647, %v833_v9  ;;  %v836_v12 = vand.u32 2147483647, %v834_v10  ;;  %vm843_vm6 = vcmp.ge.f32.partialorder %v833_v9, 0.0  ;;  %vm844_vm7 = vcmp.ge.f32.partialorder %v834_v10, 0.0 }
 0x4f4   : > { %v837_v13 = vsub.f32 0.0, %v835_v11  ;;  %v838_v14 = vsub.f32 0.0, %v836_v12 }
 0x4f6   : > { %v839_v15 = vmul.f32 1.442695, %v837_v13  ;;  %v841_v16 = vmul.f32 1.442695, %v838_v14 }
 0x4f8   : > { %1233 = vpow2.f32 %v839_v15 }
 0x4f9   : > { %1235 = vpow2.f32 %v841_v16 }
 0x502   : > { %v1234_v17 = vpop.eup %1233 }
 0x503   : > { %v1236_v18 = vpop.eup %1235  ;;  %v847_v19 = vadd.f32 1.0, %v1234_v17  ;;  %v845_v22 = vsel %vm843_vm6, %v1234_v17, 1.0 }
 0x504   : > { %v848_v20 = vadd.f32 1.0, %v1236_v18  ;;  %v846_v24 = vsel %vm844_vm7, %v1236_v18, 1.0 }
 0x505   : > { %1237 = vrcp.f32 %v847_v19 }
 0x506   : > { %1239 = vrcp.f32 %v848_v20 }
 0x50f   : > { %v1238_v21 = vpop.eup %1237 }
 0x510   : > { %v1240_v23 = vpop.eup %1239  ;;  %v851_v25 = vmul.f32 %v1238_v21, %v845_v22 }
 0x511   : > { %v852_v26 = vmul.f32 %v1240_v23, %v846_v24 }
 0x512   : > { %v853_v27 = vmul.f32 %v851_v25, %v851_v25 }
 0x513   : > { %v854_v28 = vmul.f32 %v852_v26, %v852_v26 }
 0x514   : > { %v859_v29 = vadd.f32 1.0, %v853_v27  ;;  %v855_v31 = vsub.f32 1.0, %v853_v27 }
 0x515   : > { %v860_v30 = vadd.f32 1.0, %v854_v28  ;;  %v856_v32 = vsub.f32 1.0, %v854_v28 }
 0x516   : > { %1241 = vrcp.f32 %v859_v29  ;;  %v857_v33 = vmul.f32 %v855_v31, %v833_v9 }
 0x517   : > { %1243 = vrcp.f32 %v860_v30  ;;  %v858_v35 = vmul.f32 %v856_v32, %v834_v10 }
 0x520   : > { %v1242_v34 = vpop.eup %1241 }
 0x521   : > { %v1244_v36 = vpop.eup %1243  ;;  %v863_v37 = vmul.f32 %v1242_v34, %v857_v33 }
 0x522   : > { %v864_v38 = vmul.f32 %v1244_v36, %v858_v35 }
 0x523   : > { %1140 = vmatprep.mubr.msk.f32.mxu1 %vm375_vm3, %v863_v37 }
 0x524   : > { %1141 = vmatmul.mubr.msk.f32.vlgmr.msra.gmra.mrb[8].mxu1 %vm375_vm3, %v864_v38 }
 0x5f7   : > { %v1142_v40 = vpop.f32.mrb[8].mxu1 }
 0x5f8   : > { %v958_v41 = vadd.f32 %v1142_v40, %v1037_v39  ;;  %v952_v42 = vpop.f32.mrb[9].mxu1 }
 0x5f9   : > { %v953_v1 = vadd.f32 %v1037_v39, %v952_v42 }
 0x5fa   : > { %963 = vst.msk [vmem:[%s332_s17 + $0x8] sm:$0xff] %vm961_vm8, %v958_v41 }
 0x5fb   : > { %962 = vst.msk [vmem:[%s332_s17] sm:$0xff] %vm961_vm8, %v953_v1 }
 0x5fc PF: > { %s19_s30 = sadd.s32 1, %s1251_s30  }
 0x5fd   : > { %p16_p4 = scmp.ge.s32.totalorder %s19_s30, 4  }
 0x5ff   :  { %18 = sbr.rel (!%p16_p4) target bundleno = 1 (0x1), region = 86 }

</bundles_post_ra>
